<compile_context>
chip_gen: v7x
topology: tpu7x:2x2x1
jax: 0.10.0
libtpu: 0.0.40
codegen_flags: <defaults>
</compile_context>

<pallas_src>
import jax
import jax.numpy as jnp
from jax.experimental import pallas as pl
from jax.experimental.pallas import tpu as pltpu


# ----------------------------- Pallas kernels ------------------------------

def _make_conv_stage_kernel(hc, wc, cin, n_lanes):
    """conv3x3(pad=1) + bias + relu + maxpool2x2, one image per grid step.

    x_ref : (1, hc+2, (wc+2)*cin)  f32 padded image, lanes = (col, cin).
    re/ro : (9, wc*cin, n_lanes)   bf16 per-tap matrices for even/odd output columns,
                                   lanes = (pooled col, cout).
    se/so : (hc//2, hc)            f32 0/1 row-selection (even / odd conv rows).
    o_ref : (1, hc//2, n_lanes)    f32 pooled activations.
    """

    def kernel(x_ref, re_ref, ro_ref, b_ref, se_ref, so_ref, o_ref):
        x = x_ref[0]                                            # (hc+2, (wc+2)*cin)
        acc_e = jnp.zeros((hc, n_lanes), jnp.float32)
        acc_o = jnp.zeros((hc, n_lanes), jnp.float32)
        t = 0
        for ky in range(3):
            for kx in range(3):
                tap = x[ky:ky + hc, kx * cin:(kx + wc) * cin]   # (hc, wc*cin)
                tap = tap.astype(jnp.bfloat16)
                acc_e += jnp.dot(tap, re_ref[t], preferred_element_type=jnp.float32)
                acc_o += jnp.dot(tap, ro_ref[t], preferred_element_type=jnp.float32)
                t += 1
        # column-phase max, bias, relu (relu commutes with max-pool)
        z = jnp.maximum(acc_e, acc_o) + b_ref[...]
        z = jnp.maximum(z, 0.0)                                 # (hc, n_lanes)
        # row-phase max via exact 0/1 row-selection matmuls
        he = jnp.dot(se_ref[...], z, preferred_element_type=jnp.float32)
        ho = jnp.dot(so_ref[...], z, preferred_element_type=jnp.float32)
        o_ref[0] = jnp.maximum(he, ho).astype(o_ref.dtype)

    return kernel


def _head_kernel(x_ref, wh_ref, bh_ref, wo_ref, bo_ref, o_ref):
    # TODO(synk): F.dropout(p=0.5) is stochastic (training=True by default in the
    # reference); modeled as identity (deterministic eval-mode inference).
    h = jnp.dot(x_ref[...], wh_ref[...], preferred_element_type=jnp.float32) + bh_ref[...]
    logits = jnp.dot(h.astype(jnp.bfloat16), wo_ref[...],
                     preferred_element_type=jnp.float32) + bo_ref[...]
    # log_softmax over the (padded-to-128) class axis; pad logits are -1e30 -> exp == 0.
    m = jnp.max(logits, axis=-1, keepdims=True)
    lse = m + jnp.log(jnp.sum(jnp.exp(logits - m), axis=-1, keepdims=True))
    o_ref[...] = logits - lse


# ------------------------------ Pallas wrappers -----------------------------

_COMPILER_PARAMS = pltpu.CompilerParams(
    dimension_semantics=("parallel",),
    vmem_limit_bytes=32 * 1024 * 1024,
)


def conv_stage(xp, r_e, r_o, b_row, s_e, s_o, *, hc, wc, cin):
    n = xp.shape[0]
    n_lanes = r_e.shape[-1]
    ho = s_e.shape[0]
    kernel = _make_conv_stage_kernel(hc, wc, cin, n_lanes)
    return pl.pallas_call(
        kernel,
        out_shape=jax.ShapeDtypeStruct((n, ho, n_lanes), jnp.float32),
        grid=(n,),
        in_specs=[
            pl.BlockSpec((1,) + xp.shape[1:], lambda i: (i, 0, 0)),
            pl.BlockSpec(r_e.shape, lambda i: (0, 0, 0)),      # weights stay resident
            pl.BlockSpec(r_o.shape, lambda i: (0, 0, 0)),
            pl.BlockSpec(b_row.shape, lambda i: (0, 0)),
            pl.BlockSpec(s_e.shape, lambda i: (0, 0)),
            pl.BlockSpec(s_o.shape, lambda i: (0, 0)),
        ],
        out_specs=pl.BlockSpec((1, ho, n_lanes), lambda i: (i, 0, 0)),
        compiler_params=_COMPILER_PARAMS,
    )(xp, r_e, r_o, b_row, s_e, s_o)


def mlp_head(flat, wh, bh, wo, bo, *, row_block=128):
    n, din = flat.shape
    dh = wh.shape[1]
    dc = wo.shape[1]
    bn = n if n <= row_block else row_block
    return pl.pallas_call(
        _head_kernel,
        out_shape=jax.ShapeDtypeStruct((n, dc), jnp.float32),
        grid=(pl.cdiv(n, bn),),
        in_specs=[
            pl.BlockSpec((bn, din), lambda i: (i, 0)),
            pl.BlockSpec((din, dh), lambda i: (0, 0)),         # weights stay resident
            pl.BlockSpec((1, dh), lambda i: (0, 0)),
            pl.BlockSpec((dh, dc), lambda i: (0, 0)),
            pl.BlockSpec((1, dc), lambda i: (0, 0)),
        ],
        out_specs=pl.BlockSpec((bn, dc), lambda i: (i, 0)),
        compiler_params=_COMPILER_PARAMS,
    )(flat, wh, bh, wo, bo)


# --------------------------------- Forward ----------------------------------

def convnet_forward(x_nchw, params):
    n = x_nchw.shape[0]

    # conv1 (1->16, 3x3, pad 1) + relu + maxpool2  -> (N, 14, 14*16)
    x = jnp.pad(x_nchw.reshape(n, 28, 28), ((0, 0), (1, 1), (1, 1)))     # (N, 30, 30)
    y1 = conv_stage(x, params["r1e"], params["r1o"], params["b1_row"],
                    params["s1e"], params["s1o"], hc=28, wc=28, cin=1)

    # conv2 (16->32, 3x3, pad 1) + relu + maxpool2 -> (N, 7, 7*32)
    y1p = jnp.pad(y1, ((0, 0), (1, 1), (16, 16)))                        # (N, 16, 16*16)
    y2 = conv_stage(y1p, params["r2e"], params["r2o"], params["b2_row"],
                    params["s2e"], params["s2o"], hc=14, wc=14, cin=16)

    # flatten in (h, w, c) order (head weights are pre-permuted to match), run the head
    flat = y2.reshape(n, 7 * 7 * 32).astype(jnp.bfloat16)
    out = mlp_head(flat, params["wh"], params["bh"], params["wo"], params["bo"])
    return out[:, :10]                                                   # drop class padding


# --------------------------------- Params ------------------------------------

def init_params(key):
    hidden_units = (7 * 7 * 32 + 10) // 2          # 789, as in the PyTorch module
    hidden_pad = 896                                # padded to a multiple of 128 lanes
    nclass_pad = 128                                # lane-dense head output
    ks = jax.random.split(key, 6)
    s = 0.05

    # PyTorch-layout weights
    w1 = s * jax.random.normal(ks[0], (16, 1, 3, 3), jnp.float32)   # (Cout, Cin, Kh, Kw)
    w2 = s * jax.random.normal(ks[1], (32, 16, 3, 3), jnp.float32)
    wh = s * jax.random.normal(ks[2], (hidden_units, 7 * 7 * 32), jnp.float32)  # (out, in[c,h,w])
    wo = s * jax.random.normal(ks[3], (10, hidden_units), jnp.float32)
    b1 = 0.01 * jax.random.normal(ks[4], (16,), jnp.float32)
    b2 = 0.01 * jax.random.normal(ks[5], (32,), jnp.float32)
    bh = jnp.zeros((hidden_units,), jnp.float32)
    bo = jnp.zeros((10,), jnp.float32)

    # conv1: per-tap (9, 28, 14*16) matrices, rows = input col, cols = (pooled col, cout)
    w1_t = jnp.transpose(w1, (2, 3, 1, 0)).reshape(9, 16)                 # (tap, cout)
    c28, p14 = jnp.arange(28), jnp.arange(14)
    sel1_e = (c28[:, None] == 2 * p14[None, :]).astype(jnp.float32)       # (28, 14)
    sel1_o = (c28[:, None] == 2 * p14[None, :] + 1).astype(jnp.float32)
    r1e = (sel1_e[None, :, :, None] * w1_t[:, None, None, :]).reshape(9, 28, 224)
    r1o = (sel1_o[None, :, :, None] * w1_t[:, None, None, :]).reshape(9, 28, 224)

    # conv2: per-tap (9, 14*16, 7*32) matrices, rows = (col, cin), cols = (pooled col, cout)
    w2_t = jnp.transpose(w2, (2, 3, 1, 0)).reshape(9, 16, 32)             # (tap, cin, cout)
    c14, p7 = jnp.arange(14), jnp.arange(7)
    sel2_e = (c14[:, None] == 2 * p7[None, :]).astype(jnp.float32)        # (14, 7)
    sel2_o = (c14[:, None] == 2 * p7[None, :] + 1).astype(jnp.float32)
    r2e = (sel2_e[None, :, None, :, None] * w2_t[:, None, :, None, :]).reshape(9, 224, 224)
    r2o = (sel2_o[None, :, None, :, None] * w2_t[:, None, :, None, :]).reshape(9, 224, 224)

    # exact 0/1 row-selection matrices for the fused row pooling (kept f32)
    s1e = (2 * p14[:, None] == c28[None, :]).astype(jnp.float32)          # (14, 28)
    s1o = (2 * p14[:, None] + 1 == c28[None, :]).astype(jnp.float32)
    s2e = (2 * p7[:, None] == c14[None, :]).astype(jnp.float32)           # (7, 14)
    s2o = (2 * p7[:, None] + 1 == c14[None, :]).astype(jnp.float32)

    # head: permute wh's input dim from PyTorch (c,h,w) order to our (h,w,c) order,
    # pad hidden 789->896 and classes 10->128 (pad logits forced to -1e30).
    wh_hwc = wh.reshape(hidden_units, 32, 7, 7).transpose(0, 2, 3, 1)
    wh_hwc = wh_hwc.reshape(hidden_units, 7 * 7 * 32).T                    # (1568, 789)
    wh_p = jnp.zeros((7 * 7 * 32, hidden_pad), jnp.float32).at[:, :hidden_units].set(wh_hwc)
    bh_p = jnp.zeros((hidden_pad,), jnp.float32).at[:hidden_units].set(bh)
    wo_p = jnp.zeros((hidden_pad, nclass_pad), jnp.float32).at[:hidden_units, :10].set(wo.T)
    bo_p = jnp.full((nclass_pad,), -1e30, jnp.float32).at[:10].set(bo)

    return {
        "r1e": r1e.astype(jnp.bfloat16), "r1o": r1o.astype(jnp.bfloat16),
        "b1_row": jnp.tile(b1, 14).reshape(1, 224),
        "s1e": s1e, "s1o": s1o,
        "r2e": r2e.astype(jnp.bfloat16), "r2o": r2o.astype(jnp.bfloat16),
        "b2_row": jnp.tile(b2, 7).reshape(1, 224),
        "s2e": s2e, "s2o": s2o,
        "wh": wh_p.astype(jnp.bfloat16), "bh": bh_p.reshape(1, hidden_pad),
        "wo": wo_p.astype(jnp.bfloat16), "bo": bo_p.reshape(1, nclass_pad),
    }


if __name__ == "__main__":
    key = jax.random.PRNGKey(0)
    k_x, k_p = jax.random.split(key)
    x = jax.random.normal(k_x, (2, 1, 28, 28), jnp.float32)   # NCHW like PyTorch
    params = init_params(k_p)

    out = jax.jit(convnet_forward)(x, params)
    out = jax.block_until_ready(out)

    assert out.shape == (2, 10)
    assert bool(jnp.all(jnp.isfinite(out)))
    # log_softmax rows must exponentiate-sum to ~1
    assert bool(jnp.allclose(jnp.sum(jnp.exp(out), axis=-1), 1.0, atol=1e-4))
    print("KERNEL_OK")
</pallas_src>

<mosaic_0001>
module attributes {stable_mosaic.version = 11 : i64} {
  func.func @kernel(%arg0: i32, %arg1: memref<1x30x30xf32, #tpu.memory_space<vmem>>, %arg2: memref<9x28x224xbf16, #tpu.memory_space<vmem>>, %arg3: memref<9x28x224xbf16, #tpu.memory_space<vmem>>, %arg4: memref<1x224xf32, #tpu.memory_space<vmem>>, %arg5: memref<14x28xf32, #tpu.memory_space<vmem>>, %arg6: memref<14x28xf32, #tpu.memory_space<vmem>>, %arg7: memref<1x14x224xf32, #tpu.memory_space<vmem>>) attributes {dimension_semantics = [#tpu.dimension_semantics<parallel>], iteration_bounds = array<i64: 2>, scalar_prefetch = 0 : i64, scratch_operands = 0 : i64, tpu.core_type = #tpu.core_type<tc>, window_params = [{transform_indices = @transform_0, window_bounds = array<i64: 1, 30, 30>}, {pipeline_mode = #tpu.pipeline_mode<synchronous>, transform_indices = @transform_1, window_bounds = array<i64: 9, 28, 224>}, {pipeline_mode = #tpu.pipeline_mode<synchronous>, transform_indices = @transform_2, window_bounds = array<i64: 9, 28, 224>}, {pipeline_mode = #tpu.pipeline_mode<synchronous>, transform_indices = @transform_3, window_bounds = array<i64: 1, 224>}, {pipeline_mode = #tpu.pipeline_mode<synchronous>, transform_indices = @transform_4, window_bounds = array<i64: 14, 28>}, {pipeline_mode = #tpu.pipeline_mode<synchronous>, transform_indices = @transform_5, window_bounds = array<i64: 14, 28>}, {transform_indices = @transform_6, window_bounds = array<i64: 1, 14, 224>}]} {
    %c0 = arith.constant 0 : index
    %c0_0 = arith.constant 0 : index
    %c0_1 = arith.constant 0 : index
    %0 = vector.load %arg1[%c0, %c0_0, %c0_1] : memref<1x30x30xf32, #tpu.memory_space<vmem>>, vector<1x30x30xf32>
    %1 = vector.shape_cast %0 : vector<1x30x30xf32> to vector<30x30xf32>
    %cst = arith.constant 0.000000e+00 : f32
    %2 = vector.broadcast %cst : f32 to vector<28x224xf32>
    %cst_2 = arith.constant 0.000000e+00 : f32
    %3 = vector.broadcast %cst_2 : f32 to vector<28x224xf32>
    %4 = vector.extract_strided_slice %1 {offsets = [0, 0], sizes = [28, 28], strides = [1, 1]} : vector<30x30xf32> to vector<28x28xf32>
    %5 = arith.truncf %4 : vector<28x28xf32> to vector<28x28xbf16>
    %c0_3 = arith.constant 0 : index
    %c0_4 = arith.constant 0 : index
    %c0_5 = arith.constant 0 : index
    %6 = vector.load %arg2[%c0_3, %c0_4, %c0_5] : memref<9x28x224xbf16, #tpu.memory_space<vmem>>, vector<1x28x224xbf16>
    %7 = vector.shape_cast %6 : vector<1x28x224xbf16> to vector<28x224xbf16>
    %cst_6 = arith.constant dense<0.000000e+00> : vector<28x224xf32>
    %8 = tpu.matmul %5, %7, %cst_6 {dimension_numbers = #tpu.dot_dimension_numbers<[1], [0], [0], [1], [0, 0, 1, 1], [], []>} : vector<28x28xbf16>, vector<28x224xbf16>, vector<28x224xf32> -> vector<28x224xf32>
    %9 = arith.addf %2, %8 : vector<28x224xf32>
    %c0_7 = arith.constant 0 : index
    %c0_8 = arith.constant 0 : index
    %c0_9 = arith.constant 0 : index
    %10 = vector.load %arg3[%c0_7, %c0_8, %c0_9] : memref<9x28x224xbf16, #tpu.memory_space<vmem>>, vector<1x28x224xbf16>
    %11 = vector.shape_cast %10 : vector<1x28x224xbf16> to vector<28x224xbf16>
    %cst_10 = arith.constant dense<0.000000e+00> : vector<28x224xf32>
    %12 = tpu.matmul %5, %11, %cst_10 {dimension_numbers = #tpu.dot_dimension_numbers<[1], [0], [0], [1], [0, 0, 1, 1], [], []>} : vector<28x28xbf16>, vector<28x224xbf16>, vector<28x224xf32> -> vector<28x224xf32>
    %13 = arith.addf %3, %12 : vector<28x224xf32>
    %14 = vector.extract_strided_slice %1 {offsets = [0, 1], sizes = [28, 28], strides = [1, 1]} : vector<30x30xf32> to vector<28x28xf32>
    %15 = arith.truncf %14 : vector<28x28xf32> to vector<28x28xbf16>
    %c1 = arith.constant 1 : index
    %c0_11 = arith.constant 0 : index
    %c0_12 = arith.constant 0 : index
    %16 = vector.load %arg2[%c1, %c0_11, %c0_12] : memref<9x28x224xbf16, #tpu.memory_space<vmem>>, vector<1x28x224xbf16>
    %17 = vector.shape_cast %16 : vector<1x28x224xbf16> to vector<28x224xbf16>
    %cst_13 = arith.constant dense<0.000000e+00> : vector<28x224xf32>
    %18 = tpu.matmul %15, %17, %cst_13 {dimension_numbers = #tpu.dot_dimension_numbers<[1], [0], [0], [1], [0, 0, 1, 1], [], []>} : vector<28x28xbf16>, vector<28x224xbf16>, vector<28x224xf32> -> vector<28x224xf32>
    %19 = arith.addf %9, %18 : vector<28x224xf32>
    %c1_14 = arith.constant 1 : index
    %c0_15 = arith.constant 0 : index
    %c0_16 = arith.constant 0 : index
    %20 = vector.load %arg3[%c1_14, %c0_15, %c0_16] : memref<9x28x224xbf16, #tpu.memory_space<vmem>>, vector<1x28x224xbf16>
    %21 = vector.shape_cast %20 : vector<1x28x224xbf16> to vector<28x224xbf16>
    %cst_17 = arith.constant dense<0.000000e+00> : vector<28x224xf32>
    %22 = tpu.matmul %15, %21, %cst_17 {dimension_numbers = #tpu.dot_dimension_numbers<[1], [0], [0], [1], [0, 0, 1, 1], [], []>} : vector<28x28xbf16>, vector<28x224xbf16>, vector<28x224xf32> -> vector<28x224xf32>
    %23 = arith.addf %13, %22 : vector<28x224xf32>
    %24 = vector.extract_strided_slice %1 {offsets = [0, 2], sizes = [28, 28], strides = [1, 1]} : vector<30x30xf32> to vector<28x28xf32>
    %25 = arith.truncf %24 : vector<28x28xf32> to vector<28x28xbf16>
    %c2 = arith.constant 2 : index
    %c0_18 = arith.constant 0 : index
    %c0_19 = arith.constant 0 : index
    %26 = vector.load %arg2[%c2, %c0_18, %c0_19] : memref<9x28x224xbf16, #tpu.memory_space<vmem>>, vector<1x28x224xbf16>
    %27 = vector.shape_cast %26 : vector<1x28x224xbf16> to vector<28x224xbf16>
    %cst_20 = arith.constant dense<0.000000e+00> : vector<28x224xf32>
    %28 = tpu.matmul %25, %27, %cst_20 {dimension_numbers = #tpu.dot_dimension_numbers<[1], [0], [0], [1], [0, 0, 1, 1], [], []>} : vector<28x28xbf16>, vector<28x224xbf16>, vector<28x224xf32> -> vector<28x224xf32>
    %29 = arith.addf %19, %28 : vector<28x224xf32>
    %c2_21 = arith.constant 2 : index
    %c0_22 = arith.constant 0 : index
    %c0_23 = arith.constant 0 : index
    %30 = vector.load %arg3[%c2_21, %c0_22, %c0_23] : memref<9x28x224xbf16, #tpu.memory_space<vmem>>, vector<1x28x224xbf16>
    %31 = vector.shape_cast %30 : vector<1x28x224xbf16> to vector<28x224xbf16>
    %cst_24 = arith.constant dense<0.000000e+00> : vector<28x224xf32>
    %32 = tpu.matmul %25, %31, %cst_24 {dimension_numbers = #tpu.dot_dimension_numbers<[1], [0], [0], [1], [0, 0, 1, 1], [], []>} : vector<28x28xbf16>, vector<28x224xbf16>, vector<28x224xf32> -> vector<28x224xf32>
    %33 = arith.addf %23, %32 : vector<28x224xf32>
    %34 = vector.extract_strided_slice %1 {offsets = [1, 0], sizes = [28, 28], strides = [1, 1]} : vector<30x30xf32> to vector<28x28xf32>
    %35 = arith.truncf %34 : vector<28x28xf32> to vector<28x28xbf16>
    %c3 = arith.constant 3 : index
    %c0_25 = arith.constant 0 : index
    %c0_26 = arith.constant 0 : index
    %36 = vector.load %arg2[%c3, %c0_25, %c0_26] : memref<9x28x224xbf16, #tpu.memory_space<vmem>>, vector<1x28x224xbf16>
    %37 = vector.shape_cast %36 : vector<1x28x224xbf16> to vector<28x224xbf16>
    %cst_27 = arith.constant dense<0.000000e+00> : vector<28x224xf32>
    %38 = tpu.matmul %35, %37, %cst_27 {dimension_numbers = #tpu.dot_dimension_numbers<[1], [0], [0], [1], [0, 0, 1, 1], [], []>} : vector<28x28xbf16>, vector<28x224xbf16>, vector<28x224xf32> -> vector<28x224xf32>
    %39 = arith.addf %29, %38 : vector<28x224xf32>
    %c3_28 = arith.constant 3 : index
    %c0_29 = arith.constant 0 : index
    %c0_30 = arith.constant 0 : index
    %40 = vector.load %arg3[%c3_28, %c0_29, %c0_30] : memref<9x28x224xbf16, #tpu.memory_space<vmem>>, vector<1x28x224xbf16>
    %41 = vector.shape_cast %40 : vector<1x28x224xbf16> to vector<28x224xbf16>
    %cst_31 = arith.constant dense<0.000000e+00> : vector<28x224xf32>
    %42 = tpu.matmul %35, %41, %cst_31 {dimension_numbers = #tpu.dot_dimension_numbers<[1], [0], [0], [1], [0, 0, 1, 1], [], []>} : vector<28x28xbf16>, vector<28x224xbf16>, vector<28x224xf32> -> vector<28x224xf32>
    %43 = arith.addf %33, %42 : vector<28x224xf32>
    %44 = vector.extract_strided_slice %1 {offsets = [1, 1], sizes = [28, 28], strides = [1, 1]} : vector<30x30xf32> to vector<28x28xf32>
    %45 = arith.truncf %44 : vector<28x28xf32> to vector<28x28xbf16>
    %c4 = arith.constant 4 : index
    %c0_32 = arith.constant 0 : index
    %c0_33 = arith.constant 0 : index
    %46 = vector.load %arg2[%c4, %c0_32, %c0_33] : memref<9x28x224xbf16, #tpu.memory_space<vmem>>, vector<1x28x224xbf16>
    %47 = vector.shape_cast %46 : vector<1x28x224xbf16> to vector<28x224xbf16>
    %cst_34 = arith.constant dense<0.000000e+00> : vector<28x224xf32>
    %48 = tpu.matmul %45, %47, %cst_34 {dimension_numbers = #tpu.dot_dimension_numbers<[1], [0], [0], [1], [0, 0, 1, 1], [], []>} : vector<28x28xbf16>, vector<28x224xbf16>, vector<28x224xf32> -> vector<28x224xf32>
    %49 = arith.addf %39, %48 : vector<28x224xf32>
    %c4_35 = arith.constant 4 : index
    %c0_36 = arith.constant 0 : index
    %c0_37 = arith.constant 0 : index
    %50 = vector.load %arg3[%c4_35, %c0_36, %c0_37] : memref<9x28x224xbf16, #tpu.memory_space<vmem>>, vector<1x28x224xbf16>
    %51 = vector.shape_cast %50 : vector<1x28x224xbf16> to vector<28x224xbf16>
    %cst_38 = arith.constant dense<0.000000e+00> : vector<28x224xf32>
    %52 = tpu.matmul %45, %51, %cst_38 {dimension_numbers = #tpu.dot_dimension_numbers<[1], [0], [0], [1], [0, 0, 1, 1], [], []>} : vector<28x28xbf16>, vector<28x224xbf16>, vector<28x224xf32> -> vector<28x224xf32>
    %53 = arith.addf %43, %52 : vector<28x224xf32>
    %54 = vector.extract_strided_slice %1 {offsets = [1, 2], sizes = [28, 28], strides = [1, 1]} : vector<30x30xf32> to vector<28x28xf32>
    %55 = arith.truncf %54 : vector<28x28xf32> to vector<28x28xbf16>
    %c5 = arith.constant 5 : index
    %c0_39 = arith.constant 0 : index
    %c0_40 = arith.constant 0 : index
    %56 = vector.load %arg2[%c5, %c0_39, %c0_40] : memref<9x28x224xbf16, #tpu.memory_space<vmem>>, vector<1x28x224xbf16>
    %57 = vector.shape_cast %56 : vector<1x28x224xbf16> to vector<28x224xbf16>
    %cst_41 = arith.constant dense<0.000000e+00> : vector<28x224xf32>
    %58 = tpu.matmul %55, %57, %cst_41 {dimension_numbers = #tpu.dot_dimension_numbers<[1], [0], [0], [1], [0, 0, 1, 1], [], []>} : vector<28x28xbf16>, vector<28x224xbf16>, vector<28x224xf32> -> vector<28x224xf32>
    %59 = arith.addf %49, %58 : vector<28x224xf32>
    %c5_42 = arith.constant 5 : index
    %c0_43 = arith.constant 0 : index
    %c0_44 = arith.constant 0 : index
    %60 = vector.load %arg3[%c5_42, %c0_43, %c0_44] : memref<9x28x224xbf16, #tpu.memory_space<vmem>>, vector<1x28x224xbf16>
    %61 = vector.shape_cast %60 : vector<1x28x224xbf16> to vector<28x224xbf16>
    %cst_45 = arith.constant dense<0.000000e+00> : vector<28x224xf32>
    %62 = tpu.matmul %55, %61, %cst_45 {dimension_numbers = #tpu.dot_dimension_numbers<[1], [0], [0], [1], [0, 0, 1, 1], [], []>} : vector<28x28xbf16>, vector<28x224xbf16>, vector<28x224xf32> -> vector<28x224xf32>
    %63 = arith.addf %53, %62 : vector<28x224xf32>
    %64 = vector.extract_strided_slice %1 {offsets = [2, 0], sizes = [28, 28], strides = [1, 1]} : vector<30x30xf32> to vector<28x28xf32>
    %65 = arith.truncf %64 : vector<28x28xf32> to vector<28x28xbf16>
    %c6 = arith.constant 6 : index
    %c0_46 = arith.constant 0 : index
    %c0_47 = arith.constant 0 : index
    %66 = vector.load %arg2[%c6, %c0_46, %c0_47] : memref<9x28x224xbf16, #tpu.memory_space<vmem>>, vector<1x28x224xbf16>
    %67 = vector.shape_cast %66 : vector<1x28x224xbf16> to vector<28x224xbf16>
    %cst_48 = arith.constant dense<0.000000e+00> : vector<28x224xf32>
    %68 = tpu.matmul %65, %67, %cst_48 {dimension_numbers = #tpu.dot_dimension_numbers<[1], [0], [0], [1], [0, 0, 1, 1], [], []>} : vector<28x28xbf16>, vector<28x224xbf16>, vector<28x224xf32> -> vector<28x224xf32>
    %69 = arith.addf %59, %68 : vector<28x224xf32>
    %c6_49 = arith.constant 6 : index
    %c0_50 = arith.constant 0 : index
    %c0_51 = arith.constant 0 : index
    %70 = vector.load %arg3[%c6_49, %c0_50, %c0_51] : memref<9x28x224xbf16, #tpu.memory_space<vmem>>, vector<1x28x224xbf16>
    %71 = vector.shape_cast %70 : vector<1x28x224xbf16> to vector<28x224xbf16>
    %cst_52 = arith.constant dense<0.000000e+00> : vector<28x224xf32>
    %72 = tpu.matmul %65, %71, %cst_52 {dimension_numbers = #tpu.dot_dimension_numbers<[1], [0], [0], [1], [0, 0, 1, 1], [], []>} : vector<28x28xbf16>, vector<28x224xbf16>, vector<28x224xf32> -> vector<28x224xf32>
    %73 = arith.addf %63, %72 : vector<28x224xf32>
    %74 = vector.extract_strided_slice %1 {offsets = [2, 1], sizes = [28, 28], strides = [1, 1]} : vector<30x30xf32> to vector<28x28xf32>
    %75 = arith.truncf %74 : vector<28x28xf32> to vector<28x28xbf16>
    %c7 = arith.constant 7 : index
    %c0_53 = arith.constant 0 : index
    %c0_54 = arith.constant 0 : index
    %76 = vector.load %arg2[%c7, %c0_53, %c0_54] : memref<9x28x224xbf16, #tpu.memory_space<vmem>>, vector<1x28x224xbf16>
    %77 = vector.shape_cast %76 : vector<1x28x224xbf16> to vector<28x224xbf16>
    %cst_55 = arith.constant dense<0.000000e+00> : vector<28x224xf32>
    %78 = tpu.matmul %75, %77, %cst_55 {dimension_numbers = #tpu.dot_dimension_numbers<[1], [0], [0], [1], [0, 0, 1, 1], [], []>} : vector<28x28xbf16>, vector<28x224xbf16>, vector<28x224xf32> -> vector<28x224xf32>
    %79 = arith.addf %69, %78 : vector<28x224xf32>
    %c7_56 = arith.constant 7 : index
    %c0_57 = arith.constant 0 : index
    %c0_58 = arith.constant 0 : index
    %80 = vector.load %arg3[%c7_56, %c0_57, %c0_58] : memref<9x28x224xbf16, #tpu.memory_space<vmem>>, vector<1x28x224xbf16>
    %81 = vector.shape_cast %80 : vector<1x28x224xbf16> to vector<28x224xbf16>
    %cst_59 = arith.constant dense<0.000000e+00> : vector<28x224xf32>
    %82 = tpu.matmul %75, %81, %cst_59 {dimension_numbers = #tpu.dot_dimension_numbers<[1], [0], [0], [1], [0, 0, 1, 1], [], []>} : vector<28x28xbf16>, vector<28x224xbf16>, vector<28x224xf32> -> vector<28x224xf32>
    %83 = arith.addf %73, %82 : vector<28x224xf32>
    %84 = vector.extract_strided_slice %1 {offsets = [2, 2], sizes = [28, 28], strides = [1, 1]} : vector<30x30xf32> to vector<28x28xf32>
    %85 = arith.truncf %84 : vector<28x28xf32> to vector<28x28xbf16>
    %c8 = arith.constant 8 : index
    %c0_60 = arith.constant 0 : index
    %c0_61 = arith.constant 0 : index
    %86 = vector.load %arg2[%c8, %c0_60, %c0_61] : memref<9x28x224xbf16, #tpu.memory_space<vmem>>, vector<1x28x224xbf16>
    %87 = vector.shape_cast %86 : vector<1x28x224xbf16> to vector<28x224xbf16>
    %cst_62 = arith.constant dense<0.000000e+00> : vector<28x224xf32>
    %88 = tpu.matmul %85, %87, %cst_62 {dimension_numbers = #tpu.dot_dimension_numbers<[1], [0], [0], [1], [0, 0, 1, 1], [], []>} : vector<28x28xbf16>, vector<28x224xbf16>, vector<28x224xf32> -> vector<28x224xf32>
    %89 = arith.addf %79, %88 : vector<28x224xf32>
    %c8_63 = arith.constant 8 : index
    %c0_64 = arith.constant 0 : index
    %c0_65 = arith.constant 0 : index
    %90 = vector.load %arg3[%c8_63, %c0_64, %c0_65] : memref<9x28x224xbf16, #tpu.memory_space<vmem>>, vector<1x28x224xbf16>
    %91 = vector.shape_cast %90 : vector<1x28x224xbf16> to vector<28x224xbf16>
    %cst_66 = arith.constant dense<0.000000e+00> : vector<28x224xf32>
    %92 = tpu.matmul %85, %91, %cst_66 {dimension_numbers = #tpu.dot_dimension_numbers<[1], [0], [0], [1], [0, 0, 1, 1], [], []>} : vector<28x28xbf16>, vector<28x224xbf16>, vector<28x224xf32> -> vector<28x224xf32>
    %93 = arith.addf %83, %92 : vector<28x224xf32>
    %94 = arith.maximumf %89, %93 : vector<28x224xf32>
    %c0_67 = arith.constant 0 : index
    %c0_68 = arith.constant 0 : index
    %95 = vector.load %arg4[%c0_67, %c0_68] : memref<1x224xf32, #tpu.memory_space<vmem>>, vector<1x224xf32>
    %96 = vector.broadcast %95 : vector<1x224xf32> to vector<28x224xf32>
    %97 = arith.addf %94, %96 : vector<28x224xf32>
    %cst_69 = arith.constant 0.000000e+00 : f32
    %98 = vector.broadcast %cst_69 : f32 to vector<28x224xf32>
    %99 = arith.maximumf %97, %98 : vector<28x224xf32>
    %c0_70 = arith.constant 0 : index
    %c0_71 = arith.constant 0 : index
    %100 = vector.load %arg5[%c0_70, %c0_71] : memref<14x28xf32, #tpu.memory_space<vmem>>, vector<14x28xf32>
    %cst_72 = arith.constant dense<0.000000e+00> : vector<14x224xf32>
    %101 = tpu.matmul %100, %99, %cst_72 {dimension_numbers = #tpu.dot_dimension_numbers<[1], [0], [0], [1], [0, 0, 1, 1], [], []>} : vector<14x28xf32>, vector<28x224xf32>, vector<14x224xf32> -> vector<14x224xf32>
    %c0_73 = arith.constant 0 : index
    %c0_74 = arith.constant 0 : index
    %102 = vector.load %arg6[%c0_73, %c0_74] : memref<14x28xf32, #tpu.memory_space<vmem>>, vector<14x28xf32>
    %cst_75 = arith.constant dense<0.000000e+00> : vector<14x224xf32>
    %103 = tpu.matmul %102, %99, %cst_75 {dimension_numbers = #tpu.dot_dimension_numbers<[1], [0], [0], [1], [0, 0, 1, 1], [], []>} : vector<14x28xf32>, vector<28x224xf32>, vector<14x224xf32> -> vector<14x224xf32>
    %104 = arith.maximumf %101, %103 : vector<14x224xf32>
    %c0_76 = arith.constant 0 : index
    %c0_77 = arith.constant 0 : index
    %c0_78 = arith.constant 0 : index
    %105 = vector.load %arg7[%c0_76, %c0_77, %c0_78] : memref<1x14x224xf32, #tpu.memory_space<vmem>>, vector<1x14x224xf32>
    %106 = vector.shape_cast %105 : vector<1x14x224xf32> to vector<14x224xf32>
    %107 = vector.shape_cast %104 : vector<14x224xf32> to vector<1x14x224xf32>
    tpu.vector_store %arg7[%c0_76, %c0_77, %c0_78], %107 {strides = array<i32>} : memref<1x14x224xf32, #tpu.memory_space<vmem>>, vector<1x14x224xf32>,
    return
  }
  func.func @transform_0(%arg0: i32) -> (i32, i32, i32) {
    %c0_i32 = arith.constant 0 : i32
    %c0_i32_0 = arith.constant 0 : i32
    %c0_i32_1 = arith.constant 0 : i32
    return %arg0, %c0_i32, %c0_i32_0 : i32, i32, i32
  }
  func.func @transform_1(%arg0: i32) -> (i32, i32, i32) {
    %c0_i32 = arith.constant 0 : i32
    %c0_i32_0 = arith.constant 0 : i32
    %c0_i32_1 = arith.constant 0 : i32
    %c0_i32_2 = arith.constant 0 : i32
    return %c0_i32, %c0_i32_0, %c0_i32_1 : i32, i32, i32
  }
  func.func @transform_2(%arg0: i32) -> (i32, i32, i32) {
    %c0_i32 = arith.constant 0 : i32
    %c0_i32_0 = arith.constant 0 : i32
    %c0_i32_1 = arith.constant 0 : i32
    %c0_i32_2 = arith.constant 0 : i32
    return %c0_i32, %c0_i32_0, %c0_i32_1 : i32, i32, i32
  }
  func.func @transform_3(%arg0: i32) -> (i32, i32) {
    %c0_i32 = arith.constant 0 : i32
    %c0_i32_0 = arith.constant 0 : i32
    %c0_i32_1 = arith.constant 0 : i32
    return %c0_i32, %c0_i32_0 : i32, i32
  }
  func.func @transform_4(%arg0: i32) -> (i32, i32) {
    %c0_i32 = arith.constant 0 : i32
    %c0_i32_0 = arith.constant 0 : i32
    %c0_i32_1 = arith.constant 0 : i32
    return %c0_i32, %c0_i32_0 : i32, i32
  }
  func.func @transform_5(%arg0: i32) -> (i32, i32) {
    %c0_i32 = arith.constant 0 : i32
    %c0_i32_0 = arith.constant 0 : i32
    %c0_i32_1 = arith.constant 0 : i32
    return %c0_i32, %c0_i32_0 : i32, i32
  }
  func.func @transform_6(%arg0: i32) -> (i32, i32, i32) {
    %c0_i32 = arith.constant 0 : i32
    %c0_i32_0 = arith.constant 0 : i32
    %c0_i32_1 = arith.constant 0 : i32
    return %arg0, %c0_i32, %c0_i32_0 : i32, i32, i32
  }
}

module attributes {stable_mosaic.version = 11 : i64} {
  func.func @kernel(%arg0: i32, %arg1: memref<1x16x256xf32, #tpu.memory_space<vmem>>, %arg2: memref<9x224x224xbf16, #tpu.memory_space<vmem>>, %arg3: memref<9x224x224xbf16, #tpu.memory_space<vmem>>, %arg4: memref<1x224xf32, #tpu.memory_space<vmem>>, %arg5: memref<7x14xf32, #tpu.memory_space<vmem>>, %arg6: memref<7x14xf32, #tpu.memory_space<vmem>>, %arg7: memref<1x7x224xf32, #tpu.memory_space<vmem>>) attributes {dimension_semantics = [#tpu.dimension_semantics<parallel>], iteration_bounds = array<i64: 2>, scalar_prefetch = 0 : i64, scratch_operands = 0 : i64, tpu.core_type = #tpu.core_type<tc>, window_params = [{transform_indices = @transform_0, window_bounds = array<i64: 1, 16, 256>}, {pipeline_mode = #tpu.pipeline_mode<synchronous>, transform_indices = @transform_1, window_bounds = array<i64: 9, 224, 224>}, {pipeline_mode = #tpu.pipeline_mode<synchronous>, transform_indices = @transform_2, window_bounds = array<i64: 9, 224, 224>}, {pipeline_mode = #tpu.pipeline_mode<synchronous>, transform_indices = @transform_3, window_bounds = array<i64: 1, 224>}, {pipeline_mode = #tpu.pipeline_mode<synchronous>, transform_indices = @transform_4, window_bounds = array<i64: 7, 14>}, {pipeline_mode = #tpu.pipeline_mode<synchronous>, transform_indices = @transform_5, window_bounds = array<i64: 7, 14>}, {transform_indices = @transform_6, window_bounds = array<i64: 1, 7, 224>}]} {
    %c0 = arith.constant 0 : index
    %c0_0 = arith.constant 0 : index
    %c0_1 = arith.constant 0 : index
    %0 = vector.load %arg1[%c0, %c0_0, %c0_1] : memref<1x16x256xf32, #tpu.memory_space<vmem>>, vector<1x16x256xf32>
    %1 = vector.shape_cast %0 : vector<1x16x256xf32> to vector<16x256xf32>
    %cst = arith.constant 0.000000e+00 : f32
    %2 = vector.broadcast %cst : f32 to vector<14x224xf32>
    %cst_2 = arith.constant 0.000000e+00 : f32
    %3 = vector.broadcast %cst_2 : f32 to vector<14x224xf32>
    %4 = vector.extract_strided_slice %1 {offsets = [0, 0], sizes = [14, 224], strides = [1, 1]} : vector<16x256xf32> to vector<14x224xf32>
    %5 = arith.truncf %4 : vector<14x224xf32> to vector<14x224xbf16>
    %c0_3 = arith.constant 0 : index
    %c0_4 = arith.constant 0 : index
    %c0_5 = arith.constant 0 : index
    %6 = vector.load %arg2[%c0_3, %c0_4, %c0_5] : memref<9x224x224xbf16, #tpu.memory_space<vmem>>, vector<1x224x224xbf16>
    %7 = vector.shape_cast %6 : vector<1x224x224xbf16> to vector<224x224xbf16>
    %cst_6 = arith.constant dense<0.000000e+00> : vector<14x224xf32>
    %8 = tpu.matmul %5, %7, %cst_6 {dimension_numbers = #tpu.dot_dimension_numbers<[1], [0], [0], [1], [0, 0, 1, 1], [], []>} : vector<14x224xbf16>, vector<224x224xbf16>, vector<14x224xf32> -> vector<14x224xf32>
    %9 = arith.addf %2, %8 : vector<14x224xf32>
    %c0_7 = arith.constant 0 : index
    %c0_8 = arith.constant 0 : index
    %c0_9 = arith.constant 0 : index
    %10 = vector.load %arg3[%c0_7, %c0_8, %c0_9] : memref<9x224x224xbf16, #tpu.memory_space<vmem>>, vector<1x224x224xbf16>
    %11 = vector.shape_cast %10 : vector<1x224x224xbf16> to vector<224x224xbf16>
    %cst_10 = arith.constant dense<0.000000e+00> : vector<14x224xf32>
    %12 = tpu.matmul %5, %11, %cst_10 {dimension_numbers = #tpu.dot_dimension_numbers<[1], [0], [0], [1], [0, 0, 1, 1], [], []>} : vector<14x224xbf16>, vector<224x224xbf16>, vector<14x224xf32> -> vector<14x224xf32>
    %13 = arith.addf %3, %12 : vector<14x224xf32>
    %14 = vector.extract_strided_slice %1 {offsets = [0, 16], sizes = [14, 224], strides = [1, 1]} : vector<16x256xf32> to vector<14x224xf32>
    %15 = arith.truncf %14 : vector<14x224xf32> to vector<14x224xbf16>
    %c1 = arith.constant 1 : index
    %c0_11 = arith.constant 0 : index
    %c0_12 = arith.constant 0 : index
    %16 = vector.load %arg2[%c1, %c0_11, %c0_12] : memref<9x224x224xbf16, #tpu.memory_space<vmem>>, vector<1x224x224xbf16>
    %17 = vector.shape_cast %16 : vector<1x224x224xbf16> to vector<224x224xbf16>
    %cst_13 = arith.constant dense<0.000000e+00> : vector<14x224xf32>
    %18 = tpu.matmul %15, %17, %cst_13 {dimension_numbers = #tpu.dot_dimension_numbers<[1], [0], [0], [1], [0, 0, 1, 1], [], []>} : vector<14x224xbf16>, vector<224x224xbf16>, vector<14x224xf32> -> vector<14x224xf32>
    %19 = arith.addf %9, %18 : vector<14x224xf32>
    %c1_14 = arith.constant 1 : index
    %c0_15 = arith.constant 0 : index
    %c0_16 = arith.constant 0 : index
    %20 = vector.load %arg3[%c1_14, %c0_15, %c0_16] : memref<9x224x224xbf16, #tpu.memory_space<vmem>>, vector<1x224x224xbf16>
    %21 = vector.shape_cast %20 : vector<1x224x224xbf16> to vector<224x224xbf16>
    %cst_17 = arith.constant dense<0.000000e+00> : vector<14x224xf32>
    %22 = tpu.matmul %15, %21, %cst_17 {dimension_numbers = #tpu.dot_dimension_numbers<[1], [0], [0], [1], [0, 0, 1, 1], [], []>} : vector<14x224xbf16>, vector<224x224xbf16>, vector<14x224xf32> -> vector<14x224xf32>
    %23 = arith.addf %13, %22 : vector<14x224xf32>
    %24 = vector.extract_strided_slice %1 {offsets = [0, 32], sizes = [14, 224], strides = [1, 1]} : vector<16x256xf32> to vector<14x224xf32>
    %25 = arith.truncf %24 : vector<14x224xf32> to vector<14x224xbf16>
    %c2 = arith.constant 2 : index
    %c0_18 = arith.constant 0 : index
    %c0_19 = arith.constant 0 : index
    %26 = vector.load %arg2[%c2, %c0_18, %c0_19] : memref<9x224x224xbf16, #tpu.memory_space<vmem>>, vector<1x224x224xbf16>
    %27 = vector.shape_cast %26 : vector<1x224x224xbf16> to vector<224x224xbf16>
    %cst_20 = arith.constant dense<0.000000e+00> : vector<14x224xf32>
    %28 = tpu.matmul %25, %27, %cst_20 {dimension_numbers = #tpu.dot_dimension_numbers<[1], [0], [0], [1], [0, 0, 1, 1], [], []>} : vector<14x224xbf16>, vector<224x224xbf16>, vector<14x224xf32> -> vector<14x224xf32>
    %29 = arith.addf %19, %28 : vector<14x224xf32>
    %c2_21 = arith.constant 2 : index
    %c0_22 = arith.constant 0 : index
    %c0_23 = arith.constant 0 : index
    %30 = vector.load %arg3[%c2_21, %c0_22, %c0_23] : memref<9x224x224xbf16, #tpu.memory_space<vmem>>, vector<1x224x224xbf16>
    %31 = vector.shape_cast %30 : vector<1x224x224xbf16> to vector<224x224xbf16>
    %cst_24 = arith.constant dense<0.000000e+00> : vector<14x224xf32>
    %32 = tpu.matmul %25, %31, %cst_24 {dimension_numbers = #tpu.dot_dimension_numbers<[1], [0], [0], [1], [0, 0, 1, 1], [], []>} : vector<14x224xbf16>, vector<224x224xbf16>, vector<14x224xf32> -> vector<14x224xf32>
    %33 = arith.addf %23, %32 : vector<14x224xf32>
    %34 = vector.extract_strided_slice %1 {offsets = [1, 0], sizes = [14, 224], strides = [1, 1]} : vector<16x256xf32> to vector<14x224xf32>
    %35 = arith.truncf %34 : vector<14x224xf32> to vector<14x224xbf16>
    %c3 = arith.constant 3 : index
    %c0_25 = arith.constant 0 : index
    %c0_26 = arith.constant 0 : index
    %36 = vector.load %arg2[%c3, %c0_25, %c0_26] : memref<9x224x224xbf16, #tpu.memory_space<vmem>>, vector<1x224x224xbf16>
    %37 = vector.shape_cast %36 : vector<1x224x224xbf16> to vector<224x224xbf16>
    %cst_27 = arith.constant dense<0.000000e+00> : vector<14x224xf32>
    %38 = tpu.matmul %35, %37, %cst_27 {dimension_numbers = #tpu.dot_dimension_numbers<[1], [0], [0], [1], [0, 0, 1, 1], [], []>} : vector<14x224xbf16>, vector<224x224xbf16>, vector<14x224xf32> -> vector<14x224xf32>
    %39 = arith.addf %29, %38 : vector<14x224xf32>
    %c3_28 = arith.constant 3 : index
    %c0_29 = arith.constant 0 : index
    %c0_30 = arith.constant 0 : index
    %40 = vector.load %arg3[%c3_28, %c0_29, %c0_30] : memref<9x224x224xbf16, #tpu.memory_space<vmem>>, vector<1x224x224xbf16>
    %41 = vector.shape_cast %40 : vector<1x224x224xbf16> to vector<224x224xbf16>
    %cst_31 = arith.constant dense<0.000000e+00> : vector<14x224xf32>
    %42 = tpu.matmul %35, %41, %cst_31 {dimension_numbers = #tpu.dot_dimension_numbers<[1], [0], [0], [1], [0, 0, 1, 1], [], []>} : vector<14x224xbf16>, vector<224x224xbf16>, vector<14x224xf32> -> vector<14x224xf32>
    %43 = arith.addf %33, %42 : vector<14x224xf32>
    %44 = vector.extract_strided_slice %1 {offsets = [1, 16], sizes = [14, 224], strides = [1, 1]} : vector<16x256xf32> to vector<14x224xf32>
    %45 = arith.truncf %44 : vector<14x224xf32> to vector<14x224xbf16>
    %c4 = arith.constant 4 : index
    %c0_32 = arith.constant 0 : index
    %c0_33 = arith.constant 0 : index
    %46 = vector.load %arg2[%c4, %c0_32, %c0_33] : memref<9x224x224xbf16, #tpu.memory_space<vmem>>, vector<1x224x224xbf16>
    %47 = vector.shape_cast %46 : vector<1x224x224xbf16> to vector<224x224xbf16>
    %cst_34 = arith.constant dense<0.000000e+00> : vector<14x224xf32>
    %48 = tpu.matmul %45, %47, %cst_34 {dimension_numbers = #tpu.dot_dimension_numbers<[1], [0], [0], [1], [0, 0, 1, 1], [], []>} : vector<14x224xbf16>, vector<224x224xbf16>, vector<14x224xf32> -> vector<14x224xf32>
    %49 = arith.addf %39, %48 : vector<14x224xf32>
    %c4_35 = arith.constant 4 : index
    %c0_36 = arith.constant 0 : index
    %c0_37 = arith.constant 0 : index
    %50 = vector.load %arg3[%c4_35, %c0_36, %c0_37] : memref<9x224x224xbf16, #tpu.memory_space<vmem>>, vector<1x224x224xbf16>
    %51 = vector.shape_cast %50 : vector<1x224x224xbf16> to vector<224x224xbf16>
    %cst_38 = arith.constant dense<0.000000e+00> : vector<14x224xf32>
    %52 = tpu.matmul %45, %51, %cst_38 {dimension_numbers = #tpu.dot_dimension_numbers<[1], [0], [0], [1], [0, 0, 1, 1], [], []>} : vector<14x224xbf16>, vector<224x224xbf16>, vector<14x224xf32> -> vector<14x224xf32>
    %53 = arith.addf %43, %52 : vector<14x224xf32>
    %54 = vector.extract_strided_slice %1 {offsets = [1, 32], sizes = [14, 224], strides = [1, 1]} : vector<16x256xf32> to vector<14x224xf32>
    %55 = arith.truncf %54 : vector<14x224xf32> to vector<14x224xbf16>
    %c5 = arith.constant 5 : index
    %c0_39 = arith.constant 0 : index
    %c0_40 = arith.constant 0 : index
    %56 = vector.load %arg2[%c5, %c0_39, %c0_40] : memref<9x224x224xbf16, #tpu.memory_space<vmem>>, vector<1x224x224xbf16>
    %57 = vector.shape_cast %56 : vector<1x224x224xbf16> to vector<224x224xbf16>
    %cst_41 = arith.constant dense<0.000000e+00> : vector<14x224xf32>
    %58 = tpu.matmul %55, %57, %cst_41 {dimension_numbers = #tpu.dot_dimension_numbers<[1], [0], [0], [1], [0, 0, 1, 1], [], []>} : vector<14x224xbf16>, vector<224x224xbf16>, vector<14x224xf32> -> vector<14x224xf32>
    %59 = arith.addf %49, %58 : vector<14x224xf32>
    %c5_42 = arith.constant 5 : index
    %c0_43 = arith.constant 0 : index
    %c0_44 = arith.constant 0 : index
    %60 = vector.load %arg3[%c5_42, %c0_43, %c0_44] : memref<9x224x224xbf16, #tpu.memory_space<vmem>>, vector<1x224x224xbf16>
    %61 = vector.shape_cast %60 : vector<1x224x224xbf16> to vector<224x224xbf16>
    %cst_45 = arith.constant dense<0.000000e+00> : vector<14x224xf32>
    %62 = tpu.matmul %55, %61, %cst_45 {dimension_numbers = #tpu.dot_dimension_numbers<[1], [0], [0], [1], [0, 0, 1, 1], [], []>} : vector<14x224xbf16>, vector<224x224xbf16>, vector<14x224xf32> -> vector<14x224xf32>
    %63 = arith.addf %53, %62 : vector<14x224xf32>
    %64 = vector.extract_strided_slice %1 {offsets = [2, 0], sizes = [14, 224], strides = [1, 1]} : vector<16x256xf32> to vector<14x224xf32>
    %65 = arith.truncf %64 : vector<14x224xf32> to vector<14x224xbf16>
    %c6 = arith.constant 6 : index
    %c0_46 = arith.constant 0 : index
    %c0_47 = arith.constant 0 : index
    %66 = vector.load %arg2[%c6, %c0_46, %c0_47] : memref<9x224x224xbf16, #tpu.memory_space<vmem>>, vector<1x224x224xbf16>
    %67 = vector.shape_cast %66 : vector<1x224x224xbf16> to vector<224x224xbf16>
    %cst_48 = arith.constant dense<0.000000e+00> : vector<14x224xf32>
    %68 = tpu.matmul %65, %67, %cst_48 {dimension_numbers = #tpu.dot_dimension_numbers<[1], [0], [0], [1], [0, 0, 1, 1], [], []>} : vector<14x224xbf16>, vector<224x224xbf16>, vector<14x224xf32> -> vector<14x224xf32>
    %69 = arith.addf %59, %68 : vector<14x224xf32>
    %c6_49 = arith.constant 6 : index
    %c0_50 = arith.constant 0 : index
    %c0_51 = arith.constant 0 : index
    %70 = vector.load %arg3[%c6_49, %c0_50, %c0_51] : memref<9x224x224xbf16, #tpu.memory_space<vmem>>, vector<1x224x224xbf16>
    %71 = vector.shape_cast %70 : vector<1x224x224xbf16> to vector<224x224xbf16>
    %cst_52 = arith.constant dense<0.000000e+00> : vector<14x224xf32>
    %72 = tpu.matmul %65, %71, %cst_52 {dimension_numbers = #tpu.dot_dimension_numbers<[1], [0], [0], [1], [0, 0, 1, 1], [], []>} : vector<14x224xbf16>, vector<224x224xbf16>, vector<14x224xf32> -> vector<14x224xf32>
    %73 = arith.addf %63, %72 : vector<14x224xf32>
    %74 = vector.extract_strided_slice %1 {offsets = [2, 16], sizes = [14, 224], strides = [1, 1]} : vector<16x256xf32> to vector<14x224xf32>
    %75 = arith.truncf %74 : vector<14x224xf32> to vector<14x224xbf16>
    %c7 = arith.constant 7 : index
    %c0_53 = arith.constant 0 : index
    %c0_54 = arith.constant 0 : index
    %76 = vector.load %arg2[%c7, %c0_53, %c0_54] : memref<9x224x224xbf16, #tpu.memory_space<vmem>>, vector<1x224x224xbf16>
    %77 = vector.shape_cast %76 : vector<1x224x224xbf16> to vector<224x224xbf16>
    %cst_55 = arith.constant dense<0.000000e+00> : vector<14x224xf32>
    %78 = tpu.matmul %75, %77, %cst_55 {dimension_numbers = #tpu.dot_dimension_numbers<[1], [0], [0], [1], [0, 0, 1, 1], [], []>} : vector<14x224xbf16>, vector<224x224xbf16>, vector<14x224xf32> -> vector<14x224xf32>
    %79 = arith.addf %69, %78 : vector<14x224xf32>
    %c7_56 = arith.constant 7 : index
    %c0_57 = arith.constant 0 : index
    %c0_58 = arith.constant 0 : index
    %80 = vector.load %arg3[%c7_56, %c0_57, %c0_58] : memref<9x224x224xbf16, #tpu.memory_space<vmem>>, vector<1x224x224xbf16>
    %81 = vector.shape_cast %80 : vector<1x224x224xbf16> to vector<224x224xbf16>
    %cst_59 = arith.constant dense<0.000000e+00> : vector<14x224xf32>
    %82 = tpu.matmul %75, %81, %cst_59 {dimension_numbers = #tpu.dot_dimension_numbers<[1], [0], [0], [1], [0, 0, 1, 1], [], []>} : vector<14x224xbf16>, vector<224x224xbf16>, vector<14x224xf32> -> vector<14x224xf32>
    %83 = arith.addf %73, %82 : vector<14x224xf32>
    %84 = vector.extract_strided_slice %1 {offsets = [2, 32], sizes = [14, 224], strides = [1, 1]} : vector<16x256xf32> to vector<14x224xf32>
    %85 = arith.truncf %84 : vector<14x224xf32> to vector<14x224xbf16>
    %c8 = arith.constant 8 : index
    %c0_60 = arith.constant 0 : index
    %c0_61 = arith.constant 0 : index
    %86 = vector.load %arg2[%c8, %c0_60, %c0_61] : memref<9x224x224xbf16, #tpu.memory_space<vmem>>, vector<1x224x224xbf16>
    %87 = vector.shape_cast %86 : vector<1x224x224xbf16> to vector<224x224xbf16>
    %cst_62 = arith.constant dense<0.000000e+00> : vector<14x224xf32>
    %88 = tpu.matmul %85, %87, %cst_62 {dimension_numbers = #tpu.dot_dimension_numbers<[1], [0], [0], [1], [0, 0, 1, 1], [], []>} : vector<14x224xbf16>, vector<224x224xbf16>, vector<14x224xf32> -> vector<14x224xf32>
    %89 = arith.addf %79, %88 : vector<14x224xf32>
    %c8_63 = arith.constant 8 : index
    %c0_64 = arith.constant 0 : index
    %c0_65 = arith.constant 0 : index
    %90 = vector.load %arg3[%c8_63, %c0_64, %c0_65] : memref<9x224x224xbf16, #tpu.memory_space<vmem>>, vector<1x224x224xbf16>
    %91 = vector.shape_cast %90 : vector<1x224x224xbf16> to vector<224x224xbf16>
    %cst_66 = arith.constant dense<0.000000e+00> : vector<14x224xf32>
    %92 = tpu.matmul %85, %91, %cst_66 {dimension_numbers = #tpu.dot_dimension_numbers<[1], [0], [0], [1], [0, 0, 1, 1], [], []>} : vector<14x224xbf16>, vector<224x224xbf16>, vector<14x224xf32> -> vector<14x224xf32>
    %93 = arith.addf %83, %92 : vector<14x224xf32>
    %94 = arith.maximumf %89, %93 : vector<14x224xf32>
    %c0_67 = arith.constant 0 : index
    %c0_68 = arith.constant 0 : index
    %95 = vector.load %arg4[%c0_67, %c0_68] : memref<1x224xf32, #tpu.memory_space<vmem>>, vector<1x224xf32>
    %96 = vector.broadcast %95 : vector<1x224xf32> to vector<14x224xf32>
    %97 = arith.addf %94, %96 : vector<14x224xf32>
    %cst_69 = arith.constant 0.000000e+00 : f32
    %98 = vector.broadcast %cst_69 : f32 to vector<14x224xf32>
    %99 = arith.maximumf %97, %98 : vector<14x224xf32>
    %c0_70 = arith.constant 0 : index
    %c0_71 = arith.constant 0 : index
    %100 = vector.load %arg5[%c0_70, %c0_71] : memref<7x14xf32, #tpu.memory_space<vmem>>, vector<7x14xf32>
    %cst_72 = arith.constant dense<0.000000e+00> : vector<7x224xf32>
    %101 = tpu.matmul %100, %99, %cst_72 {dimension_numbers = #tpu.dot_dimension_numbers<[1], [0], [0], [1], [0, 0, 1, 1], [], []>} : vector<7x14xf32>, vector<14x224xf32>, vector<7x224xf32> -> vector<7x224xf32>
    %c0_73 = arith.constant 0 : index
    %c0_74 = arith.constant 0 : index
    %102 = vector.load %arg6[%c0_73, %c0_74] : memref<7x14xf32, #tpu.memory_space<vmem>>, vector<7x14xf32>
    %cst_75 = arith.constant dense<0.000000e+00> : vector<7x224xf32>
    %103 = tpu.matmul %102, %99, %cst_75 {dimension_numbers = #tpu.dot_dimension_numbers<[1], [0], [0], [1], [0, 0, 1, 1], [], []>} : vector<7x14xf32>, vector<14x224xf32>, vector<7x224xf32> -> vector<7x224xf32>
    %104 = arith.maximumf %101, %103 : vector<7x224xf32>
    %c0_76 = arith.constant 0 : index
    %c0_77 = arith.constant 0 : index
    %c0_78 = arith.constant 0 : index
    %105 = vector.load %arg7[%c0_76, %c0_77, %c0_78] : memref<1x7x224xf32, #tpu.memory_space<vmem>>, vector<1x7x224xf32>
    %106 = vector.shape_cast %105 : vector<1x7x224xf32> to vector<7x224xf32>
    %107 = vector.shape_cast %104 : vector<7x224xf32> to vector<1x7x224xf32>
    tpu.vector_store %arg7[%c0_76, %c0_77, %c0_78], %107 {strides = array<i32>} : memref<1x7x224xf32, #tpu.memory_space<vmem>>, vector<1x7x224xf32>,
    return
  }
  func.func @transform_0(%arg0: i32) -> (i32, i32, i32) {
    %c0_i32 = arith.constant 0 : i32
    %c0_i32_0 = arith.constant 0 : i32
    %c0_i32_1 = arith.constant 0 : i32
    return %arg0, %c0_i32, %c0_i32_0 : i32, i32, i32
  }
  func.func @transform_1(%arg0: i32) -> (i32, i32, i32) {
    %c0_i32 = arith.constant 0 : i32
    %c0_i32_0 = arith.constant 0 : i32
    %c0_i32_1 = arith.constant 0 : i32
    %c0_i32_2 = arith.constant 0 : i32
    return %c0_i32, %c0_i32_0, %c0_i32_1 : i32, i32, i32
  }
  func.func @transform_2(%arg0: i32) -> (i32, i32, i32) {
    %c0_i32 = arith.constant 0 : i32
    %c0_i32_0 = arith.constant 0 : i32
    %c0_i32_1 = arith.constant 0 : i32
    %c0_i32_2 = arith.constant 0 : i32
    return %c0_i32, %c0_i32_0, %c0_i32_1 : i32, i32, i32
  }
  func.func @transform_3(%arg0: i32) -> (i32, i32) {
    %c0_i32 = arith.constant 0 : i32
    %c0_i32_0 = arith.constant 0 : i32
    %c0_i32_1 = arith.constant 0 : i32
    return %c0_i32, %c0_i32_0 : i32, i32
  }
  func.func @transform_4(%arg0: i32) -> (i32, i32) {
    %c0_i32 = arith.constant 0 : i32
    %c0_i32_0 = arith.constant 0 : i32
    %c0_i32_1 = arith.constant 0 : i32
    return %c0_i32, %c0_i32_0 : i32, i32
  }
  func.func @transform_5(%arg0: i32) -> (i32, i32) {
    %c0_i32 = arith.constant 0 : i32
    %c0_i32_0 = arith.constant 0 : i32
    %c0_i32_1 = arith.constant 0 : i32
    return %c0_i32, %c0_i32_0 : i32, i32
  }
  func.func @transform_6(%arg0: i32) -> (i32, i32, i32) {
    %c0_i32 = arith.constant 0 : i32
    %c0_i32_0 = arith.constant 0 : i32
    %c0_i32_1 = arith.constant 0 : i32
    return %arg0, %c0_i32, %c0_i32_0 : i32, i32, i32
  }
}

module attributes {stable_mosaic.version = 11 : i64} {
  func.func @_head_kernel(%arg0: i32, %arg1: memref<2x1568xbf16, #tpu.memory_space<vmem>>, %arg2: memref<1568x896xbf16, #tpu.memory_space<vmem>>, %arg3: memref<1x896xf32, #tpu.memory_space<vmem>>, %arg4: memref<896x128xbf16, #tpu.memory_space<vmem>>, %arg5: memref<1x128xf32, #tpu.memory_space<vmem>>, %arg6: memref<2x128xf32, #tpu.memory_space<vmem>>) attributes {dimension_semantics = [#tpu.dimension_semantics<parallel>], iteration_bounds = array<i64: 1>, scalar_prefetch = 0 : i64, scratch_operands = 0 : i64, tpu.core_type = #tpu.core_type<tc>, window_params = [{transform_indices = @transform_0, window_bounds = array<i64: 2, 1568>}, {pipeline_mode = #tpu.pipeline_mode<synchronous>, transform_indices = @transform_1, window_bounds = array<i64: 1568, 896>}, {pipeline_mode = #tpu.pipeline_mode<synchronous>, transform_indices = @transform_2, window_bounds = array<i64: 1, 896>}, {pipeline_mode = #tpu.pipeline_mode<synchronous>, transform_indices = @transform_3, window_bounds = array<i64: 896, 128>}, {pipeline_mode = #tpu.pipeline_mode<synchronous>, transform_indices = @transform_4, window_bounds = array<i64: 1, 128>}, {transform_indices = @transform_5, window_bounds = array<i64: 2, 128>}]} {
    %c0 = arith.constant 0 : index
    %c0_0 = arith.constant 0 : index
    %0 = vector.load %arg1[%c0, %c0_0] : memref<2x1568xbf16, #tpu.memory_space<vmem>>, vector<2x1568xbf16>
    %c0_1 = arith.constant 0 : index
    %c0_2 = arith.constant 0 : index
    %1 = vector.load %arg2[%c0_1, %c0_2] : memref<1568x896xbf16, #tpu.memory_space<vmem>>, vector<1568x896xbf16>
    %cst = arith.constant dense<0.000000e+00> : vector<2x896xf32>
    %2 = tpu.matmul %0, %1, %cst {dimension_numbers = #tpu.dot_dimension_numbers<[1], [0], [0], [1], [0, 0, 1, 1], [], []>} : vector<2x1568xbf16>, vector<1568x896xbf16>, vector<2x896xf32> -> vector<2x896xf32>
    %c0_3 = arith.constant 0 : index
    %c0_4 = arith.constant 0 : index
    %3 = vector.load %arg3[%c0_3, %c0_4] : memref<1x896xf32, #tpu.memory_space<vmem>>, vector<1x896xf32>
    %4 = vector.broadcast %3 : vector<1x896xf32> to vector<2x896xf32>
    %5 = arith.addf %2, %4 : vector<2x896xf32>
    %6 = arith.truncf %5 : vector<2x896xf32> to vector<2x896xbf16>
    %c0_5 = arith.constant 0 : index
    %c0_6 = arith.constant 0 : index
    %7 = vector.load %arg4[%c0_5, %c0_6] : memref<896x128xbf16, #tpu.memory_space<vmem>>, vector<896x128xbf16>
    %cst_7 = arith.constant dense<0.000000e+00> : vector<2x128xf32>
    %8 = tpu.matmul %6, %7, %cst_7 {dimension_numbers = #tpu.dot_dimension_numbers<[1], [0], [0], [1], [0, 0, 1, 1], [], []>} : vector<2x896xbf16>, vector<896x128xbf16>, vector<2x128xf32> -> vector<2x128xf32>
    %c0_8 = arith.constant 0 : index
    %c0_9 = arith.constant 0 : index
    %9 = vector.load %arg5[%c0_8, %c0_9] : memref<1x128xf32, #tpu.memory_space<vmem>>, vector<1x128xf32>
    %10 = vector.broadcast %9 : vector<1x128xf32> to vector<2x128xf32>
    %11 = arith.addf %8, %10 : vector<2x128xf32>
    %cst_10 = arith.constant dense<0xFF800000> : vector<2xf32>
    %12 = vector.multi_reduction <maximumf>, %11, %cst_10 [1] : vector<2x128xf32> to vector<2xf32>
    %13 = vector.shape_cast %12 : vector<2xf32> to vector<2x1xf32>
    %14 = vector.broadcast %13 : vector<2x1xf32> to vector<2x128xf32>
    %15 = arith.subf %11, %14 : vector<2x128xf32>
    %16 = math.exp %15 : vector<2x128xf32>
    %cst_11 = arith.constant dense<0.000000e+00> : vector<2xf32>
    %17 = vector.multi_reduction <add>, %16, %cst_11 [1] : vector<2x128xf32> to vector<2xf32>
    %18 = vector.shape_cast %17 : vector<2xf32> to vector<2x1xf32>
    %19 = math.log %18 : vector<2x1xf32>
    %20 = arith.addf %13, %19 : vector<2x1xf32>
    %21 = vector.broadcast %20 : vector<2x1xf32> to vector<2x128xf32>
    %22 = arith.subf %11, %21 : vector<2x128xf32>
    %c0_12 = arith.constant 0 : index
    %c0_13 = arith.constant 0 : index
    %23 = vector.load %arg6[%c0_12, %c0_13] : memref<2x128xf32, #tpu.memory_space<vmem>>, vector<2x128xf32>
    tpu.vector_store %arg6[%c0_12, %c0_13], %22 {strides = array<i32>} : memref<2x128xf32, #tpu.memory_space<vmem>>, vector<2x128xf32>,
    return
  }
  func.func @transform_0(%arg0: i32) -> (i32, i32) {
    %c0_i32 = arith.constant 0 : i32
    %c0_i32_0 = arith.constant 0 : i32
    return %arg0, %c0_i32 : i32, i32
  }
  func.func @transform_1(%arg0: i32) -> (i32, i32) {
    %c0_i32 = arith.constant 0 : i32
    %c0_i32_0 = arith.constant 0 : i32
    %c0_i32_1 = arith.constant 0 : i32
    return %c0_i32, %c0_i32_0 : i32, i32
  }
  func.func @transform_2(%arg0: i32) -> (i32, i32) {
    %c0_i32 = arith.constant 0 : i32
    %c0_i32_0 = arith.constant 0 : i32
    %c0_i32_1 = arith.constant 0 : i32
    return %c0_i32, %c0_i32_0 : i32, i32
  }
  func.func @transform_3(%arg0: i32) -> (i32, i32) {
    %c0_i32 = arith.constant 0 : i32
    %c0_i32_0 = arith.constant 0 : i32
    %c0_i32_1 = arith.constant 0 : i32
    return %c0_i32, %c0_i32_0 : i32, i32
  }
  func.func @transform_4(%arg0: i32) -> (i32, i32) {
    %c0_i32 = arith.constant 0 : i32
    %c0_i32_0 = arith.constant 0 : i32
    %c0_i32_1 = arith.constant 0 : i32
    return %c0_i32, %c0_i32_0 : i32, i32
  }
  func.func @transform_5(%arg0: i32) -> (i32, i32) {
    %c0_i32 = arith.constant 0 : i32
    %c0_i32_0 = arith.constant 0 : i32
    return %arg0, %c0_i32 : i32, i32
  }
}

</mosaic_0001>

<bundles_post_ra>
// kernel: convnet_forward.3
= control target key start
LH: loop header
LB: loop body
LE: loop exit
PB: predicated region body
PF: predicated region fallthrough
CT: control target
= control target key end

     0   :  { %11 = vsyncpa [#allocation3], 0  ;;  %s3389_s0 = inlined_call_operand.vmem [shape: f32[2,30,30], index: 0, kind: input, shape index: {}]   ;;  %s3390_s1 = inlined_call_operand.hbm [shape: bf16[9,28,224], index: 1, kind: input, shape index: {}]   ;;  %s3391_s2 = inlined_call_operand.hbm [shape: bf16[9,28,224], index: 2, kind: input, shape index: {}]   ;;  %s3392_s3 = inlined_call_operand.hbm [shape: f32[1,224], index: 3, kind: input, shape index: {}]   ;;  %s3393_s4 = inlined_call_operand.hbm [shape: f32[14,28], index: 4, kind: input, shape index: {}]   ;;  %s3394_s5 = inlined_call_operand.hbm [shape: f32[14,28], index: 5, kind: input, shape index: {}]   ;;  %s3395_s6 = inlined_call_operand.vmem [shape: f32[2,14,224], index: 6, kind: output, shape index: {}]  }
   0x1   :  { %12 = vsyncpa [#allocation5], 0 }
   0x2   :  { %13 = vsyncpa [#allocation8], 0  ;;  %s3030_s21 = smov 0  }
   0x3 LB: > { %s3036_s22 = sadd.s32 4294967295, %s2981_s21   ;;  %p2346_p0 = scmp.ge.s32.totalorder %s2981_s21, 1  ;;  %s2981_s21 = sphi %s3030_s21, %s19_s21  }
   0x4   : > { %p181_p1 = scmp.lt.s32.totalorder %s2981_s21, 3  ;;  %p3396_p2 = scmp.eq.s32.totalorder %s3036_s22, 0 }
   0x5   : > { %s2983_s24 = smov [#allocation4]   ;;  %s2984_s26 = smov [#allocation7]  }
   0x6   : > { %p3041_p3 = pnand %p2346_p0, %p181_p1  ;;  %s206_s25 = sshll.u32 %s2983_s24, 4  ;;  %s3045_s25 = int_to_ptr.vmem [resolvable:$true] %s206_s25 }
   0x7   : > { %s230_s27 = sshll.u32 %s2984_s26, 4  ;;  %s2985_s29 = smov [#allocation2]   ;;  %s3049_s27 = int_to_ptr.vmem [resolvable:$true] %s230_s27 }
   0x8   : > { %s3398_s23 = scalar_select %p3041_p3, 1, 0 }
   0x9   : > { %p2669_p4 = pneg %p3041_p3  ;;  %s193_s30 = sshll.u32 %s2985_s29, 4  ;;  %s3057_s30 = int_to_ptr.vmem [resolvable:$true] %s193_s30 }
   0xa   : > { %s2986_s7 = smov [#allocation6]   ;;  %s2823_s11 = scalar_lea.hbm %s3391_s2, 4608 }
   0xb   : > { %p3053_p5 = pnand %p3396_p2, %p2669_p4  ;;  %s3059_s8 = sshll.u32 %s2986_s7, 4  ;;  %s221_s8 = int_to_ptr.vmem [resolvable:$true] %s3059_s8 }
   0xc   : > { %p2824_p6 = scmp.ne.s32.totalorder %s3391_s2, %s2823_s11  ;;  %p2830_p10 = scmp.lt.u32.totalorder %s2823_s11, %s3391_s2 }
   0xd   : > { %p3069_p7 = pneg %p3053_p5 }
   0xf   : > { %p2826_p8 = pnand %p3069_p7, %p2824_p6 }
  0x11   : > { %p2827_p9 = pneg %p2826_p8 }
  0x13   : > { %p2832_p11 = pnand %p2830_p10, %p2827_p9 }
  0x15   : > { %2835 = shalt.err (!%p2832_p11)
}
  0x16   : > { %s2836_s17 = scalar_lea.vmem %s3045_s25, 4608  ;;  %p2844_p1 = scmp.lt.s32.totalorder %s3045_s25, %s3045_s25 }
  0x17   : > { %p2837_p12 = scmp.ne.s32.totalorder %s3045_s25, %s2836_s17  ;;  %p2845_p4 = scmp.lt.s32.totalorder %s2836_s17, %s2836_s17 }
  0x19   : > { %p2839_p13 = pnand %p2837_p12, %p3069_p7  ;;  %p2846_p6 = por %p2845_p4, %p2844_p1 }
  0x1b   : > { %p2840_p0 = pneg %p2839_p13 }
  0x1d   : > { %p2847_p8 = pnand %p2846_p6, %p2840_p0 }
  0x1f   : > { %2850 = shalt.err (!%p2847_p8)
}
  0x20   : > { %s2987_s18 = smov 128   ;;  %s2988_s19 = smov 8  }
  0x21   : > { %2675 = dma.hbm_to_vmem [thread:$0]  (!%p3053_p5), %s3391_s2, 4608, %s3045_s25, [#allocation5], %s2987_s18, %s2987_s18, %s2988_s19  }
  0x22   : > { %s2851_s7 = scalar_lea.hbm %s3393_s4, 256 }
  0x23   : > { %p2852_p9 = scmp.ne.s32.totalorder %s3393_s4, %s2851_s7  ;;  %p2858_p12 = scmp.lt.u32.totalorder %s2851_s7, %s3393_s4 }
  0x25   : > { %p2854_p10 = pnand %p2852_p9, %p3069_p7 }
  0x27   : > { %p2855_p11 = pneg %p2854_p10 }
  0x29   : > { %p2860_p13 = pnand %p2858_p12, %p2855_p11 }
  0x2b   : > { %2863 = shalt.err (!%p2860_p13)
}
  0x2c   : > { %s2864_s25 = scalar_lea.vmem %s3049_s27, 256  ;;  %p2872_p6 = scmp.lt.s32.totalorder %s3049_s27, %s3049_s27 }
  0x2d   : > { %p2865_p0 = scmp.ne.s32.totalorder %s3049_s27, %s2864_s25  ;;  %p2873_p8 = scmp.lt.s32.totalorder %s2864_s25, %s2864_s25 }
  0x2f   : > { %p2867_p1 = pnand %p2865_p0, %p3069_p7  ;;  %p2874_p9 = por %p2873_p8, %p2872_p6 }
  0x31   : > { %p2868_p4 = pneg %p2867_p1 }
  0x33   : > { %p2875_p10 = pnand %p2874_p9, %p2868_p4 }
  0x35   : > { %2878 = shalt.err (!%p2875_p10)
}
  0x36   : > { %2681 = dma.hbm_to_vmem [thread:$0]  (!%p3053_p5), %s3393_s4, 256, %s3049_s27, [#allocation8], %s2987_s18, %s2987_s18, %s2988_s19  }
  0x37   : > { %s2879_s20 = scalar_lea.hbm %s3390_s1, 4608 }
  0x38   : > { %p2880_p11 = scmp.ne.s32.totalorder %s3390_s1, %s2879_s20  ;;  %p2886_p0 = scmp.lt.u32.totalorder %s2879_s20, %s3390_s1 }
  0x3a   : > { %p2882_p12 = pnand %p2880_p11, %p3069_p7 }
  0x3c   : > { %p2883_p13 = pneg %p2882_p12 }
  0x3e   : > { %p2888_p1 = pnand %p2886_p0, %p2883_p13 }
  0x40   : > { %2891 = shalt.err (!%p2888_p1)
}
  0x41   : > { %s2892_s27 = scalar_lea.vmem %s3057_s30, 4608  ;;  %p2900_p9 = scmp.lt.s32.totalorder %s3057_s30, %s3057_s30 }
  0x42   : > { %p2893_p4 = scmp.ne.s32.totalorder %s3057_s30, %s2892_s27  ;;  %p2901_p10 = scmp.lt.s32.totalorder %s2892_s27, %s2892_s27 }
  0x44   : > { %p2895_p6 = pnand %p2893_p4, %p3069_p7  ;;  %p2902_p11 = por %p2901_p10, %p2900_p9 }
  0x46   : > { %p2896_p8 = pneg %p2895_p6 }
  0x48   : > { %p2903_p12 = pnand %p2902_p11, %p2896_p8 }
  0x4a   : > { %2906 = shalt.err (!%p2903_p12)
}
  0x4b   : > { %2672 = dma.hbm_to_vmem [thread:$0]  (!%p3053_p5), %s3390_s1, 4608, %s3057_s30, [#allocation3], %s2987_s18, %s2987_s18, %s2988_s19  }
  0x4c   : > { %s2907_s25 = scalar_lea.hbm %s3392_s3, 32 }
  0x4d   : > { %p2908_p13 = scmp.ne.s32.totalorder %s3392_s3, %s2907_s25  ;;  %p2914_p4 = scmp.lt.u32.totalorder %s2907_s25, %s3392_s3 }
  0x4f   : > { %p2910_p0 = pnand %p2908_p13, %p3069_p7 }
  0x51   : > { %p2911_p1 = pneg %p2910_p0 }
  0x53   : > { %p2916_p6 = pnand %p2914_p4, %p2911_p1 }
  0x55   : > { %2919 = shalt.err (!%p2916_p6)
}
  0x56   : > { %s2920_s20 = scalar_lea.vmem %s221_s8, 32  ;;  %p2928_p11 = scmp.lt.s32.totalorder %s221_s8, %s221_s8 }
  0x57   : > { %p2921_p8 = scmp.ne.s32.totalorder %s221_s8, %s2920_s20  ;;  %p2929_p12 = scmp.lt.s32.totalorder %s2920_s20, %s2920_s20 }
  0x59   : > { %p2923_p9 = pnand %p2921_p8, %p3069_p7  ;;  %p2930_p2 = por %p2929_p12, %p2928_p11 }
  0x5b   : > { %p2924_p10 = pneg %p2923_p9 }
  0x5d   : > { %p2931_p3 = pnand %p2930_p2, %p2924_p10 }
  0x5f   : > { %2934 = shalt.err (!%p2931_p3)
}
  0x60   : > { %2678 = dma.hbm_to_vmem [thread:$0]  (!%p3053_p5), %s3392_s3, 32, %s221_s8, [#allocation5]  }
  0x61   : > { %s2989_s26 = smov [#allocation9]   ;;  %s2935_s9 = scalar_lea.hbm %s3394_s5, 256 }
  0x62   : > { %s243_s29 = sshll.u32 %s2989_s26, 4  ;;  %p2936_p13 = scmp.ne.s32.totalorder %s3394_s5, %s2935_s9  ;;  %s244_s29 = int_to_ptr.vmem [resolvable:$true] %s243_s29 }
  0x63   : > { %p2942_p0 = scmp.lt.u32.totalorder %s2935_s9, %s3394_s5 }
  0x64   : > { %p2938_p2 = pnand %p2936_p13, %p3069_p7 }
  0x66   : > { %p2939_p3 = pneg %p2938_p2 }
  0x68   : > { %p2944_p1 = pnand %p2942_p0, %p2939_p3 }
  0x6a   : > { %2947 = shalt.err (!%p2944_p1)
}
  0x6b   : > { %s2948_s8 = scalar_lea.vmem %s244_s29, 256  ;;  %p2956_p9 = scmp.lt.s32.totalorder %s244_s29, %s244_s29 }
  0x6c   : > { %p2949_p4 = scmp.ne.s32.totalorder %s244_s29, %s2948_s8  ;;  %p2957_p10 = scmp.lt.s32.totalorder %s2948_s8, %s2948_s8 }
  0x6e   : > { %p2951_p6 = pnand %p2949_p4, %p3069_p7  ;;  %p2958_p11 = por %p2957_p10, %p2956_p9 }
  0x70   : > { %p2952_p8 = pneg %p2951_p6 }
  0x72   : > { %p2959_p12 = pnand %p2958_p11, %p2952_p8 }
  0x74   : > { %2962 = shalt.err (!%p2959_p12)
}
  0x75   : > { %2684 = dma.hbm_to_vmem [thread:$0]  (!%p3053_p5), %s3394_s5, 256, %s244_s29, [#allocation8], %s2987_s18, %s2987_s18, %s2988_s19  }
  0x76   : > { %p3401_p13 = scmp.ne.s32.totalorder %s3398_s23, 0 }
  0x77   : > { %p3402_p7 = scmp.eq.s32.totalorder (!%p3401_p13), %s3036_s22, 0 }
  0x78   : > { %267 = sbr.rel (%p3401_p13) target bundleno = 841 (0x349), region = 44 }
  0x7f   : > { %2968 = dma.done.wait (%p3402_p7), [#allocation3], 4608   ;;  %p3403_p2 = pmov %p3402_p7 }
  0x81   : > { %2970 = vsyncadd (%p3403_p2), [#allocation3], 4294962688  ;;  %p3404_p3 = pmov %p3403_p2 }
  0x82   : > { %p3405_p0 = pmov %p3403_p2 }
  0x83   : > { %2972 = dma.done.wait (%p3404_p3), [#allocation5], 4640  }
  0x84   : > { %2974 = vsyncadd (%p3405_p0), [#allocation5], 4294962656  ;;  %p3406_p1 = pmov %p3405_p0 }
  0x85   : > { %p3407_p5 = pmov %p3405_p0 }
  0x86   : > { %2976 = dma.done.wait (%p3406_p1), [#allocation8], 512  }
  0x87   : > { %2978 = vsyncadd (%p3407_p5), [#allocation8], 4294966784  ;;  %p313_p4 = scmp.lt.s32.totalorder %s3036_s22, 1  ;;  %v2990_v0 = vmov 0   ;;  %vm871_vm0 = vsmask.f32 7424 }
  0x88   : > { %413 = vmatprep.mubr.bf16.mxu0 %v2990_v0  ;;  %578 = vmatprep.mubr.bf16.mxu1 %v2990_v0  ;;  %v2715_v7 = vld [vmem:[#allocation2 + $0x24] ss:$8 sps:$4 sm:$0xff]   ;;  %vm374_vm1 = vcmask 1045504   ;;  %s2991_s19 = smov 127   ;;  %s2992_s16 = smov 126   ;;  %vm1451_vm2 = vcmask 1046528  }
  0x89   : > { %s3409_s22 = smov (!%p313_p4, %s3036_s22), 1  ;;  %v2717_v10 = vld [vmem:[#allocation4 + $0x24] ss:$8 sps:$4 sm:$0xff]   ;;  %v2719_v11 = vld [vmem:[#allocation2 + $0x20] ss:$8 sps:$4 sm:$0xff]   ;;  %381 = vmatprep.subr.bf16.mxu0 %v2715_v7  ;;  %vm367_vm3 = vcmask 228352  }
  0x8a   : > { %s2499_s23 = sshll.u32 %s3409_s22, 5  ;;  %v2720_v14 = vld [vmem:[#allocation4 + $0x20] ss:$8 sps:$4 sm:$0xff]   ;;  %546 = vmatprep.subr.bf16.mxu1 %v2717_v10  ;;  %382 = vmatpush1.bf16.msra.mxu0 %v2719_v11  ;;  %v2721_v16 = vld [vmem:[#allocation2 + $0x34] ss:$8 sps:$4 sm:$0x3f]  }
  0x8b   : > { %s317_s18 = scalar_lea.vmem %s3389_s0, %s2499_s23  ;;  %547 = vmatpush1.bf16.msra.mxu1 %v2720_v14  ;;  %v2723_v18 = vld [vmem:[#allocation4 + $0x34] ss:$8 sps:$4 sm:$0x3f]   ;;  %v2725_v20 = vld [vmem:[#allocation2 + $0x30] ss:$8 sps:$4 sm:$0x3f]   ;;  %2367 = vmatprep.subr.msk.bf16.mxu0 %vm374_vm1, %v2721_v16  ;;  %s322_s30 = scalar_lea.vmem %s3395_s6, %s2499_s23 }
  0x8c   : > { %v324_v1 = vld [vmem:[%s317_s18] sm:$0xff]  ;;  %v325_v2 = vld [vmem:[%s317_s18 + $0x8] sm:$0xff]  ;;  %v326_v3 = vld [vmem:[%s317_s18 + $0x10] sm:$0xff]  ;;  %2381 = vmatprep.subr.msk.bf16.mxu1 %vm374_vm1, %v2723_v18  ;;  %v376_v24 = vsel %vm374_vm1, %v2725_v20, 0  ;;  %vm2060_vm4 = vcmask 1043456   ;;  %vm2994_vm5 = vmmov 1  }
  0x8d   : > { %v3211_v4 = vpack.c.bf16 %v325_v2, %v324_v1  ;;  %v327_v5 = vld [vmem:[%s317_s18 + $0x18] sm:$0x3f]  ;;  %v2726_v21 = vld [vmem:[#allocation4 + $0x30] ss:$8 sps:$4 sm:$0x3f]   ;;  %vm2506_vm6 = vmpackc.low %vm2060_vm4, %vm2994_vm5  ;;  %vm2234_vm7 = vcmask 785408  }
  0x8e   : > { %v3213_v6 = vpack.c.bf16 %v327_v5, %v326_v3  ;;  %v541_v25 = vsel %vm374_vm1, %v2726_v21, 0  ;;  %v2729_v26 = vld [vmem:[#allocation2 + $0x4] ss:$8 sps:$4 sm:$0xff]   ;;  %384 = vmatpush1.bf16.msra.mxu0 %v376_v24  ;;  %v2727_v31 = vld [vmem:[#allocation2] ss:$8 sps:$4 sm:$0xff]   ;;  %vm2237_vm8 = vcmask 783360  }
  0x8f   : > { %345 = vrot.lane.b32.xlu0 %v3211_v4, %s2991_s19  ;;  %681 = vrot.lane.b32.xlu1 %v3211_v4, %s2992_s16  ;;  %v872_v8 = vshrl.u32 %v3211_v4, 16  ;;  %v874_v9 = vshll.u32 %v3211_v4, 16  ;;  %v2732_v27 = vld [vmem:[#allocation4 + $0x4] ss:$8 sps:$4 sm:$0xff]   ;;  %v1452_v28 = vrot.slane %v3211_v4, 1 }
  0x90   : > { %v878_v12 = vshll.u32 %v3213_v6, 16  ;;  %v882_v13 = vshrl.u32 %v3213_v6, 16  ;;  %549 = vmatpush1.bf16.msra.mxu1 %v541_v25  ;;  %v3242_v29 = vrot.slane %v3213_v6, 1  ;;  %464 = vmatprep.subr.bf16.mxu0 %v2729_v26  ;;  %v2730_v32 = vld [vmem:[#allocation4] ss:$8 sps:$4 sm:$0xff]  }
  0x91   : > { %v876_v15 = vrot.slane %v874_v9, 1  ;;  %623 = vmatprep.subr.bf16.mxu1 %v2732_v27  ;;  %v2737_v33 = vld [vmem:[#allocation2 + $0x10] ss:$8 sps:$4 sm:$0x3f]   ;;  %v2741_v40 = vld [vmem:[#allocation2 + $0x44] ss:$8 sps:$4 sm:$0xff]  }
  0x92   : > { %v880_v17 = vrot.slane %v878_v12, 1  ;;  %v3249_v30 = vsel %vm1451_vm2, %v1452_v28, %v3242_v29  ;;  %v2738_v34 = vld [vmem:[#allocation4 + $0x10] ss:$8 sps:$4 sm:$0x3f]   ;;  %v459_v38 = vsel %vm374_vm1, %v2737_v33, 0 }
  0x93   : > { %347 = vrot.lane.b32.xlu0 %v3213_v6, %s2991_s19  ;;  %683 = vrot.lane.b32.xlu1 %v3213_v6, %s2992_s16  ;;  %v877_v19 = vor.u32 %v876_v15, %v872_v8  ;;  %v2733_v36 = vld [vmem:[#allocation2 + $0x14] ss:$8 sps:$4 sm:$0x3f]   ;;  %v618_v39 = vsel %vm374_vm1, %v2738_v34, 0  ;;  %v2744_v41 = vld [vmem:[#allocation4 + $0x44] ss:$8 sps:$4 sm:$0xff]  }
  0x94   : > { %v3227_v22 = vor.u32 %v882_v13, %v880_v17  ;;  %v2735_v37 = vld [vmem:[#allocation4 + $0x14] ss:$8 sps:$4 sm:$0x3f]   ;;  %v2739_v43 = vld [vmem:[#allocation2 + $0x40] ss:$8 sps:$4 sm:$0xff]  }
  0x95   : > { %v3232_v23 = vsel %vm871_vm0, %v877_v19, %v880_v17  ;;  %v2742_v44 = vld [vmem:[#allocation4 + $0x40] ss:$8 sps:$4 sm:$0xff]   ;;  %v2749_v45 = vld [vmem:[#allocation2 + $0x50] ss:$8 sps:$4 sm:$0x3f]  }
  0x96   : > { %v2750_v46 = vld [vmem:[#allocation4 + $0x50] ss:$8 sps:$4 sm:$0x3f]   ;;  %v2745_v47 = vld [vmem:[#allocation2 + $0x54] ss:$8 sps:$4 sm:$0x3f]  }
  0x97   : > { %1071 = vrot.lane.b32.xlu0 %v3232_v23, %s2991_s19  ;;  %1073 = vrot.lane.b32.xlu1 %v3227_v22, %s2991_s19  ;;  %v2747_v48 = vld [vmem:[#allocation4 + $0x54] ss:$8 sps:$4 sm:$0x3f]   ;;  %v710_v49 = vsel %vm374_vm1, %v2749_v45, 0  ;;  %v800_v50 = vsel %vm374_vm1, %v2750_v46, 0 }
  0x98   : > { %v2753_v51 = vld [vmem:[#allocation2 + $0x64] ss:$8 sps:$4 sm:$0xff]   ;;  %v2751_v54 = vld [vmem:[#allocation2 + $0x60] ss:$8 sps:$4 sm:$0xff]  }
  0x99   : > { %v2756_v52 = vld [vmem:[#allocation4 + $0x64] ss:$8 sps:$4 sm:$0xff]   ;;  %v2754_v55 = vld [vmem:[#allocation4 + $0x60] ss:$8 sps:$4 sm:$0xff]  }
  0x9a   : > { %v2761_v56 = vld [vmem:[#allocation2 + $0x70] ss:$8 sps:$4 sm:$0x3f]   ;;  %v2757_v58 = vld [vmem:[#allocation2 + $0x74] ss:$8 sps:$4 sm:$0x3f]  }
  0x9b   : > { %1261 = vrot.lane.b32.xlu0 %v3232_v23, %s2992_s16  ;;  %1263 = vrot.lane.b32.xlu1 %v3227_v22, %s2992_s16  ;;  %v2762_v57 = vld [vmem:[#allocation4 + $0x70] ss:$8 sps:$4 sm:$0x3f]   ;;  %v2759_v59 = vld [vmem:[#allocation4 + $0x74] ss:$8 sps:$4 sm:$0x3f]  }
  0x9c   : > { %v910_v60 = vsel %vm374_vm1, %v2761_v56, 0  ;;  %v1000_v61 = vsel %vm374_vm1, %v2762_v57, 0  ;;  %v2765_v62 = vld [vmem:[#allocation2 + $0x84] ss:$8 sps:$4 sm:$0xff]   ;;  %v2763_v2 = vld [vmem:[#allocation2 + $0x80] ss:$8 sps:$4 sm:$0xff]  }
  0x9d   : > { %v2768_v63 = vld [vmem:[#allocation4 + $0x84] ss:$8 sps:$4 sm:$0xff]   ;;  %v2766_v3 = vld [vmem:[#allocation4 + $0x80] ss:$8 sps:$4 sm:$0xff]  }
  0x9e   : > { %v2774_v5 = vld [vmem:[#allocation4 + $0x90] ss:$8 sps:$4 sm:$0x3f]   ;;  %v2771_v7 = vld [vmem:[#allocation4 + $0x94] ss:$8 sps:$4 sm:$0x3f]  }
  0x9f   : > { %1641 = vrot.lane.b32.xlu0 %v3249_v30, %s2991_s19  ;;  %1643 = vrot.lane.b32.xlu1 %v3242_v29, %s2991_s19  ;;  %v1190_v9 = vsel %vm374_vm1, %v2774_v5, 0  ;;  %v2777_v10 = vld [vmem:[#allocation2 + $0xa4] ss:$8 sps:$4 sm:$0xff]   ;;  %v2775_v13 = vld [vmem:[#allocation2 + $0xa0] ss:$8 sps:$4 sm:$0xff]  }
  0xa0   : > { %v2780_v11 = vld [vmem:[#allocation4 + $0xa4] ss:$8 sps:$4 sm:$0xff]   ;;  %v2778_v14 = vld [vmem:[#allocation4 + $0xa0] ss:$8 sps:$4 sm:$0xff]  }
  0xa1   : > { %v2785_v15 = vld [vmem:[#allocation2 + $0xb0] ss:$8 sps:$4 sm:$0x3f]   ;;  %v2781_v17 = vld [vmem:[#allocation2 + $0xb4] ss:$8 sps:$4 sm:$0x3f]  }
  0xa2   : > { %v2786_v16 = vld [vmem:[#allocation4 + $0xb0] ss:$8 sps:$4 sm:$0x3f]   ;;  %v2783_v18 = vld [vmem:[#allocation4 + $0xb4] ss:$8 sps:$4 sm:$0x3f]  }
  0xa3   : > { %1831 = vrot.lane.b32.xlu0 %v3249_v30, %s2992_s16  ;;  %1833 = vrot.lane.b32.xlu1 %v3242_v29, %s2992_s16  ;;  %v1290_v19 = vsel %vm374_vm1, %v2785_v15, 0  ;;  %v1380_v20 = vsel %vm374_vm1, %v2786_v16, 0  ;;  %v2789_v21 = vld [vmem:[#allocation2 + $0xc4] ss:$8 sps:$4 sm:$0xff]   ;;  %v2787_v25 = vld [vmem:[#allocation2 + $0xc0] ss:$8 sps:$4 sm:$0xff]  }
  0xa4   : > { %v2790_v26 = vld [vmem:[#allocation4 + $0xc0] ss:$8 sps:$4 sm:$0xff]   ;;  %v2797_v27 = vld [vmem:[#allocation2 + $0xd0] ss:$8 sps:$4 sm:$0x3f]  }
  0xa5   : > { %v2798_v28 = vld [vmem:[#allocation4 + $0xd0] ss:$8 sps:$4 sm:$0x3f]   ;;  %v1480_v33 = vsel %vm374_vm1, %v2797_v27, 0  ;;  %v2813_v46 = vld [vmem:[#allocation2 + $0x104] ss:$8 sps:$4 sm:$0xff]  }
  0xa6   : > { %v1570_v34 = vsel %vm374_vm1, %v2798_v28, 0 }
 0x101   : > { %v346_v35 = vpop.permute.xlu0 %345  ;;  %v682_v53 = vpop.permute.xlu1 %681 }
 0x102   : > { %2368 = vmatmul.mubr.msk.bf16.vlgmr.msra.gmra.mrb[0].mxu0 %vm367_vm3, %v346_v35  ;;  %2382 = vmatmul.mubr.msk.bf16.vlgmr.msra.gmra.mrb[0].mxu1 %vm367_vm3, %v346_v35  ;;  %v2801_v35 = vld [vmem:[#allocation2 + $0xe4] ss:$8 sps:$4 sm:$0xff]  }
 0x103   : > { %465 = vmatpush1.bf16.msra.mxu0 %v2727_v31  ;;  %624 = vmatpush1.bf16.msra.mxu1 %v2730_v32  ;;  %v2793_v31 = vld [vmem:[#allocation2 + $0xd4] ss:$8 sps:$4 sm:$0x3f]  }
 0x104   : > { %423 = vmatprep.mubr.bf16.mxu0 %v2990_v0  ;;  %588 = vmatprep.mubr.bf16.mxu1 %v2990_v0  ;;  %v2795_v32 = vld [vmem:[#allocation4 + $0xd4] ss:$8 sps:$4 sm:$0x3f]  }
 0x105   : > { %2374 = vmatprep.subr.msk.bf16.mxu0 %vm374_vm1, %v2733_v36  ;;  %2388 = vmatprep.subr.msk.bf16.mxu1 %vm374_vm1, %v2735_v37  ;;  %v348_v42 = vpop.permute.xlu0 %347  ;;  %v684_v1 = vpop.permute.xlu1 %683  ;;  %v2804_v36 = vld [vmem:[#allocation4 + $0xe4] ss:$8 sps:$4 sm:$0xff]  }
 0x107   : > { %467 = vmatpush1.bf16.msra.mxu0 %v459_v38  ;;  %626 = vmatpush1.bf16.msra.mxu1 %v618_v39  ;;  %v2799_v38 = vld [vmem:[#allocation2 + $0xe0] ss:$8 sps:$4 sm:$0xff]  }
 0x108   : > { %715 = vmatprep.subr.bf16.mxu0 %v2741_v40  ;;  %805 = vmatprep.subr.bf16.mxu1 %v2744_v41  ;;  %v2802_v39 = vld [vmem:[#allocation4 + $0xe0] ss:$8 sps:$4 sm:$0xff]   ;;  %v2809_v40 = vld [vmem:[#allocation2 + $0xf0] ss:$8 sps:$4 sm:$0x3f]  }
 0x109   : > { %v1072_v12 = vpop.permute.xlu0 %1071  ;;  %v2810_v41 = vld [vmem:[#allocation4 + $0xf0] ss:$8 sps:$4 sm:$0x3f]  }
 0x10a   : > { %2369 = vmatmul.mubr.msk.bf16.gmra.mrb[4].mxu0 %vm367_vm3, %v348_v42  ;;  %2383 = vmatmul.mubr.msk.bf16.gmra.mrb[4].mxu1 %vm367_vm3, %v348_v42  ;;  %v2805_v42 = vld [vmem:[#allocation2 + $0xf4] ss:$8 sps:$4 sm:$0x3f]   ;;  %v1760_v45 = vsel %vm374_vm1, %v2810_v41, 0 }
 0x10b   : > { %496 = vmatprep.mubr.bf16.mxu0 %v2990_v0  ;;  %655 = vmatprep.mubr.bf16.mxu1 %v2990_v0 }
 0x10d   : > { %v1262_v24 = vpop.permute.xlu0 %1261 }
 0x112   : > { %2375 = vmatmul.mubr.msk.bf16.vlgmr.msra.gmra.mrb[0].mxu0 %vm367_vm3, %v3211_v4  ;;  %2389 = vmatmul.mubr.msk.bf16.vlgmr.msra.gmra.mrb[0].mxu1 %vm367_vm3, %v3211_v4  ;;  %v2773_v4 = vld [vmem:[#allocation2 + $0x90] ss:$8 sps:$4 sm:$0x3f]  }
 0x113   : > { %716 = vmatpush1.bf16.msra.mxu0 %v2739_v43  ;;  %806 = vmatpush1.bf16.msra.mxu1 %v2742_v44  ;;  %v1100_v8 = vsel %vm374_vm1, %v2773_v4, 0  ;;  %v2807_v43 = vld [vmem:[#allocation4 + $0xf4] ss:$8 sps:$4 sm:$0x3f]   ;;  %v1670_v44 = vsel %vm374_vm1, %v2809_v40, 0 }
 0x114   : > { %506 = vmatprep.mubr.bf16.mxu0 %v2990_v0  ;;  %665 = vmatprep.mubr.bf16.mxu1 %v2990_v0 }
 0x115   : > { %2395 = vmatprep.subr.msk.bf16.mxu0 %vm374_vm1, %v2745_v47  ;;  %2402 = vmatprep.subr.msk.bf16.mxu1 %vm374_vm1, %v2747_v48  ;;  %v2816_v47 = vld [vmem:[#allocation4 + $0x104] ss:$8 sps:$4 sm:$0xff]   ;;  %v2811_v48 = vld [vmem:[#allocation2 + $0x100] ss:$8 sps:$4 sm:$0xff]  }
 0x117   : > { %718 = vmatpush1.bf16.msra.mxu0 %v710_v49  ;;  %808 = vmatpush1.bf16.msra.mxu1 %v800_v50  ;;  %v2814_v49 = vld [vmem:[#allocation4 + $0x100] ss:$8 sps:$4 sm:$0xff]   ;;  %v2821_v50 = vld [vmem:[#allocation2 + $0x110] ss:$8 sps:$4 sm:$0x3f]  }
 0x118   : > { %915 = vmatprep.subr.bf16.mxu0 %v2753_v51  ;;  %1005 = vmatprep.subr.bf16.mxu1 %v2756_v52  ;;  %v2822_v51 = vld [vmem:[#allocation4 + $0x110] ss:$8 sps:$4 sm:$0x3f]   ;;  %v2817_v52 = vld [vmem:[#allocation2 + $0x114] ss:$8 sps:$4 sm:$0x3f]  }
 0x11a   : > { %2376 = vmatmul.mubr.msk.bf16.gmra.mrb[4].mxu0 %vm367_vm3, %v3213_v6  ;;  %2390 = vmatmul.mubr.msk.bf16.gmra.mrb[4].mxu1 %vm367_vm3, %v3213_v6  ;;  %v2769_v6 = vld [vmem:[#allocation2 + $0x94] ss:$8 sps:$4 sm:$0x3f]  }
 0x11b   : > { %747 = vmatprep.mubr.bf16.mxu0 %v2990_v0  ;;  %837 = vmatprep.mubr.bf16.mxu1 %v2990_v0 }
 0x122   : > { %2396 = vmatmul.mubr.msk.bf16.vlgmr.msra.gmra.mrb[0].mxu0 %vm367_vm3, %v682_v53  ;;  %2403 = vmatmul.mubr.msk.bf16.vlgmr.msra.gmra.mrb[0].mxu1 %vm367_vm3, %v682_v53  ;;  %v2819_v53 = vld [vmem:[#allocation4 + $0x114] ss:$8 sps:$4 sm:$0x3f]  }
 0x123   : > { %916 = vmatpush1.bf16.msra.mxu0 %v2751_v54  ;;  %1006 = vmatpush1.bf16.msra.mxu1 %v2754_v55  ;;  %v1950_v54 = vsel %vm374_vm1, %v2822_v51, 0 }
 0x124   : > { %757 = vmatprep.mubr.bf16.mxu0 %v2990_v0  ;;  %847 = vmatprep.mubr.bf16.mxu1 %v2990_v0 }
 0x125   : > { %2409 = vmatprep.subr.msk.bf16.mxu0 %vm374_vm1, %v2757_v58  ;;  %2416 = vmatprep.subr.msk.bf16.mxu1 %vm374_vm1, %v2759_v59  ;;  %v2993_v58 = vmov 0.0   ;;  %v2026_v59 = vlaneseq }
 0x127   : > { %918 = vmatpush1.bf16.msra.mxu0 %v910_v60  ;;  %1008 = vmatpush1.bf16.msra.mxu1 %v1000_v61  ;;  %v2027_v60 = vshrl.u32 %v2026_v59, 7 }
 0x128   : > { %1105 = vmatprep.subr.bf16.mxu0 %v2765_v62  ;;  %1195 = vmatprep.subr.bf16.mxu1 %v2768_v63  ;;  %v2024_v62 = vld [vmem:[#allocation6] sm:$0x3] }
 0x129   : > { %v2028_v61 = vsub.s32 0, %v2027_v60  ;;  %v2032_v63 = vsub.s32 1, %v2027_v60 }
 0x12a   : > { %2397 = vmatmul.mubr.msk.bf16.gmra.mrb[4].mxu0 %vm367_vm3, %v684_v1  ;;  %2404 = vmatmul.mubr.msk.bf16.gmra.mrb[4].mxu1 %vm367_vm3, %v684_v1 }
 0x12b   : > { %947 = vmatprep.mubr.bf16.mxu0 %v2990_v0  ;;  %1037 = vmatprep.mubr.bf16.mxu1 %v2990_v0  ;;  %v2029_v1 = vrot.slane %v2024_v62, %v2028_v61  ;;  %v2033_v4 = vrot.slane %v2024_v62, %v2032_v63 }
 0x132   : > { %2410 = vmatmul.mubr.msk.bf16.vlgmr.msra.gmra.mrb[0].mxu0 %vm367_vm3, %v3232_v23  ;;  %2417 = vmatmul.mubr.msk.bf16.vlgmr.msra.gmra.mrb[0].mxu1 %vm367_vm3, %v3232_v23  ;;  %v1074_v23 = vpop.permute.xlu1 %1073 }
 0x133   : > { %1106 = vmatpush1.bf16.msra.mxu0 %v2763_v2  ;;  %1196 = vmatpush1.bf16.msra.mxu1 %v2766_v3 }
 0x134   : > { %957 = vmatprep.mubr.bf16.mxu0 %v2990_v0  ;;  %1047 = vmatprep.mubr.bf16.mxu1 %v2990_v0 }
 0x135   : > { %2423 = vmatprep.subr.msk.bf16.mxu0 %vm374_vm1, %v2769_v6  ;;  %2430 = vmatprep.subr.msk.bf16.mxu1 %vm374_vm1, %v2771_v7 }
 0x136   : > { %v1264_v37 = vpop.permute.xlu1 %1263 }
 0x137   : > { %1108 = vmatpush1.bf16.msra.mxu0 %v1100_v8  ;;  %1198 = vmatpush1.bf16.msra.mxu1 %v1190_v9 }
 0x138   : > { %1295 = vmatprep.subr.bf16.mxu0 %v2777_v10  ;;  %1385 = vmatprep.subr.bf16.mxu1 %v2780_v11 }
 0x13a   : > { %2411 = vmatmul.mubr.msk.bf16.gmra.mrb[4].mxu0 %vm367_vm3, %v3227_v22  ;;  %2418 = vmatmul.mubr.msk.bf16.gmra.mrb[4].mxu1 %vm367_vm3, %v3227_v22  ;;  %v2792_v22 = vld [vmem:[#allocation4 + $0xc4] ss:$8 sps:$4 sm:$0xff]   ;;  %v1644_v55 = vpop.permute.xlu1 %1643 }
 0x13b   : > { %1137 = vmatprep.mubr.bf16.mxu0 %v2990_v0  ;;  %1227 = vmatprep.mubr.bf16.mxu1 %v2990_v0 }
 0x13e   : > { %v1834_v57 = vpop.permute.xlu1 %1833 }
 0x142   : > { %2424 = vmatmul.mubr.msk.bf16.vlgmr.msra.gmra.mrb[0].mxu0 %vm367_vm3, %v1072_v12  ;;  %2431 = vmatmul.mubr.msk.bf16.vlgmr.msra.gmra.mrb[0].mxu1 %vm367_vm3, %v1072_v12 }
 0x143   : > { %1296 = vmatpush1.bf16.msra.mxu0 %v2775_v13  ;;  %1386 = vmatpush1.bf16.msra.mxu1 %v2778_v14 }
 0x144   : > { %1147 = vmatprep.mubr.bf16.mxu0 %v2990_v0  ;;  %1237 = vmatprep.mubr.bf16.mxu1 %v2990_v0 }
 0x145   : > { %2437 = vmatprep.subr.msk.bf16.mxu0 %vm374_vm1, %v2781_v17  ;;  %2444 = vmatprep.subr.msk.bf16.mxu1 %vm374_vm1, %v2783_v18 }
 0x147   : > { %1298 = vmatpush1.bf16.msra.mxu0 %v1290_v19  ;;  %1388 = vmatpush1.bf16.msra.mxu1 %v1380_v20 }
 0x148   : > { %1485 = vmatprep.subr.bf16.mxu0 %v2789_v21  ;;  %1575 = vmatprep.subr.bf16.mxu1 %v2792_v22 }
 0x14a   : > { %2425 = vmatmul.mubr.msk.bf16.gmra.mrb[4].mxu0 %vm367_vm3, %v1074_v23  ;;  %2432 = vmatmul.mubr.msk.bf16.gmra.mrb[4].mxu1 %vm367_vm3, %v1074_v23 }
 0x14b   : > { %1327 = vmatprep.mubr.bf16.mxu0 %v2990_v0  ;;  %1417 = vmatprep.mubr.bf16.mxu1 %v2990_v0 }
 0x152   : > { %2438 = vmatmul.mubr.msk.bf16.vlgmr.msra.gmra.mrb[0].mxu0 %vm367_vm3, %v1262_v24  ;;  %2445 = vmatmul.mubr.msk.bf16.vlgmr.msra.gmra.mrb[0].mxu1 %vm367_vm3, %v1262_v24 }
 0x153   : > { %1486 = vmatpush1.bf16.msra.mxu0 %v2787_v25  ;;  %1576 = vmatpush1.bf16.msra.mxu1 %v2790_v26 }
 0x154   : > { %1337 = vmatprep.mubr.bf16.mxu0 %v2990_v0  ;;  %1427 = vmatprep.mubr.bf16.mxu1 %v2990_v0 }
 0x155   : > { %2451 = vmatprep.subr.msk.bf16.mxu0 %vm374_vm1, %v2793_v31  ;;  %2458 = vmatprep.subr.msk.bf16.mxu1 %vm374_vm1, %v2795_v32 }
 0x157   : > { %1488 = vmatpush1.bf16.msra.mxu0 %v1480_v33  ;;  %1578 = vmatpush1.bf16.msra.mxu1 %v1570_v34 }
 0x158   : > { %1675 = vmatprep.subr.bf16.mxu0 %v2801_v35  ;;  %1765 = vmatprep.subr.bf16.mxu1 %v2804_v36 }
 0x15a   : > { %2439 = vmatmul.mubr.msk.bf16.gmra.mrb[4].mxu0 %vm367_vm3, %v1264_v37  ;;  %2446 = vmatmul.mubr.msk.bf16.gmra.mrb[4].mxu1 %vm367_vm3, %v1264_v37 }
 0x15b   : > { %1517 = vmatprep.mubr.bf16.mxu0 %v2990_v0  ;;  %1607 = vmatprep.mubr.bf16.mxu1 %v2990_v0 }
 0x162   : > { %2452 = vmatmul.mubr.msk.bf16.vlgmr.msra.gmra.mrb[0].mxu0 %vm367_vm3, %v3249_v30  ;;  %2459 = vmatmul.mubr.msk.bf16.vlgmr.msra.gmra.mrb[0].mxu1 %vm367_vm3, %v3249_v30  ;;  %v1642_v30 = vpop.permute.xlu0 %1641 }
 0x163   : > { %1676 = vmatpush1.bf16.msra.mxu0 %v2799_v38  ;;  %1766 = vmatpush1.bf16.msra.mxu1 %v2802_v39 }
 0x164   : > { %1527 = vmatprep.mubr.bf16.mxu0 %v2990_v0  ;;  %1617 = vmatprep.mubr.bf16.mxu1 %v2990_v0 }
 0x165   : > { %2465 = vmatprep.subr.msk.bf16.mxu0 %vm374_vm1, %v2805_v42  ;;  %2472 = vmatprep.subr.msk.bf16.mxu1 %vm374_vm1, %v2807_v43 }
 0x166   : > { %v1832_v56 = vpop.permute.xlu0 %1831 }
 0x167   : > { %1678 = vmatpush1.bf16.msra.mxu0 %v1670_v44  ;;  %1768 = vmatpush1.bf16.msra.mxu1 %v1760_v45 }
 0x168   : > { %1865 = vmatprep.subr.bf16.mxu0 %v2813_v46  ;;  %1955 = vmatprep.subr.bf16.mxu1 %v2816_v47 }
 0x16a   : > { %2453 = vmatmul.mubr.msk.bf16.gmra.mrb[4].mxu0 %vm367_vm3, %v3242_v29  ;;  %2460 = vmatmul.mubr.msk.bf16.gmra.mrb[4].mxu1 %vm367_vm3, %v3242_v29  ;;  %v1860_v29 = vsel %vm374_vm1, %v2821_v50, 0  ;;  %v2145_v50 = vld [vmem:[#allocation9 + $0x8] sm:$0x3f] }
 0x16b   : > { %1707 = vmatprep.mubr.bf16.mxu0 %v2990_v0  ;;  %1797 = vmatprep.mubr.bf16.mxu1 %v2990_v0 }
 0x172   : > { %2466 = vmatmul.mubr.msk.bf16.vlgmr.msra.gmra.mrb[0].mxu0 %vm367_vm3, %v1642_v30  ;;  %2473 = vmatmul.mubr.msk.bf16.vlgmr.msra.gmra.mrb[0].mxu1 %vm367_vm3, %v1642_v30  ;;  %v2052_v30 = vld [vmem:[#allocation7] sm:$0xff] }
 0x173   : > { %1866 = vmatpush1.bf16.msra.mxu0 %v2811_v48  ;;  %1956 = vmatpush1.bf16.msra.mxu1 %v2814_v49  ;;  %v2144_v48 = vld [vmem:[#allocation9] sm:$0xff]  ;;  %v2053_v49 = vld [vmem:[#allocation7 + $0x8] sm:$0x3f] }
 0x174   : > { %1717 = vmatprep.mubr.bf16.mxu0 %v2990_v0  ;;  %1807 = vmatprep.mubr.bf16.mxu1 %v2990_v0 }
 0x175   : > { %2479 = vmatprep.subr.msk.bf16.mxu0 %vm374_vm1, %v2817_v52  ;;  %2486 = vmatprep.subr.msk.bf16.mxu1 %vm374_vm1, %v2819_v53 }
 0x177   : > { %1868 = vmatpush1.bf16.msra.mxu0 %v1860_v29  ;;  %1958 = vmatpush1.bf16.msra.mxu1 %v1950_v54 }
 0x17a   : > { %2467 = vmatmul.mubr.msk.bf16.gmra.mrb[4].mxu0 %vm367_vm3, %v1644_v55  ;;  %2474 = vmatmul.mubr.msk.bf16.gmra.mrb[4].mxu1 %vm367_vm3, %v1644_v55 }
 0x17b   : > { %1897 = vmatprep.mubr.bf16.mxu0 %v2990_v0  ;;  %1987 = vmatprep.mubr.bf16.mxu1 %v2990_v0 }
 0x182   : > { %2480 = vmatmul.mubr.msk.bf16.vlgmr.msra.gmra.mrb[0].mxu0 %vm367_vm3, %v1832_v56  ;;  %2487 = vmatmul.mubr.msk.bf16.vlgmr.msra.gmra.mrb[0].mxu1 %vm367_vm3, %v1832_v56 }
 0x183   : > { %1907 = vmatprep.mubr.bf16.mxu0 %v2990_v0  ;;  %1997 = vmatprep.mubr.bf16.mxu1 %v2990_v0 }
 0x18a   : > { %2481 = vmatmul.mubr.msk.bf16.gmra.mrb[4].mxu0 %vm367_vm3, %v1834_v57  ;;  %2488 = vmatmul.mubr.msk.bf16.gmra.mrb[4].mxu1 %vm367_vm3, %v1834_v57 }
 0x18b   : > { %2131 = vmatprep.mubr.f32.mxu0 %v2993_v58  ;;  %2216 = vmatprep.mubr.f32.mxu1 %v2993_v58 }
 0x255   : > { %v1899_v2 = vpop.f32.mrb[0].mxu0  ;;  %v1989_v3 = vpop.f32.mrb[0].mxu1 }
 0x256   : > { %v2016_v0 = vmax.f32 %v1899_v2, %v1989_v3  ;;  %v1901_v5 = vpop.f32.mrb[1].mxu0  ;;  %v1991_v6 = vpop.f32.mrb[1].mxu1 }
 0x257   : > { %v2017_v7 = vmax.f32 %v1901_v5, %v1991_v6  ;;  %v1903_v8 = vpop.f32.mrb[2].mxu0  ;;  %v1993_v9 = vpop.f32.mrb[2].mxu1 }
 0x258   : > { %v2036_v10 = vadd.f32 %v2029_v1, %v2016_v0  ;;  %v2018_v11 = vmax.f32 %v1903_v8, %v1993_v9  ;;  %v1905_v12 = vpop.f32.mrb[3].mxu0  ;;  %v1995_v13 = vpop.f32.mrb[3].mxu1 }
 0x259   : > { %v2037_v14 = vadd.f32 %v2033_v4, %v2017_v7  ;;  %v2019_v15 = vmax.f32 %v1905_v12, %v1995_v13 }
 0x25a   : > { %v2038_v16 = vadd.f32 %v2029_v1, %v2018_v11  ;;  %v2044_v18 = vmax.f32 %v2036_v10, 0.0 }
 0x25b   : > { %v2039_v17 = vadd.f32 %v2033_v4, %v2019_v15  ;;  %v2045_v20 = vmax.f32 %v2037_v14, 0.0 }
 0x25c   : > { %v2046_v19 = vmax.f32 %v2038_v16, 0.0 }
 0x25d   : > { %v2047_v21 = vmax.f32 %v2039_v17, 0.0  ;;  %v1909_v22 = vpop.f32.mrb[4].mxu0  ;;  %v1999_v23 = vpop.f32.mrb[4].mxu1 }
 0x25e   : > { %v2503_v24 = vpack.c.bf16 %v2046_v19, %v2044_v18  ;;  %v2020_v25 = vmax.f32 %v1909_v22, %v1999_v23  ;;  %v1911_v26 = vpop.f32.mrb[5].mxu0  ;;  %v2001_v27 = vpop.f32.mrb[5].mxu1 }
 0x25f   : > { %v2021_v28 = vmax.f32 %v1911_v26, %v2001_v27  ;;  %v1913_v31 = vpop.f32.mrb[6].mxu0  ;;  %v2003_v32 = vpop.f32.mrb[6].mxu1  ;;  %v2501_v33 = vpack.c.bf16 %v2047_v21, %v2045_v20 }
 0x260   : > { %v2040_v34 = vadd.f32 %v2029_v1, %v2020_v25  ;;  %v2022_v35 = vmax.f32 %v1913_v31, %v2003_v32  ;;  %v1915_v36 = vpop.f32.mrb[7].mxu0  ;;  %v2005_v37 = vpop.f32.mrb[7].mxu1 }
 0x261   : > { %v2041_v38 = vadd.f32 %v2033_v4, %v2021_v28  ;;  %v2023_v39 = vmax.f32 %v1915_v36, %v2005_v37  ;;  %2502 = vmatprep.subr.bf16.mxu0 %v2501_v33  ;;  %2512 = vmatprep.subr.bf16.mxu1 %v2501_v33 }
 0x262   : > { %v2042_v40 = vadd.f32 %v2029_v1, %v2022_v35  ;;  %2504 = vmatpush1.bf16.msra.mxu0 %v2503_v24  ;;  %2514 = vmatpush1.bf16.msra.mxu1 %v2503_v24  ;;  %v2048_v42 = vmax.f32 %v2040_v34, 0.0 }
 0x263   : > { %v2043_v41 = vadd.f32 %v2033_v4, %v2023_v39  ;;  %v2049_v44 = vmax.f32 %v2041_v38, 0.0 }
 0x264   : > { %v2050_v43 = vmax.f32 %v2042_v40, 0.0 }
 0x265   : > { %v2051_v45 = vmax.f32 %v2043_v41, 0.0 }
 0x266   : > { %v2508_v46 = vpack.c.bf16 %v2050_v43, %v2048_v42 }
 0x267   : > { %v2505_v47 = vpack.c.bf16 %v2051_v45, %v2049_v44 }
 0x269   : > { %2507 = vmatprep.subr.msk.bf16.mxu0 %vm2506_vm6, %v2505_v47  ;;  %2517 = vmatprep.subr.msk.bf16.mxu1 %vm2506_vm6, %v2505_v47 }
 0x26a   : > { %2510 = vmatpush1.bf16.msk.msra.mxu0 %vm2506_vm6, %v2508_v46  ;;  %2520 = vmatpush1.bf16.msk.msra.mxu1 %vm2506_vm6, %v2508_v46 }
 0x26d   : > { %2491 = vmatmul.mubr.msk.f32.vlgmr.msra.gmra.mrb[8].mxu0 %vm367_vm3, %v2052_v30  ;;  %2495 = vmatmul.mubr.msk.f32.vlgmr.msra.gmra.mrb[8].mxu1 %vm367_vm3, %v2144_v48 }
 0x26e   : > { %2137 = vmatprep.mubr.f32.mxu0 %v2993_v58  ;;  %2222 = vmatprep.mubr.f32.mxu1 %v2993_v58 }
 0x271   : > { %2492 = vmatmul.mubr.msk.f32.gmra.mrb[10].mxu0 %vm367_vm3, %v2053_v49  ;;  %2496 = vmatmul.mubr.msk.f32.gmra.mrb[10].mxu1 %vm367_vm3, %v2145_v50 }
 0x340   : > { %v2133_v51 = vpop.f32.mrb[8].mxu0  ;;  %v2218_v52 = vpop.f32.mrb[8].mxu1 }
 0x341   : > { %v2229_v53 = vmax.f32 %v2133_v51, %v2218_v52  ;;  %v2135_v29 = vpop.f32.mrb[9].mxu0  ;;  %v2220_v54 = vpop.f32.mrb[9].mxu1 }
 0x342   : > { %v2230_v55 = vmax.f32 %v2135_v29, %v2220_v54 }
 0x343   : > { %2233 = vst [vmem:[%s322_s30] sm:$0xff] %v2229_v53 }
 0x344   : > { %2235 = vst.msk [vmem:[%s322_s30 + $0x8] sm:$0xff] %vm2234_vm7, %v2230_v55  ;;  %v2139_v56 = vpop.f32.mrb[10].mxu0  ;;  %v2224_v57 = vpop.f32.mrb[10].mxu1 }
 0x345   : > { %v2231_v58 = vmax.f32 %v2139_v56, %v2224_v57  ;;  %v2141_v59 = vpop.f32.mrb[11].mxu0  ;;  %v2226_v60 = vpop.f32.mrb[11].mxu1 }
 0x346   : > { %v2232_v61 = vmax.f32 %v2141_v59, %v2226_v60 }
 0x347   : > { %2236 = vst [vmem:[%s322_s30 + $0x10] sm:$0x3f] %v2231_v58 }
 0x348   : > { %2238 = vst.msk [vmem:[%s322_s30 + $0x18] sm:$0x3f] %vm2237_vm8, %v2232_v61 }
 0x349 PF: > { %s19_s21 = sadd.s32 1, %s2981_s21  }
 0x34a   : > { %p16_p6 = scmp.ge.s32.totalorder %s19_s21, 4  }
 0x34c   :  { %18 = sbr.rel (!%p16_p6) target bundleno = 3 (0x3), region = 111 }
 0x353   :  { %2260 = vsyncpa [#allocation3], 1 }
 0x354   :  { %2262 = vsyncpa [#allocation3 + $0x1], 1 }
 0x355   :  { %2263 = vsyncpa [#allocation5], 1 }
 0x356   :  { %2264 = vsyncpa [#allocation8], 1 }

// kernel: convnet_forward.4
= control target key start
LH: loop header
LB: loop body
LE: loop exit
PB: predicated region body
PF: predicated region fallthrough
CT: control target
= control target key end

     0   :  { %11 = vsyncpa [#allocation3], 0  ;;  %s6511_s0 = inlined_call_operand.vmem [shape: f32[2,16,256], index: 0, kind: input, shape index: {}]   ;;  %s6512_s1 = inlined_call_operand.hbm [shape: bf16[9,224,224], index: 1, kind: input, shape index: {}]   ;;  %s6513_s2 = inlined_call_operand.hbm [shape: bf16[9,224,224], index: 2, kind: input, shape index: {}]   ;;  %s6514_s3 = inlined_call_operand.hbm [shape: f32[1,224], index: 3, kind: input, shape index: {}]   ;;  %s6515_s4 = inlined_call_operand.hbm [shape: f32[7,14], index: 4, kind: input, shape index: {}]   ;;  %s6516_s5 = inlined_call_operand.hbm [shape: f32[7,14], index: 5, kind: input, shape index: {}]   ;;  %s6517_s6 = inlined_call_operand.vmem [shape: f32[2,7,224], index: 6, kind: output, shape index: {}]  }
   0x1   :  { %12 = vsyncpa [#allocation5], 0 }
   0x2   :  { %13 = vsyncpa [#allocation8], 0  ;;  %s6227_s21 = smov 0  }
   0x3 LB: > { %s6233_s22 = sadd.s32 4294967295, %s6179_s21   ;;  %p4575_p0 = scmp.ge.s32.totalorder %s6179_s21, 1  ;;  %s6179_s21 = sphi %s6227_s21, %s19_s21  }
   0x4   : > { %p181_p1 = scmp.lt.s32.totalorder %s6179_s21, 3  ;;  %p6518_p2 = scmp.eq.s32.totalorder %s6233_s22, 0 }
   0x5   : > { %s6181_s24 = smov [#allocation4]   ;;  %s6182_s26 = smov [#allocation7]  }
   0x6   : > { %p6238_p3 = pnand %p4575_p0, %p181_p1  ;;  %s206_s25 = sshll.u32 %s6181_s24, 4  ;;  %s6242_s25 = int_to_ptr.vmem [resolvable:$true] %s206_s25 }
   0x7   : > { %s231_s27 = sshll.u32 %s6182_s26, 4  ;;  %s6183_s29 = smov [#allocation2]   ;;  %s6246_s27 = int_to_ptr.vmem [resolvable:$true] %s231_s27 }
   0x8   : > { %s6520_s23 = scalar_select %p6238_p3, 1, 0 }
   0x9   : > { %p5220_p4 = pneg %p6238_p3  ;;  %s193_s30 = sshll.u32 %s6183_s29, 4  ;;  %s6254_s30 = int_to_ptr.vmem [resolvable:$true] %s193_s30 }
   0xa   : > { %s6184_s7 = smov [#allocation6]   ;;  %s6021_s11 = scalar_lea.hbm %s6513_s2, 32256 }
   0xb   : > { %p6250_p5 = pnand %p6518_p2, %p5220_p4  ;;  %s6256_s8 = sshll.u32 %s6184_s7, 4  ;;  %s221_s8 = int_to_ptr.vmem [resolvable:$true] %s6256_s8 }
   0xc   : > { %p6022_p6 = scmp.ne.s32.totalorder %s6513_s2, %s6021_s11  ;;  %p6028_p10 = scmp.lt.u32.totalorder %s6021_s11, %s6513_s2 }
   0xd   : > { %p6266_p7 = pneg %p6250_p5 }
   0xf   : > { %p6024_p8 = pnand %p6266_p7, %p6022_p6 }
  0x11   : > { %p6025_p9 = pneg %p6024_p8 }
  0x13   : > { %p6030_p11 = pnand %p6028_p10, %p6025_p9 }
  0x15   : > { %6033 = shalt.err (!%p6030_p11)
}
  0x16   : > { %s6034_s17 = scalar_lea.vmem %s6242_s25, 32256  ;;  %p6042_p1 = scmp.lt.s32.totalorder %s6242_s25, %s6242_s25 }
  0x17   : > { %p6035_p12 = scmp.ne.s32.totalorder %s6242_s25, %s6034_s17  ;;  %p6043_p4 = scmp.lt.s32.totalorder %s6034_s17, %s6034_s17 }
  0x19   : > { %p6037_p13 = pnand %p6035_p12, %p6266_p7  ;;  %p6044_p6 = por %p6043_p4, %p6042_p1 }
  0x1b   : > { %p6038_p0 = pneg %p6037_p13 }
  0x1d   : > { %p6045_p8 = pnand %p6044_p6, %p6038_p0 }
  0x1f   : > { %6048 = shalt.err (!%p6045_p8)
}
  0x20   : > { %s6185_s18 = smov 128   ;;  %s6186_s19 = smov 8  }
  0x21   : > { %5226 = dma.hbm_to_vmem [thread:$0]  (!%p6250_p5), %s6513_s2, 32256, %s6242_s25, [#allocation5], %s6185_s18, %s6185_s18, %s6186_s19  }
  0x22   : > { %s6049_s7 = scalar_lea.hbm %s6515_s4, 128 }
  0x23   : > { %p6050_p9 = scmp.ne.s32.totalorder %s6515_s4, %s6049_s7  ;;  %p6056_p12 = scmp.lt.u32.totalorder %s6049_s7, %s6515_s4 }
  0x25   : > { %p6052_p10 = pnand %p6050_p9, %p6266_p7 }
  0x27   : > { %p6053_p11 = pneg %p6052_p10 }
  0x29   : > { %p6058_p13 = pnand %p6056_p12, %p6053_p11 }
  0x2b   : > { %6061 = shalt.err (!%p6058_p13)
}
  0x2c   : > { %s6062_s25 = scalar_lea.vmem %s6246_s27, 128  ;;  %p6070_p6 = scmp.lt.s32.totalorder %s6246_s27, %s6246_s27 }
  0x2d   : > { %p6063_p0 = scmp.ne.s32.totalorder %s6246_s27, %s6062_s25  ;;  %p6071_p8 = scmp.lt.s32.totalorder %s6062_s25, %s6062_s25 }
  0x2f   : > { %p6065_p1 = pnand %p6063_p0, %p6266_p7  ;;  %p6072_p9 = por %p6071_p8, %p6070_p6 }
  0x31   : > { %p6066_p4 = pneg %p6065_p1 }
  0x33   : > { %p6073_p10 = pnand %p6072_p9, %p6066_p4 }
  0x35   : > { %6076 = shalt.err (!%p6073_p10)
}
  0x36   : > { %5232 = dma.hbm_to_vmem [thread:$0]  (!%p6250_p5), %s6515_s4, 128, %s6246_s27, [#allocation8]  }
  0x37   : > { %s6077_s20 = scalar_lea.hbm %s6512_s1, 32256 }
  0x38   : > { %p6078_p11 = scmp.ne.s32.totalorder %s6512_s1, %s6077_s20  ;;  %p6084_p0 = scmp.lt.u32.totalorder %s6077_s20, %s6512_s1 }
  0x3a   : > { %p6080_p12 = pnand %p6078_p11, %p6266_p7 }
  0x3c   : > { %p6081_p13 = pneg %p6080_p12 }
  0x3e   : > { %p6086_p1 = pnand %p6084_p0, %p6081_p13 }
  0x40   : > { %6089 = shalt.err (!%p6086_p1)
}
  0x41   : > { %s6090_s27 = scalar_lea.vmem %s6254_s30, 32256  ;;  %p6098_p9 = scmp.lt.s32.totalorder %s6254_s30, %s6254_s30 }
  0x42   : > { %p6091_p4 = scmp.ne.s32.totalorder %s6254_s30, %s6090_s27  ;;  %p6099_p10 = scmp.lt.s32.totalorder %s6090_s27, %s6090_s27 }
  0x44   : > { %p6093_p6 = pnand %p6091_p4, %p6266_p7  ;;  %p6100_p11 = por %p6099_p10, %p6098_p9 }
  0x46   : > { %p6094_p8 = pneg %p6093_p6 }
  0x48   : > { %p6101_p12 = pnand %p6100_p11, %p6094_p8 }
  0x4a   : > { %6104 = shalt.err (!%p6101_p12)
}
  0x4b   : > { %5223 = dma.hbm_to_vmem [thread:$0]  (!%p6250_p5), %s6512_s1, 32256, %s6254_s30, [#allocation3], %s6185_s18, %s6185_s18, %s6186_s19  }
  0x4c   : > { %s6105_s25 = scalar_lea.hbm %s6514_s3, 32 }
  0x4d   : > { %p6106_p13 = scmp.ne.s32.totalorder %s6514_s3, %s6105_s25  ;;  %p6112_p4 = scmp.lt.u32.totalorder %s6105_s25, %s6514_s3 }
  0x4f   : > { %p6108_p0 = pnand %p6106_p13, %p6266_p7 }
  0x51   : > { %p6109_p1 = pneg %p6108_p0 }
  0x53   : > { %p6114_p6 = pnand %p6112_p4, %p6109_p1 }
  0x55   : > { %6117 = shalt.err (!%p6114_p6)
}
  0x56   : > { %s6118_s20 = scalar_lea.vmem %s221_s8, 32  ;;  %p6126_p11 = scmp.lt.s32.totalorder %s221_s8, %s221_s8 }
  0x57   : > { %p6119_p8 = scmp.ne.s32.totalorder %s221_s8, %s6118_s20  ;;  %p6127_p12 = scmp.lt.s32.totalorder %s6118_s20, %s6118_s20 }
  0x59   : > { %p6121_p9 = pnand %p6119_p8, %p6266_p7  ;;  %p6128_p2 = por %p6127_p12, %p6126_p11 }
  0x5b   : > { %p6122_p10 = pneg %p6121_p9 }
  0x5d   : > { %p6129_p3 = pnand %p6128_p2, %p6122_p10 }
  0x5f   : > { %6132 = shalt.err (!%p6129_p3)
}
  0x60   : > { %5229 = dma.hbm_to_vmem [thread:$0]  (!%p6250_p5), %s6514_s3, 32, %s221_s8, [#allocation5]  }
  0x61   : > { %s6187_s19 = smov [#allocation9]   ;;  %s6133_s7 = scalar_lea.hbm %s6516_s5, 128 }
  0x62   : > { %s242_s24 = sshll.u32 %s6187_s19, 4  ;;  %p6134_p13 = scmp.ne.s32.totalorder %s6516_s5, %s6133_s7  ;;  %s243_s24 = int_to_ptr.vmem [resolvable:$true] %s242_s24 }
  0x63   : > { %p6140_p0 = scmp.lt.u32.totalorder %s6133_s7, %s6516_s5 }
  0x64   : > { %p6136_p2 = pnand %p6134_p13, %p6266_p7 }
  0x66   : > { %p6137_p3 = pneg %p6136_p2 }
  0x68   : > { %p6142_p1 = pnand %p6140_p0, %p6137_p3 }
  0x6a   : > { %6145 = shalt.err (!%p6142_p1)
}
  0x6b   : > { %s6146_s8 = scalar_lea.vmem %s243_s24, 128  ;;  %p6154_p9 = scmp.lt.s32.totalorder %s243_s24, %s243_s24 }
  0x6c   : > { %p6147_p4 = scmp.ne.s32.totalorder %s243_s24, %s6146_s8  ;;  %p6155_p10 = scmp.lt.s32.totalorder %s6146_s8, %s6146_s8 }
  0x6e   : > { %p6149_p6 = pnand %p6147_p4, %p6266_p7  ;;  %p6156_p11 = por %p6155_p10, %p6154_p9 }
  0x70   : > { %p6150_p8 = pneg %p6149_p6 }
  0x72   : > { %p6157_p12 = pnand %p6156_p11, %p6150_p8 }
  0x74   : > { %6160 = shalt.err (!%p6157_p12)
}
  0x75   : > { %5235 = dma.hbm_to_vmem [thread:$0]  (!%p6250_p5), %s6516_s5, 128, %s243_s24, [#allocation8]  }
  0x76   : > { %p6523_p13 = scmp.ne.s32.totalorder %s6520_s23, 0 }
  0x77   : > { %p6524_p2 = scmp.eq.s32.totalorder (!%p6523_p13), %s6233_s22, 0 }
  0x78   : > { %263 = sbr.rel (%p6523_p13) target bundleno = 1154 (0x482), region = 44 }
  0x7f   : > { %6166 = dma.done.wait (%p6524_p2), [#allocation3], 32256   ;;  %p6525_p7 = pmov %p6524_p2 }
  0x80   : > { %p6526_p3 = pmov %p6524_p2 }
  0x81   : > { %6168 = vsyncadd (%p6525_p7), [#allocation3], 4294935040 }
  0x82   : > { %6170 = dma.done.wait (%p6526_p3), [#allocation5], 32288   ;;  %p6527_p0 = pmov %p6524_p2 }
  0x84   : > { %6172 = vsyncadd (%p6527_p0), [#allocation5], 4294935008  ;;  %p6528_p1 = pmov %p6527_p0 }
  0x85   : > { %p6529_p5 = pmov %p6527_p0 }
  0x86   : > { %6174 = dma.done.wait (%p6528_p1), [#allocation8], 256  }
  0x87   : > { %6176 = vsyncadd (%p6529_p5), [#allocation8], 4294967040  ;;  %p309_p4 = scmp.lt.s32.totalorder %s6233_s22, 1  ;;  %v5265_v5 = vld [vmem:[#allocation2 + $0xe4] ss:$8 sps:$4 sm:$0xff]   ;;  %s6188_s15 = smov 112  }
  0x88   : > { %v5267_v7 = vld [vmem:[#allocation4 + $0xe4] ss:$8 sps:$4 sm:$0xff]   ;;  %v5269_v8 = vld [vmem:[#allocation2 + $0xe0] ss:$8 sps:$4 sm:$0xff]   ;;  %s6189_s16 = smov 96   ;;  %564 = vmatprep.subr.bf16.mxu0 %v5265_v5  ;;  %vm560_vm0 = vcmask 785408  }
  0x89   : > { %s6531_s22 = smov (!%p309_p4, %s6233_s22), 1  ;;  %v5270_v9 = vld [vmem:[#allocation4 + $0xe0] ss:$8 sps:$4 sm:$0xff]   ;;  %v5271_v10 = vld [vmem:[#allocation2 + $0xf4] ss:$8 sps:$4 sm:$0xff]   ;;  %962 = vmatprep.subr.bf16.mxu1 %v5267_v7  ;;  %565 = vmatpush1.bf16.msra.mxu0 %v5269_v8  ;;  %vm417_vm1 = vcmask 916480  }
  0x8a   : > { %s5122_s23 = sshll.u32 %s6531_s22, 5  ;;  %v5273_v11 = vld [vmem:[#allocation4 + $0xf4] ss:$8 sps:$4 sm:$0xff]   ;;  %963 = vmatpush1.bf16.msra.mxu1 %v5270_v9  ;;  %566 = vmatprep.subr.bf16.mxu0 %v5271_v10  ;;  %v5275_v12 = vld [vmem:[#allocation2 + $0xf0] ss:$8 sps:$4 sm:$0xff]   ;;  %vm4310_vm2 = vcmask 1045504  }
  0x8b   : > { %s313_s13 = scalar_lea.vmem %s6511_s0, %s5122_s23  ;;  %v5276_v13 = vld [vmem:[#allocation4 + $0xf0] ss:$8 sps:$4 sm:$0xff]   ;;  %964 = vmatprep.subr.bf16.mxu1 %v5273_v11  ;;  %v5277_v14 = vld [vmem:[#allocation2 + $0x104] ss:$8 sps:$4 sm:$0xff]   ;;  %v5281_v16 = vld [vmem:[#allocation2 + $0x100] ss:$8 sps:$4 sm:$0xff]  }
  0x8c   : > { %v320_v0 = vld [vmem:[%s313_s13] sm:$0xff]  ;;  %v322_v1 = vld [vmem:[%s313_s13 + $0x10] sm:$0xff]  ;;  %v321_v2 = vld [vmem:[%s313_s13 + $0x8] sm:$0xff]  ;;  %vm6191_vm3 = vmmov 1   ;;  %vm4306_vm5 = vcmask 113664   ;;  %s5123_s17 = sshll.u32 %s6531_s22, 4 }
  0x8d   : > { %v6398_v3 = vpack.c.bf16 %v322_v1, %v320_v0  ;;  %v323_v4 = vld [vmem:[%s313_s13 + $0x18] sm:$0xff]  ;;  %567 = vmatpush1.bf16.msra.mxu0 %v5275_v12  ;;  %v5283_v18 = vld [vmem:[#allocation2 + $0x114] ss:$8 sps:$4 sm:$0xff]   ;;  %v5287_v20 = vld [vmem:[#allocation2 + $0x110] ss:$8 sps:$4 sm:$0xff]   ;;  %s318_s18 = scalar_lea.vmem %s6517_s6, %s5123_s17  ;;  %vm4466_vm6 = vcmask 784384  }
  0x8e   : > { %v6402_v6 = vpack.c.bf16 %v323_v4, %v321_v2  ;;  %v5279_v15 = vld [vmem:[#allocation4 + $0x104] ss:$8 sps:$4 sm:$0xff]   ;;  %v5282_v17 = vld [vmem:[#allocation4 + $0x100] ss:$8 sps:$4 sm:$0xff]   ;;  %965 = vmatpush1.bf16.msra.mxu1 %v5276_v13  ;;  %568 = vmatprep.subr.bf16.mxu0 %v5277_v14  ;;  %v5285_v19 = vld [vmem:[#allocation4 + $0x114] ss:$8 sps:$4 sm:$0xff]  }
  0x8f   : > { %413 = vrot.lane.b32.xlu0 %v6398_v3, %s6188_s15  ;;  %1217 = vrot.lane.b32.xlu1 %v6398_v3, %s6189_s16  ;;  %v5288_v21 = vld [vmem:[#allocation4 + $0x110] ss:$8 sps:$4 sm:$0xff]   ;;  %v5289_v22 = vld [vmem:[#allocation2 + $0x124] ss:$8 sps:$4 sm:$0xff]   ;;  %v5293_v24 = vld [vmem:[#allocation2 + $0x120] ss:$8 sps:$4 sm:$0xff]  }
  0x90   : > { %966 = vmatprep.subr.bf16.mxu1 %v5279_v15  ;;  %v5291_v23 = vld [vmem:[#allocation4 + $0x124] ss:$8 sps:$4 sm:$0xff]   ;;  %v5294_v25 = vld [vmem:[#allocation4 + $0x120] ss:$8 sps:$4 sm:$0xff]   ;;  %v5295_v26 = vld [vmem:[#allocation2 + $0x134] ss:$8 sps:$4 sm:$0xff]  }
  0x91   : > { %569 = vmatpush1.bf16.msra.mxu0 %v5281_v16  ;;  %v5297_v27 = vld [vmem:[#allocation4 + $0x134] ss:$8 sps:$4 sm:$0xff]   ;;  %v5299_v28 = vld [vmem:[#allocation2 + $0x130] ss:$8 sps:$4 sm:$0xff]   ;;  %v5301_v30 = vld [vmem:[#allocation2 + $0x144] ss:$8 sps:$4 sm:$0xff]  }
  0x92   : > { %967 = vmatpush1.bf16.msra.mxu1 %v5282_v17  ;;  %570 = vmatprep.subr.bf16.mxu0 %v5283_v18  ;;  %v5300_v29 = vld [vmem:[#allocation4 + $0x130] ss:$8 sps:$4 sm:$0xff]   ;;  %v5303_v31 = vld [vmem:[#allocation4 + $0x144] ss:$8 sps:$4 sm:$0xff]   ;;  %v5305_v32 = vld [vmem:[#allocation2 + $0x140] ss:$8 sps:$4 sm:$0xff]  }
  0x93   : > { %415 = vrot.lane.b32.xlu0 %v6402_v6, %s6188_s15  ;;  %1219 = vrot.lane.b32.xlu1 %v6402_v6, %s6189_s16  ;;  %v5306_v33 = vld [vmem:[#allocation4 + $0x140] ss:$8 sps:$4 sm:$0xff]   ;;  %v5307_v34 = vld [vmem:[#allocation2 + $0x154] ss:$8 sps:$4 sm:$0xff]   ;;  %v5311_v36 = vld [vmem:[#allocation2 + $0x150] ss:$8 sps:$4 sm:$0xff]  }
  0x94   : > { %968 = vmatprep.subr.bf16.mxu1 %v5285_v19  ;;  %v5309_v35 = vld [vmem:[#allocation4 + $0x154] ss:$8 sps:$4 sm:$0xff]   ;;  %v5312_v37 = vld [vmem:[#allocation4 + $0x150] ss:$8 sps:$4 sm:$0xff]   ;;  %v5313_v38 = vld [vmem:[#allocation2 + $0x164] ss:$8 sps:$4 sm:$0xff]  }
  0x95   : > { %571 = vmatpush1.bf16.msra.mxu0 %v5287_v20  ;;  %v5315_v39 = vld [vmem:[#allocation4 + $0x164] ss:$8 sps:$4 sm:$0xff]   ;;  %v5317_v40 = vld [vmem:[#allocation2 + $0x160] ss:$8 sps:$4 sm:$0xff]   ;;  %v5319_v42 = vld [vmem:[#allocation2 + $0x174] ss:$8 sps:$4 sm:$0xff]  }
  0x96   : > { %969 = vmatpush1.bf16.msra.mxu1 %v5288_v21  ;;  %572 = vmatprep.subr.bf16.mxu0 %v5289_v22  ;;  %v5318_v41 = vld [vmem:[#allocation4 + $0x160] ss:$8 sps:$4 sm:$0xff]   ;;  %v5321_v43 = vld [vmem:[#allocation4 + $0x174] ss:$8 sps:$4 sm:$0xff]   ;;  %v5323_v44 = vld [vmem:[#allocation2 + $0x170] ss:$8 sps:$4 sm:$0xff]  }
  0x97   : > { %970 = vmatprep.subr.bf16.mxu1 %v5291_v23  ;;  %v5324_v45 = vld [vmem:[#allocation4 + $0x170] ss:$8 sps:$4 sm:$0xff]   ;;  %v5325_v46 = vld [vmem:[#allocation2 + $0x184] ss:$8 sps:$4 sm:$0xff]   ;;  %v5329_v48 = vld [vmem:[#allocation2 + $0x180] ss:$8 sps:$4 sm:$0xff]  }
  0x98   : > { %v5327_v47 = vld [vmem:[#allocation4 + $0x184] ss:$8 sps:$4 sm:$0xff]   ;;  %v5330_v49 = vld [vmem:[#allocation4 + $0x180] ss:$8 sps:$4 sm:$0xff]   ;;  %v5331_v50 = vld [vmem:[#allocation2 + $0x194] ss:$8 sps:$4 sm:$0xff]  }
  0x99   : > { %573 = vmatpush1.bf16.msra.mxu0 %v5293_v24  ;;  %v5333_v51 = vld [vmem:[#allocation4 + $0x194] ss:$8 sps:$4 sm:$0xff]   ;;  %v5335_v52 = vld [vmem:[#allocation2 + $0x190] ss:$8 sps:$4 sm:$0xff]   ;;  %v5337_v54 = vld [vmem:[#allocation2 + $0x1a4] ss:$8 sps:$4 sm:$0xff]  }
  0x9a   : > { %971 = vmatpush1.bf16.msra.mxu1 %v5294_v25  ;;  %574 = vmatprep.subr.bf16.mxu0 %v5295_v26  ;;  %v5336_v53 = vld [vmem:[#allocation4 + $0x190] ss:$8 sps:$4 sm:$0xff]   ;;  %v5339_v55 = vld [vmem:[#allocation4 + $0x1a4] ss:$8 sps:$4 sm:$0xff]   ;;  %v5341_v56 = vld [vmem:[#allocation2 + $0x1a0] ss:$8 sps:$4 sm:$0xff]  }
  0x9b   : > { %972 = vmatprep.subr.bf16.mxu1 %v5297_v27  ;;  %v5342_v57 = vld [vmem:[#allocation4 + $0x1a0] ss:$8 sps:$4 sm:$0xff]   ;;  %v5343_v58 = vld [vmem:[#allocation2 + $0x1b4] ss:$8 sps:$4 sm:$0xff]   ;;  %v5347_v60 = vld [vmem:[#allocation2 + $0x1b0] ss:$8 sps:$4 sm:$0xff]  }
  0x9c   : > { %v5345_v59 = vld [vmem:[#allocation4 + $0x1b4] ss:$8 sps:$4 sm:$0xff]   ;;  %v5348_v61 = vld [vmem:[#allocation4 + $0x1b0] ss:$8 sps:$4 sm:$0xff]   ;;  %v5351_v62 = vld [vmem:[#allocation2 + $0x4] ss:$8 sps:$4 sm:$0xff]  }
  0x9d   : > { %575 = vmatpush1.bf16.msra.mxu0 %v5299_v28  ;;  %v5354_v63 = vld [vmem:[#allocation4 + $0x4] ss:$8 sps:$4 sm:$0xff]   ;;  %v1668_v0 = vshll.u32 %v6402_v6, 16  ;;  %v1662_v1 = vshll.u32 %v6398_v3, 16  ;;  %v1666_v2 = vshrl.u32 %v6402_v6, 16  ;;  %v1660_v5 = vshrl.u32 %v6398_v3, 16  ;;  %vm5125_vm4 = vmpackc.low %vm4310_vm2, %vm6191_vm3 }
  0x9e   : > { %973 = vmatpush1.bf16.msra.mxu1 %v5300_v29  ;;  %576 = vmatprep.subr.bf16.mxu0 %v5301_v30  ;;  %v5349_v11 = vld [vmem:[#allocation2] ss:$8 sps:$4 sm:$0xff]   ;;  %v5357_v13 = vld [vmem:[#allocation2 + $0x14] ss:$8 sps:$4 sm:$0xff]   ;;  %v5355_v17 = vld [vmem:[#allocation2 + $0x10] ss:$8 sps:$4 sm:$0xff]  }
  0x9f   : > { %974 = vmatprep.subr.bf16.mxu1 %v5303_v31  ;;  %v1670_v4 = vrot.slane %v1668_v0, 1  ;;  %v1664_v7 = vrot.slane %v1662_v1, 1  ;;  %v5352_v12 = vld [vmem:[#allocation4] ss:$8 sps:$4 sm:$0xff]   ;;  %v5360_v15 = vld [vmem:[#allocation4 + $0x14] ss:$8 sps:$4 sm:$0xff]  }
  0xa0   : > { %v5358_v18 = vld [vmem:[#allocation4 + $0x10] ss:$8 sps:$4 sm:$0xff]   ;;  %v5363_v19 = vld [vmem:[#allocation2 + $0x24] ss:$8 sps:$4 sm:$0xff]   ;;  %v5361_v21 = vld [vmem:[#allocation2 + $0x20] ss:$8 sps:$4 sm:$0xff]  }
  0xa1   : > { %577 = vmatpush1.bf16.msra.mxu0 %v5305_v32  ;;  %v6414_v8 = vor.u32 %v1670_v4, %v1666_v2  ;;  %v6416_v9 = vor.u32 %v1664_v7, %v1660_v5  ;;  %v5366_v20 = vld [vmem:[#allocation4 + $0x24] ss:$8 sps:$4 sm:$0xff]   ;;  %v5364_v22 = vld [vmem:[#allocation4 + $0x20] ss:$8 sps:$4 sm:$0xff]   ;;  %v5369_v23 = vld [vmem:[#allocation2 + $0x34] ss:$8 sps:$4 sm:$0xff]  }
  0xa2   : > { %975 = vmatpush1.bf16.msra.mxu1 %v5306_v33  ;;  %578 = vmatprep.subr.bf16.mxu0 %v5307_v34  ;;  %v5372_v24 = vld [vmem:[#allocation4 + $0x34] ss:$8 sps:$4 sm:$0xff]   ;;  %v5367_v25 = vld [vmem:[#allocation2 + $0x30] ss:$8 sps:$4 sm:$0xff]   ;;  %v5375_v27 = vld [vmem:[#allocation2 + $0x44] ss:$8 sps:$4 sm:$0xff]  }
  0xa3   : > { %976 = vmatprep.subr.bf16.mxu1 %v5309_v35  ;;  %2110 = vrot.lane.b32.xlu1 %v6414_v8, %s6188_s15  ;;  %v5370_v26 = vld [vmem:[#allocation4 + $0x30] ss:$8 sps:$4 sm:$0xff]   ;;  %v5378_v28 = vld [vmem:[#allocation4 + $0x44] ss:$8 sps:$4 sm:$0xff]   ;;  %v5373_v29 = vld [vmem:[#allocation2 + $0x40] ss:$8 sps:$4 sm:$0xff]  }
  0xa4   : > { %2108 = vrot.lane.b32.xlu0 %v6416_v9, %s6188_s15  ;;  %v5376_v30 = vld [vmem:[#allocation4 + $0x40] ss:$8 sps:$4 sm:$0xff]   ;;  %v5381_v31 = vld [vmem:[#allocation2 + $0x54] ss:$8 sps:$4 sm:$0xff]   ;;  %v5379_v33 = vld [vmem:[#allocation2 + $0x50] ss:$8 sps:$4 sm:$0xff]  }
  0xa5   : > { %579 = vmatpush1.bf16.msra.mxu0 %v5311_v36  ;;  %v5384_v32 = vld [vmem:[#allocation4 + $0x54] ss:$8 sps:$4 sm:$0xff]   ;;  %v5382_v34 = vld [vmem:[#allocation4 + $0x50] ss:$8 sps:$4 sm:$0xff]   ;;  %v5387_v35 = vld [vmem:[#allocation2 + $0x64] ss:$8 sps:$4 sm:$0xff]  }
  0xa6   : > { %977 = vmatpush1.bf16.msra.mxu1 %v5312_v37  ;;  %580 = vmatprep.subr.bf16.mxu0 %v5313_v38  ;;  %v5390_v36 = vld [vmem:[#allocation4 + $0x64] ss:$8 sps:$4 sm:$0xff]   ;;  %v5385_v37 = vld [vmem:[#allocation2 + $0x60] ss:$8 sps:$4 sm:$0xff]   ;;  %v5432_v0 = vld [vmem:[#allocation4 + $0xd4] ss:$8 sps:$4 sm:$0xff]  }
  0xa7   : > { %978 = vmatprep.subr.bf16.mxu1 %v5315_v39  ;;  %2551 = vrot.lane.b32.xlu1 %v6414_v8, %s6189_s16  ;;  %v5388_v38 = vld [vmem:[#allocation4 + $0x60] ss:$8 sps:$4 sm:$0xff]   ;;  %v5393_v39 = vld [vmem:[#allocation2 + $0x74] ss:$8 sps:$4 sm:$0xff]   ;;  %v5427_v1 = vld [vmem:[#allocation2 + $0xd0] ss:$8 sps:$4 sm:$0xff]  }
  0xa8   : > { %2549 = vrot.lane.b32.xlu0 %v6416_v9, %s6189_s16  ;;  %v5430_v2 = vld [vmem:[#allocation4 + $0xd0] ss:$8 sps:$4 sm:$0xff]   ;;  %v5435_v4 = vld [vmem:[#allocation2 + $0x1c4] ss:$8 sps:$4 sm:$0xff]  }
  0xa9   : > { %581 = vmatpush1.bf16.msra.mxu0 %v5317_v40  ;;  %v5396_v40 = vld [vmem:[#allocation4 + $0x74] ss:$8 sps:$4 sm:$0xff]   ;;  %v5438_v5 = vld [vmem:[#allocation4 + $0x1c4] ss:$8 sps:$4 sm:$0xff]  }
  0xaa   : > { %979 = vmatpush1.bf16.msra.mxu1 %v5318_v41  ;;  %582 = vmatprep.subr.bf16.mxu0 %v5319_v42  ;;  %v5391_v41 = vld [vmem:[#allocation2 + $0x70] ss:$8 sps:$4 sm:$0xff]  }
  0xab   : > { %980 = vmatprep.subr.bf16.mxu1 %v5321_v43  ;;  %v5394_v42 = vld [vmem:[#allocation4 + $0x70] ss:$8 sps:$4 sm:$0xff]   ;;  %v5399_v43 = vld [vmem:[#allocation2 + $0x84] ss:$8 sps:$4 sm:$0xff]  }
  0xad   : > { %583 = vmatpush1.bf16.msra.mxu0 %v5323_v44  ;;  %v5402_v44 = vld [vmem:[#allocation4 + $0x84] ss:$8 sps:$4 sm:$0xff]  }
  0xae   : > { %981 = vmatpush1.bf16.msra.mxu1 %v5324_v45  ;;  %584 = vmatprep.subr.bf16.mxu0 %v5325_v46  ;;  %v5397_v45 = vld [vmem:[#allocation2 + $0x80] ss:$8 sps:$4 sm:$0xff]  }
  0xaf   : > { %982 = vmatprep.subr.bf16.mxu1 %v5327_v47  ;;  %v5400_v46 = vld [vmem:[#allocation4 + $0x80] ss:$8 sps:$4 sm:$0xff]   ;;  %v5405_v47 = vld [vmem:[#allocation2 + $0x94] ss:$8 sps:$4 sm:$0xff]  }
  0xb1   : > { %585 = vmatpush1.bf16.msra.mxu0 %v5329_v48  ;;  %v5408_v48 = vld [vmem:[#allocation4 + $0x94] ss:$8 sps:$4 sm:$0xff]  }
  0xb2   : > { %983 = vmatpush1.bf16.msra.mxu1 %v5330_v49  ;;  %586 = vmatprep.subr.bf16.mxu0 %v5331_v50  ;;  %v5403_v49 = vld [vmem:[#allocation2 + $0x90] ss:$8 sps:$4 sm:$0xff]  }
  0xb3   : > { %984 = vmatprep.subr.bf16.mxu1 %v5333_v51  ;;  %v5406_v50 = vld [vmem:[#allocation4 + $0x90] ss:$8 sps:$4 sm:$0xff]   ;;  %v5411_v51 = vld [vmem:[#allocation2 + $0xa4] ss:$8 sps:$4 sm:$0xff]  }
  0xb5   : > { %587 = vmatpush1.bf16.msra.mxu0 %v5335_v52  ;;  %v5414_v52 = vld [vmem:[#allocation4 + $0xa4] ss:$8 sps:$4 sm:$0xff]  }
  0xb6   : > { %985 = vmatpush1.bf16.msra.mxu1 %v5336_v53  ;;  %588 = vmatprep.subr.bf16.mxu0 %v5337_v54  ;;  %v5409_v53 = vld [vmem:[#allocation2 + $0xa0] ss:$8 sps:$4 sm:$0xff]  }
  0xb7   : > { %986 = vmatprep.subr.bf16.mxu1 %v5339_v55  ;;  %v5412_v54 = vld [vmem:[#allocation4 + $0xa0] ss:$8 sps:$4 sm:$0xff]   ;;  %v5417_v55 = vld [vmem:[#allocation2 + $0xb4] ss:$8 sps:$4 sm:$0xff]  }
  0xb9   : > { %589 = vmatpush1.bf16.msra.mxu0 %v5341_v56  ;;  %v5420_v56 = vld [vmem:[#allocation4 + $0xb4] ss:$8 sps:$4 sm:$0xff]  }
  0xba   : > { %987 = vmatpush1.bf16.msra.mxu1 %v5342_v57  ;;  %590 = vmatprep.subr.bf16.mxu0 %v5343_v58  ;;  %v5415_v57 = vld [vmem:[#allocation2 + $0xb0] ss:$8 sps:$4 sm:$0xff]  }
  0xbb   : > { %988 = vmatprep.subr.bf16.mxu1 %v5345_v59  ;;  %v5418_v58 = vld [vmem:[#allocation4 + $0xb0] ss:$8 sps:$4 sm:$0xff]   ;;  %v5423_v59 = vld [vmem:[#allocation2 + $0xc4] ss:$8 sps:$4 sm:$0xff]  }
  0xbd   : > { %591 = vmatpush1.bf16.msra.mxu0 %v5347_v60  ;;  %v5426_v60 = vld [vmem:[#allocation4 + $0xc4] ss:$8 sps:$4 sm:$0xff]  }
  0xbe   : > { %989 = vmatpush1.bf16.msra.mxu1 %v5348_v61  ;;  %750 = vmatprep.subr.bf16.mxu0 %v5351_v62  ;;  %v5421_v61 = vld [vmem:[#allocation2 + $0xc0] ss:$8 sps:$4 sm:$0xff]  }
  0xbf   : > { %1145 = vmatprep.subr.bf16.mxu1 %v5354_v63  ;;  %v5424_v62 = vld [vmem:[#allocation4 + $0xc0] ss:$8 sps:$4 sm:$0xff]   ;;  %v5429_v63 = vld [vmem:[#allocation2 + $0xd4] ss:$8 sps:$4 sm:$0xff]  }
 0x101   : > { %v414_v10 = vpop.permute.xlu0 %413  ;;  %v6433_v7 = vpop.permute.xlu1 %1217 }
 0x105   : > { %v416_v14 = vpop.permute.xlu0 %415 }
 0x106   : > { %4620 = vmatprep.mubr.msk.bf16.mxu0 %vm560_vm0, %v416_v14  ;;  %4678 = vmatprep.mubr.msk.bf16.mxu1 %vm560_vm0, %v416_v14  ;;  %v418_v16 = vsel %vm417_vm1, %v414_v10, %v416_v14  ;;  %v5433_v10 = vld [vmem:[#allocation2 + $0x1c0] ss:$8 sps:$4 sm:$0xff]   ;;  %v5439_v14 = vld [vmem:[#allocation2 + $0x1d0] ss:$8 sps:$4 sm:$0xff]  }
 0x107   : > { %597 = vmatmul.mubr.bf16.vlgmr.msra.gmra.mrb[0].mxu0 %v418_v16  ;;  %995 = vmatmul.mubr.bf16.vlgmr.msra.gmra.mrb[0].mxu1 %v418_v16  ;;  %v5447_v16 = vld [vmem:[#allocation2 + $0x1e4] ss:$8 sps:$4 sm:$0xff]  }
 0x108   : > { %751 = vmatpush1.bf16.msra.mxu0 %v5349_v11  ;;  %1146 = vmatpush1.bf16.msra.mxu1 %v5352_v12  ;;  %v5436_v11 = vld [vmem:[#allocation4 + $0x1c0] ss:$8 sps:$4 sm:$0xff]   ;;  %v5441_v12 = vld [vmem:[#allocation2 + $0x1d4] ss:$8 sps:$4 sm:$0xff]  }
 0x109   : > { %752 = vmatprep.subr.bf16.mxu0 %v5357_v13  ;;  %1147 = vmatprep.subr.bf16.mxu1 %v5360_v15  ;;  %v5444_v13 = vld [vmem:[#allocation4 + $0x1d4] ss:$8 sps:$4 sm:$0xff]   ;;  %v5442_v15 = vld [vmem:[#allocation4 + $0x1d0] ss:$8 sps:$4 sm:$0xff]  }
 0x10a   : > { %4649 = vmatprep.mubr.msk.bf16.mxu0 %vm560_vm0, %v6402_v6  ;;  %4707 = vmatprep.mubr.msk.bf16.mxu1 %vm560_vm0, %v6402_v6 }
 0x10c   : > { %753 = vmatpush1.bf16.msra.mxu0 %v5355_v17  ;;  %1148 = vmatpush1.bf16.msra.mxu1 %v5358_v18  ;;  %v5450_v17 = vld [vmem:[#allocation4 + $0x1e4] ss:$8 sps:$4 sm:$0xff]   ;;  %v6437_v18 = vpop.permute.xlu1 %1219 }
 0x10d   : > { %754 = vmatprep.subr.bf16.mxu0 %v5363_v19  ;;  %1149 = vmatprep.subr.bf16.mxu1 %v5366_v20  ;;  %v5445_v19 = vld [vmem:[#allocation2 + $0x1e0] ss:$8 sps:$4 sm:$0xff]  }
 0x10e   : > { %v5448_v20 = vld [vmem:[#allocation4 + $0x1e0] ss:$8 sps:$4 sm:$0xff]  }
 0x110   : > { %755 = vmatpush1.bf16.msra.mxu0 %v5361_v21  ;;  %1150 = vmatpush1.bf16.msra.mxu1 %v5364_v22  ;;  %v5453_v21 = vld [vmem:[#allocation2 + $0x1f4] ss:$8 sps:$4 sm:$0xff]  }
 0x111   : > { %756 = vmatprep.subr.bf16.mxu0 %v5369_v23  ;;  %1151 = vmatprep.subr.bf16.mxu1 %v5372_v24  ;;  %v5456_v22 = vld [vmem:[#allocation4 + $0x1f4] ss:$8 sps:$4 sm:$0xff]   ;;  %v5451_v23 = vld [vmem:[#allocation2 + $0x1f0] ss:$8 sps:$4 sm:$0xff]  }
 0x112   : > { %v5454_v24 = vld [vmem:[#allocation4 + $0x1f0] ss:$8 sps:$4 sm:$0xff]  }
 0x114   : > { %757 = vmatpush1.bf16.msra.mxu0 %v5367_v25  ;;  %1152 = vmatpush1.bf16.msra.mxu1 %v5370_v26  ;;  %v5459_v25 = vld [vmem:[#allocation2 + $0x204] ss:$8 sps:$4 sm:$0xff]  }
 0x115   : > { %758 = vmatprep.subr.bf16.mxu0 %v5375_v27  ;;  %1153 = vmatprep.subr.bf16.mxu1 %v5378_v28  ;;  %v5462_v26 = vld [vmem:[#allocation4 + $0x204] ss:$8 sps:$4 sm:$0xff]   ;;  %v5457_v27 = vld [vmem:[#allocation2 + $0x200] ss:$8 sps:$4 sm:$0xff]  }
 0x116   : > { %v5460_v28 = vld [vmem:[#allocation4 + $0x200] ss:$8 sps:$4 sm:$0xff]  }
 0x118   : > { %759 = vmatpush1.bf16.msra.mxu0 %v5373_v29  ;;  %1154 = vmatpush1.bf16.msra.mxu1 %v5376_v30  ;;  %v5465_v29 = vld [vmem:[#allocation2 + $0x214] ss:$8 sps:$4 sm:$0xff]  }
 0x119   : > { %760 = vmatprep.subr.bf16.mxu0 %v5381_v31  ;;  %1155 = vmatprep.subr.bf16.mxu1 %v5384_v32  ;;  %v5468_v30 = vld [vmem:[#allocation4 + $0x214] ss:$8 sps:$4 sm:$0xff]   ;;  %v5463_v31 = vld [vmem:[#allocation2 + $0x210] ss:$8 sps:$4 sm:$0xff]  }
 0x11a   : > { %v5466_v32 = vld [vmem:[#allocation4 + $0x210] ss:$8 sps:$4 sm:$0xff]  }
 0x11c   : > { %761 = vmatpush1.bf16.msra.mxu0 %v5379_v33  ;;  %1156 = vmatpush1.bf16.msra.mxu1 %v5382_v34  ;;  %v5471_v33 = vld [vmem:[#allocation2 + $0x224] ss:$8 sps:$4 sm:$0xff]  }
 0x11d   : > { %762 = vmatprep.subr.bf16.mxu0 %v5387_v35  ;;  %1157 = vmatprep.subr.bf16.mxu1 %v5390_v36  ;;  %v5474_v34 = vld [vmem:[#allocation4 + $0x224] ss:$8 sps:$4 sm:$0xff]   ;;  %v5469_v35 = vld [vmem:[#allocation2 + $0x220] ss:$8 sps:$4 sm:$0xff]  }
 0x11e   : > { %v5472_v36 = vld [vmem:[#allocation4 + $0x220] ss:$8 sps:$4 sm:$0xff]  }
 0x120   : > { %763 = vmatpush1.bf16.msra.mxu0 %v5385_v37  ;;  %1158 = vmatpush1.bf16.msra.mxu1 %v5388_v38  ;;  %v5477_v37 = vld [vmem:[#allocation2 + $0x234] ss:$8 sps:$4 sm:$0xff]  }
 0x121   : > { %764 = vmatprep.subr.bf16.mxu0 %v5393_v39  ;;  %1159 = vmatprep.subr.bf16.mxu1 %v5396_v40  ;;  %v5480_v38 = vld [vmem:[#allocation4 + $0x234] ss:$8 sps:$4 sm:$0xff]   ;;  %v5475_v39 = vld [vmem:[#allocation2 + $0x230] ss:$8 sps:$4 sm:$0xff]  }
 0x122   : > { %v5478_v40 = vld [vmem:[#allocation4 + $0x230] ss:$8 sps:$4 sm:$0xff]  }
 0x124   : > { %765 = vmatpush1.bf16.msra.mxu0 %v5391_v41  ;;  %1160 = vmatpush1.bf16.msra.mxu1 %v5394_v42  ;;  %v5483_v41 = vld [vmem:[#allocation2 + $0x244] ss:$8 sps:$4 sm:$0xff]  }
 0x125   : > { %766 = vmatprep.subr.bf16.mxu0 %v5399_v43  ;;  %1161 = vmatprep.subr.bf16.mxu1 %v5402_v44  ;;  %v5486_v42 = vld [vmem:[#allocation4 + $0x244] ss:$8 sps:$4 sm:$0xff]   ;;  %v5481_v43 = vld [vmem:[#allocation2 + $0x240] ss:$8 sps:$4 sm:$0xff]  }
 0x126   : > { %v5484_v44 = vld [vmem:[#allocation4 + $0x240] ss:$8 sps:$4 sm:$0xff]  }
 0x128   : > { %767 = vmatpush1.bf16.msra.mxu0 %v5397_v45  ;;  %1162 = vmatpush1.bf16.msra.mxu1 %v5400_v46  ;;  %v5489_v45 = vld [vmem:[#allocation2 + $0x254] ss:$8 sps:$4 sm:$0xff]  }
 0x129   : > { %768 = vmatprep.subr.bf16.mxu0 %v5405_v47  ;;  %1163 = vmatprep.subr.bf16.mxu1 %v5408_v48  ;;  %v5492_v46 = vld [vmem:[#allocation4 + $0x254] ss:$8 sps:$4 sm:$0xff]   ;;  %v5487_v47 = vld [vmem:[#allocation2 + $0x250] ss:$8 sps:$4 sm:$0xff]  }
 0x12a   : > { %v5490_v48 = vld [vmem:[#allocation4 + $0x250] ss:$8 sps:$4 sm:$0xff]  }
 0x12c   : > { %769 = vmatpush1.bf16.msra.mxu0 %v5403_v49  ;;  %1164 = vmatpush1.bf16.msra.mxu1 %v5406_v50  ;;  %v5495_v49 = vld [vmem:[#allocation2 + $0x264] ss:$8 sps:$4 sm:$0xff]  }
 0x12d   : > { %770 = vmatprep.subr.bf16.mxu0 %v5411_v51  ;;  %1165 = vmatprep.subr.bf16.mxu1 %v5414_v52  ;;  %v5498_v50 = vld [vmem:[#allocation4 + $0x264] ss:$8 sps:$4 sm:$0xff]   ;;  %v5493_v51 = vld [vmem:[#allocation2 + $0x260] ss:$8 sps:$4 sm:$0xff]  }
 0x12e   : > { %v5496_v52 = vld [vmem:[#allocation4 + $0x260] ss:$8 sps:$4 sm:$0xff]  }
 0x130   : > { %771 = vmatpush1.bf16.msra.mxu0 %v5409_v53  ;;  %1166 = vmatpush1.bf16.msra.mxu1 %v5412_v54  ;;  %v5501_v53 = vld [vmem:[#allocation2 + $0x274] ss:$8 sps:$4 sm:$0xff]  }
 0x131   : > { %772 = vmatprep.subr.bf16.mxu0 %v5417_v55  ;;  %1167 = vmatprep.subr.bf16.mxu1 %v5420_v56  ;;  %v5504_v54 = vld [vmem:[#allocation4 + $0x274] ss:$8 sps:$4 sm:$0xff]   ;;  %v5499_v55 = vld [vmem:[#allocation2 + $0x270] ss:$8 sps:$4 sm:$0xff]  }
 0x132   : > { %v5502_v56 = vld [vmem:[#allocation4 + $0x270] ss:$8 sps:$4 sm:$0xff]  }
 0x134   : > { %773 = vmatpush1.bf16.msra.mxu0 %v5415_v57  ;;  %1168 = vmatpush1.bf16.msra.mxu1 %v5418_v58  ;;  %v5507_v57 = vld [vmem:[#allocation2 + $0x284] ss:$8 sps:$4 sm:$0xff]  }
 0x135   : > { %774 = vmatprep.subr.bf16.mxu0 %v5423_v59  ;;  %1169 = vmatprep.subr.bf16.mxu1 %v5426_v60  ;;  %v5510_v58 = vld [vmem:[#allocation4 + $0x284] ss:$8 sps:$4 sm:$0xff]   ;;  %v5505_v59 = vld [vmem:[#allocation2 + $0x280] ss:$8 sps:$4 sm:$0xff]  }
 0x136   : > { %v5508_v60 = vld [vmem:[#allocation4 + $0x280] ss:$8 sps:$4 sm:$0xff]  }
 0x138   : > { %775 = vmatpush1.bf16.msra.mxu0 %v5421_v61  ;;  %1170 = vmatpush1.bf16.msra.mxu1 %v5424_v62  ;;  %v5513_v61 = vld [vmem:[#allocation2 + $0x294] ss:$8 sps:$4 sm:$0xff]  }
 0x139   : > { %776 = vmatprep.subr.bf16.mxu0 %v5429_v63  ;;  %1171 = vmatprep.subr.bf16.mxu1 %v5432_v0  ;;  %v5516_v62 = vld [vmem:[#allocation4 + $0x294] ss:$8 sps:$4 sm:$0xff]   ;;  %v5511_v63 = vld [vmem:[#allocation2 + $0x290] ss:$8 sps:$4 sm:$0xff]  }
 0x13a   : > { %v5514_v0 = vld [vmem:[#allocation4 + $0x290] ss:$8 sps:$4 sm:$0xff]  }
 0x13c   : > { %777 = vmatpush1.bf16.msra.mxu0 %v5427_v1  ;;  %1172 = vmatpush1.bf16.msra.mxu1 %v5430_v2  ;;  %v5519_v1 = vld [vmem:[#allocation2 + $0x2a4] ss:$8 sps:$4 sm:$0xff]  }
 0x13d   : > { %1367 = vmatprep.subr.bf16.mxu0 %v5435_v4  ;;  %1583 = vmatprep.subr.bf16.mxu1 %v5438_v5  ;;  %v5522_v2 = vld [vmem:[#allocation4 + $0x2a4] ss:$8 sps:$4 sm:$0xff]   ;;  %v5517_v4 = vld [vmem:[#allocation2 + $0x2a0] ss:$8 sps:$4 sm:$0xff]  }
 0x13e   : > { %v5520_v5 = vld [vmem:[#allocation4 + $0x2a0] ss:$8 sps:$4 sm:$0xff]  }
 0x13f   : > { %783 = vmatmul.mubr.bf16.vlgmr.msra.gmra.mrb[0].mxu0 %v6398_v3  ;;  %1178 = vmatmul.mubr.bf16.vlgmr.msra.gmra.mrb[0].mxu1 %v6398_v3 }
 0x140   : > { %1368 = vmatpush1.bf16.msra.mxu0 %v5433_v10  ;;  %1584 = vmatpush1.bf16.msra.mxu1 %v5436_v11  ;;  %v5525_v10 = vld [vmem:[#allocation2 + $0x2b4] ss:$8 sps:$4 sm:$0xff]  }
 0x141   : > { %1369 = vmatprep.subr.bf16.mxu0 %v5441_v12  ;;  %1585 = vmatprep.subr.bf16.mxu1 %v5444_v13  ;;  %v5528_v11 = vld [vmem:[#allocation4 + $0x2b4] ss:$8 sps:$4 sm:$0xff]   ;;  %v1222_v12 = vsel %vm560_vm0, %v6433_v7, %v6437_v18  ;;  %v5523_v13 = vld [vmem:[#allocation2 + $0x2b0] ss:$8 sps:$4 sm:$0xff]   ;;  %v5532_v7 = vld [vmem:[#allocation4 + $0x2c0] ss:$8 sps:$4 sm:$0xff]  }
 0x142   : > { %4736 = vmatprep.mubr.msk.bf16.mxu0 %vm560_vm0, %v6437_v18  ;;  %4765 = vmatprep.mubr.msk.bf16.mxu1 %vm560_vm0, %v6437_v18  ;;  %v5537_v18 = vld [vmem:[#allocation2 + $0x2d4] ss:$8 sps:$4 sm:$0xff]  }
 0x144   : > { %1370 = vmatpush1.bf16.msra.mxu0 %v5439_v14  ;;  %1586 = vmatpush1.bf16.msra.mxu1 %v5442_v15  ;;  %v5526_v14 = vld [vmem:[#allocation4 + $0x2b0] ss:$8 sps:$4 sm:$0xff]   ;;  %v5531_v15 = vld [vmem:[#allocation2 + $0x2c4] ss:$8 sps:$4 sm:$0xff]  }
 0x145   : > { %1371 = vmatprep.subr.bf16.mxu0 %v5447_v16  ;;  %1587 = vmatprep.subr.bf16.mxu1 %v5450_v17  ;;  %v5534_v16 = vld [vmem:[#allocation4 + $0x2c4] ss:$8 sps:$4 sm:$0xff]   ;;  %v5529_v17 = vld [vmem:[#allocation2 + $0x2c0] ss:$8 sps:$4 sm:$0xff]  }
 0x148   : > { %1372 = vmatpush1.bf16.msra.mxu0 %v5445_v19  ;;  %1588 = vmatpush1.bf16.msra.mxu1 %v5448_v20  ;;  %v5540_v19 = vld [vmem:[#allocation4 + $0x2d4] ss:$8 sps:$4 sm:$0xff]   ;;  %v5535_v20 = vld [vmem:[#allocation2 + $0x2d0] ss:$8 sps:$4 sm:$0xff]  }
 0x149   : > { %1373 = vmatprep.subr.bf16.mxu0 %v5453_v21  ;;  %1589 = vmatprep.subr.bf16.mxu1 %v5456_v22  ;;  %v5538_v21 = vld [vmem:[#allocation4 + $0x2d0] ss:$8 sps:$4 sm:$0xff]   ;;  %v5543_v22 = vld [vmem:[#allocation2 + $0x2e4] ss:$8 sps:$4 sm:$0xff]  }
 0x14c   : > { %1374 = vmatpush1.bf16.msra.mxu0 %v5451_v23  ;;  %1590 = vmatpush1.bf16.msra.mxu1 %v5454_v24  ;;  %v5546_v23 = vld [vmem:[#allocation4 + $0x2e4] ss:$8 sps:$4 sm:$0xff]   ;;  %v5541_v24 = vld [vmem:[#allocation2 + $0x2e0] ss:$8 sps:$4 sm:$0xff]  }
 0x14d   : > { %1375 = vmatprep.subr.bf16.mxu0 %v5459_v25  ;;  %1591 = vmatprep.subr.bf16.mxu1 %v5462_v26  ;;  %v5549_v25 = vld [vmem:[#allocation2 + $0x2f4] ss:$8 sps:$4 sm:$0xff]  }
 0x14e   : > { %v5552_v26 = vld [vmem:[#allocation4 + $0x2f4] ss:$8 sps:$4 sm:$0xff]  }
 0x150   : > { %1376 = vmatpush1.bf16.msra.mxu0 %v5457_v27  ;;  %1592 = vmatpush1.bf16.msra.mxu1 %v5460_v28  ;;  %v5547_v27 = vld [vmem:[#allocation2 + $0x2f0] ss:$8 sps:$4 sm:$0xff]  }
 0x151   : > { %1377 = vmatprep.subr.bf16.mxu0 %v5465_v29  ;;  %1593 = vmatprep.subr.bf16.mxu1 %v5468_v30  ;;  %v5550_v28 = vld [vmem:[#allocation4 + $0x2f0] ss:$8 sps:$4 sm:$0xff]   ;;  %v5555_v29 = vld [vmem:[#allocation2 + $0x304] ss:$8 sps:$4 sm:$0xff]  }
 0x152   : > { %v5558_v30 = vld [vmem:[#allocation4 + $0x304] ss:$8 sps:$4 sm:$0xff]  }
 0x154   : > { %1378 = vmatpush1.bf16.msra.mxu0 %v5463_v31  ;;  %1594 = vmatpush1.bf16.msra.mxu1 %v5466_v32  ;;  %v5553_v31 = vld [vmem:[#allocation2 + $0x300] ss:$8 sps:$4 sm:$0xff]  }
 0x155   : > { %1379 = vmatprep.subr.bf16.mxu0 %v5471_v33  ;;  %1595 = vmatprep.subr.bf16.mxu1 %v5474_v34  ;;  %v5556_v32 = vld [vmem:[#allocation4 + $0x300] ss:$8 sps:$4 sm:$0xff]   ;;  %v5561_v33 = vld [vmem:[#allocation2 + $0x314] ss:$8 sps:$4 sm:$0xff]  }
 0x156   : > { %v5564_v34 = vld [vmem:[#allocation4 + $0x314] ss:$8 sps:$4 sm:$0xff]  }
 0x158   : > { %1380 = vmatpush1.bf16.msra.mxu0 %v5469_v35  ;;  %1596 = vmatpush1.bf16.msra.mxu1 %v5472_v36  ;;  %v5559_v35 = vld [vmem:[#allocation2 + $0x310] ss:$8 sps:$4 sm:$0xff]  }
 0x159   : > { %1381 = vmatprep.subr.bf16.mxu0 %v5477_v37  ;;  %1597 = vmatprep.subr.bf16.mxu1 %v5480_v38  ;;  %v5562_v36 = vld [vmem:[#allocation4 + $0x310] ss:$8 sps:$4 sm:$0xff]   ;;  %v5567_v37 = vld [vmem:[#allocation2 + $0x324] ss:$8 sps:$4 sm:$0xff]  }
 0x15a   : > { %v5570_v38 = vld [vmem:[#allocation4 + $0x324] ss:$8 sps:$4 sm:$0xff]  }
 0x15c   : > { %1382 = vmatpush1.bf16.msra.mxu0 %v5475_v39  ;;  %1598 = vmatpush1.bf16.msra.mxu1 %v5478_v40  ;;  %v5565_v39 = vld [vmem:[#allocation2 + $0x320] ss:$8 sps:$4 sm:$0xff]  }
 0x15d   : > { %1383 = vmatprep.subr.bf16.mxu0 %v5483_v41  ;;  %1599 = vmatprep.subr.bf16.mxu1 %v5486_v42  ;;  %v5568_v40 = vld [vmem:[#allocation4 + $0x320] ss:$8 sps:$4 sm:$0xff]   ;;  %v5573_v41 = vld [vmem:[#allocation2 + $0x334] ss:$8 sps:$4 sm:$0xff]  }
 0x15e   : > { %v5576_v42 = vld [vmem:[#allocation4 + $0x334] ss:$8 sps:$4 sm:$0xff]  }
 0x160   : > { %1384 = vmatpush1.bf16.msra.mxu0 %v5481_v43  ;;  %1600 = vmatpush1.bf16.msra.mxu1 %v5484_v44  ;;  %v5571_v43 = vld [vmem:[#allocation2 + $0x330] ss:$8 sps:$4 sm:$0xff]  }
 0x161   : > { %1385 = vmatprep.subr.bf16.mxu0 %v5489_v45  ;;  %1601 = vmatprep.subr.bf16.mxu1 %v5492_v46  ;;  %v5574_v44 = vld [vmem:[#allocation4 + $0x330] ss:$8 sps:$4 sm:$0xff]   ;;  %v5579_v45 = vld [vmem:[#allocation2 + $0x344] ss:$8 sps:$4 sm:$0xff]  }
 0x162   : > { %v5582_v46 = vld [vmem:[#allocation4 + $0x344] ss:$8 sps:$4 sm:$0xff]  }
 0x164   : > { %1386 = vmatpush1.bf16.msra.mxu0 %v5487_v47  ;;  %1602 = vmatpush1.bf16.msra.mxu1 %v5490_v48  ;;  %v6451_v47 = vrot.slane %v6402_v6, 1  ;;  %v6454_v48 = vrot.slane %v6398_v3, 1  ;;  %v5583_v3 = vld [vmem:[#allocation2 + $0x350] ss:$8 sps:$4 sm:$0xff]  }
 0x165   : > { %1387 = vmatprep.subr.bf16.mxu0 %v5495_v49  ;;  %1603 = vmatprep.subr.bf16.mxu1 %v5498_v50  ;;  %v5577_v49 = vld [vmem:[#allocation2 + $0x340] ss:$8 sps:$4 sm:$0xff]   ;;  %v5586_v6 = vld [vmem:[#allocation4 + $0x350] ss:$8 sps:$4 sm:$0xff]  }
 0x166   : > { %3430 = vrot.lane.b32.xlu1 %v6451_v47, %s6188_s15  ;;  %3428 = vrot.lane.b32.xlu0 %v6454_v48, %s6188_s15  ;;  %v5580_v50 = vld [vmem:[#allocation4 + $0x340] ss:$8 sps:$4 sm:$0xff]  }
 0x168   : > { %1388 = vmatpush1.bf16.msra.mxu0 %v5493_v51  ;;  %1604 = vmatpush1.bf16.msra.mxu1 %v5496_v52  ;;  %v5585_v51 = vld [vmem:[#allocation2 + $0x354] ss:$8 sps:$4 sm:$0xff]  }
 0x169   : > { %1389 = vmatprep.subr.bf16.mxu0 %v5501_v53  ;;  %1605 = vmatprep.subr.bf16.mxu1 %v5504_v54  ;;  %v5588_v52 = vld [vmem:[#allocation4 + $0x354] ss:$8 sps:$4 sm:$0xff]   ;;  %v5591_v53 = vld [vmem:[#allocation2 + $0x364] ss:$8 sps:$4 sm:$0xff]  }
 0x16a   : > { %3871 = vrot.lane.b32.xlu1 %v6451_v47, %s6189_s16  ;;  %3869 = vrot.lane.b32.xlu0 %v6454_v48, %s6189_s16  ;;  %v5594_v54 = vld [vmem:[#allocation4 + $0x364] ss:$8 sps:$4 sm:$0xff]  }
 0x16c   : > { %1390 = vmatpush1.bf16.msra.mxu0 %v5499_v55  ;;  %1606 = vmatpush1.bf16.msra.mxu1 %v5502_v56  ;;  %v5589_v55 = vld [vmem:[#allocation2 + $0x360] ss:$8 sps:$4 sm:$0xff]  }
 0x16d   : > { %1391 = vmatprep.subr.bf16.mxu0 %v5507_v57  ;;  %1607 = vmatprep.subr.bf16.mxu1 %v5510_v58  ;;  %v5592_v56 = vld [vmem:[#allocation4 + $0x360] ss:$8 sps:$4 sm:$0xff]   ;;  %v5597_v57 = vld [vmem:[#allocation2 + $0x374] ss:$8 sps:$4 sm:$0xff]  }
 0x16e   : > { %v5600_v58 = vld [vmem:[#allocation4 + $0x374] ss:$8 sps:$4 sm:$0xff]  }
 0x170   : > { %1392 = vmatpush1.bf16.msra.mxu0 %v5505_v59  ;;  %1608 = vmatpush1.bf16.msra.mxu1 %v5508_v60  ;;  %v5595_v59 = vld [vmem:[#allocation2 + $0x370] ss:$8 sps:$4 sm:$0xff]  }
 0x171   : > { %1393 = vmatprep.subr.bf16.mxu0 %v5513_v61  ;;  %1609 = vmatprep.subr.bf16.mxu1 %v5516_v62  ;;  %v5598_v60 = vld [vmem:[#allocation4 + $0x370] ss:$8 sps:$4 sm:$0xff]   ;;  %v5603_v61 = vld [vmem:[#allocation2 + $0x384] ss:$8 sps:$4 sm:$0xff]  }
 0x172   : > { %v5606_v62 = vld [vmem:[#allocation4 + $0x384] ss:$8 sps:$4 sm:$0xff]  }
 0x174   : > { %1394 = vmatpush1.bf16.msra.mxu0 %v5511_v63  ;;  %1610 = vmatpush1.bf16.msra.mxu1 %v5514_v0  ;;  %v5601_v63 = vld [vmem:[#allocation2 + $0x380] ss:$8 sps:$4 sm:$0xff]  }
 0x175   : > { %1816 = vmatprep.subr.bf16.mxu0 %v5519_v1  ;;  %2032 = vmatprep.subr.bf16.mxu1 %v5522_v2  ;;  %v5604_v0 = vld [vmem:[#allocation4 + $0x380] ss:$8 sps:$4 sm:$0xff]   ;;  %v5609_v1 = vld [vmem:[#allocation2 + $0x394] ss:$8 sps:$4 sm:$0xff]  }
 0x176   : > { %v5612_v2 = vld [vmem:[#allocation4 + $0x394] ss:$8 sps:$4 sm:$0xff]  }
 0x177   : > { %1400 = vmatmul.mubr.bf16.vlgmr.msra.gmra.mrb[0].mxu0 %v1222_v12  ;;  %1616 = vmatmul.mubr.bf16.vlgmr.msra.gmra.mrb[0].mxu1 %v1222_v12  ;;  %v5618_v12 = vld [vmem:[#allocation4 + $0x3a4] ss:$8 sps:$4 sm:$0xff]  }
 0x178   : > { %1817 = vmatpush1.bf16.msra.mxu0 %v5517_v4  ;;  %2033 = vmatpush1.bf16.msra.mxu1 %v5520_v5  ;;  %v6466_v4 = vpop.permute.xlu1 %2110  ;;  %v5607_v5 = vld [vmem:[#allocation2 + $0x390] ss:$8 sps:$4 sm:$0xff]  }
 0x179   : > { %1818 = vmatprep.subr.bf16.mxu0 %v5525_v10  ;;  %2034 = vmatprep.subr.bf16.mxu1 %v5528_v11  ;;  %v5610_v10 = vld [vmem:[#allocation4 + $0x390] ss:$8 sps:$4 sm:$0xff]   ;;  %v5615_v11 = vld [vmem:[#allocation2 + $0x3a4] ss:$8 sps:$4 sm:$0xff]  }
 0x17a   : > { %4794 = vmatprep.mubr.msk.bf16.mxu0 %vm560_vm0, %v6414_v8  ;;  %4823 = vmatprep.mubr.msk.bf16.mxu1 %vm560_vm0, %v6414_v8  ;;  %v5544_v8 = vld [vmem:[#allocation4 + $0x2e0] ss:$8 sps:$4 sm:$0xff]  }
 0x17c   : > { %1819 = vmatpush1.bf16.msra.mxu0 %v5523_v13  ;;  %2035 = vmatpush1.bf16.msra.mxu1 %v5526_v14  ;;  %v5613_v13 = vld [vmem:[#allocation2 + $0x3a0] ss:$8 sps:$4 sm:$0xff]   ;;  %v5621_v14 = vld [vmem:[#allocation2 + $0x3b4] ss:$8 sps:$4 sm:$0xff]  }
 0x17d   : > { %1820 = vmatprep.subr.bf16.mxu0 %v5531_v15  ;;  %2036 = vmatprep.subr.bf16.mxu1 %v5534_v16  ;;  %v5624_v15 = vld [vmem:[#allocation4 + $0x3b4] ss:$8 sps:$4 sm:$0xff]   ;;  %v5619_v16 = vld [vmem:[#allocation2 + $0x3b0] ss:$8 sps:$4 sm:$0xff]  }
 0x180   : > { %1821 = vmatpush1.bf16.msra.mxu0 %v5529_v17  ;;  %2037 = vmatpush1.bf16.msra.mxu1 %v5532_v7  ;;  %v5622_v17 = vld [vmem:[#allocation4 + $0x3b0] ss:$8 sps:$4 sm:$0xff]   ;;  %v5627_v7 = vld [vmem:[#allocation2 + $0x3c4] ss:$8 sps:$4 sm:$0xff]  }
 0x181   : > { %1822 = vmatprep.subr.bf16.mxu0 %v5537_v18  ;;  %2038 = vmatprep.subr.bf16.mxu1 %v5540_v19  ;;  %v5630_v18 = vld [vmem:[#allocation4 + $0x3c4] ss:$8 sps:$4 sm:$0xff]   ;;  %v5625_v19 = vld [vmem:[#allocation2 + $0x3c0] ss:$8 sps:$4 sm:$0xff]  }
 0x184   : > { %1823 = vmatpush1.bf16.msra.mxu0 %v5535_v20  ;;  %2039 = vmatpush1.bf16.msra.mxu1 %v5538_v21  ;;  %v5628_v20 = vld [vmem:[#allocation4 + $0x3c0] ss:$8 sps:$4 sm:$0xff]   ;;  %v5633_v21 = vld [vmem:[#allocation2 + $0x3d4] ss:$8 sps:$4 sm:$0xff]  }
 0x185   : > { %1824 = vmatprep.subr.bf16.mxu0 %v5543_v22  ;;  %2040 = vmatprep.subr.bf16.mxu1 %v5546_v23  ;;  %v5636_v22 = vld [vmem:[#allocation4 + $0x3d4] ss:$8 sps:$4 sm:$0xff]   ;;  %v5631_v23 = vld [vmem:[#allocation2 + $0x3d0] ss:$8 sps:$4 sm:$0xff]  }
 0x188   : > { %1825 = vmatpush1.bf16.msra.mxu0 %v5541_v24  ;;  %2041 = vmatpush1.bf16.msra.mxu1 %v5544_v8  ;;  %v5634_v24 = vld [vmem:[#allocation4 + $0x3d0] ss:$8 sps:$4 sm:$0xff]   ;;  %v5639_v8 = vld [vmem:[#allocation2 + $0x3e4] ss:$8 sps:$4 sm:$0xff]  }
 0x189   : > { %1826 = vmatprep.subr.bf16.mxu0 %v5549_v25  ;;  %2042 = vmatprep.subr.bf16.mxu1 %v5552_v26  ;;  %v5642_v25 = vld [vmem:[#allocation4 + $0x3e4] ss:$8 sps:$4 sm:$0xff]   ;;  %v5637_v26 = vld [vmem:[#allocation2 + $0x3e0] ss:$8 sps:$4 sm:$0xff]  }
 0x18c   : > { %1827 = vmatpush1.bf16.msra.mxu0 %v5547_v27  ;;  %2043 = vmatpush1.bf16.msra.mxu1 %v5550_v28  ;;  %v5640_v27 = vld [vmem:[#allocation4 + $0x3e0] ss:$8 sps:$4 sm:$0xff]   ;;  %v5645_v28 = vld [vmem:[#allocation2 + $0x3f4] ss:$8 sps:$4 sm:$0xff]  }
 0x18d   : > { %1828 = vmatprep.subr.bf16.mxu0 %v5555_v29  ;;  %2044 = vmatprep.subr.bf16.mxu1 %v5558_v30  ;;  %v5648_v29 = vld [vmem:[#allocation4 + $0x3f4] ss:$8 sps:$4 sm:$0xff]   ;;  %v5643_v30 = vld [vmem:[#allocation2 + $0x3f0] ss:$8 sps:$4 sm:$0xff]  }
 0x190   : > { %1829 = vmatpush1.bf16.msra.mxu0 %v5553_v31  ;;  %2045 = vmatpush1.bf16.msra.mxu1 %v5556_v32  ;;  %v5646_v31 = vld [vmem:[#allocation4 + $0x3f0] ss:$8 sps:$4 sm:$0xff]   ;;  %v5651_v32 = vld [vmem:[#allocation2 + $0x404] ss:$8 sps:$4 sm:$0xff]  }
 0x191   : > { %1830 = vmatprep.subr.bf16.mxu0 %v5561_v33  ;;  %2046 = vmatprep.subr.bf16.mxu1 %v5564_v34  ;;  %v5654_v33 = vld [vmem:[#allocation4 + $0x404] ss:$8 sps:$4 sm:$0xff]   ;;  %v5649_v34 = vld [vmem:[#allocation2 + $0x400] ss:$8 sps:$4 sm:$0xff]  }
 0x194   : > { %1831 = vmatpush1.bf16.msra.mxu0 %v5559_v35  ;;  %2047 = vmatpush1.bf16.msra.mxu1 %v5562_v36  ;;  %v5652_v35 = vld [vmem:[#allocation4 + $0x400] ss:$8 sps:$4 sm:$0xff]   ;;  %v5657_v36 = vld [vmem:[#allocation2 + $0x414] ss:$8 sps:$4 sm:$0xff]  }
 0x195   : > { %1832 = vmatprep.subr.bf16.mxu0 %v5567_v37  ;;  %2048 = vmatprep.subr.bf16.mxu1 %v5570_v38  ;;  %v5660_v37 = vld [vmem:[#allocation4 + $0x414] ss:$8 sps:$4 sm:$0xff]   ;;  %v5655_v38 = vld [vmem:[#allocation2 + $0x410] ss:$8 sps:$4 sm:$0xff]  }
 0x198   : > { %1833 = vmatpush1.bf16.msra.mxu0 %v5565_v39  ;;  %2049 = vmatpush1.bf16.msra.mxu1 %v5568_v40  ;;  %v5658_v39 = vld [vmem:[#allocation4 + $0x410] ss:$8 sps:$4 sm:$0xff]   ;;  %v5663_v40 = vld [vmem:[#allocation2 + $0x424] ss:$8 sps:$4 sm:$0xff]  }
 0x199   : > { %1834 = vmatprep.subr.bf16.mxu0 %v5573_v41  ;;  %2050 = vmatprep.subr.bf16.mxu1 %v5576_v42  ;;  %v5666_v41 = vld [vmem:[#allocation4 + $0x424] ss:$8 sps:$4 sm:$0xff]   ;;  %v5661_v42 = vld [vmem:[#allocation2 + $0x420] ss:$8 sps:$4 sm:$0xff]  }
 0x19c   : > { %1835 = vmatpush1.bf16.msra.mxu0 %v5571_v43  ;;  %2051 = vmatpush1.bf16.msra.mxu1 %v5574_v44  ;;  %v5664_v43 = vld [vmem:[#allocation4 + $0x420] ss:$8 sps:$4 sm:$0xff]   ;;  %v5669_v44 = vld [vmem:[#allocation2 + $0x434] ss:$8 sps:$4 sm:$0xff]  }
 0x19d   : > { %1836 = vmatprep.subr.bf16.mxu0 %v5579_v45  ;;  %2052 = vmatprep.subr.bf16.mxu1 %v5582_v46  ;;  %v5672_v45 = vld [vmem:[#allocation4 + $0x434] ss:$8 sps:$4 sm:$0xff]   ;;  %v5667_v46 = vld [vmem:[#allocation2 + $0x430] ss:$8 sps:$4 sm:$0xff]  }
 0x1a0   : > { %1837 = vmatpush1.bf16.msra.mxu0 %v5577_v49  ;;  %2053 = vmatpush1.bf16.msra.mxu1 %v5580_v50  ;;  %v5670_v49 = vld [vmem:[#allocation4 + $0x430] ss:$8 sps:$4 sm:$0xff]   ;;  %v5675_v50 = vld [vmem:[#allocation2 + $0x444] ss:$8 sps:$4 sm:$0xff]  }
 0x1a1   : > { %1838 = vmatprep.subr.bf16.mxu0 %v5585_v51  ;;  %2054 = vmatprep.subr.bf16.mxu1 %v5588_v52  ;;  %v5678_v51 = vld [vmem:[#allocation4 + $0x444] ss:$8 sps:$4 sm:$0xff]   ;;  %v5673_v52 = vld [vmem:[#allocation2 + $0x440] ss:$8 sps:$4 sm:$0xff]  }
 0x1a4   : > { %1839 = vmatpush1.bf16.msra.mxu0 %v5583_v3  ;;  %2055 = vmatpush1.bf16.msra.mxu1 %v5586_v6  ;;  %v5676_v3 = vld [vmem:[#allocation4 + $0x440] ss:$8 sps:$4 sm:$0xff]   ;;  %v5681_v6 = vld [vmem:[#allocation2 + $0x454] ss:$8 sps:$4 sm:$0xff]  }
 0x1a5   : > { %1840 = vmatprep.subr.bf16.mxu0 %v5591_v53  ;;  %2056 = vmatprep.subr.bf16.mxu1 %v5594_v54  ;;  %v5684_v53 = vld [vmem:[#allocation4 + $0x454] ss:$8 sps:$4 sm:$0xff]   ;;  %v5679_v54 = vld [vmem:[#allocation2 + $0x450] ss:$8 sps:$4 sm:$0xff]  }
 0x1a8   : > { %1841 = vmatpush1.bf16.msra.mxu0 %v5589_v55  ;;  %2057 = vmatpush1.bf16.msra.mxu1 %v5592_v56  ;;  %v5682_v55 = vld [vmem:[#allocation4 + $0x450] ss:$8 sps:$4 sm:$0xff]   ;;  %v2109_v56 = vpop.permute.xlu0 %2108 }
 0x1a9   : > { %1842 = vmatprep.subr.bf16.mxu0 %v5597_v57  ;;  %2058 = vmatprep.subr.bf16.mxu1 %v5600_v58  ;;  %v5687_v57 = vld [vmem:[#allocation2 + $0x464] ss:$8 sps:$4 sm:$0xff]  }
 0x1aa   : > { %v5690_v58 = vld [vmem:[#allocation4 + $0x464] ss:$8 sps:$4 sm:$0xff]  }
 0x1ac   : > { %1843 = vmatpush1.bf16.msra.mxu0 %v5595_v59  ;;  %2059 = vmatpush1.bf16.msra.mxu1 %v5598_v60  ;;  %v2112_v59 = vsel %vm417_vm1, %v2109_v56, %v6466_v4  ;;  %v5685_v60 = vld [vmem:[#allocation2 + $0x460] ss:$8 sps:$4 sm:$0xff]  }
 0x1ad   : > { %2257 = vmatprep.subr.bf16.mxu0 %v5603_v61  ;;  %2473 = vmatprep.subr.bf16.mxu1 %v5606_v62  ;;  %v5688_v61 = vld [vmem:[#allocation4 + $0x460] ss:$8 sps:$4 sm:$0xff]   ;;  %v5693_v62 = vld [vmem:[#allocation2 + $0x474] ss:$8 sps:$4 sm:$0xff]  }
 0x1af   : > { %1849 = vmatmul.mubr.bf16.vlgmr.msra.gmra.mrb[0].mxu0 %v6416_v9  ;;  %2065 = vmatmul.mubr.bf16.vlgmr.msra.gmra.mrb[0].mxu1 %v6416_v9  ;;  %v5616_v9 = vld [vmem:[#allocation4 + $0x3a0] ss:$8 sps:$4 sm:$0xff]  }
 0x1b0   : > { %2258 = vmatpush1.bf16.msra.mxu0 %v5601_v63  ;;  %2474 = vmatpush1.bf16.msra.mxu1 %v5604_v0  ;;  %v5696_v63 = vld [vmem:[#allocation4 + $0x474] ss:$8 sps:$4 sm:$0xff]   ;;  %v6474_v0 = vpop.permute.xlu1 %2551 }
 0x1b1   : > { %2259 = vmatprep.subr.bf16.mxu0 %v5609_v1  ;;  %2475 = vmatprep.subr.bf16.mxu1 %v5612_v2  ;;  %v5691_v1 = vld [vmem:[#allocation2 + $0x470] ss:$8 sps:$4 sm:$0xff]  }
 0x1b2   : > { %4852 = vmatprep.mubr.msk.bf16.mxu0 %vm560_vm0, %v6466_v4  ;;  %4881 = vmatprep.mubr.msk.bf16.mxu1 %vm560_vm0, %v6466_v4  ;;  %v5694_v2 = vld [vmem:[#allocation4 + $0x470] ss:$8 sps:$4 sm:$0xff]   ;;  %v5697_v4 = vld [vmem:[#allocation2 + $0x480] ss:$8 sps:$4 sm:$0xff]  }
 0x1b4   : > { %2260 = vmatpush1.bf16.msra.mxu0 %v5607_v5  ;;  %2476 = vmatpush1.bf16.msra.mxu1 %v5610_v10  ;;  %v5699_v5 = vld [vmem:[#allocation2 + $0x484] ss:$8 sps:$4 sm:$0xff]  }
 0x1b5   : > { %2261 = vmatprep.subr.bf16.mxu0 %v5615_v11  ;;  %2477 = vmatprep.subr.bf16.mxu1 %v5618_v12  ;;  %v5702_v10 = vld [vmem:[#allocation4 + $0x484] ss:$8 sps:$4 sm:$0xff]   ;;  %v5700_v11 = vld [vmem:[#allocation4 + $0x480] ss:$8 sps:$4 sm:$0xff]   ;;  %v5705_v12 = vld [vmem:[#allocation2 + $0x494] ss:$8 sps:$4 sm:$0xff]  }
 0x1b8   : > { %2262 = vmatpush1.bf16.msra.mxu0 %v5613_v13  ;;  %2478 = vmatpush1.bf16.msra.mxu1 %v5616_v9  ;;  %v5708_v13 = vld [vmem:[#allocation4 + $0x494] ss:$8 sps:$4 sm:$0xff]   ;;  %v5703_v9 = vld [vmem:[#allocation2 + $0x490] ss:$8 sps:$4 sm:$0xff]  }
 0x1b9   : > { %2263 = vmatprep.subr.bf16.mxu0 %v5621_v14  ;;  %2479 = vmatprep.subr.bf16.mxu1 %v5624_v15  ;;  %v5706_v14 = vld [vmem:[#allocation4 + $0x490] ss:$8 sps:$4 sm:$0xff]   ;;  %v5711_v15 = vld [vmem:[#allocation2 + $0x4a4] ss:$8 sps:$4 sm:$0xff]  }
 0x1bc   : > { %2264 = vmatpush1.bf16.msra.mxu0 %v5619_v16  ;;  %2480 = vmatpush1.bf16.msra.mxu1 %v5622_v17  ;;  %v5714_v16 = vld [vmem:[#allocation4 + $0x4a4] ss:$8 sps:$4 sm:$0xff]   ;;  %v5709_v17 = vld [vmem:[#allocation2 + $0x4a0] ss:$8 sps:$4 sm:$0xff]  }
 0x1bd   : > { %2265 = vmatprep.subr.bf16.mxu0 %v5627_v7  ;;  %2481 = vmatprep.subr.bf16.mxu1 %v5630_v18  ;;  %v5712_v7 = vld [vmem:[#allocation4 + $0x4a0] ss:$8 sps:$4 sm:$0xff]   ;;  %v5717_v18 = vld [vmem:[#allocation2 + $0x4b4] ss:$8 sps:$4 sm:$0xff]  }
 0x1c0   : > { %2266 = vmatpush1.bf16.msra.mxu0 %v5625_v19  ;;  %2482 = vmatpush1.bf16.msra.mxu1 %v5628_v20  ;;  %v5720_v19 = vld [vmem:[#allocation4 + $0x4b4] ss:$8 sps:$4 sm:$0xff]   ;;  %v5715_v20 = vld [vmem:[#allocation2 + $0x4b0] ss:$8 sps:$4 sm:$0xff]  }
 0x1c1   : > { %2267 = vmatprep.subr.bf16.mxu0 %v5633_v21  ;;  %2483 = vmatprep.subr.bf16.mxu1 %v5636_v22  ;;  %v5718_v21 = vld [vmem:[#allocation4 + $0x4b0] ss:$8 sps:$4 sm:$0xff]   ;;  %v5723_v22 = vld [vmem:[#allocation2 + $0x4c4] ss:$8 sps:$4 sm:$0xff]  }
 0x1c4   : > { %2268 = vmatpush1.bf16.msra.mxu0 %v5631_v23  ;;  %2484 = vmatpush1.bf16.msra.mxu1 %v5634_v24  ;;  %v5726_v23 = vld [vmem:[#allocation4 + $0x4c4] ss:$8 sps:$4 sm:$0xff]   ;;  %v5721_v24 = vld [vmem:[#allocation2 + $0x4c0] ss:$8 sps:$4 sm:$0xff]  }
 0x1c5   : > { %2269 = vmatprep.subr.bf16.mxu0 %v5639_v8  ;;  %2485 = vmatprep.subr.bf16.mxu1 %v5642_v25  ;;  %v5724_v8 = vld [vmem:[#allocation4 + $0x4c0] ss:$8 sps:$4 sm:$0xff]   ;;  %v5729_v25 = vld [vmem:[#allocation2 + $0x4d4] ss:$8 sps:$4 sm:$0xff]  }
 0x1c8   : > { %2270 = vmatpush1.bf16.msra.mxu0 %v5637_v26  ;;  %2486 = vmatpush1.bf16.msra.mxu1 %v5640_v27  ;;  %v5732_v26 = vld [vmem:[#allocation4 + $0x4d4] ss:$8 sps:$4 sm:$0xff]   ;;  %v5727_v27 = vld [vmem:[#allocation2 + $0x4d0] ss:$8 sps:$4 sm:$0xff]  }
 0x1c9   : > { %2271 = vmatprep.subr.bf16.mxu0 %v5645_v28  ;;  %2487 = vmatprep.subr.bf16.mxu1 %v5648_v29  ;;  %v5730_v28 = vld [vmem:[#allocation4 + $0x4d0] ss:$8 sps:$4 sm:$0xff]   ;;  %v5735_v29 = vld [vmem:[#allocation2 + $0x4e4] ss:$8 sps:$4 sm:$0xff]  }
 0x1cc   : > { %2272 = vmatpush1.bf16.msra.mxu0 %v5643_v30  ;;  %2488 = vmatpush1.bf16.msra.mxu1 %v5646_v31  ;;  %v5738_v30 = vld [vmem:[#allocation4 + $0x4e4] ss:$8 sps:$4 sm:$0xff]   ;;  %v5733_v31 = vld [vmem:[#allocation2 + $0x4e0] ss:$8 sps:$4 sm:$0xff]  }
 0x1cd   : > { %2273 = vmatprep.subr.bf16.mxu0 %v5651_v32  ;;  %2489 = vmatprep.subr.bf16.mxu1 %v5654_v33  ;;  %v5736_v32 = vld [vmem:[#allocation4 + $0x4e0] ss:$8 sps:$4 sm:$0xff]   ;;  %v5741_v33 = vld [vmem:[#allocation2 + $0x4f4] ss:$8 sps:$4 sm:$0xff]  }
 0x1d0   : > { %2274 = vmatpush1.bf16.msra.mxu0 %v5649_v34  ;;  %2490 = vmatpush1.bf16.msra.mxu1 %v5652_v35  ;;  %v5744_v34 = vld [vmem:[#allocation4 + $0x4f4] ss:$8 sps:$4 sm:$0xff]   ;;  %v5739_v35 = vld [vmem:[#allocation2 + $0x4f0] ss:$8 sps:$4 sm:$0xff]  }
 0x1d1   : > { %2275 = vmatprep.subr.bf16.mxu0 %v5657_v36  ;;  %2491 = vmatprep.subr.bf16.mxu1 %v5660_v37  ;;  %v5742_v36 = vld [vmem:[#allocation4 + $0x4f0] ss:$8 sps:$4 sm:$0xff]   ;;  %v5747_v37 = vld [vmem:[#allocation2 + $0x504] ss:$8 sps:$4 sm:$0xff]  }
 0x1d4   : > { %2276 = vmatpush1.bf16.msra.mxu0 %v5655_v38  ;;  %2492 = vmatpush1.bf16.msra.mxu1 %v5658_v39  ;;  %v5750_v38 = vld [vmem:[#allocation4 + $0x504] ss:$8 sps:$4 sm:$0xff]   ;;  %v5745_v39 = vld [vmem:[#allocation2 + $0x500] ss:$8 sps:$4 sm:$0xff]  }
 0x1d5   : > { %2277 = vmatprep.subr.bf16.mxu0 %v5663_v40  ;;  %2493 = vmatprep.subr.bf16.mxu1 %v5666_v41  ;;  %v5748_v40 = vld [vmem:[#allocation4 + $0x500] ss:$8 sps:$4 sm:$0xff]   ;;  %v5753_v41 = vld [vmem:[#allocation2 + $0x514] ss:$8 sps:$4 sm:$0xff]  }
 0x1d8   : > { %2278 = vmatpush1.bf16.msra.mxu0 %v5661_v42  ;;  %2494 = vmatpush1.bf16.msra.mxu1 %v5664_v43  ;;  %v5756_v42 = vld [vmem:[#allocation4 + $0x514] ss:$8 sps:$4 sm:$0xff]   ;;  %v5751_v43 = vld [vmem:[#allocation2 + $0x510] ss:$8 sps:$4 sm:$0xff]  }
 0x1d9   : > { %2279 = vmatprep.subr.bf16.mxu0 %v5669_v44  ;;  %2495 = vmatprep.subr.bf16.mxu1 %v5672_v45  ;;  %v5754_v44 = vld [vmem:[#allocation4 + $0x510] ss:$8 sps:$4 sm:$0xff]   ;;  %v5759_v45 = vld [vmem:[#allocation2 + $0x524] ss:$8 sps:$4 sm:$0xff]  }
 0x1dc   : > { %2280 = vmatpush1.bf16.msra.mxu0 %v5667_v46  ;;  %2496 = vmatpush1.bf16.msra.mxu1 %v5670_v49  ;;  %v5762_v46 = vld [vmem:[#allocation4 + $0x524] ss:$8 sps:$4 sm:$0xff]   ;;  %v5757_v49 = vld [vmem:[#allocation2 + $0x520] ss:$8 sps:$4 sm:$0xff]  }
 0x1dd   : > { %2281 = vmatprep.subr.bf16.mxu0 %v5675_v50  ;;  %2497 = vmatprep.subr.bf16.mxu1 %v5678_v51  ;;  %v5760_v50 = vld [vmem:[#allocation4 + $0x520] ss:$8 sps:$4 sm:$0xff]   ;;  %v5765_v51 = vld [vmem:[#allocation2 + $0x534] ss:$8 sps:$4 sm:$0xff]  }
 0x1e0   : > { %2282 = vmatpush1.bf16.msra.mxu0 %v5673_v52  ;;  %2498 = vmatpush1.bf16.msra.mxu1 %v5676_v3  ;;  %v5768_v52 = vld [vmem:[#allocation4 + $0x534] ss:$8 sps:$4 sm:$0xff]   ;;  %v5763_v3 = vld [vmem:[#allocation2 + $0x530] ss:$8 sps:$4 sm:$0xff]  }
 0x1e1   : > { %2283 = vmatprep.subr.bf16.mxu0 %v5681_v6  ;;  %2499 = vmatprep.subr.bf16.mxu1 %v5684_v53  ;;  %v5766_v6 = vld [vmem:[#allocation4 + $0x530] ss:$8 sps:$4 sm:$0xff]   ;;  %v2550_v53 = vpop.permute.xlu0 %2549 }
 0x1e2   : > { %v2553_v56 = vsel %vm560_vm0, %v2550_v53, %v6474_v0  ;;  %v5864_v53 = vld [vmem:[#allocation4 + $0x634] ss:$8 sps:$4 sm:$0xff]  }
 0x1e4   : > { %2284 = vmatpush1.bf16.msra.mxu0 %v5679_v54  ;;  %2500 = vmatpush1.bf16.msra.mxu1 %v5682_v55  ;;  %v5771_v54 = vld [vmem:[#allocation2 + $0x544] ss:$8 sps:$4 sm:$0xff]  }
 0x1e5   : > { %2698 = vmatprep.subr.bf16.mxu0 %v5687_v57  ;;  %2914 = vmatprep.subr.bf16.mxu1 %v5690_v58  ;;  %v5774_v55 = vld [vmem:[#allocation4 + $0x544] ss:$8 sps:$4 sm:$0xff]   ;;  %v5769_v57 = vld [vmem:[#allocation2 + $0x540] ss:$8 sps:$4 sm:$0xff]  }
 0x1e6   : > { %v5772_v58 = vld [vmem:[#allocation4 + $0x540] ss:$8 sps:$4 sm:$0xff]  }
 0x1e7   : > { %2290 = vmatmul.mubr.bf16.vlgmr.msra.gmra.mrb[0].mxu0 %v2112_v59  ;;  %2506 = vmatmul.mubr.bf16.vlgmr.msra.gmra.mrb[0].mxu1 %v2112_v59  ;;  %v5777_v59 = vld [vmem:[#allocation2 + $0x554] ss:$8 sps:$4 sm:$0xff]  }
 0x1e8   : > { %2699 = vmatpush1.bf16.msra.mxu0 %v5685_v60  ;;  %2915 = vmatpush1.bf16.msra.mxu1 %v5688_v61  ;;  %v5780_v60 = vld [vmem:[#allocation4 + $0x554] ss:$8 sps:$4 sm:$0xff]   ;;  %v5775_v61 = vld [vmem:[#allocation2 + $0x550] ss:$8 sps:$4 sm:$0xff]  }
 0x1e9   : > { %2700 = vmatprep.subr.bf16.mxu0 %v5693_v62  ;;  %2916 = vmatprep.subr.bf16.mxu1 %v5696_v63  ;;  %v5778_v62 = vld [vmem:[#allocation4 + $0x550] ss:$8 sps:$4 sm:$0xff]   ;;  %v5783_v63 = vld [vmem:[#allocation2 + $0x564] ss:$8 sps:$4 sm:$0xff]  }
 0x1ea   : > { %4910 = vmatprep.mubr.msk.bf16.mxu0 %vm560_vm0, %v6474_v0  ;;  %4939 = vmatprep.mubr.msk.bf16.mxu1 %vm560_vm0, %v6474_v0  ;;  %v5781_v0 = vld [vmem:[#allocation2 + $0x560] ss:$8 sps:$4 sm:$0xff]  }
 0x1ec   : > { %2701 = vmatpush1.bf16.msra.mxu0 %v5691_v1  ;;  %2917 = vmatpush1.bf16.msra.mxu1 %v5694_v2  ;;  %v5786_v1 = vld [vmem:[#allocation4 + $0x564] ss:$8 sps:$4 sm:$0xff]   ;;  %v5784_v2 = vld [vmem:[#allocation4 + $0x560] ss:$8 sps:$4 sm:$0xff]  }
 0x1ed   : > { %2702 = vmatprep.subr.bf16.mxu0 %v5699_v5  ;;  %2918 = vmatprep.subr.bf16.mxu1 %v5702_v10  ;;  %v5789_v5 = vld [vmem:[#allocation2 + $0x574] ss:$8 sps:$4 sm:$0xff]  }
 0x1ee   : > { %v5792_v10 = vld [vmem:[#allocation4 + $0x574] ss:$8 sps:$4 sm:$0xff]  }
 0x1f0   : > { %2703 = vmatpush1.bf16.msra.mxu0 %v5697_v4  ;;  %2919 = vmatpush1.bf16.msra.mxu1 %v5700_v11  ;;  %v5787_v4 = vld [vmem:[#allocation2 + $0x570] ss:$8 sps:$4 sm:$0xff]  }
 0x1f1   : > { %2704 = vmatprep.subr.bf16.mxu0 %v5705_v12  ;;  %2920 = vmatprep.subr.bf16.mxu1 %v5708_v13  ;;  %v5790_v11 = vld [vmem:[#allocation4 + $0x570] ss:$8 sps:$4 sm:$0xff]   ;;  %v5795_v12 = vld [vmem:[#allocation2 + $0x584] ss:$8 sps:$4 sm:$0xff]  }
 0x1f2   : > { %v5798_v13 = vld [vmem:[#allocation4 + $0x584] ss:$8 sps:$4 sm:$0xff]  }
 0x1f4   : > { %2705 = vmatpush1.bf16.msra.mxu0 %v5703_v9  ;;  %2921 = vmatpush1.bf16.msra.mxu1 %v5706_v14  ;;  %v5793_v9 = vld [vmem:[#allocation2 + $0x580] ss:$8 sps:$4 sm:$0xff]   ;;  %v5801_v14 = vld [vmem:[#allocation2 + $0x594] ss:$8 sps:$4 sm:$0xff]  }
 0x1f5   : > { %2706 = vmatprep.subr.bf16.mxu0 %v5711_v15  ;;  %2922 = vmatprep.subr.bf16.mxu1 %v5714_v16  ;;  %v5804_v15 = vld [vmem:[#allocation4 + $0x594] ss:$8 sps:$4 sm:$0xff]   ;;  %v5799_v16 = vld [vmem:[#allocation2 + $0x590] ss:$8 sps:$4 sm:$0xff]  }
 0x1f8   : > { %2707 = vmatpush1.bf16.msra.mxu0 %v5709_v17  ;;  %2923 = vmatpush1.bf16.msra.mxu1 %v5712_v7  ;;  %v5802_v17 = vld [vmem:[#allocation4 + $0x590] ss:$8 sps:$4 sm:$0xff]   ;;  %v5807_v7 = vld [vmem:[#allocation2 + $0x5a4] ss:$8 sps:$4 sm:$0xff]  }
 0x1f9   : > { %2708 = vmatprep.subr.bf16.mxu0 %v5717_v18  ;;  %2924 = vmatprep.subr.bf16.mxu1 %v5720_v19  ;;  %v5810_v18 = vld [vmem:[#allocation4 + $0x5a4] ss:$8 sps:$4 sm:$0xff]   ;;  %v5805_v19 = vld [vmem:[#allocation2 + $0x5a0] ss:$8 sps:$4 sm:$0xff]  }
 0x1fc   : > { %2709 = vmatpush1.bf16.msra.mxu0 %v5715_v20  ;;  %2925 = vmatpush1.bf16.msra.mxu1 %v5718_v21  ;;  %v5808_v20 = vld [vmem:[#allocation4 + $0x5a0] ss:$8 sps:$4 sm:$0xff]   ;;  %v5813_v21 = vld [vmem:[#allocation2 + $0x5b4] ss:$8 sps:$4 sm:$0xff]  }
 0x1fd   : > { %2710 = vmatprep.subr.bf16.mxu0 %v5723_v22  ;;  %2926 = vmatprep.subr.bf16.mxu1 %v5726_v23  ;;  %v5816_v22 = vld [vmem:[#allocation4 + $0x5b4] ss:$8 sps:$4 sm:$0xff]   ;;  %v5811_v23 = vld [vmem:[#allocation2 + $0x5b0] ss:$8 sps:$4 sm:$0xff]  }
 0x200   : > { %2711 = vmatpush1.bf16.msra.mxu0 %v5721_v24  ;;  %2927 = vmatpush1.bf16.msra.mxu1 %v5724_v8  ;;  %v5814_v24 = vld [vmem:[#allocation4 + $0x5b0] ss:$8 sps:$4 sm:$0xff]   ;;  %v5819_v8 = vld [vmem:[#allocation2 + $0x5c4] ss:$8 sps:$4 sm:$0xff]  }
 0x201   : > { %2712 = vmatprep.subr.bf16.mxu0 %v5729_v25  ;;  %2928 = vmatprep.subr.bf16.mxu1 %v5732_v26  ;;  %v5822_v25 = vld [vmem:[#allocation4 + $0x5c4] ss:$8 sps:$4 sm:$0xff]   ;;  %v5817_v26 = vld [vmem:[#allocation2 + $0x5c0] ss:$8 sps:$4 sm:$0xff]  }
 0x204   : > { %2713 = vmatpush1.bf16.msra.mxu0 %v5727_v27  ;;  %2929 = vmatpush1.bf16.msra.mxu1 %v5730_v28  ;;  %v5820_v27 = vld [vmem:[#allocation4 + $0x5c0] ss:$8 sps:$4 sm:$0xff]   ;;  %v5825_v28 = vld [vmem:[#allocation2 + $0x5d4] ss:$8 sps:$4 sm:$0xff]  }
 0x205   : > { %2714 = vmatprep.subr.bf16.mxu0 %v5735_v29  ;;  %2930 = vmatprep.subr.bf16.mxu1 %v5738_v30  ;;  %v5828_v29 = vld [vmem:[#allocation4 + $0x5d4] ss:$8 sps:$4 sm:$0xff]   ;;  %v5823_v30 = vld [vmem:[#allocation2 + $0x5d0] ss:$8 sps:$4 sm:$0xff]  }
 0x208   : > { %2715 = vmatpush1.bf16.msra.mxu0 %v5733_v31  ;;  %2931 = vmatpush1.bf16.msra.mxu1 %v5736_v32  ;;  %v5826_v31 = vld [vmem:[#allocation4 + $0x5d0] ss:$8 sps:$4 sm:$0xff]   ;;  %v5831_v32 = vld [vmem:[#allocation2 + $0x5e4] ss:$8 sps:$4 sm:$0xff]  }
 0x209   : > { %2716 = vmatprep.subr.bf16.mxu0 %v5741_v33  ;;  %2932 = vmatprep.subr.bf16.mxu1 %v5744_v34  ;;  %v5834_v33 = vld [vmem:[#allocation4 + $0x5e4] ss:$8 sps:$4 sm:$0xff]   ;;  %v5829_v34 = vld [vmem:[#allocation2 + $0x5e0] ss:$8 sps:$4 sm:$0xff]  }
 0x20c   : > { %2717 = vmatpush1.bf16.msra.mxu0 %v5739_v35  ;;  %2933 = vmatpush1.bf16.msra.mxu1 %v5742_v36  ;;  %v5832_v35 = vld [vmem:[#allocation4 + $0x5e0] ss:$8 sps:$4 sm:$0xff]   ;;  %v5837_v36 = vld [vmem:[#allocation2 + $0x5f4] ss:$8 sps:$4 sm:$0xff]  }
 0x20d   : > { %2718 = vmatprep.subr.bf16.mxu0 %v5747_v37  ;;  %2934 = vmatprep.subr.bf16.mxu1 %v5750_v38  ;;  %v5840_v37 = vld [vmem:[#allocation4 + $0x5f4] ss:$8 sps:$4 sm:$0xff]   ;;  %v5835_v38 = vld [vmem:[#allocation2 + $0x5f0] ss:$8 sps:$4 sm:$0xff]  }
 0x210   : > { %2719 = vmatpush1.bf16.msra.mxu0 %v5745_v39  ;;  %2935 = vmatpush1.bf16.msra.mxu1 %v5748_v40  ;;  %v5838_v39 = vld [vmem:[#allocation4 + $0x5f0] ss:$8 sps:$4 sm:$0xff]   ;;  %v5843_v40 = vld [vmem:[#allocation2 + $0x604] ss:$8 sps:$4 sm:$0xff]  }
 0x211   : > { %2720 = vmatprep.subr.bf16.mxu0 %v5753_v41  ;;  %2936 = vmatprep.subr.bf16.mxu1 %v5756_v42  ;;  %v5846_v41 = vld [vmem:[#allocation4 + $0x604] ss:$8 sps:$4 sm:$0xff]   ;;  %v5841_v42 = vld [vmem:[#allocation2 + $0x600] ss:$8 sps:$4 sm:$0xff]  }
 0x214   : > { %2721 = vmatpush1.bf16.msra.mxu0 %v5751_v43  ;;  %2937 = vmatpush1.bf16.msra.mxu1 %v5754_v44  ;;  %v5844_v43 = vld [vmem:[#allocation4 + $0x600] ss:$8 sps:$4 sm:$0xff]   ;;  %v5849_v44 = vld [vmem:[#allocation2 + $0x614] ss:$8 sps:$4 sm:$0xff]  }
 0x215   : > { %2722 = vmatprep.subr.bf16.mxu0 %v5759_v45  ;;  %2938 = vmatprep.subr.bf16.mxu1 %v5762_v46  ;;  %v5852_v45 = vld [vmem:[#allocation4 + $0x614] ss:$8 sps:$4 sm:$0xff]   ;;  %v5847_v46 = vld [vmem:[#allocation2 + $0x610] ss:$8 sps:$4 sm:$0xff]  }
 0x218   : > { %2723 = vmatpush1.bf16.msra.mxu0 %v5757_v49  ;;  %2939 = vmatpush1.bf16.msra.mxu1 %v5760_v50  ;;  %v5850_v49 = vld [vmem:[#allocation4 + $0x610] ss:$8 sps:$4 sm:$0xff]   ;;  %v5855_v50 = vld [vmem:[#allocation2 + $0x624] ss:$8 sps:$4 sm:$0xff]  }
 0x219   : > { %2724 = vmatprep.subr.bf16.mxu0 %v5765_v51  ;;  %2940 = vmatprep.subr.bf16.mxu1 %v5768_v52  ;;  %v5858_v51 = vld [vmem:[#allocation4 + $0x624] ss:$8 sps:$4 sm:$0xff]   ;;  %v5853_v52 = vld [vmem:[#allocation2 + $0x620] ss:$8 sps:$4 sm:$0xff]  }
 0x21c   : > { %2725 = vmatpush1.bf16.msra.mxu0 %v5763_v3  ;;  %2941 = vmatpush1.bf16.msra.mxu1 %v5766_v6  ;;  %v5856_v3 = vld [vmem:[#allocation4 + $0x620] ss:$8 sps:$4 sm:$0xff]   ;;  %v5861_v6 = vld [vmem:[#allocation2 + $0x634] ss:$8 sps:$4 sm:$0xff]  }
 0x21d   : > { %3136 = vmatprep.subr.bf16.mxu0 %v5771_v54  ;;  %3352 = vmatprep.subr.bf16.mxu1 %v5774_v55  ;;  %v6488_v54 = vpop.permute.xlu1 %3430  ;;  %v5859_v55 = vld [vmem:[#allocation2 + $0x630] ss:$8 sps:$4 sm:$0xff]  }
 0x21f   : > { %2731 = vmatmul.mubr.bf16.vlgmr.msra.gmra.mrb[0].mxu0 %v2553_v56  ;;  %2947 = vmatmul.mubr.bf16.vlgmr.msra.gmra.mrb[0].mxu1 %v2553_v56  ;;  %v5862_v56 = vld [vmem:[#allocation4 + $0x630] ss:$8 sps:$4 sm:$0xff]  }
 0x220   : > { %3137 = vmatpush1.bf16.msra.mxu0 %v5769_v57  ;;  %3353 = vmatpush1.bf16.msra.mxu1 %v5772_v58  ;;  %v5867_v57 = vld [vmem:[#allocation2 + $0x644] ss:$8 sps:$4 sm:$0xff]  }
 0x221   : > { %3138 = vmatprep.subr.bf16.mxu0 %v5777_v59  ;;  %3354 = vmatprep.subr.bf16.mxu1 %v5780_v60  ;;  %v5870_v58 = vld [vmem:[#allocation4 + $0x644] ss:$8 sps:$4 sm:$0xff]   ;;  %v5865_v59 = vld [vmem:[#allocation2 + $0x640] ss:$8 sps:$4 sm:$0xff]   ;;  %v5873_v60 = vld [vmem:[#allocation2 + $0x654] ss:$8 sps:$4 sm:$0xff]  }
 0x222   : > { %4968 = vmatprep.mubr.msk.bf16.mxu0 %vm560_vm0, %v6451_v47  ;;  %4997 = vmatprep.mubr.msk.bf16.mxu1 %vm560_vm0, %v6451_v47  ;;  %v5796_v47 = vld [vmem:[#allocation4 + $0x580] ss:$8 sps:$4 sm:$0xff]  }
 0x224   : > { %3139 = vmatpush1.bf16.msra.mxu0 %v5775_v61  ;;  %3355 = vmatpush1.bf16.msra.mxu1 %v5778_v62  ;;  %v5876_v61 = vld [vmem:[#allocation4 + $0x654] ss:$8 sps:$4 sm:$0xff]   ;;  %v5871_v62 = vld [vmem:[#allocation2 + $0x650] ss:$8 sps:$4 sm:$0xff]  }
 0x225   : > { %3140 = vmatprep.subr.bf16.mxu0 %v5783_v63  ;;  %3356 = vmatprep.subr.bf16.mxu1 %v5786_v1  ;;  %v5874_v63 = vld [vmem:[#allocation4 + $0x650] ss:$8 sps:$4 sm:$0xff]   ;;  %v5879_v1 = vld [vmem:[#allocation2 + $0x664] ss:$8 sps:$4 sm:$0xff]  }
 0x228   : > { %3141 = vmatpush1.bf16.msra.mxu0 %v5781_v0  ;;  %3357 = vmatpush1.bf16.msra.mxu1 %v5784_v2  ;;  %v5882_v0 = vld [vmem:[#allocation4 + $0x664] ss:$8 sps:$4 sm:$0xff]   ;;  %v5877_v2 = vld [vmem:[#allocation2 + $0x660] ss:$8 sps:$4 sm:$0xff]  }
 0x229   : > { %3142 = vmatprep.subr.bf16.mxu0 %v5789_v5  ;;  %3358 = vmatprep.subr.bf16.mxu1 %v5792_v10  ;;  %v5880_v5 = vld [vmem:[#allocation4 + $0x660] ss:$8 sps:$4 sm:$0xff]   ;;  %v5885_v10 = vld [vmem:[#allocation2 + $0x674] ss:$8 sps:$4 sm:$0xff]  }
 0x22c   : > { %3143 = vmatpush1.bf16.msra.mxu0 %v5787_v4  ;;  %3359 = vmatpush1.bf16.msra.mxu1 %v5790_v11  ;;  %v5888_v4 = vld [vmem:[#allocation4 + $0x674] ss:$8 sps:$4 sm:$0xff]   ;;  %v5883_v11 = vld [vmem:[#allocation2 + $0x670] ss:$8 sps:$4 sm:$0xff]  }
 0x22d   : > { %3144 = vmatprep.subr.bf16.mxu0 %v5795_v12  ;;  %3360 = vmatprep.subr.bf16.mxu1 %v5798_v13  ;;  %v5886_v12 = vld [vmem:[#allocation4 + $0x670] ss:$8 sps:$4 sm:$0xff]   ;;  %v5891_v13 = vld [vmem:[#allocation2 + $0x684] ss:$8 sps:$4 sm:$0xff]  }
 0x230   : > { %3145 = vmatpush1.bf16.msra.mxu0 %v5793_v9  ;;  %3361 = vmatpush1.bf16.msra.mxu1 %v5796_v47  ;;  %v5894_v9 = vld [vmem:[#allocation4 + $0x684] ss:$8 sps:$4 sm:$0xff]   ;;  %v5889_v47 = vld [vmem:[#allocation2 + $0x680] ss:$8 sps:$4 sm:$0xff]  }
 0x231   : > { %3146 = vmatprep.subr.bf16.mxu0 %v5801_v14  ;;  %3362 = vmatprep.subr.bf16.mxu1 %v5804_v15  ;;  %v5892_v14 = vld [vmem:[#allocation4 + $0x680] ss:$8 sps:$4 sm:$0xff]   ;;  %v5897_v15 = vld [vmem:[#allocation2 + $0x694] ss:$8 sps:$4 sm:$0xff]  }
 0x234   : > { %3147 = vmatpush1.bf16.msra.mxu0 %v5799_v16  ;;  %3363 = vmatpush1.bf16.msra.mxu1 %v5802_v17  ;;  %v5900_v16 = vld [vmem:[#allocation4 + $0x694] ss:$8 sps:$4 sm:$0xff]   ;;  %v5895_v17 = vld [vmem:[#allocation2 + $0x690] ss:$8 sps:$4 sm:$0xff]  }
 0x235   : > { %3148 = vmatprep.subr.bf16.mxu0 %v5807_v7  ;;  %3364 = vmatprep.subr.bf16.mxu1 %v5810_v18  ;;  %v5898_v7 = vld [vmem:[#allocation4 + $0x690] ss:$8 sps:$4 sm:$0xff]   ;;  %v5903_v18 = vld [vmem:[#allocation2 + $0x6a4] ss:$8 sps:$4 sm:$0xff]  }
 0x238   : > { %3149 = vmatpush1.bf16.msra.mxu0 %v5805_v19  ;;  %3365 = vmatpush1.bf16.msra.mxu1 %v5808_v20  ;;  %v5906_v19 = vld [vmem:[#allocation4 + $0x6a4] ss:$8 sps:$4 sm:$0xff]   ;;  %v5901_v20 = vld [vmem:[#allocation2 + $0x6a0] ss:$8 sps:$4 sm:$0xff]  }
 0x239   : > { %3150 = vmatprep.subr.bf16.mxu0 %v5813_v21  ;;  %3366 = vmatprep.subr.bf16.mxu1 %v5816_v22  ;;  %v5904_v21 = vld [vmem:[#allocation4 + $0x6a0] ss:$8 sps:$4 sm:$0xff]   ;;  %v5909_v22 = vld [vmem:[#allocation2 + $0x6b4] ss:$8 sps:$4 sm:$0xff]  }
 0x23c   : > { %3151 = vmatpush1.bf16.msra.mxu0 %v5811_v23  ;;  %3367 = vmatpush1.bf16.msra.mxu1 %v5814_v24  ;;  %v5912_v23 = vld [vmem:[#allocation4 + $0x6b4] ss:$8 sps:$4 sm:$0xff]   ;;  %v5907_v24 = vld [vmem:[#allocation2 + $0x6b0] ss:$8 sps:$4 sm:$0xff]  }
 0x23d   : > { %3152 = vmatprep.subr.bf16.mxu0 %v5819_v8  ;;  %3368 = vmatprep.subr.bf16.mxu1 %v5822_v25  ;;  %v5910_v8 = vld [vmem:[#allocation4 + $0x6b0] ss:$8 sps:$4 sm:$0xff]   ;;  %v5915_v25 = vld [vmem:[#allocation2 + $0x6c4] ss:$8 sps:$4 sm:$0xff]  }
 0x240   : > { %3153 = vmatpush1.bf16.msra.mxu0 %v5817_v26  ;;  %3369 = vmatpush1.bf16.msra.mxu1 %v5820_v27  ;;  %v5918_v26 = vld [vmem:[#allocation4 + $0x6c4] ss:$8 sps:$4 sm:$0xff]   ;;  %v5913_v27 = vld [vmem:[#allocation2 + $0x6c0] ss:$8 sps:$4 sm:$0xff]  }
 0x241   : > { %3154 = vmatprep.subr.bf16.mxu0 %v5825_v28  ;;  %3370 = vmatprep.subr.bf16.mxu1 %v5828_v29  ;;  %v5916_v28 = vld [vmem:[#allocation4 + $0x6c0] ss:$8 sps:$4 sm:$0xff]   ;;  %v5921_v29 = vld [vmem:[#allocation2 + $0x6d4] ss:$8 sps:$4 sm:$0xff]  }
 0x244   : > { %3155 = vmatpush1.bf16.msra.mxu0 %v5823_v30  ;;  %3371 = vmatpush1.bf16.msra.mxu1 %v5826_v31  ;;  %v5924_v30 = vld [vmem:[#allocation4 + $0x6d4] ss:$8 sps:$4 sm:$0xff]   ;;  %v5919_v31 = vld [vmem:[#allocation2 + $0x6d0] ss:$8 sps:$4 sm:$0xff]  }
 0x245   : > { %3156 = vmatprep.subr.bf16.mxu0 %v5831_v32  ;;  %3372 = vmatprep.subr.bf16.mxu1 %v5834_v33  ;;  %v5922_v32 = vld [vmem:[#allocation4 + $0x6d0] ss:$8 sps:$4 sm:$0xff]   ;;  %v5927_v33 = vld [vmem:[#allocation2 + $0x6e4] ss:$8 sps:$4 sm:$0xff]  }
 0x248   : > { %3157 = vmatpush1.bf16.msra.mxu0 %v5829_v34  ;;  %3373 = vmatpush1.bf16.msra.mxu1 %v5832_v35  ;;  %v5930_v34 = vld [vmem:[#allocation4 + $0x6e4] ss:$8 sps:$4 sm:$0xff]   ;;  %v5925_v35 = vld [vmem:[#allocation2 + $0x6e0] ss:$8 sps:$4 sm:$0xff]  }
 0x249   : > { %3158 = vmatprep.subr.bf16.mxu0 %v5837_v36  ;;  %3374 = vmatprep.subr.bf16.mxu1 %v5840_v37  ;;  %v5928_v36 = vld [vmem:[#allocation4 + $0x6e0] ss:$8 sps:$4 sm:$0xff]   ;;  %v5933_v37 = vld [vmem:[#allocation2 + $0x6f4] ss:$8 sps:$4 sm:$0xff]  }
 0x24c   : > { %3159 = vmatpush1.bf16.msra.mxu0 %v5835_v38  ;;  %3375 = vmatpush1.bf16.msra.mxu1 %v5838_v39  ;;  %v5936_v38 = vld [vmem:[#allocation4 + $0x6f4] ss:$8 sps:$4 sm:$0xff]   ;;  %v5931_v39 = vld [vmem:[#allocation2 + $0x6f0] ss:$8 sps:$4 sm:$0xff]  }
 0x24d   : > { %3160 = vmatprep.subr.bf16.mxu0 %v5843_v40  ;;  %3376 = vmatprep.subr.bf16.mxu1 %v5846_v41  ;;  %v5934_v40 = vld [vmem:[#allocation4 + $0x6f0] ss:$8 sps:$4 sm:$0xff]   ;;  %v3429_v41 = vpop.permute.xlu0 %3428 }
 0x250   : > { %3161 = vmatpush1.bf16.msra.mxu0 %v5841_v42  ;;  %3377 = vmatpush1.bf16.msra.mxu1 %v5844_v43  ;;  %v5939_v42 = vld [vmem:[#allocation2 + $0x704] ss:$8 sps:$4 sm:$0xff]  }
 0x251   : > { %3162 = vmatprep.subr.bf16.mxu0 %v5849_v44  ;;  %3378 = vmatprep.subr.bf16.mxu1 %v5852_v45  ;;  %v5942_v43 = vld [vmem:[#allocation4 + $0x704] ss:$8 sps:$4 sm:$0xff]   ;;  %v3432_v44 = vsel %vm417_vm1, %v3429_v41, %v6488_v54  ;;  %v5937_v45 = vld [vmem:[#allocation2 + $0x700] ss:$8 sps:$4 sm:$0xff]  }
 0x254   : > { %3163 = vmatpush1.bf16.msra.mxu0 %v5847_v46  ;;  %3379 = vmatpush1.bf16.msra.mxu1 %v5850_v49  ;;  %v5940_v46 = vld [vmem:[#allocation4 + $0x700] ss:$8 sps:$4 sm:$0xff]   ;;  %v5945_v49 = vld [vmem:[#allocation2 + $0x714] ss:$8 sps:$4 sm:$0xff]  }
 0x255   : > { %3577 = vmatprep.subr.bf16.mxu0 %v5855_v50  ;;  %3793 = vmatprep.subr.bf16.mxu1 %v5858_v51  ;;  %v5948_v50 = vld [vmem:[#allocation4 + $0x714] ss:$8 sps:$4 sm:$0xff]   ;;  %v6496_v51 = vpop.permute.xlu1 %3871 }
 0x257   : > { %3169 = vmatmul.mubr.bf16.vlgmr.msra.gmra.mrb[0].mxu0 %v6454_v48  ;;  %3385 = vmatmul.mubr.bf16.vlgmr.msra.gmra.mrb[0].mxu1 %v6454_v48  ;;  %v5868_v48 = vld [vmem:[#allocation4 + $0x640] ss:$8 sps:$4 sm:$0xff]  }
 0x258   : > { %3578 = vmatpush1.bf16.msra.mxu0 %v5853_v52  ;;  %3794 = vmatpush1.bf16.msra.mxu1 %v5856_v3  ;;  %v5943_v52 = vld [vmem:[#allocation2 + $0x710] ss:$8 sps:$4 sm:$0xff]  }
 0x259   : > { %3579 = vmatprep.subr.bf16.mxu0 %v5861_v6  ;;  %3795 = vmatprep.subr.bf16.mxu1 %v5864_v53  ;;  %v5946_v3 = vld [vmem:[#allocation4 + $0x710] ss:$8 sps:$4 sm:$0xff]   ;;  %v5951_v6 = vld [vmem:[#allocation2 + $0x724] ss:$8 sps:$4 sm:$0xff]  }
 0x25a   : > { %5026 = vmatprep.mubr.msk.bf16.mxu0 %vm560_vm0, %v6488_v54  ;;  %5055 = vmatprep.mubr.msk.bf16.mxu1 %vm560_vm0, %v6488_v54  ;;  %v5954_v53 = vld [vmem:[#allocation4 + $0x724] ss:$8 sps:$4 sm:$0xff]   ;;  %v5949_v54 = vld [vmem:[#allocation2 + $0x720] ss:$8 sps:$4 sm:$0xff]  }
 0x25c   : > { %3580 = vmatpush1.bf16.msra.mxu0 %v5859_v55  ;;  %3796 = vmatpush1.bf16.msra.mxu1 %v5862_v56  ;;  %v5952_v55 = vld [vmem:[#allocation4 + $0x720] ss:$8 sps:$4 sm:$0xff]   ;;  %v5957_v56 = vld [vmem:[#allocation2 + $0x734] ss:$8 sps:$4 sm:$0xff]  }
 0x25d   : > { %3581 = vmatprep.subr.bf16.mxu0 %v5867_v57  ;;  %3797 = vmatprep.subr.bf16.mxu1 %v5870_v58  ;;  %v5960_v57 = vld [vmem:[#allocation4 + $0x734] ss:$8 sps:$4 sm:$0xff]   ;;  %v5955_v58 = vld [vmem:[#allocation2 + $0x730] ss:$8 sps:$4 sm:$0xff]  }
 0x260   : > { %3582 = vmatpush1.bf16.msra.mxu0 %v5865_v59  ;;  %3798 = vmatpush1.bf16.msra.mxu1 %v5868_v48  ;;  %v5958_v59 = vld [vmem:[#allocation4 + $0x730] ss:$8 sps:$4 sm:$0xff]   ;;  %v5963_v48 = vld [vmem:[#allocation2 + $0x744] ss:$8 sps:$4 sm:$0xff]  }
 0x261   : > { %3583 = vmatprep.subr.bf16.mxu0 %v5873_v60  ;;  %3799 = vmatprep.subr.bf16.mxu1 %v5876_v61  ;;  %v5966_v60 = vld [vmem:[#allocation4 + $0x744] ss:$8 sps:$4 sm:$0xff]   ;;  %v5961_v61 = vld [vmem:[#allocation2 + $0x740] ss:$8 sps:$4 sm:$0xff]  }
 0x264   : > { %3584 = vmatpush1.bf16.msra.mxu0 %v5871_v62  ;;  %3800 = vmatpush1.bf16.msra.mxu1 %v5874_v63  ;;  %v5964_v62 = vld [vmem:[#allocation4 + $0x740] ss:$8 sps:$4 sm:$0xff]   ;;  %v5969_v63 = vld [vmem:[#allocation2 + $0x754] ss:$8 sps:$4 sm:$0xff]  }
 0x265   : > { %3585 = vmatprep.subr.bf16.mxu0 %v5879_v1  ;;  %3801 = vmatprep.subr.bf16.mxu1 %v5882_v0  ;;  %v5972_v1 = vld [vmem:[#allocation4 + $0x754] ss:$8 sps:$4 sm:$0xff]   ;;  %v5967_v0 = vld [vmem:[#allocation2 + $0x750] ss:$8 sps:$4 sm:$0xff]  }
 0x268   : > { %3586 = vmatpush1.bf16.msra.mxu0 %v5877_v2  ;;  %3802 = vmatpush1.bf16.msra.mxu1 %v5880_v5  ;;  %v5970_v2 = vld [vmem:[#allocation4 + $0x750] ss:$8 sps:$4 sm:$0xff]   ;;  %v5975_v5 = vld [vmem:[#allocation2 + $0x764] ss:$8 sps:$4 sm:$0xff]  }
 0x269   : > { %3587 = vmatprep.subr.bf16.mxu0 %v5885_v10  ;;  %3803 = vmatprep.subr.bf16.mxu1 %v5888_v4  ;;  %v5978_v10 = vld [vmem:[#allocation4 + $0x764] ss:$8 sps:$4 sm:$0xff]   ;;  %v5973_v4 = vld [vmem:[#allocation2 + $0x760] ss:$8 sps:$4 sm:$0xff]  }
 0x26c   : > { %3588 = vmatpush1.bf16.msra.mxu0 %v5883_v11  ;;  %3804 = vmatpush1.bf16.msra.mxu1 %v5886_v12  ;;  %v5976_v11 = vld [vmem:[#allocation4 + $0x760] ss:$8 sps:$4 sm:$0xff]   ;;  %v5981_v12 = vld [vmem:[#allocation2 + $0x774] ss:$8 sps:$4 sm:$0xff]  }
 0x26d   : > { %3589 = vmatprep.subr.bf16.mxu0 %v5891_v13  ;;  %3805 = vmatprep.subr.bf16.mxu1 %v5894_v9  ;;  %v5984_v13 = vld [vmem:[#allocation4 + $0x774] ss:$8 sps:$4 sm:$0xff]   ;;  %v5979_v9 = vld [vmem:[#allocation2 + $0x770] ss:$8 sps:$4 sm:$0xff]  }
 0x270   : > { %3590 = vmatpush1.bf16.msra.mxu0 %v5889_v47  ;;  %3806 = vmatpush1.bf16.msra.mxu1 %v5892_v14  ;;  %v5982_v47 = vld [vmem:[#allocation4 + $0x770] ss:$8 sps:$4 sm:$0xff]   ;;  %v5987_v14 = vld [vmem:[#allocation2 + $0x784] ss:$8 sps:$4 sm:$0xff]  }
 0x271   : > { %3591 = vmatprep.subr.bf16.mxu0 %v5897_v15  ;;  %3807 = vmatprep.subr.bf16.mxu1 %v5900_v16  ;;  %v5990_v15 = vld [vmem:[#allocation4 + $0x784] ss:$8 sps:$4 sm:$0xff]   ;;  %v5985_v16 = vld [vmem:[#allocation2 + $0x780] ss:$8 sps:$4 sm:$0xff]  }
 0x274   : > { %3592 = vmatpush1.bf16.msra.mxu0 %v5895_v17  ;;  %3808 = vmatpush1.bf16.msra.mxu1 %v5898_v7  ;;  %v5988_v17 = vld [vmem:[#allocation4 + $0x780] ss:$8 sps:$4 sm:$0xff]   ;;  %v5993_v7 = vld [vmem:[#allocation2 + $0x794] ss:$8 sps:$4 sm:$0xff]  }
 0x275   : > { %3593 = vmatprep.subr.bf16.mxu0 %v5903_v18  ;;  %3809 = vmatprep.subr.bf16.mxu1 %v5906_v19  ;;  %v5996_v18 = vld [vmem:[#allocation4 + $0x794] ss:$8 sps:$4 sm:$0xff]   ;;  %v5991_v19 = vld [vmem:[#allocation2 + $0x790] ss:$8 sps:$4 sm:$0xff]  }
 0x278   : > { %3594 = vmatpush1.bf16.msra.mxu0 %v5901_v20  ;;  %3810 = vmatpush1.bf16.msra.mxu1 %v5904_v21  ;;  %v5994_v20 = vld [vmem:[#allocation4 + $0x790] ss:$8 sps:$4 sm:$0xff]   ;;  %v5999_v21 = vld [vmem:[#allocation2 + $0x7a4] ss:$8 sps:$4 sm:$0xff]  }
 0x279   : > { %3595 = vmatprep.subr.bf16.mxu0 %v5909_v22  ;;  %3811 = vmatprep.subr.bf16.mxu1 %v5912_v23  ;;  %v6002_v22 = vld [vmem:[#allocation4 + $0x7a4] ss:$8 sps:$4 sm:$0xff]   ;;  %v5997_v23 = vld [vmem:[#allocation2 + $0x7a0] ss:$8 sps:$4 sm:$0xff]  }
 0x27c   : > { %3596 = vmatpush1.bf16.msra.mxu0 %v5907_v24  ;;  %3812 = vmatpush1.bf16.msra.mxu1 %v5910_v8  ;;  %v6000_v24 = vld [vmem:[#allocation4 + $0x7a0] ss:$8 sps:$4 sm:$0xff]   ;;  %v6005_v8 = vld [vmem:[#allocation2 + $0x7b4] ss:$8 sps:$4 sm:$0xff]  }
 0x27d   : > { %3597 = vmatprep.subr.bf16.mxu0 %v5915_v25  ;;  %3813 = vmatprep.subr.bf16.mxu1 %v5918_v26  ;;  %v6008_v25 = vld [vmem:[#allocation4 + $0x7b4] ss:$8 sps:$4 sm:$0xff]   ;;  %v6003_v26 = vld [vmem:[#allocation2 + $0x7b0] ss:$8 sps:$4 sm:$0xff]  }
 0x280   : > { %3598 = vmatpush1.bf16.msra.mxu0 %v5913_v27  ;;  %3814 = vmatpush1.bf16.msra.mxu1 %v5916_v28  ;;  %v6006_v27 = vld [vmem:[#allocation4 + $0x7b0] ss:$8 sps:$4 sm:$0xff]   ;;  %v6011_v28 = vld [vmem:[#allocation2 + $0x7c4] ss:$8 sps:$4 sm:$0xff]  }
 0x281   : > { %3599 = vmatprep.subr.bf16.mxu0 %v5921_v29  ;;  %3815 = vmatprep.subr.bf16.mxu1 %v5924_v30  ;;  %v6014_v29 = vld [vmem:[#allocation4 + $0x7c4] ss:$8 sps:$4 sm:$0xff]   ;;  %v6009_v30 = vld [vmem:[#allocation2 + $0x7c0] ss:$8 sps:$4 sm:$0xff]  }
 0x284   : > { %3600 = vmatpush1.bf16.msra.mxu0 %v5919_v31  ;;  %3816 = vmatpush1.bf16.msra.mxu1 %v5922_v32  ;;  %v6012_v31 = vld [vmem:[#allocation4 + $0x7c0] ss:$8 sps:$4 sm:$0xff]   ;;  %v6017_v32 = vld [vmem:[#allocation2 + $0x7d4] ss:$8 sps:$4 sm:$0xff]  }
 0x285   : > { %3601 = vmatprep.subr.bf16.mxu0 %v5927_v33  ;;  %3817 = vmatprep.subr.bf16.mxu1 %v5930_v34  ;;  %v6020_v33 = vld [vmem:[#allocation4 + $0x7d4] ss:$8 sps:$4 sm:$0xff]   ;;  %v6015_v34 = vld [vmem:[#allocation2 + $0x7d0] ss:$8 sps:$4 sm:$0xff]  }
 0x288   : > { %3602 = vmatpush1.bf16.msra.mxu0 %v5925_v35  ;;  %3818 = vmatpush1.bf16.msra.mxu1 %v5928_v36  ;;  %v6018_v35 = vld [vmem:[#allocation4 + $0x7d0] ss:$8 sps:$4 sm:$0xff]   ;;  %v3870_v36 = vpop.permute.xlu0 %3869 }
 0x289   : > { %3603 = vmatprep.subr.bf16.mxu0 %v5933_v37  ;;  %3819 = vmatprep.subr.bf16.mxu1 %v5936_v38  ;;  %v3873_v37 = vsel %vm560_vm0, %v3870_v36, %v6496_v51  ;;  %v6190_v38 = vmov 0.0  }
 0x28c   : > { %3604 = vmatpush1.bf16.msra.mxu0 %v5931_v39  ;;  %3820 = vmatpush1.bf16.msra.mxu1 %v5934_v40  ;;  %v4287_v39 = vlaneseq }
 0x28d   : > { %4018 = vmatprep.subr.bf16.mxu0 %v5939_v42  ;;  %4234 = vmatprep.subr.bf16.mxu1 %v5942_v43  ;;  %v4285_v42 = vld [vmem:[#allocation6] sm:$0x3] }
 0x28e   : > { %v4288_v40 = vshrl.u32 %v4287_v39, 7 }
 0x28f   : > { %3610 = vmatmul.mubr.bf16.vlgmr.msra.gmra.mrb[0].mxu0 %v3432_v44  ;;  %3826 = vmatmul.mubr.bf16.vlgmr.msra.gmra.mrb[0].mxu1 %v3432_v44 }
 0x290   : > { %4019 = vmatpush1.bf16.msra.mxu0 %v5937_v45  ;;  %4235 = vmatpush1.bf16.msra.mxu1 %v5940_v46  ;;  %v4289_v41 = vsub.s32 0, %v4288_v40  ;;  %v4293_v43 = vsub.s32 1, %v4288_v40 }
 0x291   : > { %4020 = vmatprep.subr.bf16.mxu0 %v5945_v49  ;;  %4236 = vmatprep.subr.bf16.mxu1 %v5948_v50 }
 0x292   : > { %5084 = vmatprep.mubr.msk.bf16.mxu0 %vm560_vm0, %v6496_v51  ;;  %5113 = vmatprep.mubr.msk.bf16.mxu1 %vm560_vm0, %v6496_v51  ;;  %v4290_v44 = vrot.slane %v4285_v42, %v4289_v41  ;;  %v4294_v49 = vrot.slane %v4285_v42, %v4293_v43 }
 0x294   : > { %4021 = vmatpush1.bf16.msra.mxu0 %v5943_v52  ;;  %4237 = vmatpush1.bf16.msra.mxu1 %v5946_v3 }
 0x295   : > { %4022 = vmatprep.subr.bf16.mxu0 %v5951_v6  ;;  %4238 = vmatprep.subr.bf16.mxu1 %v5954_v53 }
 0x298   : > { %4023 = vmatpush1.bf16.msra.mxu0 %v5949_v54  ;;  %4239 = vmatpush1.bf16.msra.mxu1 %v5952_v55 }
 0x299   : > { %4024 = vmatprep.subr.bf16.mxu0 %v5957_v56  ;;  %4240 = vmatprep.subr.bf16.mxu1 %v5960_v57 }
 0x29c   : > { %4025 = vmatpush1.bf16.msra.mxu0 %v5955_v58  ;;  %4241 = vmatpush1.bf16.msra.mxu1 %v5958_v59 }
 0x29d   : > { %4026 = vmatprep.subr.bf16.mxu0 %v5963_v48  ;;  %4242 = vmatprep.subr.bf16.mxu1 %v5966_v60 }
 0x2a0   : > { %4027 = vmatpush1.bf16.msra.mxu0 %v5961_v61  ;;  %4243 = vmatpush1.bf16.msra.mxu1 %v5964_v62 }
 0x2a1   : > { %4028 = vmatprep.subr.bf16.mxu0 %v5969_v63  ;;  %4244 = vmatprep.subr.bf16.mxu1 %v5972_v1 }
 0x2a4   : > { %4029 = vmatpush1.bf16.msra.mxu0 %v5967_v0  ;;  %4245 = vmatpush1.bf16.msra.mxu1 %v5970_v2 }
 0x2a5   : > { %4030 = vmatprep.subr.bf16.mxu0 %v5975_v5  ;;  %4246 = vmatprep.subr.bf16.mxu1 %v5978_v10  ;;  %v4305_v5 = vld [vmem:[#allocation7] sm:$0x7f]  ;;  %v4388_v10 = vld [vmem:[#allocation9] sm:$0x7f] }
 0x2a8   : > { %4031 = vmatpush1.bf16.msra.mxu0 %v5973_v4  ;;  %4247 = vmatpush1.bf16.msra.mxu1 %v5976_v11 }
 0x2a9   : > { %4032 = vmatprep.subr.bf16.mxu0 %v5981_v12  ;;  %4248 = vmatprep.subr.bf16.mxu1 %v5984_v13 }
 0x2ac   : > { %4033 = vmatpush1.bf16.msra.mxu0 %v5979_v9  ;;  %4249 = vmatpush1.bf16.msra.mxu1 %v5982_v47 }
 0x2ad   : > { %4034 = vmatprep.subr.bf16.mxu0 %v5987_v14  ;;  %4250 = vmatprep.subr.bf16.mxu1 %v5990_v15 }
 0x2b0   : > { %4035 = vmatpush1.bf16.msra.mxu0 %v5985_v16  ;;  %4251 = vmatpush1.bf16.msra.mxu1 %v5988_v17 }
 0x2b1   : > { %4036 = vmatprep.subr.bf16.mxu0 %v5993_v7  ;;  %4252 = vmatprep.subr.bf16.mxu1 %v5996_v18 }
 0x2b4   : > { %4037 = vmatpush1.bf16.msra.mxu0 %v5991_v19  ;;  %4253 = vmatpush1.bf16.msra.mxu1 %v5994_v20 }
 0x2b5   : > { %4038 = vmatprep.subr.bf16.mxu0 %v5999_v21  ;;  %4254 = vmatprep.subr.bf16.mxu1 %v6002_v22 }
 0x2b8   : > { %4039 = vmatpush1.bf16.msra.mxu0 %v5997_v23  ;;  %4255 = vmatpush1.bf16.msra.mxu1 %v6000_v24 }
 0x2b9   : > { %4040 = vmatprep.subr.bf16.mxu0 %v6005_v8  ;;  %4256 = vmatprep.subr.bf16.mxu1 %v6008_v25 }
 0x2bc   : > { %4041 = vmatpush1.bf16.msra.mxu0 %v6003_v26  ;;  %4257 = vmatpush1.bf16.msra.mxu1 %v6006_v27 }
 0x2bd   : > { %4042 = vmatprep.subr.bf16.mxu0 %v6011_v28  ;;  %4258 = vmatprep.subr.bf16.mxu1 %v6014_v29 }
 0x2c0   : > { %4043 = vmatpush1.bf16.msra.mxu0 %v6009_v30  ;;  %4259 = vmatpush1.bf16.msra.mxu1 %v6012_v31 }
 0x2c1   : > { %4044 = vmatprep.subr.bf16.mxu0 %v6017_v32  ;;  %4260 = vmatprep.subr.bf16.mxu1 %v6020_v33 }
 0x2c4   : > { %4045 = vmatpush1.bf16.msra.mxu0 %v6015_v34  ;;  %4261 = vmatpush1.bf16.msra.mxu1 %v6018_v35 }
 0x2c7   : > { %4051 = vmatmul.mubr.bf16.vlgmr.msra.gmra.mrb[0].mxu0 %v3873_v37  ;;  %4267 = vmatmul.mubr.bf16.vlgmr.msra.gmra.mrb[0].mxu1 %v3873_v37 }
 0x2c8   : > { %4381 = vmatprep.mubr.f32.mxu0 %v6190_v38  ;;  %4456 = vmatprep.mubr.f32.mxu1 %v6190_v38 }
 0x39a   : > { %v4052_v45 = vpop.f32.mrb[0].mxu0  ;;  %v4268_v46 = vpop.f32.mrb[0].mxu1 }
 0x39b   : > { %v4281_v50 = vmax.f32 %v4052_v45, %v4268_v46  ;;  %v4054_v52 = vpop.f32.mrb[1].mxu0  ;;  %v4270_v3 = vpop.f32.mrb[1].mxu1 }
 0x39c   : > { %v4282_v6 = vmax.f32 %v4054_v52, %v4270_v3  ;;  %v4056_v53 = vpop.f32.mrb[2].mxu0  ;;  %v4272_v51 = vpop.f32.mrb[2].mxu1 }
 0x39d   : > { %v4297_v54 = vadd.f32 %v4290_v44, %v4281_v50  ;;  %v4283_v55 = vmax.f32 %v4056_v53, %v4272_v51  ;;  %v4058_v56 = vpop.f32.mrb[3].mxu0  ;;  %v4274_v57 = vpop.f32.mrb[3].mxu1 }
 0x39e   : > { %v4298_v58 = vadd.f32 %v4294_v49, %v4282_v6  ;;  %v4284_v59 = vmax.f32 %v4058_v56, %v4274_v57 }
 0x39f   : > { %v4299_v48 = vadd.f32 %v4290_v44, %v4283_v55  ;;  %v4301_v61 = vmax.f32 %v4297_v54, 0.0 }
 0x3a0   : > { %v4300_v60 = vadd.f32 %v4294_v49, %v4284_v59  ;;  %v4302_v63 = vmax.f32 %v4298_v58, 0.0 }
 0x3a1   : > { %v4303_v62 = vmax.f32 %v4299_v48, 0.0 }
 0x3a2   : > { %v4304_v1 = vmax.f32 %v4300_v60, 0.0 }
 0x3a3   : > { %v5127_v0 = vpack.c.bf16 %v4303_v62, %v4301_v61 }
 0x3a4   : > { %v5124_v2 = vpack.c.bf16 %v4304_v1, %v4302_v63 }
 0x3a6   : > { %5126 = vmatprep.subr.msk.bf16.mxu0 %vm5125_vm4, %v5124_v2  ;;  %5132 = vmatprep.subr.msk.bf16.mxu1 %vm5125_vm4, %v5124_v2 }
 0x3a7   : > { %5129 = vmatpush1.bf16.msk.msra.mxu0 %vm5125_vm4, %v5127_v0  ;;  %5135 = vmatpush1.bf16.msk.msra.mxu1 %vm5125_vm4, %v5127_v0 }
 0x3aa   : > { %5116 = vmatmul.mubr.msk.f32.vlgmr.msra.gmra.mrb[4].mxu0 %vm4306_vm5, %v4305_v5  ;;  %5119 = vmatmul.mubr.msk.f32.vlgmr.msra.gmra.mrb[4].mxu1 %vm4306_vm5, %v4388_v10 }
 0x47d   : > { %v4383_v4 = vpop.f32.mrb[4].mxu0  ;;  %v4458_v11 = vpop.f32.mrb[4].mxu1 }
 0x47e   : > { %v4463_v12 = vmax.f32 %v4383_v4, %v4458_v11  ;;  %v4385_v13 = vpop.f32.mrb[5].mxu0  ;;  %v4460_v9 = vpop.f32.mrb[5].mxu1 }
 0x47f   : > { %v4464_v47 = vmax.f32 %v4385_v13, %v4460_v9 }
 0x480   : > { %4465 = vst [vmem:[%s318_s18] sm:$0x7f] %v4463_v12 }
 0x481   : > { %4467 = vst.msk [vmem:[%s318_s18 + $0x8] sm:$0x7f] %vm4466_vm6, %v4464_v47 }
 0x482 PF: > { %s19_s21 = sadd.s32 1, %s6179_s21  }
 0x483   : > { %p16_p6 = scmp.ge.s32.totalorder %s19_s21, 4  }
 0x485   :  { %18 = sbr.rel (!%p16_p6) target bundleno = 3 (0x3), region = 111 }
 0x48c   :  { %4489 = vsyncpa [#allocation3], 1 }
 0x48d   :  { %4491 = vsyncpa [#allocation3 + $0x1], 1 }
 0x48e   :  { %4492 = vsyncpa [#allocation5], 1 }
 0x48f   :  { %4493 = vsyncpa [#allocation8], 1 }

// kernel: convnet_forward.5
= control target key start
LH: loop header
LB: loop body
LE: loop exit
PB: predicated region body
PF: predicated region fallthrough
CT: control target
= control target key end

     0   :  { %10 = vsyncpa [#allocation3], 0  ;;  %s10852_s0 = inlined_call_operand.vmem [shape: bf16[2,1568], index: 0, kind: input, shape index: {}]   ;;  %s10853_s1 = inlined_call_operand.vmem [shape: bf16[1568,896], index: 1, kind: input, shape index: {}]   ;;  %s10854_s2 = inlined_call_operand.hbm [shape: f32[1,896], index: 2, kind: input, shape index: {}]   ;;  %s10855_s3 = inlined_call_operand.hbm [shape: bf16[896,128], index: 3, kind: input, shape index: {}]   ;;  %s10856_s4 = inlined_call_operand.hbm [shape: f32[1,128], index: 4, kind: input, shape index: {}]   ;;  %s10857_s5 = inlined_call_operand.hbm [shape: f32[2,128], index: 5, kind: output, shape index: {}]  }
   0x1   :  { %11 = vsyncpa [#allocation6], 0 }
   0x2   :  { %12 = vsyncpa [#allocation4], 0  ;;  %s8517_s18 = smov [#allocation5]   ;;  %s8423_s22 = scalar_lea.hbm %s10855_s3, 7168 }
   0x3   :  { %s32_s19 = sshll.u32 %s8517_s18, 4  ;;  %p8424_p0 = scmp.ne.s32.totalorder %s10855_s3, %s8423_s22  ;;  %s33_s19 = int_to_ptr.vmem [resolvable:$true] %s32_s19 }
   0x4   :  { %p8427_p1 = scmp.lt.u32.totalorder %s8423_s22, %s10855_s3 }
   0x6   :  { %p8429_p2 = pnand %p8427_p1, %p8424_p0 }
   0x8   :  { %8432 = shalt.err (!%p8429_p2)
}
   0x9   :  { %s8433_s27 = scalar_lea.vmem %s33_s19, 7168  ;;  %p8438_p4 = scmp.lt.s32.totalorder %s33_s19, %s33_s19 }
   0xa   :  { %p8434_p3 = scmp.ne.s32.totalorder %s33_s19, %s8433_s27  ;;  %p8439_p5 = scmp.lt.s32.totalorder %s8433_s27, %s8433_s27 }
   0xc   :  { %p8440_p6 = por %p8439_p5, %p8438_p4 }
   0xe   :  { %p8441_p7 = pnand %p8440_p6, %p8434_p3 }
  0x10   :  { %8444 = shalt.err (!%p8441_p7)
}
  0x11   :  { %s8518_s28 = smov 64   ;;  %s8519_s29 = smov 4  }
  0x12   :  { %38 = dma.hbm_to_vmem [thread:$0]  %s10855_s3, 7168, %s33_s19, [#allocation6], %s8518_s28, %s8518_s28, %s8519_s29  }
  0x13   :  { %s8520_s7 = smov [#allocation2]   ;;  %s8521_s9 = smov [#allocation7]  }
  0x14   :  { %s23_s8 = sshll.u32 %s8520_s7, 4  ;;  %s45_s10 = sshll.u32 %s8521_s9, 4  ;;  %s24_s8 = int_to_ptr.vmem [resolvable:$true] %s23_s8  ;;  %s46_s10 = int_to_ptr.vmem [resolvable:$true] %s45_s10 }
  0x15   :  { %s8445_s13 = scalar_lea.hbm %s10854_s2, 112 }
  0x16   :  { %p8446_p8 = scmp.ne.s32.totalorder %s10854_s2, %s8445_s13  ;;  %p8449_p9 = scmp.lt.u32.totalorder %s8445_s13, %s10854_s2 }
  0x18   :  { %p8451_p10 = pnand %p8449_p9, %p8446_p8 }
  0x1a   :  { %8454 = shalt.err (!%p8451_p10)
}
  0x1b   :  { %s8455_s3 = scalar_lea.vmem %s24_s8, 112  ;;  %s8459_s18 = scalar_lea.vmem %s24_s8, 128 }
  0x1c   :  { %p8456_p11 = scmp.ne.s32.totalorder %s24_s8, %s8455_s3  ;;  %p8460_p12 = scmp.lt.s32.totalorder %s24_s8, %s24_s8 }
  0x1d   :  { %p8461_p13 = scmp.lt.s32.totalorder %s8459_s18, %s8455_s3 }
  0x1f   :  { %p8462_p0 = por %p8461_p13, %p8460_p12 }
  0x21   :  { %p8463_p1 = pnand %p8462_p0, %p8456_p11 }
  0x23   :  { %8466 = shalt.err (!%p8463_p1)
}
  0x24   :  { %26 = dma.hbm_to_vmem [thread:$0]  %s10854_s2, 112, %s24_s8, [#allocation3]  }
  0x25   :  { %s8467_s23 = scalar_lea.hbm %s10856_s4, 16 }
  0x26   :  { %p8468_p2 = scmp.ne.s32.totalorder %s10856_s4, %s8467_s23  ;;  %p8471_p3 = scmp.lt.u32.totalorder %s8467_s23, %s10856_s4 }
  0x28   :  { %p8473_p4 = pnand %p8471_p3, %p8468_p2 }
  0x2a   :  { %8476 = shalt.err (!%p8473_p4)
}
  0x2b   :  { %s8477_s28 = scalar_lea.vmem %s46_s10, 16  ;;  %s8481_s29 = scalar_lea.vmem %s46_s10, 32 }
  0x2c   :  { %p8478_p5 = scmp.ne.s32.totalorder %s46_s10, %s8477_s28  ;;  %p8482_p6 = scmp.lt.s32.totalorder %s46_s10, %s46_s10 }
  0x2d   :  { %p8483_p7 = scmp.lt.s32.totalorder %s8481_s29, %s8477_s28 }
  0x2f   :  { %p8484_p8 = por %p8483_p7, %p8482_p6 }
  0x31   :  { %p8485_p9 = pnand %p8484_p8, %p8478_p5 }
  0x33   :  { %8488 = shalt.err (!%p8485_p9)
}
  0x34   :  { %48 = dma.hbm_to_vmem [thread:$0]  %s10856_s4, 16, %s46_s10, [#allocation6]  }
  0x35   :  { %8511 = dma.done.wait [#allocation3], 112  }
  0x36   :  { %8512 = vsyncadd [#allocation3], 4294967184 }
  0x37   :  { %8513 = dma.done.wait [#allocation6], 7184  }
  0x38   :  { %8514 = vsyncadd [#allocation6], 4294960112  ;;  %v8522_v0 = vmov 0   ;;  %v847_v1 = vlaneseq  ;;  %v8523_v2 = vmov 1966171168   ;;  %vm4512_vm0 = vcmask 261120  }
  0x39   :  { %4794 = vmatprep.mubr.bf16.mxu1 %v8522_v0  ;;  %v886_v3 = vunpack.c.l.s4 %v8523_v2  ;;  %v7379_v4 = vld [vmem:[%s10853_s1 + $0x4] ss:$28 sps:$4 sm:$0xff]   ;;  %v7385_v8 = vld [vmem:[%s10853_s1 + $0x3c] ss:$28 sps:$4 sm:$0xff]   ;;  %v7391_v14 = vld [vmem:[%s10853_s1 + $0x74] ss:$28 sps:$4 sm:$0xff]  }
  0x3a   :  { %v7381_v5 = vld [vmem:[%s10853_s1 + $0x1504] ss:$28 sps:$4 sm:$0xff]   ;;  %4516 = vmatprep.subr.bf16.mxu0 %v7379_v4  ;;  %v8609_v9 = vshrl.u32 %v847_v1, 7  ;;  %v7387_v11 = vld [vmem:[%s10853_s1 + $0x153c] ss:$28 sps:$4 sm:$0xff]   ;;  %vm8525_vm1 = vmmov 0  }
  0x3b   :  { %v7383_v6 = vld [vmem:[%s10853_s1] ss:$28 sps:$4 sm:$0xff]   ;;  %4762 = vmatprep.subr.bf16.mxu1 %v7381_v5  ;;  %v887_v10 = vunpack.c.0.s8 %v886_v3  ;;  %v7389_v12 = vld [vmem:[%s10853_s1 + $0x38] ss:$28 sps:$4 sm:$0xff]   ;;  %v7395_v15 = vld [vmem:[%s10853_s1 + $0xc] ss:$28 sps:$4 sm:$0xff]  }
  0x3c   :  { %v7384_v7 = vld [vmem:[%s10853_s1 + $0x1500] ss:$28 sps:$4 sm:$0xff]   ;;  %4517 = vmatpush1.bf16.msra.mxu0 %v7383_v6  ;;  %v7390_v13 = vld [vmem:[%s10853_s1 + $0x1538] ss:$28 sps:$4 sm:$0xff]   ;;  %v7396_v16 = vld [vmem:[%s10853_s1 + $0x70] ss:$28 sps:$4 sm:$0xff]  }
  0x3d   :  { %4763 = vmatpush1.bf16.msra.mxu1 %v7384_v7  ;;  %4518 = vmatprep.subr.bf16.mxu0 %v7385_v8  ;;  %v8630_v17 = vsub.s32 %v887_v10, %v8609_v9  ;;  %v60_v18 = vld [vmem:[%s10852_s0 + $0x8] sm:$0x1f]  ;;  %v7402_v25 = vld [vmem:[%s10853_s1 + $0x44] ss:$28 sps:$4 sm:$0xff]   ;;  %v7408_v28 = vld [vmem:[%s10853_s1 + $0x7c] ss:$28 sps:$4 sm:$0xff]  }
  0x3e   :  { %4764 = vmatprep.subr.bf16.mxu1 %v7387_v11  ;;  %v933_v19 = vcombine.high %v60_v18, %v60_v18  ;;  %v7398_v20 = vld [vmem:[%s10853_s1 + $0xac] ss:$28 sps:$4 sm:$0xff]   ;;  %v7404_v26 = vld [vmem:[%s10853_s1 + $0xe4] ss:$28 sps:$4 sm:$0xff]   ;;  %v7410_v30 = vld [vmem:[%s10853_s1 + $0x11c] ss:$28 sps:$4 sm:$0xff]  }
  0x3f   :  { %v7393_v21 = vld [vmem:[%s10853_s1 + $0x8] ss:$28 sps:$4 sm:$0xff]   ;;  %v7400_v27 = vld [vmem:[%s10853_s1 + $0x40] ss:$28 sps:$4 sm:$0xff]   ;;  %v7406_v31 = vld [vmem:[%s10853_s1 + $0x78] ss:$28 sps:$4 sm:$0xff]  }
  0x40   :  { %4519 = vmatpush1.bf16.msra.mxu0 %v7389_v12  ;;  %v947_v22 = vrot.slane %v933_v19, %v8630_v17  ;;  %v7403_v23 = vld [vmem:[%s10853_s1 + $0xa8] ss:$28 sps:$4 sm:$0xff]   ;;  %v7409_v29 = vld [vmem:[%s10853_s1 + $0xe0] ss:$28 sps:$4 sm:$0xff]   ;;  %v7415_v32 = vld [vmem:[%s10853_s1 + $0x118] ss:$28 sps:$4 sm:$0xff]  }
  0x41   :  { %4765 = vmatpush1.bf16.msra.mxu1 %v7390_v13  ;;  %4520 = vmatprep.subr.bf16.mxu0 %v7391_v14  ;;  %v7414_v33 = vld [vmem:[%s10853_s1 + $0xb4] ss:$28 sps:$4 sm:$0xff]   ;;  %v7420_v36 = vld [vmem:[%s10853_s1 + $0xec] ss:$28 sps:$4 sm:$0xff]   ;;  %v7426_v41 = vld [vmem:[%s10853_s1 + $0x124] ss:$28 sps:$4 sm:$0xff]  }
  0x42   :  { %4803 = vmatprep.subr.bf16.mxu1 %v7395_v15  ;;  %v8646_v24 = vrot.slane %v947_v22, %v8630_v17  ;;  %v7416_v34 = vld [vmem:[%s10853_s1 + $0x154] ss:$28 sps:$4 sm:$0xff]   ;;  %v7422_v38 = vld [vmem:[%s10853_s1 + $0x18c] ss:$28 sps:$4 sm:$0xff]   ;;  %v7428_v42 = vld [vmem:[%s10853_s1 + $0x1c4] ss:$28 sps:$4 sm:$0xff]  }
  0x43   :  { %v7412_v35 = vld [vmem:[%s10853_s1 + $0xb0] ss:$28 sps:$4 sm:$0xff]   ;;  %v7418_v39 = vld [vmem:[%s10853_s1 + $0xe8] ss:$28 sps:$4 sm:$0xff]   ;;  %v7424_v43 = vld [vmem:[%s10853_s1 + $0x120] ss:$28 sps:$4 sm:$0xff]  }
  0x44   :  { %4521 = vmatpush1.bf16.msra.mxu0 %v7396_v16  ;;  %6996 = vmatmul.mubr.msk.bf16.vlgmr.msra.gmra.mrb[0].mxu1 %vm4512_vm0, %v8646_v24  ;;  %v7421_v37 = vld [vmem:[%s10853_s1 + $0x150] ss:$28 sps:$4 sm:$0xff]   ;;  %v7427_v40 = vld [vmem:[%s10853_s1 + $0x188] ss:$28 sps:$4 sm:$0xff]   ;;  %v7432_v44 = vld [vmem:[%s10853_s1 + $0x15c] ss:$28 sps:$4 sm:$0xff]  }
  0x45   :  { %4522 = vmatprep.subr.bf16.mxu0 %v7398_v20  ;;  %4804 = vmatpush1.bf16.msra.mxu1 %v7393_v21  ;;  %v7433_v45 = vld [vmem:[%s10853_s1 + $0x1c0] ss:$28 sps:$4 sm:$0xff]   ;;  %v7430_v47 = vld [vmem:[%s10853_s1 + $0x158] ss:$28 sps:$4 sm:$0xff]   ;;  %v7436_v51 = vld [vmem:[%s10853_s1 + $0x190] ss:$28 sps:$4 sm:$0xff]  }
  0x46   :  { %4805 = vmatprep.subr.bf16.mxu1 %v7402_v25  ;;  %v7434_v46 = vld [vmem:[%s10853_s1 + $0x1fc] ss:$28 sps:$4 sm:$0xff]   ;;  %v7438_v49 = vld [vmem:[%s10853_s1 + $0x194] ss:$28 sps:$4 sm:$0xff]   ;;  %v7444_v52 = vld [vmem:[%s10853_s1 + $0x1cc] ss:$28 sps:$4 sm:$0xff]  }
  0x47   :  { %v7439_v48 = vld [vmem:[%s10853_s1 + $0x1f8] ss:$28 sps:$4 sm:$0xff]   ;;  %v7445_v53 = vld [vmem:[%s10853_s1 + $0x230] ss:$28 sps:$4 sm:$0xff]   ;;  %v8743_v55 = vld [vmem:[%s10852_s0] sm:$0xff]  ;;  %vm6279_vm2 = vcmask 1041408  }
  0x48   :  { %4523 = vmatpush1.bf16.msra.mxu0 %v7403_v23  ;;  %v7440_v50 = vld [vmem:[%s10853_s1 + $0x234] ss:$28 sps:$4 sm:$0xff]   ;;  %v7446_v54 = vld [vmem:[%s10853_s1 + $0x26c] ss:$28 sps:$4 sm:$0xff]   ;;  %v891_v58 = vrot.slane %v8743_v55, %v8630_v17  ;;  %v7450_v59 = vld [vmem:[%s10853_s1 + $0x204] ss:$28 sps:$4 sm:$0xff]  }
  0x49   :  { %4524 = vmatprep.subr.bf16.mxu0 %v7404_v26  ;;  %4806 = vmatpush1.bf16.msra.mxu1 %v7400_v27  ;;  %v7442_v56 = vld [vmem:[%s10853_s1 + $0x1c8] ss:$28 sps:$4 sm:$0xff]   ;;  %v7448_v62 = vld [vmem:[%s10853_s1 + $0x200] ss:$28 sps:$4 sm:$0xff]   ;;  %v7454_v4 = vld [vmem:[%s10853_s1 + $0x238] ss:$28 sps:$4 sm:$0xff]  }
  0x4a   :  { %4807 = vmatprep.subr.bf16.mxu1 %v7408_v28  ;;  %v7451_v57 = vld [vmem:[%s10853_s1 + $0x268] ss:$28 sps:$4 sm:$0xff]   ;;  %v899_v61 = vcombine.high %v891_v58, %v891_v58  ;;  %v7457_v63 = vld [vmem:[%s10853_s1 + $0x2a0] ss:$28 sps:$4 sm:$0xff]   ;;  %v7463_v5 = vld [vmem:[%s10853_s1 + $0x2d8] ss:$28 sps:$4 sm:$0xff]   ;;  %v8813_v18 = vrot.slane %v891_v58, %v8630_v17 }
  0x4b   :  { %v7452_v60 = vld [vmem:[%s10853_s1 + $0x2a4] ss:$28 sps:$4 sm:$0xff]   ;;  %v7456_v2 = vld [vmem:[%s10853_s1 + $0x23c] ss:$28 sps:$4 sm:$0xff]   ;;  %v7462_v6 = vld [vmem:[%s10853_s1 + $0x274] ss:$28 sps:$4 sm:$0xff]  }
  0x4c   :  { %4525 = vmatpush1.bf16.msra.mxu0 %v7409_v29  ;;  %v8766_v1 = vrot.slane %v899_v61, %v8630_v17  ;;  %v7458_v3 = vld [vmem:[%s10853_s1 + $0x2dc] ss:$28 sps:$4 sm:$0xff]   ;;  %v7464_v7 = vld [vmem:[%s10853_s1 + $0x314] ss:$28 sps:$4 sm:$0xff]   ;;  %v7468_v11 = vld [vmem:[%s10853_s1 + $0x2ac] ss:$28 sps:$4 sm:$0xff]  }
  0x4d   :  { %4526 = vmatprep.subr.bf16.mxu0 %v7410_v30  ;;  %4808 = vmatpush1.bf16.msra.mxu1 %v7406_v31  ;;  %v7460_v8 = vld [vmem:[%s10853_s1 + $0x270] ss:$28 sps:$4 sm:$0xff]   ;;  %v7466_v13 = vld [vmem:[%s10853_s1 + $0x2a8] ss:$28 sps:$4 sm:$0xff]   ;;  %v7472_v19 = vld [vmem:[%s10853_s1 + $0x2e0] ss:$28 sps:$4 sm:$0xff]  }
  0x4e   :  { %4809 = vmatprep.subr.bf16.mxu1 %v7414_v33  ;;  %4548 = vmatprep.mubr.bf16.mxu0 %v8766_v1  ;;  %v7469_v10 = vld [vmem:[%s10853_s1 + $0x310] ss:$28 sps:$4 sm:$0xff]   ;;  %v7475_v14 = vld [vmem:[%s10853_s1 + $0x348] ss:$28 sps:$4 sm:$0xff]   ;;  %v7476_v20 = vld [vmem:[%s10853_s1 + $0x380] ss:$28 sps:$4 sm:$0xff]   ;;  %v8829_v23 = vcombine.high %v8766_v1, %v8766_v1 }
  0x4f   :  { %4835 = vmatprep.mubr.bf16.mxu1 %v8766_v1  ;;  %v7470_v12 = vld [vmem:[%s10853_s1 + $0x34c] ss:$28 sps:$4 sm:$0xff]   ;;  %v7474_v15 = vld [vmem:[%s10853_s1 + $0x2e4] ss:$28 sps:$4 sm:$0xff]   ;;  %v7481_v21 = vld [vmem:[%s10853_s1 + $0x31c] ss:$28 sps:$4 sm:$0xff]  }
  0x50   :  { %4527 = vmatpush1.bf16.msra.mxu0 %v7415_v32  ;;  %v7478_v16 = vld [vmem:[%s10853_s1 + $0x384] ss:$28 sps:$4 sm:$0xff]   ;;  %v7484_v22 = vld [vmem:[%s10853_s1 + $0x3bc] ss:$28 sps:$4 sm:$0xff]   ;;  %v7487_v27 = vld [vmem:[%s10853_s1 + $0x354] ss:$28 sps:$4 sm:$0xff]  }
  0x51   :  { %4528 = vmatprep.subr.bf16.mxu0 %v7416_v34  ;;  %4810 = vmatpush1.bf16.msra.mxu1 %v7412_v35  ;;  %v7479_v25 = vld [vmem:[%s10853_s1 + $0x318] ss:$28 sps:$4 sm:$0xff]   ;;  %v7485_v29 = vld [vmem:[%s10853_s1 + $0x350] ss:$28 sps:$4 sm:$0xff]   ;;  %v7491_v33 = vld [vmem:[%s10853_s1 + $0x388] ss:$28 sps:$4 sm:$0xff]  }
  0x52   :  { %4811 = vmatprep.subr.bf16.mxu1 %v7420_v36  ;;  %v7482_v26 = vld [vmem:[%s10853_s1 + $0x3b8] ss:$28 sps:$4 sm:$0xff]   ;;  %v7488_v30 = vld [vmem:[%s10853_s1 + $0x3f0] ss:$28 sps:$4 sm:$0xff]   ;;  %v7494_v34 = vld [vmem:[%s10853_s1 + $0x428] ss:$28 sps:$4 sm:$0xff]  }
  0x53   :  { %v7490_v28 = vld [vmem:[%s10853_s1 + $0x3f4] ss:$28 sps:$4 sm:$0xff]   ;;  %v7493_v31 = vld [vmem:[%s10853_s1 + $0x38c] ss:$28 sps:$4 sm:$0xff]   ;;  %v7499_v35 = vld [vmem:[%s10853_s1 + $0x3c4] ss:$28 sps:$4 sm:$0xff]  }
  0x54   :  { %4529 = vmatpush1.bf16.msra.mxu0 %v7421_v37  ;;  %v7496_v32 = vld [vmem:[%s10853_s1 + $0x42c] ss:$28 sps:$4 sm:$0xff]   ;;  %v7502_v36 = vld [vmem:[%s10853_s1 + $0x464] ss:$28 sps:$4 sm:$0xff]   ;;  %v7527_v58 = vld [vmem:[%s10853_s1 + $0x4d8] ss:$28 sps:$4 sm:$0xff]  }
  0x55   :  { %4530 = vmatprep.subr.bf16.mxu0 %v7422_v38  ;;  %4812 = vmatpush1.bf16.msra.mxu1 %v7418_v39  ;;  %v7497_v37 = vld [vmem:[%s10853_s1 + $0x3c0] ss:$28 sps:$4 sm:$0xff]   ;;  %v7538_v61 = vld [vmem:[%s10853_s1 + $0x5b4] ss:$28 sps:$4 sm:$0xff]  }
  0x56   :  { %4813 = vmatprep.subr.bf16.mxu1 %v7426_v41  ;;  %v7500_v38 = vld [vmem:[%s10853_s1 + $0x460] ss:$28 sps:$4 sm:$0xff]   ;;  %v7503_v41 = vld [vmem:[%s10853_s1 + $0x3f8] ss:$28 sps:$4 sm:$0xff]  }
  0x57   :  { %v7505_v39 = vld [vmem:[%s10853_s1 + $0x3fc] ss:$28 sps:$4 sm:$0xff]  }
  0x58   :  { %4531 = vmatpush1.bf16.msra.mxu0 %v7427_v40  ;;  %v7508_v40 = vld [vmem:[%s10853_s1 + $0x49c] ss:$28 sps:$4 sm:$0xff]  }
  0x59   :  { %4532 = vmatprep.subr.bf16.mxu0 %v7428_v42  ;;  %4814 = vmatpush1.bf16.msra.mxu1 %v7424_v43  ;;  %v7506_v42 = vld [vmem:[%s10853_s1 + $0x498] ss:$28 sps:$4 sm:$0xff]  }
  0x5a   :  { %4815 = vmatprep.subr.bf16.mxu1 %v7432_v44  ;;  %v7511_v43 = vld [vmem:[%s10853_s1 + $0x434] ss:$28 sps:$4 sm:$0xff]  }
  0x5b   :  { %v7514_v44 = vld [vmem:[%s10853_s1 + $0x4d4] ss:$28 sps:$4 sm:$0xff]  }
  0x5c   :  { %4533 = vmatpush1.bf16.msra.mxu0 %v7433_v45  ;;  %v7509_v45 = vld [vmem:[%s10853_s1 + $0x430] ss:$28 sps:$4 sm:$0xff]  }
  0x5d   :  { %4534 = vmatprep.subr.bf16.mxu0 %v7434_v46  ;;  %4816 = vmatpush1.bf16.msra.mxu1 %v7430_v47  ;;  %v7512_v46 = vld [vmem:[%s10853_s1 + $0x4d0] ss:$28 sps:$4 sm:$0xff]  }
  0x5e   :  { %4817 = vmatprep.subr.bf16.mxu1 %v7438_v49  ;;  %v7517_v47 = vld [vmem:[%s10853_s1 + $0x46c] ss:$28 sps:$4 sm:$0xff]  }
  0x5f   :  { %v7515_v49 = vld [vmem:[%s10853_s1 + $0x468] ss:$28 sps:$4 sm:$0xff]  }
  0x60   :  { %4535 = vmatpush1.bf16.msra.mxu0 %v7439_v48  ;;  %v7520_v48 = vld [vmem:[%s10853_s1 + $0x50c] ss:$28 sps:$4 sm:$0xff]  }
  0x61   :  { %4536 = vmatprep.subr.bf16.mxu0 %v7440_v50  ;;  %4818 = vmatpush1.bf16.msra.mxu1 %v7436_v51  ;;  %v7518_v50 = vld [vmem:[%s10853_s1 + $0x508] ss:$28 sps:$4 sm:$0xff]  }
  0x62   :  { %4819 = vmatprep.subr.bf16.mxu1 %v7444_v52  ;;  %v7523_v51 = vld [vmem:[%s10853_s1 + $0x4a4] ss:$28 sps:$4 sm:$0xff]  }
  0x63   :  { %v7526_v52 = vld [vmem:[%s10853_s1 + $0x544] ss:$28 sps:$4 sm:$0xff]  }
  0x64   :  { %4537 = vmatpush1.bf16.msra.mxu0 %v7445_v53  ;;  %v7521_v53 = vld [vmem:[%s10853_s1 + $0x4a0] ss:$28 sps:$4 sm:$0xff]  }
  0x65   :  { %4538 = vmatprep.subr.bf16.mxu0 %v7446_v54  ;;  %4820 = vmatpush1.bf16.msra.mxu1 %v7442_v56  ;;  %v7524_v54 = vld [vmem:[%s10853_s1 + $0x540] ss:$28 sps:$4 sm:$0xff]  }
  0x66   :  { %4821 = vmatprep.subr.bf16.mxu1 %v7450_v59  ;;  %v7529_v56 = vld [vmem:[%s10853_s1 + $0x4dc] ss:$28 sps:$4 sm:$0xff]  }
  0x67   :  { %v7530_v59 = vld [vmem:[%s10853_s1 + $0x578] ss:$28 sps:$4 sm:$0xff]  }
  0x68   :  { %4539 = vmatpush1.bf16.msra.mxu0 %v7451_v57  ;;  %v7532_v57 = vld [vmem:[%s10853_s1 + $0x57c] ss:$28 sps:$4 sm:$0xff]  }
  0x69   :  { %4540 = vmatprep.subr.bf16.mxu0 %v7452_v60  ;;  %4822 = vmatpush1.bf16.msra.mxu1 %v7448_v62  ;;  %v7535_v60 = vld [vmem:[%s10853_s1 + $0x514] ss:$28 sps:$4 sm:$0xff]  }
  0x6a   :  { %4823 = vmatprep.subr.bf16.mxu1 %v7456_v2  ;;  %v7533_v62 = vld [vmem:[%s10853_s1 + $0x510] ss:$28 sps:$4 sm:$0xff]  }
  0x6b   :  { %v7541_v2 = vld [vmem:[%s10853_s1 + $0x54c] ss:$28 sps:$4 sm:$0xff]  }
  0x6c   :  { %4541 = vmatpush1.bf16.msra.mxu0 %v7457_v63  ;;  %v7536_v63 = vld [vmem:[%s10853_s1 + $0x5b0] ss:$28 sps:$4 sm:$0xff]  }
  0x6d   :  { %4542 = vmatprep.subr.bf16.mxu0 %v7458_v3  ;;  %4824 = vmatpush1.bf16.msra.mxu1 %v7454_v4  ;;  %v7544_v3 = vld [vmem:[%s10853_s1 + $0x5ec] ss:$28 sps:$4 sm:$0xff]  }
  0x6e   :  { %4825 = vmatprep.subr.bf16.mxu1 %v7462_v6  ;;  %v7539_v4 = vld [vmem:[%s10853_s1 + $0x548] ss:$28 sps:$4 sm:$0xff]  }
  0x6f   :  { %v7547_v6 = vld [vmem:[%s10853_s1 + $0x584] ss:$28 sps:$4 sm:$0xff]  }
  0x70   :  { %4543 = vmatpush1.bf16.msra.mxu0 %v7463_v5  ;;  %v7542_v5 = vld [vmem:[%s10853_s1 + $0x5e8] ss:$28 sps:$4 sm:$0xff]  }
  0x71   :  { %4544 = vmatprep.subr.bf16.mxu0 %v7464_v7  ;;  %4826 = vmatpush1.bf16.msra.mxu1 %v7460_v8  ;;  %v7550_v7 = vld [vmem:[%s10853_s1 + $0x624] ss:$28 sps:$4 sm:$0xff]  }
  0x72   :  { %4827 = vmatprep.subr.bf16.mxu1 %v7468_v11  ;;  %v7545_v8 = vld [vmem:[%s10853_s1 + $0x580] ss:$28 sps:$4 sm:$0xff]  }
  0x73   :  { %v7553_v11 = vld [vmem:[%s10853_s1 + $0x5bc] ss:$28 sps:$4 sm:$0xff]  }
  0x74   :  { %4545 = vmatpush1.bf16.msra.mxu0 %v7469_v10  ;;  %v7548_v10 = vld [vmem:[%s10853_s1 + $0x620] ss:$28 sps:$4 sm:$0xff]  }
  0x75   :  { %4546 = vmatprep.subr.bf16.mxu0 %v7470_v12  ;;  %4828 = vmatpush1.bf16.msra.mxu1 %v7466_v13  ;;  %v7556_v12 = vld [vmem:[%s10853_s1 + $0x65c] ss:$28 sps:$4 sm:$0xff]  }
  0x76   :  { %4829 = vmatprep.subr.bf16.mxu1 %v7474_v15  ;;  %v7551_v13 = vld [vmem:[%s10853_s1 + $0x5b8] ss:$28 sps:$4 sm:$0xff]  }
  0x77   :  { %v7559_v15 = vld [vmem:[%s10853_s1 + $0x5f4] ss:$28 sps:$4 sm:$0xff]  }
  0x78   :  { %4547 = vmatpush1.bf16.msra.mxu0 %v7475_v14  ;;  %v7554_v14 = vld [vmem:[%s10853_s1 + $0x658] ss:$28 sps:$4 sm:$0xff]  }
  0x79   :  { %4557 = vmatprep.subr.bf16.mxu0 %v7478_v16  ;;  %4830 = vmatpush1.bf16.msra.mxu1 %v7472_v19  ;;  %v7562_v16 = vld [vmem:[%s10853_s1 + $0x694] ss:$28 sps:$4 sm:$0xff]   ;;  %v884_v19 = vcombine.high %v8743_v55, %v8743_v55  ;;  %v7568_v55 = vld [vmem:[%s10853_s1 + $0x6cc] ss:$28 sps:$4 sm:$0xff]  }
  0x7a   :  { %4831 = vmatprep.subr.bf16.mxu1 %v7481_v21  ;;  %v7560_v21 = vld [vmem:[%s10853_s1 + $0x690] ss:$28 sps:$4 sm:$0xff]  }
  0x7b   :  { %4549 = vmatmul.mubr.bf16.vlgmr.msra.gmra.mrb[0].mxu0 %v8813_v18 }
  0x7c   :  { %4558 = vmatpush1.bf16.msra.mxu0 %v7476_v20  ;;  %4589 = vmatprep.mubr.bf16.mxu0 %v8829_v23  ;;  %v7557_v20 = vld [vmem:[%s10853_s1 + $0x5f0] ss:$28 sps:$4 sm:$0xff]  }
  0x7d   :  { %4559 = vmatprep.subr.bf16.mxu0 %v7484_v22  ;;  %4832 = vmatpush1.bf16.msra.mxu1 %v7479_v25  ;;  %v7565_v22 = vld [vmem:[%s10853_s1 + $0x62c] ss:$28 sps:$4 sm:$0xff]   ;;  %v9006_v25 = vrot.slane %v884_v19, %v8630_v17 }
  0x7e   :  { %4833 = vmatprep.subr.bf16.mxu1 %v7487_v27  ;;  %v7566_v27 = vld [vmem:[%s10853_s1 + $0x6c8] ss:$28 sps:$4 sm:$0xff]  }
  0x7f   :  { %v7635_v19 = vld [vmem:[%s10853_s1 + $0x8c8] ss:$28 sps:$4 sm:$0xff]  }
  0x80   :  { %4560 = vmatpush1.bf16.msra.mxu0 %v7482_v26  ;;  %v7563_v26 = vld [vmem:[%s10853_s1 + $0x628] ss:$28 sps:$4 sm:$0xff]  }
  0x81   :  { %4561 = vmatprep.subr.bf16.mxu0 %v7490_v28  ;;  %4834 = vmatpush1.bf16.msra.mxu1 %v7485_v29  ;;  %v7571_v28 = vld [vmem:[%s10853_s1 + $0x664] ss:$28 sps:$4 sm:$0xff]  }
  0x82   :  { %4844 = vmatprep.subr.bf16.mxu1 %v7493_v31  ;;  %v7574_v29 = vld [vmem:[%s10853_s1 + $0x704] ss:$28 sps:$4 sm:$0xff]   ;;  %v9024_v31 = vcombine.high %v8813_v18, %v8813_v18 }
  0x84   :  { %4562 = vmatpush1.bf16.msra.mxu0 %v7488_v30  ;;  %4836 = vmatmul.mubr.bf16.vlgmr.msra.gmra.mrb[4].mxu1 %v8813_v18  ;;  %v900_v30 = vcombine.high %v9006_v25, %v9006_v25 }
  0x85   :  { %4563 = vmatprep.subr.bf16.mxu0 %v7496_v32  ;;  %4845 = vmatpush1.bf16.msra.mxu1 %v7491_v33  ;;  %v7569_v32 = vld [vmem:[%s10853_s1 + $0x660] ss:$28 sps:$4 sm:$0xff]  }
  0x86   :  { %4846 = vmatprep.subr.bf16.mxu1 %v7499_v35  ;;  %4876 = vmatprep.mubr.bf16.mxu1 %v8829_v23  ;;  %v7572_v33 = vld [vmem:[%s10853_s1 + $0x700] ss:$28 sps:$4 sm:$0xff]  }
  0x87   :  { %v7580_v35 = vld [vmem:[%s10853_s1 + $0x73c] ss:$28 sps:$4 sm:$0xff]  }
  0x88   :  { %4564 = vmatpush1.bf16.msra.mxu0 %v7494_v34  ;;  %v7577_v34 = vld [vmem:[%s10853_s1 + $0x69c] ss:$28 sps:$4 sm:$0xff]  }
  0x89   :  { %4565 = vmatprep.subr.bf16.mxu0 %v7502_v36  ;;  %4847 = vmatpush1.bf16.msra.mxu1 %v7497_v37  ;;  %v9039_v36 = vrot.slane %v900_v30, %v8630_v17  ;;  %v7575_v37 = vld [vmem:[%s10853_s1 + $0x698] ss:$28 sps:$4 sm:$0xff]  }
  0x8a   :  { %4848 = vmatprep.subr.bf16.mxu1 %v7505_v39  ;;  %v7583_v39 = vld [vmem:[%s10853_s1 + $0x6d4] ss:$28 sps:$4 sm:$0xff]  }
  0x8b   :  { %v7650_v30 = vld [vmem:[%s10853_s1 + $0x9d8] ss:$28 sps:$4 sm:$0xff]  }
  0x8c   :  { %4566 = vmatpush1.bf16.msra.mxu0 %v7500_v38  ;;  %v7578_v38 = vld [vmem:[%s10853_s1 + $0x738] ss:$28 sps:$4 sm:$0xff]  }
  0x8d   :  { %4567 = vmatprep.subr.bf16.mxu0 %v7508_v40  ;;  %4849 = vmatpush1.bf16.msra.mxu1 %v7503_v41  ;;  %v7586_v40 = vld [vmem:[%s10853_s1 + $0x774] ss:$28 sps:$4 sm:$0xff]  }
  0x8e   :  { %4850 = vmatprep.subr.bf16.mxu1 %v7511_v43  ;;  %v7581_v41 = vld [vmem:[%s10853_s1 + $0x6d0] ss:$28 sps:$4 sm:$0xff]  }
  0x8f   :  { %v7589_v43 = vld [vmem:[%s10853_s1 + $0x70c] ss:$28 sps:$4 sm:$0xff]  }
  0x90   :  { %4568 = vmatpush1.bf16.msra.mxu0 %v7506_v42  ;;  %v7584_v42 = vld [vmem:[%s10853_s1 + $0x770] ss:$28 sps:$4 sm:$0xff]  }
  0x91   :  { %4569 = vmatprep.subr.bf16.mxu0 %v7514_v44  ;;  %4851 = vmatpush1.bf16.msra.mxu1 %v7509_v45  ;;  %v7592_v44 = vld [vmem:[%s10853_s1 + $0x7ac] ss:$28 sps:$4 sm:$0xff]  }
  0x92   :  { %4852 = vmatprep.subr.bf16.mxu1 %v7517_v47  ;;  %v7587_v45 = vld [vmem:[%s10853_s1 + $0x708] ss:$28 sps:$4 sm:$0xff]  }
  0x93   :  { %v7595_v47 = vld [vmem:[%s10853_s1 + $0x744] ss:$28 sps:$4 sm:$0xff]  }
  0x94   :  { %4570 = vmatpush1.bf16.msra.mxu0 %v7512_v46  ;;  %v7590_v46 = vld [vmem:[%s10853_s1 + $0x7a8] ss:$28 sps:$4 sm:$0xff]  }
  0x95   :  { %4571 = vmatprep.subr.bf16.mxu0 %v7520_v48  ;;  %4853 = vmatpush1.bf16.msra.mxu1 %v7515_v49  ;;  %v7598_v48 = vld [vmem:[%s10853_s1 + $0x7e4] ss:$28 sps:$4 sm:$0xff]  }
  0x96   :  { %4854 = vmatprep.subr.bf16.mxu1 %v7523_v51  ;;  %v7593_v49 = vld [vmem:[%s10853_s1 + $0x740] ss:$28 sps:$4 sm:$0xff]  }
  0x97   :  { %v7601_v51 = vld [vmem:[%s10853_s1 + $0x77c] ss:$28 sps:$4 sm:$0xff]  }
  0x98   :  { %4572 = vmatpush1.bf16.msra.mxu0 %v7518_v50  ;;  %v7596_v50 = vld [vmem:[%s10853_s1 + $0x7e0] ss:$28 sps:$4 sm:$0xff]  }
  0x99   :  { %4573 = vmatprep.subr.bf16.mxu0 %v7526_v52  ;;  %4855 = vmatpush1.bf16.msra.mxu1 %v7521_v53  ;;  %v7604_v52 = vld [vmem:[%s10853_s1 + $0x81c] ss:$28 sps:$4 sm:$0xff]  }
  0x9a   :  { %4856 = vmatprep.subr.bf16.mxu1 %v7529_v56  ;;  %v7599_v53 = vld [vmem:[%s10853_s1 + $0x778] ss:$28 sps:$4 sm:$0xff]  }
  0x9b   :  { %v7607_v56 = vld [vmem:[%s10853_s1 + $0x7b4] ss:$28 sps:$4 sm:$0xff]  }
  0x9c   :  { %4574 = vmatpush1.bf16.msra.mxu0 %v7524_v54  ;;  %v7602_v54 = vld [vmem:[%s10853_s1 + $0x818] ss:$28 sps:$4 sm:$0xff]  }
  0x9d   :  { %4575 = vmatprep.subr.bf16.mxu0 %v7532_v57  ;;  %4857 = vmatpush1.bf16.msra.mxu1 %v7527_v58  ;;  %v7610_v57 = vld [vmem:[%s10853_s1 + $0x854] ss:$28 sps:$4 sm:$0xff]  }
  0x9e   :  { %4858 = vmatprep.subr.bf16.mxu1 %v7535_v60  ;;  %v7605_v58 = vld [vmem:[%s10853_s1 + $0x7b0] ss:$28 sps:$4 sm:$0xff]  }
  0x9f   :  { %v7613_v60 = vld [vmem:[%s10853_s1 + $0x7ec] ss:$28 sps:$4 sm:$0xff]  }
  0xa0   :  { %4576 = vmatpush1.bf16.msra.mxu0 %v7530_v59  ;;  %v7608_v59 = vld [vmem:[%s10853_s1 + $0x850] ss:$28 sps:$4 sm:$0xff]  }
  0xa1   :  { %4577 = vmatprep.subr.bf16.mxu0 %v7538_v61  ;;  %4859 = vmatpush1.bf16.msra.mxu1 %v7533_v62  ;;  %v7616_v61 = vld [vmem:[%s10853_s1 + $0x88c] ss:$28 sps:$4 sm:$0xff]  }
  0xa2   :  { %4860 = vmatprep.subr.bf16.mxu1 %v7541_v2  ;;  %v7611_v62 = vld [vmem:[%s10853_s1 + $0x7e8] ss:$28 sps:$4 sm:$0xff]  }
  0xa3   :  { %v7619_v2 = vld [vmem:[%s10853_s1 + $0x824] ss:$28 sps:$4 sm:$0xff]  }
  0xa4   :  { %4578 = vmatpush1.bf16.msra.mxu0 %v7536_v63  ;;  %v7614_v63 = vld [vmem:[%s10853_s1 + $0x888] ss:$28 sps:$4 sm:$0xff]  }
  0xa5   :  { %4579 = vmatprep.subr.bf16.mxu0 %v7544_v3  ;;  %4861 = vmatpush1.bf16.msra.mxu1 %v7539_v4  ;;  %v7622_v3 = vld [vmem:[%s10853_s1 + $0x8c4] ss:$28 sps:$4 sm:$0xff]  }
  0xa6   :  { %4862 = vmatprep.subr.bf16.mxu1 %v7547_v6  ;;  %v7617_v4 = vld [vmem:[%s10853_s1 + $0x820] ss:$28 sps:$4 sm:$0xff]  }
  0xa7   :  { %v7625_v6 = vld [vmem:[%s10853_s1 + $0x85c] ss:$28 sps:$4 sm:$0xff]  }
  0xa8   :  { %4580 = vmatpush1.bf16.msra.mxu0 %v7542_v5  ;;  %v7620_v5 = vld [vmem:[%s10853_s1 + $0x8c0] ss:$28 sps:$4 sm:$0xff]  }
  0xa9   :  { %4581 = vmatprep.subr.bf16.mxu0 %v7550_v7  ;;  %4863 = vmatpush1.bf16.msra.mxu1 %v7545_v8  ;;  %v7628_v7 = vld [vmem:[%s10853_s1 + $0x8fc] ss:$28 sps:$4 sm:$0xff]  }
  0xaa   :  { %4864 = vmatprep.subr.bf16.mxu1 %v7553_v11  ;;  %v7623_v8 = vld [vmem:[%s10853_s1 + $0x858] ss:$28 sps:$4 sm:$0xff]  }
  0xab   :  { %v7631_v11 = vld [vmem:[%s10853_s1 + $0x894] ss:$28 sps:$4 sm:$0xff]  }
  0xac   :  { %4582 = vmatpush1.bf16.msra.mxu0 %v7548_v10  ;;  %v7626_v10 = vld [vmem:[%s10853_s1 + $0x8f8] ss:$28 sps:$4 sm:$0xff]  }
  0xad   :  { %4583 = vmatprep.subr.bf16.mxu0 %v7556_v12  ;;  %4865 = vmatpush1.bf16.msra.mxu1 %v7551_v13  ;;  %v7634_v12 = vld [vmem:[%s10853_s1 + $0x934] ss:$28 sps:$4 sm:$0xff]  }
  0xae   :  { %4866 = vmatprep.subr.bf16.mxu1 %v7559_v15  ;;  %v7629_v13 = vld [vmem:[%s10853_s1 + $0x890] ss:$28 sps:$4 sm:$0xff]  }
  0xaf   :  { %v7637_v15 = vld [vmem:[%s10853_s1 + $0x8cc] ss:$28 sps:$4 sm:$0xff]  }
  0xb0   :  { %4584 = vmatpush1.bf16.msra.mxu0 %v7554_v14  ;;  %v7632_v14 = vld [vmem:[%s10853_s1 + $0x930] ss:$28 sps:$4 sm:$0xff]  }
  0xb1   :  { %4585 = vmatprep.subr.bf16.mxu0 %v7562_v16  ;;  %4867 = vmatpush1.bf16.msra.mxu1 %v7557_v20  ;;  %v7640_v16 = vld [vmem:[%s10853_s1 + $0x96c] ss:$28 sps:$4 sm:$0xff]  }
  0xb2   :  { %4868 = vmatprep.subr.bf16.mxu1 %v7565_v22  ;;  %v7638_v20 = vld [vmem:[%s10853_s1 + $0x968] ss:$28 sps:$4 sm:$0xff]  }
  0xb3   :  { %v7646_v22 = vld [vmem:[%s10853_s1 + $0x9a4] ss:$28 sps:$4 sm:$0xff]  }
  0xb4   :  { %4586 = vmatpush1.bf16.msra.mxu0 %v7560_v21  ;;  %v7643_v21 = vld [vmem:[%s10853_s1 + $0x904] ss:$28 sps:$4 sm:$0xff]  }
  0xb5   :  { %4587 = vmatprep.subr.bf16.mxu0 %v7568_v55  ;;  %4869 = vmatpush1.bf16.msra.mxu1 %v7563_v26  ;;  %v7641_v55 = vld [vmem:[%s10853_s1 + $0x900] ss:$28 sps:$4 sm:$0xff]  }
  0xb6   :  { %4870 = vmatprep.subr.bf16.mxu1 %v7571_v28  ;;  %v7644_v26 = vld [vmem:[%s10853_s1 + $0x9a0] ss:$28 sps:$4 sm:$0xff]  }
  0xb7   :  { %v7652_v28 = vld [vmem:[%s10853_s1 + $0x9dc] ss:$28 sps:$4 sm:$0xff]  }
  0xb8   :  { %4588 = vmatpush1.bf16.msra.mxu0 %v7566_v27  ;;  %v7649_v27 = vld [vmem:[%s10853_s1 + $0x93c] ss:$28 sps:$4 sm:$0xff]  }
  0xb9   :  { %4598 = vmatprep.subr.bf16.mxu0 %v7574_v29  ;;  %4871 = vmatpush1.bf16.msra.mxu1 %v7569_v32  ;;  %v7647_v29 = vld [vmem:[%s10853_s1 + $0x938] ss:$28 sps:$4 sm:$0xff]  }
  0xba   :  { %4872 = vmatprep.subr.bf16.mxu1 %v7577_v34  ;;  %v7655_v32 = vld [vmem:[%s10853_s1 + $0x974] ss:$28 sps:$4 sm:$0xff]  }
  0xbb   :  { %4590 = vmatmul.mubr.bf16.vlgmr.msra.gmra.mrb[0].mxu0 %v9024_v31  ;;  %v7653_v34 = vld [vmem:[%s10853_s1 + $0x970] ss:$28 sps:$4 sm:$0xff]  }
  0xbc   :  { %4599 = vmatpush1.bf16.msra.mxu0 %v7572_v33  ;;  %4630 = vmatprep.mubr.bf16.mxu0 %v9039_v36  ;;  %v7658_v33 = vld [vmem:[%s10853_s1 + $0xa14] ss:$28 sps:$4 sm:$0xff]  }
  0xbd   :  { %4600 = vmatprep.subr.bf16.mxu0 %v7580_v35  ;;  %4873 = vmatpush1.bf16.msra.mxu1 %v7575_v37  ;;  %v7656_v35 = vld [vmem:[%s10853_s1 + $0xa10] ss:$28 sps:$4 sm:$0xff]  }
  0xbe   :  { %4874 = vmatprep.subr.bf16.mxu1 %v7583_v39  ;;  %v7661_v37 = vld [vmem:[%s10853_s1 + $0x9ac] ss:$28 sps:$4 sm:$0xff]  }
  0xbf   :  { %v7659_v39 = vld [vmem:[%s10853_s1 + $0x9a8] ss:$28 sps:$4 sm:$0xff]  }
  0xc0   :  { %4601 = vmatpush1.bf16.msra.mxu0 %v7578_v38  ;;  %v7664_v38 = vld [vmem:[%s10853_s1 + $0xa4c] ss:$28 sps:$4 sm:$0xff]  }
  0xc1   :  { %4602 = vmatprep.subr.bf16.mxu0 %v7586_v40  ;;  %4875 = vmatpush1.bf16.msra.mxu1 %v7581_v41  ;;  %v7662_v40 = vld [vmem:[%s10853_s1 + $0xa48] ss:$28 sps:$4 sm:$0xff]  }
  0xc2   :  { %4885 = vmatprep.subr.bf16.mxu1 %v7589_v43  ;;  %v7667_v41 = vld [vmem:[%s10853_s1 + $0x9e4] ss:$28 sps:$4 sm:$0xff]   ;;  %v9227_v43 = vrot.slane %v9006_v25, %v8630_v17  ;;  %v7677_v25 = vld [vmem:[%s10853_s1 + $0xabc] ss:$28 sps:$4 sm:$0xff]  }
  0xc4   :  { %4603 = vmatpush1.bf16.msra.mxu0 %v7584_v42  ;;  %4877 = vmatmul.mubr.bf16.vlgmr.msra.gmra.mrb[4].mxu1 %v9024_v31  ;;  %v7671_v42 = vld [vmem:[%s10853_s1 + $0xa84] ss:$28 sps:$4 sm:$0xff]  }
  0xc5   :  { %4604 = vmatprep.subr.bf16.mxu0 %v7592_v44  ;;  %4886 = vmatpush1.bf16.msra.mxu1 %v7587_v45  ;;  %v7665_v44 = vld [vmem:[%s10853_s1 + $0x9e0] ss:$28 sps:$4 sm:$0xff]  }
  0xc6   :  { %4887 = vmatprep.subr.bf16.mxu1 %v7595_v47  ;;  %4917 = vmatprep.mubr.bf16.mxu1 %v9039_v36  ;;  %v7669_v45 = vld [vmem:[%s10853_s1 + $0xa80] ss:$28 sps:$4 sm:$0xff]   ;;  %v9243_v47 = vcombine.high %v9039_v36, %v9039_v36 }
  0xc8   :  { %4605 = vmatpush1.bf16.msra.mxu0 %v7590_v46  ;;  %v7674_v46 = vld [vmem:[%s10853_s1 + $0xa1c] ss:$28 sps:$4 sm:$0xff]  }
  0xc9   :  { %4606 = vmatprep.subr.bf16.mxu0 %v7598_v48  ;;  %4888 = vmatpush1.bf16.msra.mxu1 %v7593_v49  ;;  %v7672_v48 = vld [vmem:[%s10853_s1 + $0xa18] ss:$28 sps:$4 sm:$0xff]  }
  0xca   :  { %4889 = vmatprep.subr.bf16.mxu1 %v7601_v51  ;;  %v7675_v49 = vld [vmem:[%s10853_s1 + $0xab8] ss:$28 sps:$4 sm:$0xff]  }
  0xcb   :  { %v7683_v51 = vld [vmem:[%s10853_s1 + $0xaf4] ss:$28 sps:$4 sm:$0xff]  }
  0xcc   :  { %4607 = vmatpush1.bf16.msra.mxu0 %v7596_v50  ;;  %v7680_v50 = vld [vmem:[%s10853_s1 + $0xa54] ss:$28 sps:$4 sm:$0xff]  }
  0xcd   :  { %4608 = vmatprep.subr.bf16.mxu0 %v7604_v52  ;;  %4890 = vmatpush1.bf16.msra.mxu1 %v7599_v53  ;;  %v7678_v52 = vld [vmem:[%s10853_s1 + $0xa50] ss:$28 sps:$4 sm:$0xff]  }
  0xce   :  { %4891 = vmatprep.subr.bf16.mxu1 %v7607_v56  ;;  %v7681_v53 = vld [vmem:[%s10853_s1 + $0xaf0] ss:$28 sps:$4 sm:$0xff]  }
  0xcf   :  { %v7689_v56 = vld [vmem:[%s10853_s1 + $0xb2c] ss:$28 sps:$4 sm:$0xff]  }
  0xd0   :  { %4609 = vmatpush1.bf16.msra.mxu0 %v7602_v54  ;;  %v7686_v54 = vld [vmem:[%s10853_s1 + $0xa8c] ss:$28 sps:$4 sm:$0xff]  }
  0xd1   :  { %4610 = vmatprep.subr.bf16.mxu0 %v7610_v57  ;;  %4892 = vmatpush1.bf16.msra.mxu1 %v7605_v58  ;;  %v7684_v57 = vld [vmem:[%s10853_s1 + $0xa88] ss:$28 sps:$4 sm:$0xff]  }
  0xd2   :  { %4893 = vmatprep.subr.bf16.mxu1 %v7613_v60  ;;  %v7687_v58 = vld [vmem:[%s10853_s1 + $0xb28] ss:$28 sps:$4 sm:$0xff]  }
  0xd3   :  { %v7695_v60 = vld [vmem:[%s10853_s1 + $0xb64] ss:$28 sps:$4 sm:$0xff]  }
  0xd4   :  { %4611 = vmatpush1.bf16.msra.mxu0 %v7608_v59  ;;  %v7692_v59 = vld [vmem:[%s10853_s1 + $0xac4] ss:$28 sps:$4 sm:$0xff]  }
  0xd5   :  { %4612 = vmatprep.subr.bf16.mxu0 %v7616_v61  ;;  %4894 = vmatpush1.bf16.msra.mxu1 %v7611_v62  ;;  %v7690_v61 = vld [vmem:[%s10853_s1 + $0xac0] ss:$28 sps:$4 sm:$0xff]  }
  0xd6   :  { %4895 = vmatprep.subr.bf16.mxu1 %v7619_v2  ;;  %v7693_v62 = vld [vmem:[%s10853_s1 + $0xb60] ss:$28 sps:$4 sm:$0xff]  }
  0xd7   :  { %v7701_v2 = vld [vmem:[%s10853_s1 + $0xb9c] ss:$28 sps:$4 sm:$0xff]  }
  0xd8   :  { %4613 = vmatpush1.bf16.msra.mxu0 %v7614_v63  ;;  %v7698_v63 = vld [vmem:[%s10853_s1 + $0xafc] ss:$28 sps:$4 sm:$0xff]  }
  0xd9   :  { %4614 = vmatprep.subr.bf16.mxu0 %v7622_v3  ;;  %4896 = vmatpush1.bf16.msra.mxu1 %v7617_v4  ;;  %v7696_v3 = vld [vmem:[%s10853_s1 + $0xaf8] ss:$28 sps:$4 sm:$0xff]  }
  0xda   :  { %4897 = vmatprep.subr.bf16.mxu1 %v7625_v6  ;;  %v7699_v4 = vld [vmem:[%s10853_s1 + $0xb98] ss:$28 sps:$4 sm:$0xff]  }
  0xdb   :  { %v7707_v6 = vld [vmem:[%s10853_s1 + $0xbd4] ss:$28 sps:$4 sm:$0xff]  }
  0xdc   :  { %4615 = vmatpush1.bf16.msra.mxu0 %v7620_v5  ;;  %v7704_v5 = vld [vmem:[%s10853_s1 + $0xb34] ss:$28 sps:$4 sm:$0xff]  }
  0xdd   :  { %4616 = vmatprep.subr.bf16.mxu0 %v7628_v7  ;;  %4898 = vmatpush1.bf16.msra.mxu1 %v7623_v8  ;;  %v7702_v7 = vld [vmem:[%s10853_s1 + $0xb30] ss:$28 sps:$4 sm:$0xff]  }
  0xde   :  { %4899 = vmatprep.subr.bf16.mxu1 %v7631_v11  ;;  %v7705_v8 = vld [vmem:[%s10853_s1 + $0xbd0] ss:$28 sps:$4 sm:$0xff]  }
  0xdf   :  { %v7713_v11 = vld [vmem:[%s10853_s1 + $0xc0c] ss:$28 sps:$4 sm:$0xff]  }
  0xe0   :  { %4617 = vmatpush1.bf16.msra.mxu0 %v7626_v10  ;;  %v7710_v10 = vld [vmem:[%s10853_s1 + $0xb6c] ss:$28 sps:$4 sm:$0xff]  }
  0xe1   :  { %4618 = vmatprep.subr.bf16.mxu0 %v7634_v12  ;;  %4900 = vmatpush1.bf16.msra.mxu1 %v7629_v13  ;;  %v7708_v12 = vld [vmem:[%s10853_s1 + $0xb68] ss:$28 sps:$4 sm:$0xff]  }
  0xe2   :  { %4901 = vmatprep.subr.bf16.mxu1 %v7637_v15  ;;  %v7711_v13 = vld [vmem:[%s10853_s1 + $0xc08] ss:$28 sps:$4 sm:$0xff]  }
  0xe3   :  { %v7719_v15 = vld [vmem:[%s10853_s1 + $0xc44] ss:$28 sps:$4 sm:$0xff]  }
  0xe4   :  { %4619 = vmatpush1.bf16.msra.mxu0 %v7632_v14  ;;  %v7716_v14 = vld [vmem:[%s10853_s1 + $0xba4] ss:$28 sps:$4 sm:$0xff]  }
  0xe5   :  { %4620 = vmatprep.subr.bf16.mxu0 %v7640_v16  ;;  %4902 = vmatpush1.bf16.msra.mxu1 %v7635_v19  ;;  %v7714_v16 = vld [vmem:[%s10853_s1 + $0xba0] ss:$28 sps:$4 sm:$0xff]  }
  0xe6   :  { %4903 = vmatprep.subr.bf16.mxu1 %v7643_v21  ;;  %v7717_v19 = vld [vmem:[%s10853_s1 + $0xc40] ss:$28 sps:$4 sm:$0xff]  }
  0xe7   :  { %v7725_v21 = vld [vmem:[%s10853_s1 + $0xc7c] ss:$28 sps:$4 sm:$0xff]  }
  0xe8   :  { %4621 = vmatpush1.bf16.msra.mxu0 %v7638_v20  ;;  %v7722_v20 = vld [vmem:[%s10853_s1 + $0xbdc] ss:$28 sps:$4 sm:$0xff]  }
  0xe9   :  { %4622 = vmatprep.subr.bf16.mxu0 %v7646_v22  ;;  %4904 = vmatpush1.bf16.msra.mxu1 %v7641_v55  ;;  %v7720_v22 = vld [vmem:[%s10853_s1 + $0xbd8] ss:$28 sps:$4 sm:$0xff]  }
  0xea   :  { %4905 = vmatprep.subr.bf16.mxu1 %v7649_v27  ;;  %v7723_v55 = vld [vmem:[%s10853_s1 + $0xc78] ss:$28 sps:$4 sm:$0xff]  }
  0xeb   :  { %v7731_v27 = vld [vmem:[%s10853_s1 + $0xcb4] ss:$28 sps:$4 sm:$0xff]  }
  0xec   :  { %4623 = vmatpush1.bf16.msra.mxu0 %v7644_v26  ;;  %v7728_v26 = vld [vmem:[%s10853_s1 + $0xc14] ss:$28 sps:$4 sm:$0xff]  }
  0xed   :  { %4624 = vmatprep.subr.bf16.mxu0 %v7652_v28  ;;  %4906 = vmatpush1.bf16.msra.mxu1 %v7647_v29  ;;  %v7726_v28 = vld [vmem:[%s10853_s1 + $0xc10] ss:$28 sps:$4 sm:$0xff]  }
  0xee   :  { %4907 = vmatprep.subr.bf16.mxu1 %v7655_v32  ;;  %v7729_v29 = vld [vmem:[%s10853_s1 + $0xcb0] ss:$28 sps:$4 sm:$0xff]  }
  0xef   :  { %v7737_v32 = vld [vmem:[%s10853_s1 + $0xcec] ss:$28 sps:$4 sm:$0xff]  }
  0xf0   :  { %4625 = vmatpush1.bf16.msra.mxu0 %v7650_v30  ;;  %v7734_v30 = vld [vmem:[%s10853_s1 + $0xc4c] ss:$28 sps:$4 sm:$0xff]  }
  0xf1   :  { %4626 = vmatprep.subr.bf16.mxu0 %v7658_v33  ;;  %4908 = vmatpush1.bf16.msra.mxu1 %v7653_v34  ;;  %v7732_v33 = vld [vmem:[%s10853_s1 + $0xc48] ss:$28 sps:$4 sm:$0xff]  }
  0xf2   :  { %4909 = vmatprep.subr.bf16.mxu1 %v7661_v37  ;;  %v7735_v34 = vld [vmem:[%s10853_s1 + $0xce8] ss:$28 sps:$4 sm:$0xff]  }
  0xf3   :  { %v7743_v37 = vld [vmem:[%s10853_s1 + $0xd24] ss:$28 sps:$4 sm:$0xff]  }
  0xf4   :  { %4627 = vmatpush1.bf16.msra.mxu0 %v7656_v35  ;;  %v7740_v35 = vld [vmem:[%s10853_s1 + $0xc84] ss:$28 sps:$4 sm:$0xff]  }
  0xf5   :  { %4628 = vmatprep.subr.bf16.mxu0 %v7664_v38  ;;  %4910 = vmatpush1.bf16.msra.mxu1 %v7659_v39  ;;  %v7738_v38 = vld [vmem:[%s10853_s1 + $0xc80] ss:$28 sps:$4 sm:$0xff]  }
  0xf6   :  { %4911 = vmatprep.subr.bf16.mxu1 %v7667_v41  ;;  %v7741_v39 = vld [vmem:[%s10853_s1 + $0xd20] ss:$28 sps:$4 sm:$0xff]  }
  0xf7   :  { %v7749_v41 = vld [vmem:[%s10853_s1 + $0xd5c] ss:$28 sps:$4 sm:$0xff]  }
  0xf8   :  { %4629 = vmatpush1.bf16.msra.mxu0 %v7662_v40  ;;  %v7746_v40 = vld [vmem:[%s10853_s1 + $0xcbc] ss:$28 sps:$4 sm:$0xff]  }
  0xf9   :  { %4639 = vmatprep.subr.bf16.mxu0 %v7671_v42  ;;  %4912 = vmatpush1.bf16.msra.mxu1 %v7665_v44  ;;  %v7744_v42 = vld [vmem:[%s10853_s1 + $0xcb8] ss:$28 sps:$4 sm:$0xff]  }
  0xfa   :  { %4913 = vmatprep.subr.bf16.mxu1 %v7674_v46  ;;  %v7747_v44 = vld [vmem:[%s10853_s1 + $0xd58] ss:$28 sps:$4 sm:$0xff]  }
  0xfb   :  { %4631 = vmatmul.mubr.bf16.vlgmr.msra.gmra.mrb[0].mxu0 %v9227_v43  ;;  %v7755_v46 = vld [vmem:[%s10853_s1 + $0xd94] ss:$28 sps:$4 sm:$0xff]  }
  0xfc   :  { %4640 = vmatpush1.bf16.msra.mxu0 %v7669_v45  ;;  %4671 = vmatprep.mubr.bf16.mxu0 %v9243_v47  ;;  %v7752_v45 = vld [vmem:[%s10853_s1 + $0xcf4] ss:$28 sps:$4 sm:$0xff]  }
  0xfd   :  { %4641 = vmatprep.subr.bf16.mxu0 %v7677_v25  ;;  %4914 = vmatpush1.bf16.msra.mxu1 %v7672_v48  ;;  %v7750_v25 = vld [vmem:[%s10853_s1 + $0xcf0] ss:$28 sps:$4 sm:$0xff]  }
  0xfe   :  { %4915 = vmatprep.subr.bf16.mxu1 %v7680_v50  ;;  %v7753_v48 = vld [vmem:[%s10853_s1 + $0xd90] ss:$28 sps:$4 sm:$0xff]  }
  0xff   :  { %v7761_v50 = vld [vmem:[%s10853_s1 + $0xdcc] ss:$28 sps:$4 sm:$0xff]  }
 0x100   :  { %4642 = vmatpush1.bf16.msra.mxu0 %v7675_v49  ;;  %v7758_v49 = vld [vmem:[%s10853_s1 + $0xd2c] ss:$28 sps:$4 sm:$0xff]  }
 0x101   :  { %4643 = vmatprep.subr.bf16.mxu0 %v7683_v51  ;;  %4916 = vmatpush1.bf16.msra.mxu1 %v7678_v52  ;;  %v9420_v51 = vld.sshfl [vmem:[%s10852_s0 + $0x8] sm:$0x37 pattern:$0x75316420] }
 0x102   :  { %4926 = vmatprep.subr.bf16.mxu1 %v7686_v54  ;;  %v7756_v52 = vld [vmem:[%s10853_s1 + $0xd28] ss:$28 sps:$4 sm:$0xff]  }
 0x103   :  { %v7764_v54 = vld [vmem:[%s10853_s1 + $0xd64] ss:$28 sps:$4 sm:$0xff]  }
 0x104   :  { %4644 = vmatpush1.bf16.msra.mxu0 %v7681_v53  ;;  %4918 = vmatmul.mubr.bf16.vlgmr.msra.gmra.mrb[4].mxu1 %v9227_v43  ;;  %v7759_v53 = vld [vmem:[%s10853_s1 + $0xdc8] ss:$28 sps:$4 sm:$0xff]  }
 0x105   :  { %4645 = vmatprep.subr.bf16.mxu0 %v7689_v56  ;;  %4927 = vmatpush1.bf16.msra.mxu1 %v7684_v57  ;;  %v7767_v56 = vld [vmem:[%s10853_s1 + $0xe04] ss:$28 sps:$4 sm:$0xff]   ;;  %v948_v57 = vcombine.high %v9420_v51, %v9420_v51 }
 0x106   :  { %4928 = vmatprep.subr.bf16.mxu1 %v7692_v59  ;;  %4958 = vmatprep.mubr.bf16.mxu1 %v9243_v47  ;;  %v7762_v59 = vld [vmem:[%s10853_s1 + $0xd60] ss:$28 sps:$4 sm:$0xff]  }
 0x108   :  { %4646 = vmatpush1.bf16.msra.mxu0 %v7687_v58  ;;  %v9438_v58 = vcombine.high %v9227_v43, %v9227_v43 }
 0x109   :  { %4647 = vmatprep.subr.bf16.mxu0 %v7695_v60  ;;  %4929 = vmatpush1.bf16.msra.mxu1 %v7690_v61  ;;  %v7765_v60 = vld [vmem:[%s10853_s1 + $0xe00] ss:$28 sps:$4 sm:$0xff]  }
 0x10a   :  { %4930 = vmatprep.subr.bf16.mxu1 %v7698_v63  ;;  %v7770_v61 = vld [vmem:[%s10853_s1 + $0xd9c] ss:$28 sps:$4 sm:$0xff]   ;;  %v9453_v63 = vrot.slane %v948_v57, %v8630_v17  ;;  %v7831_v57 = vld [vmem:[%s10853_s1 + $0x1068] ss:$28 sps:$4 sm:$0xff]  }
 0x10c   :  { %4648 = vmatpush1.bf16.msra.mxu0 %v7693_v62  ;;  %v7773_v62 = vld [vmem:[%s10853_s1 + $0xe3c] ss:$28 sps:$4 sm:$0xff]  }
 0x10d   :  { %4649 = vmatprep.subr.bf16.mxu0 %v7701_v2  ;;  %4931 = vmatpush1.bf16.msra.mxu1 %v7696_v3  ;;  %v7768_v2 = vld [vmem:[%s10853_s1 + $0xd98] ss:$28 sps:$4 sm:$0xff]  }
 0x10e   :  { %4932 = vmatprep.subr.bf16.mxu1 %v7704_v5  ;;  %v7771_v3 = vld [vmem:[%s10853_s1 + $0xe38] ss:$28 sps:$4 sm:$0xff]  }
 0x10f   :  { %v7779_v5 = vld [vmem:[%s10853_s1 + $0xe74] ss:$28 sps:$4 sm:$0xff]  }
 0x110   :  { %4650 = vmatpush1.bf16.msra.mxu0 %v7699_v4  ;;  %v7776_v4 = vld [vmem:[%s10853_s1 + $0xdd4] ss:$28 sps:$4 sm:$0xff]  }
 0x111   :  { %4651 = vmatprep.subr.bf16.mxu0 %v7707_v6  ;;  %4933 = vmatpush1.bf16.msra.mxu1 %v7702_v7  ;;  %v7774_v6 = vld [vmem:[%s10853_s1 + $0xdd0] ss:$28 sps:$4 sm:$0xff]  }
 0x112   :  { %4934 = vmatprep.subr.bf16.mxu1 %v7710_v10  ;;  %v7777_v7 = vld [vmem:[%s10853_s1 + $0xe70] ss:$28 sps:$4 sm:$0xff]  }
 0x113   :  { %v7785_v10 = vld [vmem:[%s10853_s1 + $0xeac] ss:$28 sps:$4 sm:$0xff]  }
 0x114   :  { %4652 = vmatpush1.bf16.msra.mxu0 %v7705_v8  ;;  %v7782_v8 = vld [vmem:[%s10853_s1 + $0xe0c] ss:$28 sps:$4 sm:$0xff]  }
 0x115   :  { %4653 = vmatprep.subr.bf16.mxu0 %v7713_v11  ;;  %4935 = vmatpush1.bf16.msra.mxu1 %v7708_v12  ;;  %v7780_v11 = vld [vmem:[%s10853_s1 + $0xe08] ss:$28 sps:$4 sm:$0xff]  }
 0x116   :  { %4936 = vmatprep.subr.bf16.mxu1 %v7716_v14  ;;  %v7783_v12 = vld [vmem:[%s10853_s1 + $0xea8] ss:$28 sps:$4 sm:$0xff]  }
 0x117   :  { %v7791_v14 = vld [vmem:[%s10853_s1 + $0xee4] ss:$28 sps:$4 sm:$0xff]  }
 0x118   :  { %4654 = vmatpush1.bf16.msra.mxu0 %v7711_v13  ;;  %v7788_v13 = vld [vmem:[%s10853_s1 + $0xe44] ss:$28 sps:$4 sm:$0xff]  }
 0x119   :  { %4655 = vmatprep.subr.bf16.mxu0 %v7719_v15  ;;  %4937 = vmatpush1.bf16.msra.mxu1 %v7714_v16  ;;  %v7786_v15 = vld [vmem:[%s10853_s1 + $0xe40] ss:$28 sps:$4 sm:$0xff]  }
 0x11a   :  { %4938 = vmatprep.subr.bf16.mxu1 %v7722_v20  ;;  %v7789_v16 = vld [vmem:[%s10853_s1 + $0xee0] ss:$28 sps:$4 sm:$0xff]  }
 0x11b   :  { %v7797_v20 = vld [vmem:[%s10853_s1 + $0xf1c] ss:$28 sps:$4 sm:$0xff]  }
 0x11c   :  { %4656 = vmatpush1.bf16.msra.mxu0 %v7717_v19  ;;  %v7794_v19 = vld [vmem:[%s10853_s1 + $0xe7c] ss:$28 sps:$4 sm:$0xff]  }
 0x11d   :  { %4657 = vmatprep.subr.bf16.mxu0 %v7725_v21  ;;  %4939 = vmatpush1.bf16.msra.mxu1 %v7720_v22  ;;  %v7792_v21 = vld [vmem:[%s10853_s1 + $0xe78] ss:$28 sps:$4 sm:$0xff]  }
 0x11e   :  { %4940 = vmatprep.subr.bf16.mxu1 %v7728_v26  ;;  %v7795_v22 = vld [vmem:[%s10853_s1 + $0xf18] ss:$28 sps:$4 sm:$0xff]  }
 0x11f   :  { %v7803_v26 = vld [vmem:[%s10853_s1 + $0xf54] ss:$28 sps:$4 sm:$0xff]  }
 0x120   :  { %4658 = vmatpush1.bf16.msra.mxu0 %v7723_v55  ;;  %v7800_v55 = vld [vmem:[%s10853_s1 + $0xeb4] ss:$28 sps:$4 sm:$0xff]  }
 0x121   :  { %4659 = vmatprep.subr.bf16.mxu0 %v7731_v27  ;;  %4941 = vmatpush1.bf16.msra.mxu1 %v7726_v28  ;;  %v7798_v27 = vld [vmem:[%s10853_s1 + $0xeb0] ss:$28 sps:$4 sm:$0xff]  }
 0x122   :  { %4942 = vmatprep.subr.bf16.mxu1 %v7734_v30  ;;  %v7801_v28 = vld [vmem:[%s10853_s1 + $0xf50] ss:$28 sps:$4 sm:$0xff]  }
 0x123   :  { %v7809_v30 = vld [vmem:[%s10853_s1 + $0xf8c] ss:$28 sps:$4 sm:$0xff]  }
 0x124   :  { %4660 = vmatpush1.bf16.msra.mxu0 %v7729_v29  ;;  %v7806_v29 = vld [vmem:[%s10853_s1 + $0xeec] ss:$28 sps:$4 sm:$0xff]  }
 0x125   :  { %4661 = vmatprep.subr.bf16.mxu0 %v7737_v32  ;;  %4943 = vmatpush1.bf16.msra.mxu1 %v7732_v33  ;;  %v7804_v32 = vld [vmem:[%s10853_s1 + $0xee8] ss:$28 sps:$4 sm:$0xff]  }
 0x126   :  { %4944 = vmatprep.subr.bf16.mxu1 %v7740_v35  ;;  %v7807_v33 = vld [vmem:[%s10853_s1 + $0xf88] ss:$28 sps:$4 sm:$0xff]  }
 0x127   :  { %v7815_v35 = vld [vmem:[%s10853_s1 + $0xfc4] ss:$28 sps:$4 sm:$0xff]  }
 0x128   :  { %4662 = vmatpush1.bf16.msra.mxu0 %v7735_v34  ;;  %v7812_v34 = vld [vmem:[%s10853_s1 + $0xf24] ss:$28 sps:$4 sm:$0xff]  }
 0x129   :  { %4663 = vmatprep.subr.bf16.mxu0 %v7743_v37  ;;  %4945 = vmatpush1.bf16.msra.mxu1 %v7738_v38  ;;  %v9543_v37 = vpop.f32.mrb[0].mxu1  ;;  %v7810_v38 = vld [vmem:[%s10853_s1 + $0xf20] ss:$28 sps:$4 sm:$0xff]  }
 0x12a   :  { %4946 = vmatprep.subr.bf16.mxu1 %v7746_v40  ;;  %v9551_v40 = vpop.f32.mrb[1].mxu1 }
 0x12c   :  { %4664 = vmatpush1.bf16.msra.mxu0 %v7741_v39  ;;  %v7813_v39 = vld [vmem:[%s10853_s1 + $0xfc0] ss:$28 sps:$4 sm:$0xff]  }
 0x12d   :  { %4665 = vmatprep.subr.bf16.mxu0 %v7749_v41  ;;  %4947 = vmatpush1.bf16.msra.mxu1 %v7744_v42  ;;  %v7818_v41 = vld [vmem:[%s10853_s1 + $0xf5c] ss:$28 sps:$4 sm:$0xff]  }
 0x12e   :  { %4948 = vmatprep.subr.bf16.mxu1 %v7752_v45  ;;  %v7821_v42 = vld [vmem:[%s10853_s1 + $0xffc] ss:$28 sps:$4 sm:$0xff]  }
 0x12f   :  { %v7816_v45 = vld [vmem:[%s10853_s1 + $0xf58] ss:$28 sps:$4 sm:$0xff]  }
 0x130   :  { %4666 = vmatpush1.bf16.msra.mxu0 %v7747_v44  ;;  %v4800_v44 = vpop.f32.mrb[2].mxu1 }
 0x131   :  { %4667 = vmatprep.subr.bf16.mxu0 %v7755_v46  ;;  %4949 = vmatpush1.bf16.msra.mxu1 %v7750_v25  ;;  %v4801_v46 = vpop.f32.mrb[3].mxu1  ;;  %v7819_v25 = vld [vmem:[%s10853_s1 + $0xff8] ss:$28 sps:$4 sm:$0xff]  }
 0x132   :  { %4950 = vmatprep.subr.bf16.mxu1 %v7758_v49  ;;  %v7827_v49 = vld [vmem:[%s10853_s1 + $0x1034] ss:$28 sps:$4 sm:$0xff]   ;;  %v7890_v44 = vld [vmem:[%s10853_s1 + $0x11fc] ss:$28 sps:$4 sm:$0xff]  }
 0x133   :  { %v7888_v46 = vld [vmem:[%s10853_s1 + $0x11f8] ss:$28 sps:$4 sm:$0xff]  }
 0x134   :  { %4668 = vmatpush1.bf16.msra.mxu0 %v7753_v48  ;;  %v7824_v48 = vld [vmem:[%s10853_s1 + $0xf94] ss:$28 sps:$4 sm:$0xff]  }
 0x135   :  { %4669 = vmatprep.subr.bf16.mxu0 %v7761_v50  ;;  %4951 = vmatpush1.bf16.msra.mxu1 %v7756_v52  ;;  %v7822_v50 = vld [vmem:[%s10853_s1 + $0xf90] ss:$28 sps:$4 sm:$0xff]  }
 0x136   :  { %4952 = vmatprep.subr.bf16.mxu1 %v7764_v54  ;;  %v7825_v52 = vld [vmem:[%s10853_s1 + $0x1030] ss:$28 sps:$4 sm:$0xff]  }
 0x137   :  { %v7833_v54 = vld [vmem:[%s10853_s1 + $0x106c] ss:$28 sps:$4 sm:$0xff]  }
 0x138   :  { %4670 = vmatpush1.bf16.msra.mxu0 %v7759_v53  ;;  %v7830_v53 = vld [vmem:[%s10853_s1 + $0xfcc] ss:$28 sps:$4 sm:$0xff]  }
 0x139   :  { %4680 = vmatprep.subr.bf16.mxu0 %v7767_v56  ;;  %4953 = vmatpush1.bf16.msra.mxu1 %v7762_v59  ;;  %v7828_v56 = vld [vmem:[%s10853_s1 + $0xfc8] ss:$28 sps:$4 sm:$0xff]  }
 0x13a   :  { %4954 = vmatprep.subr.bf16.mxu1 %v7770_v61  ;;  %v7836_v59 = vld [vmem:[%s10853_s1 + $0x1004] ss:$28 sps:$4 sm:$0xff]  }
 0x13b   :  { %4672 = vmatmul.mubr.bf16.vlgmr.msra.gmra.mrb[0].mxu0 %v9438_v58  ;;  %v7834_v61 = vld [vmem:[%s10853_s1 + $0x1000] ss:$28 sps:$4 sm:$0xff]  }
 0x13c   :  { %4681 = vmatpush1.bf16.msra.mxu0 %v7765_v60  ;;  %4712 = vmatprep.mubr.bf16.mxu0 %v9453_v63  ;;  %v7839_v60 = vld [vmem:[%s10853_s1 + $0x10a4] ss:$28 sps:$4 sm:$0xff]  }
 0x13d   :  { %4682 = vmatprep.subr.bf16.mxu0 %v7773_v62  ;;  %4955 = vmatpush1.bf16.msra.mxu1 %v7768_v2  ;;  %v7837_v62 = vld [vmem:[%s10853_s1 + $0x10a0] ss:$28 sps:$4 sm:$0xff]  }
 0x13e   :  { %4956 = vmatprep.subr.bf16.mxu1 %v7776_v4  ;;  %v7842_v2 = vld [vmem:[%s10853_s1 + $0x103c] ss:$28 sps:$4 sm:$0xff]  }
 0x13f   :  { %v7840_v4 = vld [vmem:[%s10853_s1 + $0x1038] ss:$28 sps:$4 sm:$0xff]  }
 0x140   :  { %4683 = vmatpush1.bf16.msra.mxu0 %v7771_v3  ;;  %v7845_v3 = vld [vmem:[%s10853_s1 + $0x10dc] ss:$28 sps:$4 sm:$0xff]  }
 0x141   :  { %4684 = vmatprep.subr.bf16.mxu0 %v7779_v5  ;;  %4957 = vmatpush1.bf16.msra.mxu1 %v7774_v6  ;;  %v7843_v5 = vld [vmem:[%s10853_s1 + $0x10d8] ss:$28 sps:$4 sm:$0xff]  }
 0x142   :  { %4967 = vmatprep.subr.bf16.mxu1 %v7782_v8  ;;  %v7848_v6 = vld [vmem:[%s10853_s1 + $0x1074] ss:$28 sps:$4 sm:$0xff]  }
 0x143   :  { %v7846_v8 = vld [vmem:[%s10853_s1 + $0x1070] ss:$28 sps:$4 sm:$0xff]  }
 0x144   :  { %4685 = vmatpush1.bf16.msra.mxu0 %v7777_v7  ;;  %4959 = vmatmul.mubr.bf16.vlgmr.msra.gmra.mrb[4].mxu1 %v9438_v58  ;;  %v7851_v7 = vld [vmem:[%s10853_s1 + $0x1114] ss:$28 sps:$4 sm:$0xff]  }
 0x145   :  { %4686 = vmatprep.subr.bf16.mxu0 %v7785_v10  ;;  %4968 = vmatpush1.bf16.msra.mxu1 %v7780_v11  ;;  %v7849_v10 = vld [vmem:[%s10853_s1 + $0x1110] ss:$28 sps:$4 sm:$0xff]  }
 0x146   :  { %4969 = vmatprep.subr.bf16.mxu1 %v7788_v13  ;;  %4999 = vmatprep.mubr.bf16.mxu1 %v9453_v63  ;;  %v7854_v11 = vld [vmem:[%s10853_s1 + $0x10ac] ss:$28 sps:$4 sm:$0xff]  }
 0x147   :  { %v7852_v13 = vld [vmem:[%s10853_s1 + $0x10a8] ss:$28 sps:$4 sm:$0xff]  }
 0x148   :  { %4687 = vmatpush1.bf16.msra.mxu0 %v7783_v12  ;;  %v7857_v12 = vld [vmem:[%s10853_s1 + $0x114c] ss:$28 sps:$4 sm:$0xff]  }
 0x149   :  { %4688 = vmatprep.subr.bf16.mxu0 %v7791_v14  ;;  %4970 = vmatpush1.bf16.msra.mxu1 %v7786_v15  ;;  %v7855_v14 = vld [vmem:[%s10853_s1 + $0x1148] ss:$28 sps:$4 sm:$0xff]  }
 0x14a   :  { %4971 = vmatprep.subr.bf16.mxu1 %v7794_v19  ;;  %v7860_v15 = vld [vmem:[%s10853_s1 + $0x10e4] ss:$28 sps:$4 sm:$0xff]  }
 0x14b   :  { %v7858_v19 = vld [vmem:[%s10853_s1 + $0x10e0] ss:$28 sps:$4 sm:$0xff]  }
 0x14c   :  { %4689 = vmatpush1.bf16.msra.mxu0 %v7789_v16  ;;  %v7863_v16 = vld [vmem:[%s10853_s1 + $0x1184] ss:$28 sps:$4 sm:$0xff]  }
 0x14d   :  { %4690 = vmatprep.subr.bf16.mxu0 %v7797_v20  ;;  %4972 = vmatpush1.bf16.msra.mxu1 %v7792_v21  ;;  %v9648_v20 = vrot.slane %v9420_v51, %v8630_v17  ;;  %v7861_v21 = vld [vmem:[%s10853_s1 + $0x1180] ss:$28 sps:$4 sm:$0xff]   ;;  %v7864_v17 = vld [vmem:[%s10853_s1 + $0x1118] ss:$28 sps:$4 sm:$0xff]   ;;  %v9664_v51 = vcombine.high %v9453_v63, %v9453_v63 }
 0x14e   :  { %4973 = vmatprep.subr.bf16.mxu1 %v7800_v55  ;;  %v7869_v55 = vld [vmem:[%s10853_s1 + $0x11bc] ss:$28 sps:$4 sm:$0xff]  }
 0x150   :  { %4691 = vmatpush1.bf16.msra.mxu0 %v7795_v22  ;;  %v7866_v22 = vld [vmem:[%s10853_s1 + $0x111c] ss:$28 sps:$4 sm:$0xff]  }
 0x151   :  { %4692 = vmatprep.subr.bf16.mxu0 %v7803_v26  ;;  %4974 = vmatpush1.bf16.msra.mxu1 %v7798_v27  ;;  %v7867_v26 = vld [vmem:[%s10853_s1 + $0x11b8] ss:$28 sps:$4 sm:$0xff]  }
 0x152   :  { %4975 = vmatprep.subr.bf16.mxu1 %v7806_v29  ;;  %v7872_v27 = vld [vmem:[%s10853_s1 + $0x1154] ss:$28 sps:$4 sm:$0xff]  }
 0x153   :  { %v7870_v29 = vld [vmem:[%s10853_s1 + $0x1150] ss:$28 sps:$4 sm:$0xff]  }
 0x154   :  { %4693 = vmatpush1.bf16.msra.mxu0 %v7801_v28  ;;  %v7875_v28 = vld [vmem:[%s10853_s1 + $0x11f4] ss:$28 sps:$4 sm:$0xff]  }
 0x155   :  { %4694 = vmatprep.subr.bf16.mxu0 %v7809_v30  ;;  %4976 = vmatpush1.bf16.msra.mxu1 %v7804_v32  ;;  %v7873_v30 = vld [vmem:[%s10853_s1 + $0x11f0] ss:$28 sps:$4 sm:$0xff]  }
 0x156   :  { %4977 = vmatprep.subr.bf16.mxu1 %v7812_v34  ;;  %v7878_v32 = vld [vmem:[%s10853_s1 + $0x118c] ss:$28 sps:$4 sm:$0xff]  }
 0x157   :  { %v7876_v34 = vld [vmem:[%s10853_s1 + $0x1188] ss:$28 sps:$4 sm:$0xff]  }
 0x158   :  { %4695 = vmatpush1.bf16.msra.mxu0 %v7807_v33  ;;  %v7881_v33 = vld [vmem:[%s10853_s1 + $0x122c] ss:$28 sps:$4 sm:$0xff]  }
 0x159   :  { %4696 = vmatprep.subr.bf16.mxu0 %v7815_v35  ;;  %4978 = vmatpush1.bf16.msra.mxu1 %v7810_v38  ;;  %v7879_v35 = vld [vmem:[%s10853_s1 + $0x1228] ss:$28 sps:$4 sm:$0xff]  }
 0x15a   :  { %4979 = vmatprep.subr.bf16.mxu1 %v7818_v41  ;;  %v7884_v38 = vld [vmem:[%s10853_s1 + $0x11c4] ss:$28 sps:$4 sm:$0xff]  }
 0x15b   :  { %v7882_v41 = vld [vmem:[%s10853_s1 + $0x11c0] ss:$28 sps:$4 sm:$0xff]  }
 0x15c   :  { %4697 = vmatpush1.bf16.msra.mxu0 %v7813_v39  ;;  %v7887_v39 = vld [vmem:[%s10853_s1 + $0x1264] ss:$28 sps:$4 sm:$0xff]  }
 0x15d   :  { %4698 = vmatprep.subr.bf16.mxu0 %v7821_v42  ;;  %4980 = vmatpush1.bf16.msra.mxu1 %v7816_v45  ;;  %v7885_v42 = vld [vmem:[%s10853_s1 + $0x1260] ss:$28 sps:$4 sm:$0xff]  }
 0x15e   :  { %4981 = vmatprep.subr.bf16.mxu1 %v7824_v48  ;;  %v7893_v45 = vld [vmem:[%s10853_s1 + $0x129c] ss:$28 sps:$4 sm:$0xff]   ;;  %v7896_v48 = vld [vmem:[%s10853_s1 + $0x1234] ss:$28 sps:$4 sm:$0xff]  }
 0x160   :  { %4699 = vmatpush1.bf16.msra.mxu0 %v7819_v25  ;;  %v7891_v25 = vld [vmem:[%s10853_s1 + $0x1298] ss:$28 sps:$4 sm:$0xff]  }
 0x161   :  { %4700 = vmatprep.subr.bf16.mxu0 %v7827_v49  ;;  %4982 = vmatpush1.bf16.msra.mxu1 %v7822_v50  ;;  %v7899_v49 = vld [vmem:[%s10853_s1 + $0x12d4] ss:$28 sps:$4 sm:$0xff]  }
 0x162   :  { %4983 = vmatprep.subr.bf16.mxu1 %v7830_v53  ;;  %v7894_v50 = vld [vmem:[%s10853_s1 + $0x1230] ss:$28 sps:$4 sm:$0xff]  }
 0x163   :  { %v7902_v53 = vld [vmem:[%s10853_s1 + $0x126c] ss:$28 sps:$4 sm:$0xff]  }
 0x164   :  { %4701 = vmatpush1.bf16.msra.mxu0 %v7825_v52  ;;  %v7897_v52 = vld [vmem:[%s10853_s1 + $0x12d0] ss:$28 sps:$4 sm:$0xff]  }
 0x165   :  { %4702 = vmatprep.subr.bf16.mxu0 %v7833_v54  ;;  %4984 = vmatpush1.bf16.msra.mxu1 %v7828_v56  ;;  %v7905_v54 = vld [vmem:[%s10853_s1 + $0x130c] ss:$28 sps:$4 sm:$0xff]  }
 0x166   :  { %4985 = vmatprep.subr.bf16.mxu1 %v7836_v59  ;;  %v7900_v56 = vld [vmem:[%s10853_s1 + $0x1268] ss:$28 sps:$4 sm:$0xff]  }
 0x167   :  { %v7908_v59 = vld [vmem:[%s10853_s1 + $0x12a4] ss:$28 sps:$4 sm:$0xff]  }
 0x168   :  { %4703 = vmatpush1.bf16.msra.mxu0 %v7831_v57  ;;  %v7903_v57 = vld [vmem:[%s10853_s1 + $0x1308] ss:$28 sps:$4 sm:$0xff]  }
 0x169   :  { %4704 = vmatprep.subr.bf16.mxu0 %v7839_v60  ;;  %4986 = vmatpush1.bf16.msra.mxu1 %v7834_v61  ;;  %v7911_v60 = vld [vmem:[%s10853_s1 + $0x1344] ss:$28 sps:$4 sm:$0xff]  }
 0x16a   :  { %4987 = vmatprep.subr.bf16.mxu1 %v7842_v2  ;;  %v7906_v61 = vld [vmem:[%s10853_s1 + $0x12a0] ss:$28 sps:$4 sm:$0xff]  }
 0x16b   :  { %v7914_v2 = vld [vmem:[%s10853_s1 + $0x12dc] ss:$28 sps:$4 sm:$0xff]  }
 0x16c   :  { %4705 = vmatpush1.bf16.msra.mxu0 %v7837_v62  ;;  %v7909_v62 = vld [vmem:[%s10853_s1 + $0x1340] ss:$28 sps:$4 sm:$0xff]  }
 0x16d   :  { %4706 = vmatprep.subr.bf16.mxu0 %v7845_v3  ;;  %4988 = vmatpush1.bf16.msra.mxu1 %v7840_v4  ;;  %v7917_v3 = vld [vmem:[%s10853_s1 + $0x137c] ss:$28 sps:$4 sm:$0xff]  }
 0x16e   :  { %4989 = vmatprep.subr.bf16.mxu1 %v7848_v6  ;;  %v7912_v4 = vld [vmem:[%s10853_s1 + $0x12d8] ss:$28 sps:$4 sm:$0xff]  }
 0x16f   :  { %v7920_v6 = vld [vmem:[%s10853_s1 + $0x1314] ss:$28 sps:$4 sm:$0xff]  }
 0x170   :  { %4707 = vmatpush1.bf16.msra.mxu0 %v7843_v5  ;;  %v7915_v5 = vld [vmem:[%s10853_s1 + $0x1378] ss:$28 sps:$4 sm:$0xff]  }
 0x171   :  { %4708 = vmatprep.subr.bf16.mxu0 %v7851_v7  ;;  %4990 = vmatpush1.bf16.msra.mxu1 %v7846_v8  ;;  %v7923_v7 = vld [vmem:[%s10853_s1 + $0x13b4] ss:$28 sps:$4 sm:$0xff]  }
 0x172   :  { %4991 = vmatprep.subr.bf16.mxu1 %v7854_v11  ;;  %v7918_v8 = vld [vmem:[%s10853_s1 + $0x1310] ss:$28 sps:$4 sm:$0xff]  }
 0x173   :  { %v7926_v11 = vld [vmem:[%s10853_s1 + $0x134c] ss:$28 sps:$4 sm:$0xff]  }
 0x174   :  { %4709 = vmatpush1.bf16.msra.mxu0 %v7849_v10  ;;  %v7921_v10 = vld [vmem:[%s10853_s1 + $0x13b0] ss:$28 sps:$4 sm:$0xff]  }
 0x175   :  { %4710 = vmatprep.subr.bf16.mxu0 %v7857_v12  ;;  %4992 = vmatpush1.bf16.msra.mxu1 %v7852_v13  ;;  %v7929_v12 = vld [vmem:[%s10853_s1 + $0x13ec] ss:$28 sps:$4 sm:$0xff]  }
 0x176   :  { %4993 = vmatprep.subr.bf16.mxu1 %v7860_v15  ;;  %v7924_v13 = vld [vmem:[%s10853_s1 + $0x1348] ss:$28 sps:$4 sm:$0xff]  }
 0x177   :  { %v7932_v15 = vld [vmem:[%s10853_s1 + $0x1384] ss:$28 sps:$4 sm:$0xff]  }
 0x178   :  { %4711 = vmatpush1.bf16.msra.mxu0 %v7855_v14  ;;  %v7927_v14 = vld [vmem:[%s10853_s1 + $0x13e8] ss:$28 sps:$4 sm:$0xff]  }
 0x179   :  { %4721 = vmatprep.subr.bf16.mxu0 %v7863_v16  ;;  %4994 = vmatpush1.bf16.msra.mxu1 %v7858_v19  ;;  %v7935_v16 = vld [vmem:[%s10853_s1 + $0x1424] ss:$28 sps:$4 sm:$0xff]  }
 0x17a   :  { %4995 = vmatprep.subr.bf16.mxu1 %v7866_v22  ;;  %v7930_v19 = vld [vmem:[%s10853_s1 + $0x1380] ss:$28 sps:$4 sm:$0xff]  }
 0x17b   :  { %4713 = vmatmul.mubr.bf16.vlgmr.msra.gmra.mrb[0].mxu0 %v9648_v20  ;;  %v7938_v22 = vld [vmem:[%s10853_s1 + $0x13bc] ss:$28 sps:$4 sm:$0xff]  }
 0x17c   :  { %4722 = vmatpush1.bf16.msra.mxu0 %v7861_v21  ;;  %4753 = vmatprep.mubr.bf16.mxu0 %v9664_v51  ;;  %v7933_v21 = vld [vmem:[%s10853_s1 + $0x1420] ss:$28 sps:$4 sm:$0xff]  }
 0x17d   :  { %4723 = vmatprep.subr.bf16.mxu0 %v7869_v55  ;;  %4996 = vmatpush1.bf16.msra.mxu1 %v7864_v17  ;;  %v7941_v55 = vld [vmem:[%s10853_s1 + $0x145c] ss:$28 sps:$4 sm:$0xff]  }
 0x17e   :  { %4997 = vmatprep.subr.bf16.mxu1 %v7872_v27  ;;  %v7936_v17 = vld [vmem:[%s10853_s1 + $0x13b8] ss:$28 sps:$4 sm:$0xff]  }
 0x17f   :  { %v7944_v27 = vld [vmem:[%s10853_s1 + $0x13f4] ss:$28 sps:$4 sm:$0xff]  }
 0x180   :  { %4724 = vmatpush1.bf16.msra.mxu0 %v7867_v26  ;;  %v7939_v26 = vld [vmem:[%s10853_s1 + $0x1458] ss:$28 sps:$4 sm:$0xff]  }
 0x181   :  { %4725 = vmatprep.subr.bf16.mxu0 %v7875_v28  ;;  %4998 = vmatpush1.bf16.msra.mxu1 %v7870_v29  ;;  %v7947_v28 = vld [vmem:[%s10853_s1 + $0x1494] ss:$28 sps:$4 sm:$0xff]  }
 0x182   :  { %5008 = vmatprep.subr.bf16.mxu1 %v7878_v32  ;;  %v7942_v29 = vld [vmem:[%s10853_s1 + $0x13f0] ss:$28 sps:$4 sm:$0xff]  }
 0x183   :  { %v7950_v32 = vld [vmem:[%s10853_s1 + $0x142c] ss:$28 sps:$4 sm:$0xff]  }
 0x184   :  { %4726 = vmatpush1.bf16.msra.mxu0 %v7873_v30  ;;  %5000 = vmatmul.mubr.bf16.vlgmr.msra.gmra.mrb[4].mxu1 %v9648_v20  ;;  %v7945_v30 = vld [vmem:[%s10853_s1 + $0x1490] ss:$28 sps:$4 sm:$0xff]  }
 0x185   :  { %4727 = vmatprep.subr.bf16.mxu0 %v7881_v33  ;;  %5009 = vmatpush1.bf16.msra.mxu1 %v7876_v34  ;;  %v7953_v33 = vld [vmem:[%s10853_s1 + $0x14cc] ss:$28 sps:$4 sm:$0xff]  }
 0x186   :  { %5010 = vmatprep.subr.bf16.mxu1 %v7884_v38  ;;  %5040 = vmatprep.mubr.bf16.mxu1 %v9664_v51  ;;  %v7948_v34 = vld [vmem:[%s10853_s1 + $0x1428] ss:$28 sps:$4 sm:$0xff]  }
 0x187   :  { %v7956_v38 = vld [vmem:[%s10853_s1 + $0x1464] ss:$28 sps:$4 sm:$0xff]  }
 0x188   :  { %4728 = vmatpush1.bf16.msra.mxu0 %v7879_v35  ;;  %v7951_v35 = vld [vmem:[%s10853_s1 + $0x14c8] ss:$28 sps:$4 sm:$0xff]  }
 0x189   :  { %4729 = vmatprep.subr.bf16.mxu0 %v7887_v39  ;;  %5011 = vmatpush1.bf16.msra.mxu1 %v7882_v41  ;;  %v7962_v39 = vld [vmem:[%s10853_s1 + $0x14] ss:$28 sps:$4 sm:$0xff]   ;;  %v7954_v41 = vld [vmem:[%s10853_s1 + $0x1460] ss:$28 sps:$4 sm:$0xff]  }
 0x18a   :  { %5012 = vmatprep.subr.bf16.mxu1 %v7890_v44  ;;  %v7960_v44 = vld [vmem:[%s10853_s1 + $0x10] ss:$28 sps:$4 sm:$0xff]  }
 0x18c   :  { %4730 = vmatpush1.bf16.msra.mxu0 %v7885_v42  ;;  %v9852_v42 = vcombine.high %v9648_v20, %v9648_v20 }
 0x18d   :  { %4731 = vmatprep.subr.bf16.mxu0 %v7893_v45  ;;  %5013 = vmatpush1.bf16.msra.mxu1 %v7888_v46  ;;  %v7959_v45 = vld [vmem:[%s10853_s1 + $0x149c] ss:$28 sps:$4 sm:$0xff]   ;;  %v7968_v46 = vld [vmem:[%s10853_s1 + $0x4c] ss:$28 sps:$4 sm:$0xff]  }
 0x18e   :  { %5014 = vmatprep.subr.bf16.mxu1 %v7896_v48  ;;  %v7966_v48 = vld [vmem:[%s10853_s1 + $0x48] ss:$28 sps:$4 sm:$0xff]  }
 0x190   :  { %4732 = vmatpush1.bf16.msra.mxu0 %v7891_v25  ;;  %v7957_v25 = vld [vmem:[%s10853_s1 + $0x1498] ss:$28 sps:$4 sm:$0xff]  }
 0x191   :  { %4733 = vmatprep.subr.bf16.mxu0 %v7899_v49  ;;  %5015 = vmatpush1.bf16.msra.mxu1 %v7894_v50  ;;  %v7965_v49 = vld [vmem:[%s10853_s1 + $0x14d4] ss:$28 sps:$4 sm:$0xff]   ;;  %v7971_v50 = vld [vmem:[%s10853_s1 + $0x84] ss:$28 sps:$4 sm:$0xff]  }
 0x192   :  { %5016 = vmatprep.subr.bf16.mxu1 %v7902_v53  ;;  %v7969_v53 = vld [vmem:[%s10853_s1 + $0x80] ss:$28 sps:$4 sm:$0xff]  }
 0x194   :  { %4734 = vmatpush1.bf16.msra.mxu0 %v7897_v52  ;;  %v7963_v52 = vld [vmem:[%s10853_s1 + $0x14d0] ss:$28 sps:$4 sm:$0xff]  }
 0x195   :  { %4735 = vmatprep.subr.bf16.mxu0 %v7905_v54  ;;  %5017 = vmatpush1.bf16.msra.mxu1 %v7900_v56  ;;  %v7974_v54 = vld [vmem:[%s10853_s1 + $0x150c] ss:$28 sps:$4 sm:$0xff]   ;;  %v7977_v56 = vld [vmem:[%s10853_s1 + $0xbc] ss:$28 sps:$4 sm:$0xff]  }
 0x196   :  { %5018 = vmatprep.subr.bf16.mxu1 %v7908_v59  ;;  %v7975_v59 = vld [vmem:[%s10853_s1 + $0xb8] ss:$28 sps:$4 sm:$0xff]  }
 0x198   :  { %4736 = vmatpush1.bf16.msra.mxu0 %v7903_v57  ;;  %v7972_v57 = vld [vmem:[%s10853_s1 + $0x1508] ss:$28 sps:$4 sm:$0xff]  }
 0x199   :  { %4737 = vmatprep.subr.bf16.mxu0 %v7911_v60  ;;  %5019 = vmatpush1.bf16.msra.mxu1 %v7906_v61  ;;  %v7980_v60 = vld [vmem:[%s10853_s1 + $0x1544] ss:$28 sps:$4 sm:$0xff]   ;;  %v7983_v61 = vld [vmem:[%s10853_s1 + $0xf4] ss:$28 sps:$4 sm:$0xff]  }
 0x19a   :  { %5020 = vmatprep.subr.bf16.mxu1 %v7914_v2  ;;  %v7981_v2 = vld [vmem:[%s10853_s1 + $0xf0] ss:$28 sps:$4 sm:$0xff]  }
 0x19c   :  { %4738 = vmatpush1.bf16.msra.mxu0 %v7909_v62  ;;  %v7978_v62 = vld [vmem:[%s10853_s1 + $0x1540] ss:$28 sps:$4 sm:$0xff]  }
 0x19d   :  { %4739 = vmatprep.subr.bf16.mxu0 %v7917_v3  ;;  %5021 = vmatpush1.bf16.msra.mxu1 %v7912_v4  ;;  %v7986_v3 = vld [vmem:[%s10853_s1 + $0x1514] ss:$28 sps:$4 sm:$0xff]   ;;  %v7989_v4 = vld [vmem:[%s10853_s1 + $0x12c] ss:$28 sps:$4 sm:$0xff]  }
 0x19e   :  { %5022 = vmatprep.subr.bf16.mxu1 %v7920_v6  ;;  %v7995_v6 = vld [vmem:[%s10853_s1 + $0x164] ss:$28 sps:$4 sm:$0xff]  }
 0x1a0   :  { %4740 = vmatpush1.bf16.msra.mxu0 %v7915_v5  ;;  %v7987_v5 = vld [vmem:[%s10853_s1 + $0x128] ss:$28 sps:$4 sm:$0xff]  }
 0x1a1   :  { %4741 = vmatprep.subr.bf16.mxu0 %v7923_v7  ;;  %5023 = vmatpush1.bf16.msra.mxu1 %v7918_v8  ;;  %v7984_v7 = vld [vmem:[%s10853_s1 + $0x1510] ss:$28 sps:$4 sm:$0xff]   ;;  %v7993_v8 = vld [vmem:[%s10853_s1 + $0x160] ss:$28 sps:$4 sm:$0xff]  }
 0x1a2   :  { %5024 = vmatprep.subr.bf16.mxu1 %v7926_v11  ;;  %v7999_v11 = vld [vmem:[%s10853_s1 + $0x19c] ss:$28 sps:$4 sm:$0xff]  }
 0x1a4   :  { %4742 = vmatpush1.bf16.msra.mxu0 %v7921_v10  ;;  %v7992_v10 = vld [vmem:[%s10853_s1 + $0x154c] ss:$28 sps:$4 sm:$0xff]  }
 0x1a5   :  { %4743 = vmatprep.subr.bf16.mxu0 %v7929_v12  ;;  %5025 = vmatpush1.bf16.msra.mxu1 %v7924_v13  ;;  %v7990_v12 = vld [vmem:[%s10853_s1 + $0x1548] ss:$28 sps:$4 sm:$0xff]   ;;  %v7997_v13 = vld [vmem:[%s10853_s1 + $0x198] ss:$28 sps:$4 sm:$0xff]  }
 0x1a6   :  { %5026 = vmatprep.subr.bf16.mxu1 %v7932_v15  ;;  %v8004_v15 = vld [vmem:[%s10853_s1 + $0x1d4] ss:$28 sps:$4 sm:$0xff]  }
 0x1a8   :  { %4744 = vmatpush1.bf16.msra.mxu0 %v7927_v14  ;;  %v7996_v14 = vld [vmem:[%s10853_s1 + $0x1d8] ss:$28 sps:$4 sm:$0xff]  }
 0x1a9   :  { %4745 = vmatprep.subr.bf16.mxu0 %v7935_v16  ;;  %5027 = vmatpush1.bf16.msra.mxu1 %v7930_v19  ;;  %v8000_v16 = vld [vmem:[%s10853_s1 + $0x18] ss:$28 sps:$4 sm:$0xff]   ;;  %v8002_v19 = vld [vmem:[%s10853_s1 + $0x1d0] ss:$28 sps:$4 sm:$0xff]  }
 0x1aa   :  { %5028 = vmatprep.subr.bf16.mxu1 %v7938_v22  ;;  %v8005_v22 = vld [vmem:[%s10853_s1 + $0x50] ss:$28 sps:$4 sm:$0xff]  }
 0x1ac   :  { %4746 = vmatpush1.bf16.msra.mxu0 %v7933_v21  ;;  %v8009_v21 = vld [vmem:[%s10853_s1 + $0x20c] ss:$28 sps:$4 sm:$0xff]  }
 0x1ad   :  { %4747 = vmatprep.subr.bf16.mxu0 %v7941_v55  ;;  %5029 = vmatpush1.bf16.msra.mxu1 %v7936_v17  ;;  %v8007_v55 = vld [vmem:[%s10853_s1 + $0x208] ss:$28 sps:$4 sm:$0xff]  }
 0x1ae   :  { %5030 = vmatprep.subr.bf16.mxu1 %v7944_v27  ;;  %v8006_v17 = vld [vmem:[%s10853_s1 + $0x248] ss:$28 sps:$4 sm:$0xff]  }
 0x1af   :  { %v8010_v27 = vld [vmem:[%s10853_s1 + $0x88] ss:$28 sps:$4 sm:$0xff]  }
 0x1b0   :  { %4748 = vmatpush1.bf16.msra.mxu0 %v7939_v26  ;;  %v8014_v26 = vld [vmem:[%s10853_s1 + $0x244] ss:$28 sps:$4 sm:$0xff]  }
 0x1b1   :  { %4749 = vmatprep.subr.bf16.mxu0 %v7947_v28  ;;  %5031 = vmatpush1.bf16.msra.mxu1 %v7942_v29  ;;  %v8012_v28 = vld [vmem:[%s10853_s1 + $0x240] ss:$28 sps:$4 sm:$0xff]  }
 0x1b2   :  { %5032 = vmatprep.subr.bf16.mxu1 %v7950_v32  ;;  %v8011_v29 = vld [vmem:[%s10853_s1 + $0x280] ss:$28 sps:$4 sm:$0xff]   ;;  %v8017_v32 = vld [vmem:[%s10853_s1 + $0x278] ss:$28 sps:$4 sm:$0xff]  }
 0x1b4   :  { %4750 = vmatpush1.bf16.msra.mxu0 %v7945_v30  ;;  %v8019_v30 = vld [vmem:[%s10853_s1 + $0x27c] ss:$28 sps:$4 sm:$0xff]  }
 0x1b5   :  { %4751 = vmatprep.subr.bf16.mxu0 %v7953_v33  ;;  %5033 = vmatpush1.bf16.msra.mxu1 %v7948_v34  ;;  %v8016_v33 = vld [vmem:[%s10853_s1 + $0x2b8] ss:$28 sps:$4 sm:$0xff]  }
 0x1b6   :  { %5034 = vmatprep.subr.bf16.mxu1 %v7956_v38  ;;  %v8024_v34 = vld [vmem:[%s10853_s1 + $0x2b4] ss:$28 sps:$4 sm:$0xff]  }
 0x1b7   :  { %v8022_v38 = vld [vmem:[%s10853_s1 + $0x2b0] ss:$28 sps:$4 sm:$0xff]  }
 0x1b8   :  { %4752 = vmatpush1.bf16.msra.mxu0 %v7951_v35  ;;  %v8020_v35 = vld [vmem:[%s10853_s1 + $0xf8] ss:$28 sps:$4 sm:$0xff]  }
 0x1b9   :  { %5090 = vmatprep.subr.bf16.mxu0 %v7962_v39  ;;  %5035 = vmatpush1.bf16.msra.mxu1 %v7954_v41  ;;  %v8021_v39 = vld [vmem:[%s10853_s1 + $0x2f0] ss:$28 sps:$4 sm:$0xff]  }
 0x1ba   :  { %5036 = vmatprep.subr.bf16.mxu1 %v7959_v45  ;;  %v8029_v41 = vld [vmem:[%s10853_s1 + $0x2ec] ss:$28 sps:$4 sm:$0xff]  }
 0x1bb   :  { %4754 = vmatmul.mubr.bf16.vlgmr.msra.gmra.mrb[0].mxu0 %v9852_v42  ;;  %v8027_v45 = vld [vmem:[%s10853_s1 + $0x2e8] ss:$28 sps:$4 sm:$0xff]  }
 0x1bc   :  { %5091 = vmatpush1.bf16.msra.mxu0 %v7960_v44  ;;  %5122 = vmatprep.mubr.bf16.mxu0 %v8766_v1  ;;  %v8025_v44 = vld [vmem:[%s10853_s1 + $0x130] ss:$28 sps:$4 sm:$0xff]  }
 0x1bd   :  { %5092 = vmatprep.subr.bf16.mxu0 %v7968_v46  ;;  %5037 = vmatpush1.bf16.msra.mxu1 %v7957_v25  ;;  %v8026_v46 = vld [vmem:[%s10853_s1 + $0x328] ss:$28 sps:$4 sm:$0xff]  }
 0x1be   :  { %5038 = vmatprep.subr.bf16.mxu1 %v7965_v49  ;;  %v8034_v25 = vld [vmem:[%s10853_s1 + $0x324] ss:$28 sps:$4 sm:$0xff]  }
 0x1bf   :  { %v8032_v49 = vld [vmem:[%s10853_s1 + $0x320] ss:$28 sps:$4 sm:$0xff]  }
 0x1c0   :  { %5093 = vmatpush1.bf16.msra.mxu0 %v7966_v48  ;;  %v8030_v48 = vld [vmem:[%s10853_s1 + $0x168] ss:$28 sps:$4 sm:$0xff]  }
 0x1c1   :  { %5094 = vmatprep.subr.bf16.mxu0 %v7971_v50  ;;  %5039 = vmatpush1.bf16.msra.mxu1 %v7963_v52  ;;  %v8031_v50 = vld [vmem:[%s10853_s1 + $0x360] ss:$28 sps:$4 sm:$0xff]  }
 0x1c2   :  { %5049 = vmatprep.subr.bf16.mxu1 %v7974_v54  ;;  %v8039_v52 = vld [vmem:[%s10853_s1 + $0x35c] ss:$28 sps:$4 sm:$0xff]  }
 0x1c3   :  { %v8037_v54 = vld [vmem:[%s10853_s1 + $0x358] ss:$28 sps:$4 sm:$0xff]  }
 0x1c4   :  { %5095 = vmatpush1.bf16.msra.mxu0 %v7969_v53  ;;  %5041 = vmatmul.mubr.bf16.vlgmr.msra.gmra.mrb[4].mxu1 %v9852_v42  ;;  %v8035_v53 = vld [vmem:[%s10853_s1 + $0x1a0] ss:$28 sps:$4 sm:$0xff]  }
 0x1c5   :  { %5096 = vmatprep.subr.bf16.mxu0 %v7977_v56  ;;  %5050 = vmatpush1.bf16.msra.mxu1 %v7972_v57  ;;  %v8036_v56 = vld [vmem:[%s10853_s1 + $0x558] ss:$28 sps:$4 sm:$0xff]  }
 0x1c6   :  { %5051 = vmatprep.subr.bf16.mxu1 %v7980_v60  ;;  %5081 = vmatprep.mubr.bf16.mxu1 %v8522_v0  ;;  %v8044_v57 = vld [vmem:[%s10853_s1 + $0x394] ss:$28 sps:$4 sm:$0xff]  }
 0x1c7   :  { %v8042_v60 = vld [vmem:[%s10853_s1 + $0x390] ss:$28 sps:$4 sm:$0xff]  }
 0x1c8   :  { %5097 = vmatpush1.bf16.msra.mxu0 %v7975_v59  ;;  %v8040_v59 = vld [vmem:[%s10853_s1 + $0x398] ss:$28 sps:$4 sm:$0xff]  }
 0x1c9   :  { %5098 = vmatprep.subr.bf16.mxu0 %v7983_v61  ;;  %5052 = vmatpush1.bf16.msra.mxu1 %v7978_v62  ;;  %v8041_v61 = vld [vmem:[%s10853_s1 + $0x590] ss:$28 sps:$4 sm:$0xff]  }
 0x1ca   :  { %5336 = vmatprep.subr.bf16.mxu1 %v7986_v3  ;;  %v8049_v62 = vld [vmem:[%s10853_s1 + $0x3cc] ss:$28 sps:$4 sm:$0xff]  }
 0x1cb   :  { %v8047_v3 = vld [vmem:[%s10853_s1 + $0x3c8] ss:$28 sps:$4 sm:$0xff]  }
 0x1cc   :  { %5099 = vmatpush1.bf16.msra.mxu0 %v7981_v2  ;;  %v8045_v2 = vld [vmem:[%s10853_s1 + $0x3d0] ss:$28 sps:$4 sm:$0xff]  }
 0x1cd   :  { %5100 = vmatprep.subr.bf16.mxu0 %v7989_v4  ;;  %v8046_v4 = vld [vmem:[%s10853_s1 + $0x5c8] ss:$28 sps:$4 sm:$0xff]  }
 0x1d0   :  { %5101 = vmatpush1.bf16.msra.mxu0 %v7987_v5  ;;  %6997 = vmatmul.mubr.msk.bf16.vlgmr.msra.gmra.mrb[4].mxu1 %vm4512_vm0, %v8646_v24  ;;  %v8054_v5 = vld [vmem:[%s10853_s1 + $0x404] ss:$28 sps:$4 sm:$0xff]  }
 0x1d1   :  { %5102 = vmatprep.subr.bf16.mxu0 %v7995_v6  ;;  %5337 = vmatpush1.bf16.msra.mxu1 %v7984_v7  ;;  %v8052_v6 = vld [vmem:[%s10853_s1 + $0x400] ss:$28 sps:$4 sm:$0xff]  }
 0x1d2   :  { %5338 = vmatprep.subr.bf16.mxu1 %v7992_v10  ;;  %5368 = vmatprep.mubr.bf16.mxu1 %v8522_v0  ;;  %v8001_v0 = vld [vmem:[%s10853_s1 + $0x210] ss:$28 sps:$4 sm:$0xff]   ;;  %v8051_v7 = vld [vmem:[%s10853_s1 + $0x600] ss:$28 sps:$4 sm:$0xff]   ;;  %v8057_v10 = vld [vmem:[%s10853_s1 + $0x438] ss:$28 sps:$4 sm:$0xff]  }
 0x1d4   :  { %5103 = vmatpush1.bf16.msra.mxu0 %v7993_v8  ;;  %v8059_v8 = vld [vmem:[%s10853_s1 + $0x43c] ss:$28 sps:$4 sm:$0xff]  }
 0x1d5   :  { %5104 = vmatprep.subr.bf16.mxu0 %v7999_v11  ;;  %5339 = vmatpush1.bf16.msra.mxu1 %v7990_v12  ;;  %v8056_v11 = vld [vmem:[%s10853_s1 + $0x638] ss:$28 sps:$4 sm:$0xff]  }
 0x1d6   :  { %7057 = vmatprep.subr.bf16.mxu1 %v7996_v14  ;;  %v8064_v12 = vld [vmem:[%s10853_s1 + $0x474] ss:$28 sps:$4 sm:$0xff]  }
 0x1d7   :  { %v8062_v14 = vld [vmem:[%s10853_s1 + $0x470] ss:$28 sps:$4 sm:$0xff]  }
 0x1d8   :  { %5105 = vmatpush1.bf16.msra.mxu0 %v7997_v13  ;;  %6998 = vmatmul.mubr.msk.bf16.vlgmr.msra.gmra.mrb[8].mxu1 %vm4512_vm0, %v8646_v24  ;;  %v8060_v13 = vld [vmem:[%s10853_s1 + $0x478] ss:$28 sps:$4 sm:$0xff]  }
 0x1d9   :  { %5106 = vmatprep.subr.bf16.mxu0 %v8004_v15  ;;  %7058 = vmatpush3.bf16.msra.mxu1 %v8000_v16  ;;  %v8061_v15 = vld [vmem:[%s10853_s1 + $0x670] ss:$28 sps:$4 sm:$0xff]  }
 0x1da   :  { %7059 = vmatprep.subr.bf16.mxu1 %v8001_v0  ;;  %5409 = vmatprep.mubr.bf16.mxu1 %v8766_v1  ;;  %v8015_v1 = vld [vmem:[%s10853_s1 + $0xc0] ss:$28 sps:$4 sm:$0xff]   ;;  %v8069_v16 = vld [vmem:[%s10853_s1 + $0x4ac] ss:$28 sps:$4 sm:$0xff]  }
 0x1db   :  { %v8067_v0 = vld [vmem:[%s10853_s1 + $0x4a8] ss:$28 sps:$4 sm:$0xff]  }
 0x1dc   :  { %5107 = vmatpush1.bf16.msra.mxu0 %v8002_v19  ;;  %v8065_v19 = vld [vmem:[%s10853_s1 + $0x4b0] ss:$28 sps:$4 sm:$0xff]  }
 0x1dd   :  { %5108 = vmatprep.subr.bf16.mxu0 %v8009_v21  ;;  %7060 = vmatpush3.bf16.msra.mxu1 %v8005_v22  ;;  %v8066_v21 = vld [vmem:[%s10853_s1 + $0x6a8] ss:$28 sps:$4 sm:$0xff]  }
 0x1de   :  { %7061 = vmatprep.subr.bf16.mxu1 %v8006_v17  ;;  %v8074_v22 = vld [vmem:[%s10853_s1 + $0x4e4] ss:$28 sps:$4 sm:$0xff]  }
 0x1df   :  { %v8071_v17 = vld [vmem:[%s10853_s1 + $0x6e0] ss:$28 sps:$4 sm:$0xff]  }
 0x1e0   :  { %5109 = vmatpush1.bf16.msra.mxu0 %v8007_v55  ;;  %v8070_v55 = vld [vmem:[%s10853_s1 + $0x4e8] ss:$28 sps:$4 sm:$0xff]  }
 0x1e1   :  { %5110 = vmatprep.subr.bf16.mxu0 %v8014_v26  ;;  %7062 = vmatpush3.bf16.msra.mxu1 %v8010_v27  ;;  %v8072_v26 = vld [vmem:[%s10853_s1 + $0x4e0] ss:$28 sps:$4 sm:$0xff]  }
 0x1e2   :  { %7063 = vmatprep.subr.bf16.mxu1 %v8011_v29  ;;  %v8079_v27 = vld [vmem:[%s10853_s1 + $0x51c] ss:$28 sps:$4 sm:$0xff]  }
 0x1e3   :  { %v8077_v29 = vld [vmem:[%s10853_s1 + $0x518] ss:$28 sps:$4 sm:$0xff]  }
 0x1e4   :  { %5111 = vmatpush1.bf16.msra.mxu0 %v8012_v28  ;;  %v8075_v28 = vld [vmem:[%s10853_s1 + $0x520] ss:$28 sps:$4 sm:$0xff]  }
 0x1e5   :  { %5112 = vmatprep.subr.bf16.mxu0 %v8019_v30  ;;  %7064 = vmatpush3.bf16.msra.mxu1 %v8015_v1  ;;  %v8076_v30 = vld [vmem:[%s10853_s1 + $0x8d8] ss:$28 sps:$4 sm:$0xff]  }
 0x1e6   :  { %7065 = vmatprep.subr.bf16.mxu1 %v8016_v33  ;;  %v8084_v1 = vld [vmem:[%s10853_s1 + $0x554] ss:$28 sps:$4 sm:$0xff]  }
 0x1e7   :  { %v8082_v33 = vld [vmem:[%s10853_s1 + $0x550] ss:$28 sps:$4 sm:$0xff]  }
 0x1e8   :  { %5113 = vmatpush1.bf16.msra.mxu0 %v8017_v32  ;;  %v8080_v32 = vld [vmem:[%s10853_s1 + $0x718] ss:$28 sps:$4 sm:$0xff]  }
 0x1e9   :  { %5114 = vmatprep.subr.bf16.mxu0 %v8024_v34  ;;  %7066 = vmatpush3.bf16.msra.mxu1 %v8020_v35  ;;  %v8081_v34 = vld [vmem:[%s10853_s1 + $0x910] ss:$28 sps:$4 sm:$0xff]  }
 0x1ea   :  { %7067 = vmatprep.subr.bf16.mxu1 %v8021_v39  ;;  %v8089_v35 = vld [vmem:[%s10853_s1 + $0x58c] ss:$28 sps:$4 sm:$0xff]  }
 0x1eb   :  { %v8087_v39 = vld [vmem:[%s10853_s1 + $0x588] ss:$28 sps:$4 sm:$0xff]  }
 0x1ec   :  { %5115 = vmatpush1.bf16.msra.mxu0 %v8022_v38  ;;  %v8085_v38 = vld [vmem:[%s10853_s1 + $0x750] ss:$28 sps:$4 sm:$0xff]  }
 0x1ed   :  { %5116 = vmatprep.subr.bf16.mxu0 %v8029_v41  ;;  %7068 = vmatpush3.bf16.msra.mxu1 %v8025_v44  ;;  %v8086_v41 = vld [vmem:[%s10853_s1 + $0x948] ss:$28 sps:$4 sm:$0xff]  }
 0x1ee   :  { %7069 = vmatprep.subr.bf16.mxu1 %v8026_v46  ;;  %v8094_v44 = vld [vmem:[%s10853_s1 + $0x5c4] ss:$28 sps:$4 sm:$0xff]  }
 0x1ef   :  { %v8091_v46 = vld [vmem:[%s10853_s1 + $0x980] ss:$28 sps:$4 sm:$0xff]  }
 0x1f0   :  { %5117 = vmatpush1.bf16.msra.mxu0 %v8027_v45  ;;  %v8090_v45 = vld [vmem:[%s10853_s1 + $0x788] ss:$28 sps:$4 sm:$0xff]  }
 0x1f1   :  { %5118 = vmatprep.subr.bf16.mxu0 %v8034_v25  ;;  %7070 = vmatpush3.bf16.msra.mxu1 %v8030_v48  ;;  %v8092_v25 = vld [vmem:[%s10853_s1 + $0x5c0] ss:$28 sps:$4 sm:$0xff]  }
 0x1f2   :  { %7071 = vmatprep.subr.bf16.mxu1 %v8031_v50  ;;  %v8099_v48 = vld [vmem:[%s10853_s1 + $0x5fc] ss:$28 sps:$4 sm:$0xff]  }
 0x1f3   :  { %v8096_v50 = vld [vmem:[%s10853_s1 + $0x9b8] ss:$28 sps:$4 sm:$0xff]  }
 0x1f4   :  { %5119 = vmatpush1.bf16.msra.mxu0 %v8032_v49  ;;  %v8095_v49 = vld [vmem:[%s10853_s1 + $0x7c0] ss:$28 sps:$4 sm:$0xff]  }
 0x1f5   :  { %5120 = vmatprep.subr.bf16.mxu0 %v8039_v52  ;;  %7072 = vmatpush3.bf16.msra.mxu1 %v8035_v53  ;;  %v8097_v52 = vld [vmem:[%s10853_s1 + $0x5f8] ss:$28 sps:$4 sm:$0xff]  }
 0x1f6   :  { %7079 = vmatprep.subr.bf16.mxu1 %v8036_v56  ;;  %v8104_v53 = vld [vmem:[%s10853_s1 + $0x634] ss:$28 sps:$4 sm:$0xff]  }
 0x1f7   :  { %v8101_v56 = vld [vmem:[%s10853_s1 + $0x9f0] ss:$28 sps:$4 sm:$0xff]  }
 0x1f8   :  { %5121 = vmatpush1.bf16.msra.mxu0 %v8037_v54  ;;  %5410 = vmatmul.mubr.bf16.vlgmr.msra.gmra.mrb[12].mxu1 %v8813_v18  ;;  %v8100_v54 = vld [vmem:[%s10853_s1 + $0x7f8] ss:$28 sps:$4 sm:$0xff]  }
 0x1f9   :  { %5131 = vmatprep.subr.bf16.mxu0 %v8044_v57  ;;  %7080 = vmatpush3.bf16.msra.mxu1 %v8040_v59  ;;  %v8102_v57 = vld [vmem:[%s10853_s1 + $0x630] ss:$28 sps:$4 sm:$0xff]  }
 0x1fa   :  { %7081 = vmatprep.subr.bf16.mxu1 %v8041_v61  ;;  %5449 = vmatprep.mubr.bf16.mxu1 %v8829_v23  ;;  %v8109_v59 = vld [vmem:[%s10853_s1 + $0x66c] ss:$28 sps:$4 sm:$0xff]  }
 0x1fb   :  { %5123 = vmatmul.mubr.bf16.vlgmr.msra.gmra.mrb[4].mxu0 %v8813_v18  ;;  %v8050_v18 = vld [vmem:[%s10853_s1 + $0x408] ss:$28 sps:$4 sm:$0xff]  }
 0x1fc   :  { %5132 = vmatpush1.bf16.msra.mxu0 %v8042_v60  ;;  %5163 = vmatprep.mubr.bf16.mxu0 %v8829_v23  ;;  %v8055_v23 = vld [vmem:[%s10853_s1 + $0x440] ss:$28 sps:$4 sm:$0xff]   ;;  %v8105_v60 = vld [vmem:[%s10853_s1 + $0x830] ss:$28 sps:$4 sm:$0xff]   ;;  %v8107_v61 = vld [vmem:[%s10853_s1 + $0x668] ss:$28 sps:$4 sm:$0xff]  }
 0x1fd   :  { %5133 = vmatprep.subr.bf16.mxu0 %v8049_v62  ;;  %7082 = vmatpush3.bf16.msra.mxu1 %v8045_v2  ;;  %v8106_v62 = vld [vmem:[%s10853_s1 + $0xa28] ss:$28 sps:$4 sm:$0xff]  }
 0x1fe   :  { %7083 = vmatprep.subr.bf16.mxu1 %v8046_v4  ;;  %v8114_v2 = vld [vmem:[%s10853_s1 + $0x6a4] ss:$28 sps:$4 sm:$0xff]  }
 0x1ff   :  { %v8112_v4 = vld [vmem:[%s10853_s1 + $0x6a0] ss:$28 sps:$4 sm:$0xff]  }
 0x200   :  { %5134 = vmatpush1.bf16.msra.mxu0 %v8047_v3  ;;  %v8110_v3 = vld [vmem:[%s10853_s1 + $0x868] ss:$28 sps:$4 sm:$0xff]  }
 0x201   :  { %5135 = vmatprep.subr.bf16.mxu0 %v8054_v5  ;;  %7084 = vmatpush3.bf16.msra.mxu1 %v8050_v18  ;;  %v8111_v5 = vld [vmem:[%s10853_s1 + $0xa60] ss:$28 sps:$4 sm:$0xff]  }
 0x202   :  { %7085 = vmatprep.subr.bf16.mxu1 %v8051_v7  ;;  %v8119_v18 = vld [vmem:[%s10853_s1 + $0x6dc] ss:$28 sps:$4 sm:$0xff]  }
 0x203   :  { %v8117_v7 = vld [vmem:[%s10853_s1 + $0x6d8] ss:$28 sps:$4 sm:$0xff]  }
 0x204   :  { %5136 = vmatpush1.bf16.msra.mxu0 %v8052_v6  ;;  %v8115_v6 = vld [vmem:[%s10853_s1 + $0x8a0] ss:$28 sps:$4 sm:$0xff]  }
 0x205   :  { %5137 = vmatprep.subr.bf16.mxu0 %v8059_v8  ;;  %7086 = vmatpush3.bf16.msra.mxu1 %v8055_v23  ;;  %v8116_v8 = vld [vmem:[%s10853_s1 + $0xc58] ss:$28 sps:$4 sm:$0xff]  }
 0x206   :  { %7087 = vmatprep.subr.bf16.mxu1 %v8056_v11  ;;  %v8124_v23 = vld [vmem:[%s10853_s1 + $0x714] ss:$28 sps:$4 sm:$0xff]  }
 0x207   :  { %v8122_v11 = vld [vmem:[%s10853_s1 + $0x710] ss:$28 sps:$4 sm:$0xff]  }
 0x208   :  { %5138 = vmatpush1.bf16.msra.mxu0 %v8057_v10  ;;  %v8120_v10 = vld [vmem:[%s10853_s1 + $0xa98] ss:$28 sps:$4 sm:$0xff]  }
 0x209   :  { %5139 = vmatprep.subr.bf16.mxu0 %v8064_v12  ;;  %7088 = vmatpush3.bf16.msra.mxu1 %v8060_v13  ;;  %v8121_v12 = vld [vmem:[%s10853_s1 + $0xc90] ss:$28 sps:$4 sm:$0xff]  }
 0x20a   :  { %7089 = vmatprep.subr.bf16.mxu1 %v8061_v15  ;;  %v8129_v13 = vld [vmem:[%s10853_s1 + $0x74c] ss:$28 sps:$4 sm:$0xff]  }
 0x20b   :  { %v8127_v15 = vld [vmem:[%s10853_s1 + $0x748] ss:$28 sps:$4 sm:$0xff]  }
 0x20c   :  { %5140 = vmatpush1.bf16.msra.mxu0 %v8062_v14  ;;  %v8125_v14 = vld [vmem:[%s10853_s1 + $0xad0] ss:$28 sps:$4 sm:$0xff]  }
 0x20d   :  { %5141 = vmatprep.subr.bf16.mxu0 %v8069_v16  ;;  %7090 = vmatpush3.bf16.msra.mxu1 %v8065_v19  ;;  %v8126_v16 = vld [vmem:[%s10853_s1 + $0xcc8] ss:$28 sps:$4 sm:$0xff]  }
 0x20e   :  { %7091 = vmatprep.subr.bf16.mxu1 %v8066_v21  ;;  %v8130_v19 = vld [vmem:[%s10853_s1 + $0xb08] ss:$28 sps:$4 sm:$0xff]   ;;  %v8131_v21 = vld [vmem:[%s10853_s1 + $0xd00] ss:$28 sps:$4 sm:$0xff]  }
 0x210   :  { %5142 = vmatpush1.bf16.msra.mxu0 %v8067_v0  ;;  %v8132_v0 = vld [vmem:[%s10853_s1 + $0x780] ss:$28 sps:$4 sm:$0xff]  }
 0x211   :  { %5143 = vmatprep.subr.bf16.mxu0 %v8074_v22  ;;  %7092 = vmatpush3.bf16.msra.mxu1 %v8070_v55  ;;  %v8135_v22 = vld [vmem:[%s10853_s1 + $0xb40] ss:$28 sps:$4 sm:$0xff]   ;;  %v8137_v55 = vld [vmem:[%s10853_s1 + $0x7b8] ss:$28 sps:$4 sm:$0xff]  }
 0x212   :  { %7093 = vmatprep.subr.bf16.mxu1 %v8071_v17  ;;  %v8136_v17 = vld [vmem:[%s10853_s1 + $0xd38] ss:$28 sps:$4 sm:$0xff]  }
 0x214   :  { %5144 = vmatpush1.bf16.msra.mxu0 %v8072_v26  ;;  %v8144_v26 = vld [vmem:[%s10853_s1 + $0x7f4] ss:$28 sps:$4 sm:$0xff]  }
 0x215   :  { %5145 = vmatprep.subr.bf16.mxu0 %v8079_v27  ;;  %7094 = vmatpush3.bf16.msra.mxu1 %v8075_v28  ;;  %v8140_v27 = vld [vmem:[%s10853_s1 + $0xb78] ss:$28 sps:$4 sm:$0xff]   ;;  %v8142_v28 = vld [vmem:[%s10853_s1 + $0x7f0] ss:$28 sps:$4 sm:$0xff]  }
 0x216   :  { %7101 = vmatprep.subr.bf16.mxu1 %v8076_v30  ;;  %v8149_v30 = vld [vmem:[%s10853_s1 + $0x82c] ss:$28 sps:$4 sm:$0xff]  }
 0x218   :  { %5146 = vmatpush1.bf16.msra.mxu0 %v8077_v29  ;;  %5450 = vmatmul.mubr.bf16.vlgmr.msra.gmra.mrb[16].mxu1 %v9024_v31  ;;  %v8141_v29 = vld [vmem:[%s10853_s1 + $0xd70] ss:$28 sps:$4 sm:$0xff]  }
 0x219   :  { %5147 = vmatprep.subr.bf16.mxu0 %v8084_v1  ;;  %7102 = vmatpush3.bf16.msra.mxu1 %v8080_v32  ;;  %v8145_v1 = vld [vmem:[%s10853_s1 + $0xbb0] ss:$28 sps:$4 sm:$0xff]   ;;  %v8147_v32 = vld [vmem:[%s10853_s1 + $0x828] ss:$28 sps:$4 sm:$0xff]  }
 0x21a   :  { %7103 = vmatprep.subr.bf16.mxu1 %v8081_v34  ;;  %5489 = vmatprep.mubr.bf16.mxu1 %v9039_v36  ;;  %v8154_v34 = vld [vmem:[%s10853_s1 + $0x864] ss:$28 sps:$4 sm:$0xff]  }
 0x21c   :  { %5148 = vmatpush1.bf16.msra.mxu0 %v8082_v33  ;;  %v8146_v33 = vld [vmem:[%s10853_s1 + $0xda8] ss:$28 sps:$4 sm:$0xff]  }
 0x21d   :  { %5149 = vmatprep.subr.bf16.mxu0 %v8089_v35  ;;  %7104 = vmatpush3.bf16.msra.mxu1 %v8085_v38  ;;  %v8150_v35 = vld [vmem:[%s10853_s1 + $0xbe8] ss:$28 sps:$4 sm:$0xff]   ;;  %v8152_v38 = vld [vmem:[%s10853_s1 + $0x860] ss:$28 sps:$4 sm:$0xff]  }
 0x21e   :  { %7105 = vmatprep.subr.bf16.mxu1 %v8086_v41  ;;  %v8159_v41 = vld [vmem:[%s10853_s1 + $0x89c] ss:$28 sps:$4 sm:$0xff]  }
 0x220   :  { %5150 = vmatpush1.bf16.msra.mxu0 %v8087_v39  ;;  %v8151_v39 = vld [vmem:[%s10853_s1 + $0xde0] ss:$28 sps:$4 sm:$0xff]  }
 0x221   :  { %5151 = vmatprep.subr.bf16.mxu0 %v8094_v44  ;;  %7106 = vmatpush3.bf16.msra.mxu1 %v8090_v45  ;;  %v8155_v44 = vld [vmem:[%s10853_s1 + $0xc20] ss:$28 sps:$4 sm:$0xff]   ;;  %v8157_v45 = vld [vmem:[%s10853_s1 + $0x898] ss:$28 sps:$4 sm:$0xff]  }
 0x222   :  { %7107 = vmatprep.subr.bf16.mxu1 %v8091_v46  ;;  %v8156_v46 = vld [vmem:[%s10853_s1 + $0xfd8] ss:$28 sps:$4 sm:$0xff]  }
 0x224   :  { %5152 = vmatpush1.bf16.msra.mxu0 %v8092_v25  ;;  %v8164_v25 = vld [vmem:[%s10853_s1 + $0x8d4] ss:$28 sps:$4 sm:$0xff]  }
 0x225   :  { %5153 = vmatprep.subr.bf16.mxu0 %v8099_v48  ;;  %7108 = vmatpush3.bf16.msra.mxu1 %v8095_v49  ;;  %v8160_v48 = vld [vmem:[%s10853_s1 + $0xe18] ss:$28 sps:$4 sm:$0xff]   ;;  %v8162_v49 = vld [vmem:[%s10853_s1 + $0x8d0] ss:$28 sps:$4 sm:$0xff]  }
 0x226   :  { %7109 = vmatprep.subr.bf16.mxu1 %v8096_v50  ;;  %v8161_v50 = vld [vmem:[%s10853_s1 + $0x1010] ss:$28 sps:$4 sm:$0xff]  }
 0x228   :  { %5154 = vmatpush1.bf16.msra.mxu0 %v8097_v52  ;;  %v8169_v52 = vld [vmem:[%s10853_s1 + $0x90c] ss:$28 sps:$4 sm:$0xff]  }
 0x229   :  { %5155 = vmatprep.subr.bf16.mxu0 %v8104_v53  ;;  %7110 = vmatpush3.bf16.msra.mxu1 %v8100_v54  ;;  %v8165_v53 = vld [vmem:[%s10853_s1 + $0xe50] ss:$28 sps:$4 sm:$0xff]   ;;  %v8167_v54 = vld [vmem:[%s10853_s1 + $0x908] ss:$28 sps:$4 sm:$0xff]  }
 0x22a   :  { %7111 = vmatprep.subr.bf16.mxu1 %v8101_v56  ;;  %v8166_v56 = vld [vmem:[%s10853_s1 + $0x1048] ss:$28 sps:$4 sm:$0xff]  }
 0x22c   :  { %5156 = vmatpush1.bf16.msra.mxu0 %v8102_v57  ;;  %v8174_v57 = vld [vmem:[%s10853_s1 + $0x944] ss:$28 sps:$4 sm:$0xff]  }
 0x22d   :  { %5157 = vmatprep.subr.bf16.mxu0 %v8109_v59  ;;  %7112 = vmatpush3.bf16.msra.mxu1 %v8105_v60  ;;  %v8170_v59 = vld [vmem:[%s10853_s1 + $0xe88] ss:$28 sps:$4 sm:$0xff]   ;;  %v8172_v60 = vld [vmem:[%s10853_s1 + $0x940] ss:$28 sps:$4 sm:$0xff]  }
 0x22e   :  { %7113 = vmatprep.subr.bf16.mxu1 %v8106_v62  ;;  %v8179_v62 = vld [vmem:[%s10853_s1 + $0x97c] ss:$28 sps:$4 sm:$0xff]  }
 0x230   :  { %5158 = vmatpush1.bf16.msra.mxu0 %v8107_v61  ;;  %v8171_v61 = vld [vmem:[%s10853_s1 + $0x1080] ss:$28 sps:$4 sm:$0xff]  }
 0x231   :  { %5159 = vmatprep.subr.bf16.mxu0 %v8114_v2  ;;  %7114 = vmatpush3.bf16.msra.mxu1 %v8110_v3  ;;  %v8175_v2 = vld [vmem:[%s10853_s1 + $0xec0] ss:$28 sps:$4 sm:$0xff]   ;;  %v8177_v3 = vld [vmem:[%s10853_s1 + $0x978] ss:$28 sps:$4 sm:$0xff]  }
 0x232   :  { %7115 = vmatprep.subr.bf16.mxu1 %v8111_v5  ;;  %v8184_v5 = vld [vmem:[%s10853_s1 + $0x9b4] ss:$28 sps:$4 sm:$0xff]  }
 0x234   :  { %5160 = vmatpush1.bf16.msra.mxu0 %v8112_v4  ;;  %v8176_v4 = vld [vmem:[%s10853_s1 + $0x10b8] ss:$28 sps:$4 sm:$0xff]  }
 0x235   :  { %5161 = vmatprep.subr.bf16.mxu0 %v8119_v18  ;;  %7116 = vmatpush3.bf16.msra.mxu1 %v8115_v6  ;;  %v8180_v18 = vld [vmem:[%s10853_s1 + $0xef8] ss:$28 sps:$4 sm:$0xff]   ;;  %v8182_v6 = vld [vmem:[%s10853_s1 + $0x9b0] ss:$28 sps:$4 sm:$0xff]  }
 0x236   :  { %7123 = vmatprep.subr.bf16.mxu1 %v8116_v8  ;;  %v8189_v8 = vld [vmem:[%s10853_s1 + $0x9ec] ss:$28 sps:$4 sm:$0xff]  }
 0x238   :  { %5162 = vmatpush1.bf16.msra.mxu0 %v8117_v7  ;;  %5490 = vmatmul.mubr.bf16.vlgmr.msra.gmra.mrb[20].mxu1 %v9227_v43  ;;  %v8181_v7 = vld [vmem:[%s10853_s1 + $0x10f0] ss:$28 sps:$4 sm:$0xff]  }
 0x239   :  { %5172 = vmatprep.subr.bf16.mxu0 %v8124_v23  ;;  %7124 = vmatpush3.bf16.msra.mxu1 %v8120_v10  ;;  %v8185_v23 = vld [vmem:[%s10853_s1 + $0xf30] ss:$28 sps:$4 sm:$0xff]   ;;  %v8187_v10 = vld [vmem:[%s10853_s1 + $0x9e8] ss:$28 sps:$4 sm:$0xff]  }
 0x23a   :  { %7125 = vmatprep.subr.bf16.mxu1 %v8121_v12  ;;  %5529 = vmatprep.mubr.bf16.mxu1 %v9243_v47  ;;  %v8194_v12 = vld [vmem:[%s10853_s1 + $0xa24] ss:$28 sps:$4 sm:$0xff]  }
 0x23b   :  { %5164 = vmatmul.mubr.bf16.vlgmr.msra.gmra.mrb[4].mxu0 %v9024_v31  ;;  %v8134_v31 = vld [vmem:[%s10853_s1 + $0x784] ss:$28 sps:$4 sm:$0xff]  }
 0x23c   :  { %5173 = vmatpush1.bf16.msra.mxu0 %v8122_v11  ;;  %5204 = vmatprep.mubr.bf16.mxu0 %v9039_v36  ;;  %v8139_v36 = vld [vmem:[%s10853_s1 + $0x7bc] ss:$28 sps:$4 sm:$0xff]   ;;  %v8186_v11 = vld [vmem:[%s10853_s1 + $0x1128] ss:$28 sps:$4 sm:$0xff]  }
 0x23d   :  { %5174 = vmatprep.subr.bf16.mxu0 %v8129_v13  ;;  %7126 = vmatpush3.bf16.msra.mxu1 %v8125_v14  ;;  %v8190_v13 = vld [vmem:[%s10853_s1 + $0xf68] ss:$28 sps:$4 sm:$0xff]   ;;  %v8192_v14 = vld [vmem:[%s10853_s1 + $0xa20] ss:$28 sps:$4 sm:$0xff]  }
 0x23e   :  { %7127 = vmatprep.subr.bf16.mxu1 %v8126_v16  ;;  %v8199_v16 = vld [vmem:[%s10853_s1 + $0xa5c] ss:$28 sps:$4 sm:$0xff]  }
 0x240   :  { %5175 = vmatpush1.bf16.msra.mxu0 %v8127_v15  ;;  %v8191_v15 = vld [vmem:[%s10853_s1 + $0x1160] ss:$28 sps:$4 sm:$0xff]  }
 0x241   :  { %5176 = vmatprep.subr.bf16.mxu0 %v8134_v31  ;;  %7128 = vmatpush3.bf16.msra.mxu1 %v8130_v19  ;;  %v8195_v31 = vld [vmem:[%s10853_s1 + $0xfa0] ss:$28 sps:$4 sm:$0xff]   ;;  %v8197_v19 = vld [vmem:[%s10853_s1 + $0xa58] ss:$28 sps:$4 sm:$0xff]  }
 0x242   :  { %7129 = vmatprep.subr.bf16.mxu1 %v8131_v21  ;;  %v8204_v21 = vld [vmem:[%s10853_s1 + $0xa94] ss:$28 sps:$4 sm:$0xff]  }
 0x244   :  { %5177 = vmatpush1.bf16.msra.mxu0 %v8132_v0  ;;  %v8196_v0 = vld [vmem:[%s10853_s1 + $0x1358] ss:$28 sps:$4 sm:$0xff]  }
 0x245   :  { %5178 = vmatprep.subr.bf16.mxu0 %v8139_v36  ;;  %7130 = vmatpush3.bf16.msra.mxu1 %v8135_v22  ;;  %v8200_v36 = vld [vmem:[%s10853_s1 + $0x1198] ss:$28 sps:$4 sm:$0xff]   ;;  %v8202_v22 = vld [vmem:[%s10853_s1 + $0xa90] ss:$28 sps:$4 sm:$0xff]  }
 0x246   :  { %7131 = vmatprep.subr.bf16.mxu1 %v8136_v17  ;;  %v8209_v17 = vld [vmem:[%s10853_s1 + $0xacc] ss:$28 sps:$4 sm:$0xff]  }
 0x248   :  { %5179 = vmatpush1.bf16.msra.mxu0 %v8137_v55  ;;  %v8201_v55 = vld [vmem:[%s10853_s1 + $0x1390] ss:$28 sps:$4 sm:$0xff]  }
 0x249   :  { %5180 = vmatprep.subr.bf16.mxu0 %v8144_v26  ;;  %7132 = vmatpush3.bf16.msra.mxu1 %v8140_v27  ;;  %v8205_v26 = vld [vmem:[%s10853_s1 + $0x11d0] ss:$28 sps:$4 sm:$0xff]   ;;  %v8207_v27 = vld [vmem:[%s10853_s1 + $0xac8] ss:$28 sps:$4 sm:$0xff]  }
 0x24a   :  { %7133 = vmatprep.subr.bf16.mxu1 %v8141_v29  ;;  %v8210_v29 = vld [vmem:[%s10853_s1 + $0x1208] ss:$28 sps:$4 sm:$0xff]  }
 0x24c   :  { %5181 = vmatpush1.bf16.msra.mxu0 %v8142_v28  ;;  %v8206_v28 = vld [vmem:[%s10853_s1 + $0x13c8] ss:$28 sps:$4 sm:$0xff]  }
 0x24d   :  { %5182 = vmatprep.subr.bf16.mxu0 %v8149_v30  ;;  %7134 = vmatpush3.bf16.msra.mxu1 %v8145_v1  ;;  %v8212_v30 = vld [vmem:[%s10853_s1 + $0xb00] ss:$28 sps:$4 sm:$0xff]  }
 0x24e   :  { %7135 = vmatprep.subr.bf16.mxu1 %v8146_v33  ;;  %v8211_v1 = vld [vmem:[%s10853_s1 + $0x1400] ss:$28 sps:$4 sm:$0xff]   ;;  %v8217_v33 = vld [vmem:[%s10853_s1 + $0xb38] ss:$28 sps:$4 sm:$0xff]  }
 0x250   :  { %5183 = vmatpush1.bf16.msra.mxu0 %v8147_v32  ;;  %v8215_v32 = vld [vmem:[%s10853_s1 + $0x1240] ss:$28 sps:$4 sm:$0xff]  }
 0x251   :  { %5184 = vmatprep.subr.bf16.mxu0 %v8154_v34  ;;  %7136 = vmatpush3.bf16.msra.mxu1 %v8150_v35  ;;  %v8216_v34 = vld [vmem:[%s10853_s1 + $0x1438] ss:$28 sps:$4 sm:$0xff]  }
 0x252   :  { %7137 = vmatprep.subr.bf16.mxu1 %v8151_v39  ;;  %v8224_v35 = vld [vmem:[%s10853_s1 + $0xb74] ss:$28 sps:$4 sm:$0xff]  }
 0x253   :  { %v8220_v39 = vld [vmem:[%s10853_s1 + $0x1278] ss:$28 sps:$4 sm:$0xff]  }
 0x254   :  { %5185 = vmatpush1.bf16.msra.mxu0 %v8152_v38  ;;  %v849_v38 = vsub.s32 0, %v8609_v9 }
 0x255   :  { %5186 = vmatprep.subr.bf16.mxu0 %v8159_v41  ;;  %7138 = vmatpush3.bf16.msra.mxu1 %v8155_v44  ;;  %v8222_v41 = vld [vmem:[%s10853_s1 + $0xb70] ss:$28 sps:$4 sm:$0xff]  }
 0x256   :  { %7145 = vmatprep.subr.bf16.mxu1 %v8156_v46  ;;  %v10502_v44 = vld [vmem:[#allocation2] sm:$0xff] }
 0x257   :  { %v8221_v46 = vld [vmem:[%s10853_s1 + $0x1470] ss:$28 sps:$4 sm:$0xff]  }
 0x258   :  { %5187 = vmatpush1.bf16.msra.mxu0 %v8157_v45  ;;  %5530 = vmatmul.mubr.bf16.vlgmr.msra.gmra.mrb[24].mxu1 %v9438_v58  ;;  %v853_v45 = vsub.s32 1, %v8609_v9 }
 0x259   :  { %5188 = vmatprep.subr.bf16.mxu0 %v8164_v25  ;;  %7146 = vmatpush3.bf16.msra.mxu1 %v8160_v48  ;;  %v8229_v25 = vld [vmem:[%s10853_s1 + $0xbac] ss:$28 sps:$4 sm:$0xff]   ;;  %v850_v48 = vrot.slane %v10502_v44, %v849_v38  ;;  %v8269_v38 = vld [vmem:[#allocation5 + $0x68] sm:$0xff]  }
 0x25a   :  { %7147 = vmatprep.subr.bf16.mxu1 %v8161_v50  ;;  %5569 = vmatprep.mubr.bf16.mxu1 %v9453_v63  ;;  %v854_v50 = vrot.slane %v10502_v44, %v853_v45  ;;  %v8273_v45 = vld [vmem:[#allocation5 + $0x28] sm:$0xff]  }
 0x25c   :  { %5189 = vmatpush1.bf16.msra.mxu0 %v8162_v49  ;;  %v8225_v49 = vld [vmem:[%s10853_s1 + $0x12b0] ss:$28 sps:$4 sm:$0xff]  }
 0x25d   :  { %5190 = vmatprep.subr.bf16.mxu0 %v8169_v52  ;;  %7148 = vmatpush3.bf16.msra.mxu1 %v8165_v53  ;;  %v8227_v52 = vld [vmem:[%s10853_s1 + $0xba8] ss:$28 sps:$4 sm:$0xff]  }
 0x25e   :  { %7149 = vmatprep.subr.bf16.mxu1 %v8166_v56  ;;  %v8226_v53 = vld [vmem:[%s10853_s1 + $0x14a8] ss:$28 sps:$4 sm:$0xff]  }
 0x260   :  { %5191 = vmatpush1.bf16.msra.mxu0 %v8167_v54  ;;  %v8234_v54 = vld [vmem:[%s10853_s1 + $0xbe4] ss:$28 sps:$4 sm:$0xff]  }
 0x261   :  { %5192 = vmatprep.subr.bf16.mxu0 %v8174_v57  ;;  %7150 = vmatpush3.bf16.msra.mxu1 %v8170_v59 }
 0x262   :  { %7151 = vmatprep.subr.bf16.mxu1 %v8171_v61  ;;  %v8230_v61 = vld [vmem:[%s10853_s1 + $0x12e8] ss:$28 sps:$4 sm:$0xff]  }
 0x264   :  { %5193 = vmatpush1.bf16.msra.mxu0 %v8172_v60 }
 0x265   :  { %5194 = vmatprep.subr.bf16.mxu0 %v8179_v62  ;;  %7152 = vmatpush3.bf16.msra.mxu1 %v8175_v2  ;;  %v8232_v2 = vld [vmem:[%s10853_s1 + $0xbe0] ss:$28 sps:$4 sm:$0xff]  }
 0x266   :  { %7153 = vmatprep.subr.bf16.mxu1 %v8176_v4 }
 0x268   :  { %5195 = vmatpush1.bf16.msra.mxu0 %v8177_v3 }
 0x269   :  { %5196 = vmatprep.subr.bf16.mxu0 %v8184_v5  ;;  %7154 = vmatpush3.bf16.msra.mxu1 %v8180_v18  ;;  %v8231_v5 = vld [vmem:[%s10853_s1 + $0x14e0] ss:$28 sps:$4 sm:$0xff]  }
 0x26a   :  { %7155 = vmatprep.subr.bf16.mxu1 %v8181_v7  ;;  %v8238_v18 = vld [vmem:[%s10853_s1 + $0xc1c] ss:$28 sps:$4 sm:$0xff]  }
 0x26b   :  { %v8235_v7 = vld [vmem:[%s10853_s1 + $0x1320] ss:$28 sps:$4 sm:$0xff]  }
 0x26c   :  { %5197 = vmatpush1.bf16.msra.mxu0 %v8182_v6 }
 0x26d   :  { %5198 = vmatprep.subr.bf16.mxu0 %v8189_v8  ;;  %7156 = vmatpush3.bf16.msra.mxu1 %v8185_v23  ;;  %v8242_v8 = vld [vmem:[%s10853_s1 + $0xc54] ss:$28 sps:$4 sm:$0xff]  }
 0x26e   :  { %7157 = vmatprep.subr.bf16.mxu1 %v8186_v11  ;;  %v8240_v23 = vld [vmem:[%s10853_s1 + $0xc50] ss:$28 sps:$4 sm:$0xff]  }
 0x26f   :  { %v8247_v11 = vld [vmem:[%s10853_s1 + $0xc8c] ss:$28 sps:$4 sm:$0xff]  }
 0x270   :  { %5199 = vmatpush1.bf16.msra.mxu0 %v8187_v10  ;;  %v8524_v10 = vmov 0.0  }
 0x271   :  { %5200 = vmatprep.subr.bf16.mxu0 %v8194_v12  ;;  %7158 = vmatpush3.bf16.msra.mxu1 %v8190_v13  ;;  %v8243_v12 = vld [vmem:[%s10853_s1 + $0x1550] ss:$28 sps:$4 sm:$0xff]   ;;  %v8245_v13 = vld [vmem:[%s10853_s1 + $0xc88] ss:$28 sps:$4 sm:$0xff]  }
 0x272   :  { %7159 = vmatprep.subr.bf16.mxu1 %v8191_v15  ;;  %v8252_v15 = vld [vmem:[%s10853_s1 + $0xcc4] ss:$28 sps:$4 sm:$0xff]  }
 0x274   :  { %5201 = vmatpush1.bf16.msra.mxu0 %v8192_v14  ;;  %v8244_v14 = vld [vmem:[#allocation5 + $0x40] sm:$0xff]  }
 0x275   :  { %5202 = vmatprep.subr.bf16.mxu0 %v8199_v16  ;;  %7160 = vmatpush3.bf16.msra.mxu1 %v8195_v31  ;;  %v8248_v16 = vld [vmem:[#allocation5] sm:$0xff]   ;;  %v8249_v31 = vld [vmem:[#allocation5 + $0x48] sm:$0xff]  }
 0x276   :  { %7167 = vmatprep.subr.bf16.mxu1 %v8196_v0 }
 0x278   :  { %5203 = vmatpush1.bf16.msra.mxu0 %v8197_v19  ;;  %5570 = vmatmul.mubr.bf16.vlgmr.msra.gmra.mrb[28].mxu1 %v9648_v20  ;;  %v8250_v19 = vld [vmem:[%s10853_s1 + $0xcc0] ss:$28 sps:$4 sm:$0xff]  }
 0x279   :  { %5213 = vmatprep.subr.bf16.mxu0 %v8204_v21  ;;  %7168 = vmatpush3.bf16.msra.mxu1 %v8200_v36  ;;  %v8257_v21 = vld [vmem:[%s10853_s1 + $0xcfc] ss:$28 sps:$4 sm:$0xff]   ;;  %v8253_v36 = vld [vmem:[#allocation5 + $0x8] sm:$0xff]  }
 0x27a   :  { %7169 = vmatprep.subr.bf16.mxu1 %v8201_v55  ;;  %5609 = vmatprep.mubr.bf16.mxu1 %v9664_v51  ;;  %v8255_v55 = vld [vmem:[%s10853_s1 + $0xcf8] ss:$28 sps:$4 sm:$0xff]  }
 0x27b   :  { %5205 = vmatmul.mubr.bf16.vlgmr.msra.gmra.mrb[4].mxu0 %v9227_v43  ;;  %v8214_v43 = vld [vmem:[%s10853_s1 + $0xb04] ss:$28 sps:$4 sm:$0xff]  }
 0x27c   :  { %5214 = vmatpush1.bf16.msra.mxu0 %v8202_v22  ;;  %5245 = vmatprep.mubr.bf16.mxu0 %v9243_v47  ;;  %v8219_v47 = vld [vmem:[%s10853_s1 + $0xb3c] ss:$28 sps:$4 sm:$0xff]   ;;  %v8254_v22 = vld [vmem:[#allocation5 + $0x50] sm:$0xff]  }
 0x27d   :  { %5215 = vmatprep.subr.bf16.mxu0 %v8209_v17  ;;  %7170 = vmatpush3.bf16.msra.mxu1 %v8205_v26  ;;  %v8262_v26 = vld [vmem:[%s10853_s1 + $0xd34] ss:$28 sps:$4 sm:$0xff]  }
 0x27e   :  { %7171 = vmatprep.subr.bf16.mxu1 %v8206_v28  ;;  %v8258_v28 = vld [vmem:[#allocation5 + $0x10] sm:$0xff]  }
 0x280   :  { %5216 = vmatpush1.bf16.msra.mxu0 %v8207_v27 }
 0x281   :  { %5217 = vmatprep.subr.bf16.mxu0 %v8214_v43  ;;  %7172 = vmatpush3.bf16.msra.mxu1 %v8210_v29  ;;  %v8259_v29 = vld [vmem:[#allocation5 + $0x58] sm:$0xff]  }
 0x282   :  { %7173 = vmatprep.subr.bf16.mxu1 %v8211_v1  ;;  %v8267_v1 = vld [vmem:[%s10853_s1 + $0xd6c] ss:$28 sps:$4 sm:$0xff]  }
 0x284   :  { %5218 = vmatpush1.bf16.msra.mxu0 %v8212_v30  ;;  %v8260_v30 = vld [vmem:[%s10853_s1 + $0xd30] ss:$28 sps:$4 sm:$0xff]  }
 0x285   :  { %5219 = vmatprep.subr.bf16.mxu0 %v8219_v47  ;;  %7174 = vmatpush3.bf16.msra.mxu1 %v8215_v32  ;;  %v8263_v47 = vld [vmem:[#allocation5 + $0x18] sm:$0xff]   ;;  %v8264_v32 = vld [vmem:[#allocation5 + $0x60] sm:$0xff]  }
 0x286   :  { %7175 = vmatprep.subr.bf16.mxu1 %v8216_v34  ;;  %v8272_v34 = vld [vmem:[%s10853_s1 + $0xda4] ss:$28 sps:$4 sm:$0xff]  }
 0x288   :  { %5220 = vmatpush1.bf16.msra.mxu0 %v8217_v33  ;;  %v8265_v33 = vld [vmem:[%s10853_s1 + $0xd68] ss:$28 sps:$4 sm:$0xff]  }
 0x289   :  { %5221 = vmatprep.subr.bf16.mxu0 %v8224_v35  ;;  %7176 = vmatpush3.bf16.msra.mxu1 %v8220_v39  ;;  %v8268_v35 = vld [vmem:[#allocation5 + $0x20] sm:$0xff]  }
 0x28a   :  { %7177 = vmatprep.subr.bf16.mxu1 %v8221_v46  ;;  %v8270_v39 = vld [vmem:[%s10853_s1 + $0xda0] ss:$28 sps:$4 sm:$0xff]   ;;  %v8274_v46 = vld [vmem:[#allocation5 + $0x70] sm:$0xff]  }
 0x28c   :  { %5222 = vmatpush1.bf16.msra.mxu0 %v8222_v41  ;;  %v8277_v41 = vld [vmem:[%s10853_s1 + $0xddc] ss:$28 sps:$4 sm:$0xff]  }
 0x28d   :  { %5223 = vmatprep.subr.bf16.mxu0 %v8229_v25  ;;  %7178 = vmatpush3.bf16.msra.mxu1 %v8225_v49  ;;  %v8275_v25 = vld [vmem:[%s10853_s1 + $0xdd8] ss:$28 sps:$4 sm:$0xff]  }
 0x28e   :  { %v4755_v56 = vpop.f32.mrb[0].mxu0  ;;  %7179 = vmatprep.subr.bf16.mxu1 %v8226_v53  ;;  %v8282_v49 = vld [vmem:[%s10853_s1 + $0xe14] ss:$28 sps:$4 sm:$0xff]  }
 0x28f   :  { %v7295_v57 = vadd.f32 %v4755_v56, %v850_v48  ;;  %v4757_v59 = vpop.f32.mrb[1].mxu0  ;;  %v861_v48 = vsub.s32 3, %v8609_v9  ;;  %v8280_v53 = vld [vmem:[%s10853_s1 + $0xe10] ss:$28 sps:$4 sm:$0xff]  }
 0x290   :  { %v7297_v60 = vadd.f32 %v4757_v59, %v854_v50  ;;  %v4759_v62 = vpop.f32.mrb[2].mxu0  ;;  %5224 = vmatpush1.bf16.msra.mxu0 %v8227_v52  ;;  %v8278_v50 = vld [vmem:[#allocation5 + $0x30] sm:$0xff]   ;;  %v8279_v52 = vld [vmem:[#allocation5 + $0x78] sm:$0xff]  }
 0x291   :  { %v10532_v3 = vadd.f32 %v7295_v57, %v9543_v37  ;;  %v4760_v4 = vpop.f32.mrb[3].mxu0  ;;  %5225 = vmatprep.subr.bf16.mxu0 %v8234_v54  ;;  %7180 = vmatpush3.bf16.msra.mxu1 %v8230_v61  ;;  %v8236_v37 = vld [vmem:[%s10853_s1 + $0xc18] ss:$28 sps:$4 sm:$0xff]   ;;  %v862_v54 = vrot.slane %v10502_v44, %v861_v48  ;;  %v8287_v56 = vld [vmem:[%s10853_s1 + $0xe4c] ss:$28 sps:$4 sm:$0xff]  }
 0x292   :  { %v7298_v6 = vadd.f32 %v7297_v60, %v9551_v40  ;;  %7181 = vmatprep.subr.bf16.mxu1 %v8231_v5  ;;  %v8239_v40 = vld [vmem:[%s10853_s1 + $0x1518] ss:$28 sps:$4 sm:$0xff]   ;;  %v8285_v61 = vld [vmem:[%s10853_s1 + $0xe48] ss:$28 sps:$4 sm:$0xff]  }
 0x293   :  { %v8283_v57 = vld [vmem:[#allocation5 + $0x38] sm:$0xff]   ;;  %v8284_v60 = vld [vmem:[#allocation5 + $0xc0] sm:$0xff]   ;;  %v8292_v4 = vld [vmem:[%s10853_s1 + $0xe84] ss:$28 sps:$4 sm:$0xff]  }
 0x294   :  { %5226 = vmatpush1.bf16.msra.mxu0 %v8232_v2  ;;  %v5658_v0 = vpack.c.bf16 %v7298_v6, %v7298_v6  ;;  %v5657_v6 = vpack.c.bf16 %v10532_v3, %v10532_v3  ;;  %v8294_v3 = vld [vmem:[#allocation5 + $0xd0] sm:$0xff]  }
 0x295   :  { %5227 = vmatprep.subr.bf16.mxu0 %v8238_v18  ;;  %7182 = vmatpush3.bf16.msra.mxu1 %v8235_v7  ;;  %v8288_v18 = vld [vmem:[#allocation5 + $0x80] sm:$0xff]   ;;  %v8289_v7 = vld [vmem:[#allocation5 + $0xc8] sm:$0xff]  }
 0x296   :  { %7267 = vmatprep.subr.bf16.mxu1 %v8524_v10 }
 0x298   :  { %5228 = vmatpush1.bf16.msra.mxu0 %v8236_v37  ;;  %5610 = vmatmul.mubr.bf16.vlgmr.msra.gmra.mrb[32].mxu1 %v9852_v42  ;;  %v8290_v37 = vld [vmem:[%s10853_s1 + $0xe80] ss:$28 sps:$4 sm:$0xff]  }
 0x299   :  { %5229 = vmatprep.subr.bf16.mxu0 %v8242_v8  ;;  %7268 = vmatpush3.bf16.msra.mxu1 %v8239_v40  ;;  %v8293_v40 = vld [vmem:[#allocation5 + $0x88] sm:$0xff]  }
 0x29a   :  { %7269 = vmatprep.subr.bf16.mxu1 %v8524_v10  ;;  %7271 = vmatprep.mubr.msk.bf16.mxu1 %vm8525_vm1, %v8524_v10 }
 0x29c   :  { %5230 = vmatpush1.bf16.msra.mxu0 %v8240_v23  ;;  %v8295_v23 = vld [vmem:[%s10853_s1 + $0xeb8] ss:$28 sps:$4 sm:$0xff]  }
 0x29d   :  { %5231 = vmatprep.subr.bf16.mxu0 %v8247_v11  ;;  %7270 = vmatpush3.bf16.msra.mxu1 %v8243_v12  ;;  %v8302_v11 = vld [vmem:[%s10853_s1 + $0xef4] ss:$28 sps:$4 sm:$0xff]   ;;  %v8298_v12 = vld [vmem:[#allocation5 + $0x90] sm:$0xff]  }
 0x29e   :  { %7192 = vmatprep.subr.bf16.mxu1 %v8244_v14  ;;  %v8300_v14 = vld [vmem:[%s10853_s1 + $0xef0] ss:$28 sps:$4 sm:$0xff]  }
 0x2a0   :  { %5232 = vmatpush1.bf16.msra.mxu0 %v8245_v13  ;;  %7272 = vmatmul.mubr.msk.bf16.vlgmr.msra.gmra.mrb[36].mxu1 %vm4512_vm0, %v8646_v24  ;;  %v8299_v13 = vld [vmem:[#allocation5 + $0xd8] sm:$0xff]  }
 0x2a1   :  { %5233 = vmatprep.subr.bf16.mxu0 %v8252_v15  ;;  %7193 = vmatpush3.bf16.msra.mxu1 %v8248_v16  ;;  %v8307_v15 = vld [vmem:[%s10853_s1 + $0xf2c] ss:$28 sps:$4 sm:$0xff]   ;;  %v8303_v16 = vld [vmem:[#allocation5 + $0x98] sm:$0xff]  }
 0x2a2   :  { %6151 = vmatprep.mubr.bf16.mxu1 %v5658_v0  ;;  %7194 = vmatprep.subr.bf16.mxu1 %v8249_v31  ;;  %v8304_v31 = vld [vmem:[#allocation5 + $0xe0] sm:$0xff]   ;;  %v8312_v0 = vld [vmem:[%s10853_s1 + $0xf64] ss:$28 sps:$4 sm:$0xff]  }
 0x2a3   :  { %v10584_v17 = vpop.f32.mrb[4].mxu1 }
 0x2a4   :  { %5234 = vmatpush1.bf16.msra.mxu0 %v8250_v19  ;;  %v5085_v27 = vpop.f32.mrb[5].mxu1  ;;  %v8305_v19 = vld [vmem:[%s10853_s1 + $0xf28] ss:$28 sps:$4 sm:$0xff]  }
 0x2a5   :  { %5235 = vmatprep.subr.bf16.mxu0 %v8257_v21  ;;  %7195 = vmatpush3.bf16.msra.mxu1 %v8253_v36  ;;  %v5087_v24 = vpop.f32.mrb[6].mxu1  ;;  %v7300_v2 = vadd.f32 %v5085_v27, %v862_v54  ;;  %v8309_v27 = vld [vmem:[#allocation5 + $0xe8] sm:$0xff]   ;;  %v8333_v54 = vld [vmem:[%s10853_s1 + $0x10b0] ss:$28 sps:$4 sm:$0xff]  }
 0x2a6   :  { %v5088_v43 = vpop.f32.mrb[7].mxu1  ;;  %7196 = vmatprep.subr.bf16.mxu1 %v8254_v22  ;;  %v8308_v22 = vld [vmem:[#allocation5 + $0xa0] sm:$0xff]  }
 0x2a7   :  { %v5660_v8 = vpack.c.bf16 %v7300_v2, %v7300_v2  ;;  %v8310_v24 = vld [vmem:[%s10853_s1 + $0xf60] ss:$28 sps:$4 sm:$0xff]  }
 0x2a8   :  { %5236 = vmatpush1.bf16.msra.mxu0 %v8255_v55  ;;  %v8317_v43 = vld [vmem:[%s10853_s1 + $0xf9c] ss:$28 sps:$4 sm:$0xff]  }
 0x2a9   :  { %5237 = vmatprep.subr.bf16.mxu0 %v8262_v26  ;;  %7197 = vmatpush3.bf16.msra.mxu1 %v8258_v28 }
 0x2aa   :  { %7198 = vmatprep.subr.bf16.mxu1 %v8259_v29  ;;  %v8313_v29 = vld [vmem:[#allocation5 + $0xa8] sm:$0xff]  }
 0x2ab   :  { %v10622_v59 = vpop.f32.mrb[8].mxu1 }
 0x2ac   :  { %5238 = vmatpush1.bf16.msra.mxu0 %v8260_v30  ;;  %v10627_v62 = vpop.f32.mrb[9].mxu1  ;;  %v857_v30 = vsub.s32 2, %v8609_v9 }
 0x2ad   :  { %5239 = vmatprep.subr.bf16.mxu0 %v8267_v1  ;;  %7199 = vmatpush3.bf16.msra.mxu1 %v8263_v47  ;;  %v8314_v1 = vld [vmem:[#allocation5 + $0xf0] sm:$0xff]   ;;  %v8315_v47 = vld [vmem:[%s10853_s1 + $0xf98] ss:$28 sps:$4 sm:$0xff]  }
 0x2ae   :  { %7200 = vmatprep.subr.bf16.mxu1 %v8264_v32  ;;  %v8322_v32 = vld [vmem:[%s10853_s1 + $0xfd4] ss:$28 sps:$4 sm:$0xff]  }
 0x2b0   :  { %5240 = vmatpush1.bf16.msra.mxu0 %v8265_v33  ;;  %v8318_v33 = vld [vmem:[#allocation5 + $0xb0] sm:$0xff]  }
 0x2b1   :  { %5241 = vmatprep.subr.bf16.mxu0 %v8272_v34  ;;  %7201 = vmatpush3.bf16.msra.mxu1 %v8268_v35  ;;  %v858_v34 = vrot.slane %v10502_v44, %v857_v30  ;;  %v8319_v35 = vld [vmem:[#allocation5 + $0xf8] sm:$0xff]   ;;  %v8374_v30 = vld [vmem:[%s10853_s1 + $0x138c] ss:$28 sps:$4 sm:$0xff]  }
 0x2b2   :  { %7202 = vmatprep.subr.bf16.mxu1 %v8269_v38  ;;  %v8320_v38 = vld [vmem:[%s10853_s1 + $0xfd0] ss:$28 sps:$4 sm:$0xff]  }
 0x2b4   :  { %5242 = vmatpush1.bf16.msra.mxu0 %v8270_v39  ;;  %v8326_v39 = vld [vmem:[%s10853_s1 + $0x100c] ss:$28 sps:$4 sm:$0xff]  }
 0x2b5   :  { %5243 = vmatprep.subr.bf16.mxu0 %v8277_v41  ;;  %7203 = vmatpush3.bf16.msra.mxu1 %v8273_v45  ;;  %v8323_v41 = vld [vmem:[#allocation5 + $0xb8] sm:$0xff]   ;;  %v7299_v45 = vadd.f32 %v10584_v17, %v858_v34  ;;  %v8332_v17 = vld [vmem:[%s10853_s1 + $0x107c] ss:$28 sps:$4 sm:$0xff]  }
 0x2b6   :  { %7204 = vmatprep.subr.bf16.mxu1 %v8274_v46  ;;  %v8324_v46 = vld [vmem:[%s10853_s1 + $0x1008] ss:$28 sps:$4 sm:$0xff]   ;;  %v8378_v34 = vld [vmem:[%s10853_s1 + $0x13f8] ss:$28 sps:$4 sm:$0xff]  }
 0x2b7   :  { %v5659_v48 = vpack.c.bf16 %v7299_v45, %v7299_v45  ;;  %v8389_v45 = vld [vmem:[%s10853_s1 + $0x14a4] ss:$28 sps:$4 sm:$0xff]  }
 0x2b8   :  { %5244 = vmatpush1.bf16.msra.mxu0 %v8275_v25  ;;  %v8329_v25 = vld [vmem:[%s10853_s1 + $0x1044] ss:$28 sps:$4 sm:$0xff]  }
 0x2b9   :  { %5254 = vmatprep.subr.bf16.mxu0 %v8282_v49  ;;  %7205 = vmatpush3.bf16.msra.mxu1 %v8278_v50  ;;  %v8327_v49 = vld [vmem:[%s10853_s1 + $0x1040] ss:$28 sps:$4 sm:$0xff]   ;;  %v8330_v50 = vld [vmem:[%s10853_s1 + $0x1078] ss:$28 sps:$4 sm:$0xff]  }
 0x2ba   :  { %7206 = vmatprep.subr.bf16.mxu1 %v8279_v52  ;;  %v8335_v52 = vld [vmem:[%s10853_s1 + $0x10b4] ss:$28 sps:$4 sm:$0xff]  }
 0x2bb   :  { %5246 = vmatmul.mubr.bf16.vlgmr.msra.gmra.mrb[4].mxu0 %v9438_v58  ;;  %v5374_v58 = vpop.f32.mrb[10].mxu1 }
 0x2bc   :  { %5255 = vmatpush1.bf16.msra.mxu0 %v8280_v53  ;;  %5286 = vmatprep.mubr.bf16.mxu0 %v9453_v63  ;;  %v5375_v5 = vpop.f32.mrb[11].mxu1  ;;  %v8297_v63 = vld [vmem:[%s10853_s1 + $0xebc] ss:$28 sps:$4 sm:$0xff]   ;;  %v873_v53 = vsub.s32 6, %v8609_v9 }
 0x2bd   :  { %5256 = vmatprep.subr.bf16.mxu0 %v8287_v56  ;;  %7207 = vmatpush3.bf16.msra.mxu1 %v8283_v57  ;;  %v8338_v56 = vld [vmem:[%s10853_s1 + $0x10ec] ss:$28 sps:$4 sm:$0xff]  }
 0x2be   :  { %7214 = vmatprep.subr.bf16.mxu1 %v8284_v60  ;;  %v874_v57 = vrot.slane %v10502_v44, %v873_v53  ;;  %v8336_v60 = vld [vmem:[%s10853_s1 + $0x10e8] ss:$28 sps:$4 sm:$0xff]  }
 0x2c0   :  { %5257 = vmatpush1.bf16.msra.mxu0 %v8285_v61  ;;  %6152 = vmatmul.mubr.bf16.vlgmr.msra.gmra.mrb[40].mxu1 %v5657_v6  ;;  %v8341_v61 = vld [vmem:[%s10853_s1 + $0x1124] ss:$28 sps:$4 sm:$0xff]  }
 0x2c1   :  { %5258 = vmatprep.subr.bf16.mxu0 %v8292_v4  ;;  %7215 = vmatpush3.bf16.msra.mxu1 %v8288_v18  ;;  %v8339_v6 = vld [vmem:[%s10853_s1 + $0x1120] ss:$28 sps:$4 sm:$0xff]  }
 0x2c2   :  { %6191 = vmatprep.mubr.bf16.mxu1 %v5660_v8  ;;  %7216 = vmatprep.subr.bf16.mxu1 %v8289_v7 }
 0x2c4   :  { %5259 = vmatpush1.bf16.msra.mxu0 %v8290_v37  ;;  %v8344_v37 = vld [vmem:[%s10853_s1 + $0x115c] ss:$28 sps:$4 sm:$0xff]  }
 0x2c5   :  { %5260 = vmatprep.subr.bf16.mxu0 %v8297_v63  ;;  %7217 = vmatpush3.bf16.msra.mxu1 %v8293_v40  ;;  %v8342_v63 = vld [vmem:[%s10853_s1 + $0x1158] ss:$28 sps:$4 sm:$0xff]  }
 0x2c6   :  { %7218 = vmatprep.subr.bf16.mxu1 %v8294_v3  ;;  %v8347_v40 = vld [vmem:[%s10853_s1 + $0x1194] ss:$28 sps:$4 sm:$0xff]  }
 0x2c7   :  { %v8345_v3 = vld [vmem:[%s10853_s1 + $0x1190] ss:$28 sps:$4 sm:$0xff]  }
 0x2c8   :  { %5261 = vmatpush1.bf16.msra.mxu0 %v8295_v23  ;;  %v8350_v23 = vld [vmem:[%s10853_s1 + $0x11cc] ss:$28 sps:$4 sm:$0xff]  }
 0x2c9   :  { %5262 = vmatprep.subr.bf16.mxu0 %v8302_v11  ;;  %7219 = vmatpush3.bf16.msra.mxu1 %v8298_v12  ;;  %v8348_v11 = vld [vmem:[%s10853_s1 + $0x11c8] ss:$28 sps:$4 sm:$0xff]  }
 0x2ca   :  { %7220 = vmatprep.subr.bf16.mxu1 %v8299_v13  ;;  %v8353_v12 = vld [vmem:[%s10853_s1 + $0x1204] ss:$28 sps:$4 sm:$0xff]  }
 0x2cb   :  { %v7073_v21 = vpop.f32.mrb[12].mxu1  ;;  %v8351_v13 = vld [vmem:[%s10853_s1 + $0x1200] ss:$28 sps:$4 sm:$0xff]  }
 0x2cc   :  { %5263 = vmatpush1.bf16.msra.mxu0 %v8300_v14  ;;  %v7074_v36 = vpop.f32.mrb[13].mxu1  ;;  %v8359_v14 = vld [vmem:[%s10853_s1 + $0x1274] ss:$28 sps:$4 sm:$0xff]  }
 0x2cd   :  { %5264 = vmatprep.subr.bf16.mxu0 %v8307_v15  ;;  %7221 = vmatpush3.bf16.msra.mxu1 %v8303_v16  ;;  %v7075_v55 = vadd.f32 %v7074_v36, %v7073_v21  ;;  %v7076_v26 = vpop.f32.mrb[14].mxu1  ;;  %v8357_v15 = vld [vmem:[%s10853_s1 + $0x1270] ss:$28 sps:$4 sm:$0xff]  }
 0x2ce   :  { %7222 = vmatprep.subr.bf16.mxu1 %v8304_v31  ;;  %v7077_v28 = vpop.f32.mrb[15].mxu1  ;;  %v8362_v16 = vld [vmem:[%s10853_s1 + $0x12ac] ss:$28 sps:$4 sm:$0xff]  }
 0x2cf   :  { %v5412_v2 = vadd.f32 %v7075_v55, %v874_v57  ;;  %v8360_v31 = vld [vmem:[%s10853_s1 + $0x12a8] ss:$28 sps:$4 sm:$0xff]   ;;  %v8363_v55 = vld [vmem:[%s10853_s1 + $0x12e0] ss:$28 sps:$4 sm:$0xff]   ;;  %v8366_v28 = vld [vmem:[%s10853_s1 + $0x1318] ss:$28 sps:$4 sm:$0xff]  }
 0x2d0   :  { %5265 = vmatpush1.bf16.msra.mxu0 %v8305_v19  ;;  %v8365_v19 = vld [vmem:[%s10853_s1 + $0x12e4] ss:$28 sps:$4 sm:$0xff]   ;;  %v8394_v57 = vld [vmem:[#allocation5 + $0x100] sm:$0xff]  }
 0x2d1   :  { %5266 = vmatprep.subr.bf16.mxu0 %v8312_v0  ;;  %7223 = vmatpush3.bf16.msra.mxu1 %v8308_v22 }
 0x2d2   :  { %7224 = vmatprep.subr.bf16.mxu1 %v8309_v27  ;;  %v8368_v27 = vld [vmem:[%s10853_s1 + $0x131c] ss:$28 sps:$4 sm:$0xff]  }
 0x2d4   :  { %5267 = vmatpush1.bf16.msra.mxu0 %v8310_v24 }
 0x2d5   :  { %5268 = vmatprep.subr.bf16.mxu0 %v8317_v43  ;;  %7225 = vmatpush3.bf16.msra.mxu1 %v8313_v29  ;;  %v8371_v43 = vld [vmem:[%s10853_s1 + $0x1354] ss:$28 sps:$4 sm:$0xff]  }
 0x2d6   :  { %7226 = vmatprep.subr.bf16.mxu1 %v8314_v1  ;;  %v8369_v29 = vld [vmem:[%s10853_s1 + $0x1350] ss:$28 sps:$4 sm:$0xff]   ;;  %v8372_v1 = vld [vmem:[%s10853_s1 + $0x1388] ss:$28 sps:$4 sm:$0xff]  }
 0x2d8   :  { %5269 = vmatpush1.bf16.msra.mxu0 %v8315_v47  ;;  %v8377_v47 = vld [vmem:[%s10853_s1 + $0x13c4] ss:$28 sps:$4 sm:$0xff]  }
 0x2d9   :  { %5270 = vmatprep.subr.bf16.mxu0 %v8322_v32  ;;  %7227 = vmatpush3.bf16.msra.mxu1 %v8318_v33  ;;  %v8375_v32 = vld [vmem:[%s10853_s1 + $0x13c0] ss:$28 sps:$4 sm:$0xff]  }
 0x2da   :  { %7228 = vmatprep.subr.bf16.mxu1 %v8319_v35  ;;  %v8380_v33 = vld [vmem:[%s10853_s1 + $0x13fc] ss:$28 sps:$4 sm:$0xff]   ;;  %v8383_v35 = vld [vmem:[%s10853_s1 + $0x1434] ss:$28 sps:$4 sm:$0xff]  }
 0x2dc   :  { %5271 = vmatpush1.bf16.msra.mxu0 %v8320_v38  ;;  %v8381_v38 = vld [vmem:[%s10853_s1 + $0x1430] ss:$28 sps:$4 sm:$0xff]  }
 0x2dd   :  { %5272 = vmatprep.subr.bf16.mxu0 %v8326_v39  ;;  %7229 = vmatpush3.bf16.msra.mxu1 %v8323_v41  ;;  %v8386_v39 = vld [vmem:[%s10853_s1 + $0x146c] ss:$28 sps:$4 sm:$0xff]  }
 0x2de   :  { %v8384_v41 = vld [vmem:[%s10853_s1 + $0x1468] ss:$28 sps:$4 sm:$0xff]  }
 0x2e0   :  { %5273 = vmatpush1.bf16.msra.mxu0 %v8324_v46  ;;  %6192 = vmatmul.mubr.bf16.vlgmr.msra.gmra.mrb[44].mxu1 %v5659_v48 }
 0x2e1   :  { %5274 = vmatprep.subr.bf16.mxu0 %v8329_v25 }
 0x2e4   :  { %5275 = vmatpush1.bf16.msra.mxu0 %v8327_v49 }
 0x2e5   :  { %5276 = vmatprep.subr.bf16.mxu0 %v8332_v17  ;;  %v8387_v17 = vld [vmem:[%s10853_s1 + $0x14a0] ss:$28 sps:$4 sm:$0xff]  }
 0x2e8   :  { %5277 = vmatpush1.bf16.msra.mxu0 %v8330_v50 }
 0x2e9   :  { %5278 = vmatprep.subr.bf16.mxu0 %v8335_v52  ;;  %v8392_v52 = vld [vmem:[%s10853_s1 + $0x14dc] ss:$28 sps:$4 sm:$0xff]  }
 0x2eb   :  { %v7095_v4 = vpop.f32.mrb[16].mxu1 }
 0x2ec   :  { %5279 = vmatpush1.bf16.msra.mxu0 %v8333_v54  ;;  %v7096_v58 = vpop.f32.mrb[17].mxu1  ;;  %v8390_v54 = vld [vmem:[%s10853_s1 + $0x14d8] ss:$28 sps:$4 sm:$0xff]  }
 0x2ed   :  { %5280 = vmatprep.subr.bf16.mxu0 %v8338_v56  ;;  %v7097_v5 = vadd.f32 %v7096_v58, %v7095_v4  ;;  %v7098_v18 = vpop.f32.mrb[18].mxu1  ;;  %v8393_v56 = vld [vmem:[#allocation5 + $0x140] sm:$0xff]   ;;  %v8398_v4 = vld [vmem:[#allocation5 + $0x110] sm:$0xff]   ;;  %v8399_v58 = vld [vmem:[#allocation5 + $0x158] sm:$0xff]  }
 0x2ee   :  { %v7099_v7 = vpop.f32.mrb[19].mxu1  ;;  %7236 = vmatprep.subr.bf16.mxu1 %v8393_v56  ;;  %v8401_v18 = vld [vmem:[#allocation5 + $0x160] sm:$0xff]  }
 0x2ef   :  { %v5452_v8 = vadd.f32 %v7097_v5, %v5412_v2  ;;  %7237 = vmatpush3.bf16.msra.mxu1 %v8394_v57  ;;  %v8397_v2 = vld [vmem:[#allocation5 + $0x150] sm:$0xff]   ;;  %v8400_v5 = vld [vmem:[#allocation5 + $0x118] sm:$0xff]   ;;  %v8403_v7 = vld [vmem:[#allocation5 + $0x168] sm:$0xff]  }
 0x2f0   :  { %5281 = vmatpush1.bf16.msra.mxu0 %v8336_v60  ;;  %v8395_v60 = vld [vmem:[#allocation5 + $0x148] sm:$0xff]   ;;  %v8409_v56 = vld [vmem:[#allocation5 + $0x180] sm:$0xff]  }
 0x2f1   :  { %5282 = vmatprep.subr.bf16.mxu0 %v8341_v61  ;;  %v8396_v61 = vld [vmem:[#allocation5 + $0x108] sm:$0xff]   ;;  %7238 = vmatprep.subr.bf16.mxu1 %v8395_v60 }
 0x2f2   :  { %v8414_v60 = vld [vmem:[#allocation5 + $0x1a8] sm:$0xff]  }
 0x2f3   :  { %7239 = vmatpush3.bf16.msra.mxu1 %v8396_v61  ;;  %v8415_v61 = vld [vmem:[#allocation5 + $0x1b0] sm:$0xff]  }
 0x2f4   :  { %5283 = vmatpush1.bf16.msra.mxu0 %v8339_v6  ;;  %7240 = vmatprep.subr.bf16.mxu1 %v8397_v2  ;;  %v8402_v6 = vld [vmem:[#allocation5 + $0x120] sm:$0xff]   ;;  %v8416_v2 = vld [vmem:[#allocation5 + $0x1b8] sm:$0xff]  }
 0x2f5   :  { %5284 = vmatprep.subr.bf16.mxu0 %v8344_v37  ;;  %v8404_v37 = vld [vmem:[#allocation5 + $0x128] sm:$0xff]  }
 0x2f7   :  { %7241 = vmatpush3.bf16.msra.mxu1 %v8398_v4 }
 0x2f8   :  { %5285 = vmatpush1.bf16.msra.mxu0 %v8342_v63  ;;  %7242 = vmatprep.subr.bf16.mxu1 %v8399_v58 }
 0x2f9   :  { %5295 = vmatprep.subr.bf16.mxu0 %v8347_v40 }
 0x2fb   :  { %5287 = vmatmul.mubr.bf16.vlgmr.msra.gmra.mrb[4].mxu0 %v9648_v20  ;;  %v8356_v20 = vld [vmem:[%s10853_s1 + $0x123c] ss:$28 sps:$4 sm:$0xff]   ;;  %7243 = vmatpush3.bf16.msra.mxu1 %v8400_v5 }
 0x2fc   :  { %5296 = vmatpush1.bf16.msra.mxu0 %v8345_v3  ;;  %5327 = vmatprep.mubr.bf16.mxu0 %v9664_v51  ;;  %v8354_v51 = vld [vmem:[%s10853_s1 + $0x1238] ss:$28 sps:$4 sm:$0xff]   ;;  %s8526_s1 = smov [#allocation8]  }
 0x2fd   :  { %5297 = vmatprep.subr.bf16.mxu0 %v8350_v23  ;;  %7244 = vmatprep.subr.bf16.mxu1 %v8401_v18  ;;  %s6300_s4 = sshll.u32 %s8526_s1, 4  ;;  %s6301_s4 = int_to_ptr.vmem [resolvable:$true] %s6300_s4 }
 0x2fe   :  { %s8489_s10 = scalar_lea.vmem %s6301_s4, 32  ;;  %p8494_p11 = scmp.lt.s32.totalorder %s6301_s4, %s6301_s4 }
 0x2ff   :  { %7245 = vmatpush3.bf16.msra.mxu1 %v8402_v6  ;;  %p8490_p10 = scmp.ne.s32.totalorder %s6301_s4, %s8489_s10  ;;  %p8495_p12 = scmp.lt.s32.totalorder %s8489_s10, %s8489_s10 }
 0x300   :  { %5298 = vmatpush1.bf16.msra.mxu0 %v8348_v11  ;;  %7246 = vmatprep.subr.bf16.mxu1 %v8403_v7 }
 0x301   :  { %5299 = vmatprep.subr.bf16.mxu0 %v8353_v12  ;;  %p8496_p13 = por %p8495_p12, %p8494_p11 }
 0x303   :  { %7247 = vmatpush3.bf16.msra.mxu1 %v8404_v37  ;;  %p8497_p0 = pnand %p8496_p13, %p8490_p10 }
 0x304   :  { %5300 = vmatpush1.bf16.msra.mxu0 %v8351_v13 }
 0x305   :  { %5301 = vmatprep.subr.bf16.mxu0 %v8356_v20 }
 0x308   :  { %5302 = vmatpush1.bf16.msra.mxu0 %v8354_v51 }
 0x309   :  { %5303 = vmatprep.subr.bf16.mxu0 %v8359_v14 }
 0x30b   :  { %v7117_v0 = vpop.f32.mrb[20].mxu1 }
 0x30c   :  { %5304 = vmatpush1.bf16.msra.mxu0 %v8357_v15  ;;  %v7118_v21 = vpop.f32.mrb[21].mxu1 }
 0x30d   :  { %5305 = vmatprep.subr.bf16.mxu0 %v8362_v16  ;;  %v7119_v36 = vadd.f32 %v7118_v21, %v7117_v0  ;;  %v7120_v22 = vpop.f32.mrb[22].mxu1  ;;  %v8405_v21 = vld [vmem:[#allocation5 + $0x170] sm:$0xff]  }
 0x30e   :  { %v7121_v26 = vpop.f32.mrb[23].mxu1  ;;  %7248 = vmatprep.subr.bf16.mxu1 %v8405_v21  ;;  %v8407_v22 = vld [vmem:[#allocation5 + $0x178] sm:$0xff]  }
 0x30f   :  { %v5492_v24 = vadd.f32 %v7119_v36, %v5452_v8  ;;  %v8406_v36 = vld [vmem:[#allocation5 + $0x130] sm:$0xff]  }
 0x310   :  { %5306 = vmatpush1.bf16.msra.mxu0 %v8360_v31  ;;  %7249 = vmatpush3.bf16.msra.mxu1 %v8406_v36 }
 0x311   :  { %5307 = vmatprep.subr.bf16.mxu0 %v8365_v19  ;;  %7250 = vmatprep.subr.bf16.mxu1 %v8407_v22 }
 0x314   :  { %5308 = vmatpush1.bf16.msra.mxu0 %v8363_v55  ;;  %v8408_v55 = vld [vmem:[#allocation5 + $0x138] sm:$0xff]  }
 0x315   :  { %5309 = vmatprep.subr.bf16.mxu0 %v8368_v27  ;;  %7251 = vmatpush3.bf16.msra.mxu1 %v8408_v55 }
 0x316   :  { %7275 = vmatprep.subr.bf16.mxu1 %v8524_v10 }
 0x318   :  { %5310 = vmatpush1.bf16.msra.mxu0 %v8366_v28 }
 0x319   :  { %5311 = vmatprep.subr.bf16.mxu0 %v8371_v43 }
 0x31c   :  { %5312 = vmatpush1.bf16.msra.mxu0 %v8369_v29  ;;  %v7000_v29 = vld [vmem:[#allocation7] ss:$0 sm:$0xff] }
 0x31d   :  { %5313 = vmatprep.subr.bf16.mxu0 %v8374_v30 }
 0x320   :  { %5314 = vmatpush1.bf16.msra.mxu0 %v8372_v1 }
 0x321   :  { %5315 = vmatprep.subr.bf16.mxu0 %v8377_v47 }
 0x324   :  { %5316 = vmatpush1.bf16.msra.mxu0 %v8375_v32 }
 0x325   :  { %5317 = vmatprep.subr.bf16.mxu0 %v8380_v33 }
 0x328   :  { %5318 = vmatpush1.bf16.msra.mxu0 %v8378_v34 }
 0x329   :  { %5319 = vmatprep.subr.bf16.mxu0 %v8383_v35 }
 0x32b   :  { %v7139_v46 = vpop.f32.mrb[24].mxu1 }
 0x32c   :  { %5320 = vmatpush1.bf16.msra.mxu0 %v8381_v38  ;;  %v7140_v25 = vpop.f32.mrb[25].mxu1  ;;  %v865_v38 = vsub.s32 4, %v8609_v9 }
 0x32d   :  { %5321 = vmatprep.subr.bf16.mxu0 %v8386_v39  ;;  %v7141_v48 = vadd.f32 %v7140_v25, %v7139_v46  ;;  %v7142_v49 = vpop.f32.mrb[26].mxu1  ;;  %v869_v39 = vsub.s32 5, %v8609_v9  ;;  %v8410_v9 = vld [vmem:[#allocation5 + $0x188] sm:$0xff]  }
 0x32e   :  { %v7143_v50 = vpop.f32.mrb[27].mxu1 }
 0x32f   :  { %v5532_v53 = vadd.f32 %v7141_v48, %v5492_v24 }
 0x330   :  { %5322 = vmatpush1.bf16.msra.mxu0 %v8384_v41  ;;  %v866_v41 = vrot.slane %v10502_v44, %v865_v38 }
 0x331   :  { %5323 = vmatprep.subr.bf16.mxu0 %v8389_v45  ;;  %v870_v45 = vrot.slane %v10502_v44, %v869_v39  ;;  %v8411_v44 = vld [vmem:[#allocation5 + $0x190] sm:$0xff]  }
 0x334   :  { %5324 = vmatpush1.bf16.msra.mxu0 %v8387_v17 }
 0x335   :  { %5325 = vmatprep.subr.bf16.mxu0 %v8392_v52 }
 0x338   :  { %5326 = vmatpush1.bf16.msra.mxu0 %v8390_v54 }
 0x33b   :  { %5328 = vmatmul.mubr.bf16.vlgmr.msra.gmra.mrb[4].mxu0 %v9852_v42 }
 0x34b   :  { %v7161_v42 = vpop.f32.mrb[28].mxu1 }
 0x34c   :  { %v7162_v8 = vpop.f32.mrb[29].mxu1 }
 0x34d   :  { %v7163_v63 = vadd.f32 %v7162_v8, %v7161_v42  ;;  %v7164_v40 = vpop.f32.mrb[30].mxu1 }
 0x34e   :  { %v7165_v3 = vpop.f32.mrb[31].mxu1 }
 0x34f   :  { %v5572_v23 = vadd.f32 %v7163_v63, %v5532_v53 }
 0x36b   :  { %v7183_v11 = vpop.f32.mrb[32].mxu1 }
 0x36c   :  { %v7184_v12 = vpop.f32.mrb[33].mxu1 }
 0x36d   :  { %v7185_v13 = vadd.f32 %v7184_v12, %v7183_v11  ;;  %v7186_v20 = vpop.f32.mrb[34].mxu1 }
 0x36e   :  { %v7187_v51 = vpop.f32.mrb[35].mxu1 }
 0x36f   :  { %v5612_v14 = vadd.f32 %v7185_v13, %v5572_v23 }
 0x373   :  { %v5651_v15 = vpop.f32.mrb[36].mxu1 }
 0x374   :  { %v10820_v16 = vadd.f32 %v5651_v15, %v5612_v14  ;;  %v7273_v31 = vpop.f32.mrb[37].mxu1 }
 0x375   :  { %v5654_v19 = vpop.f32.mrb[38].mxu1 }
 0x376   :  { %v7274_v0 = vpop.f32.mrb[39].mxu1  ;;  %v5663_v4 = vpack.c.bf16 %v10820_v16, %v10820_v16 }
 0x393   :  { %v7208_v26 = vpop.f32.mrb[40].mxu1 }
 0x394   :  { %v7209_v27 = vpop.f32.mrb[41].mxu1 }
 0x395   :  { %v7210_v24 = vadd.f32 %v7209_v27, %v7208_v26  ;;  %v7211_v28 = vpop.f32.mrb[42].mxu1 }
 0x396   :  { %v7212_v43 = vpop.f32.mrb[43].mxu1 }
 0x397   :  { %v6154_v47 = vadd.f32 %v7210_v24, %v7000_v29 }
 0x3b3   :  { %v7230_v30 = vpop.f32.mrb[44].mxu1 }
 0x3b4   :  { %v7231_v1 = vpop.f32.mrb[45].mxu1 }
 0x3b5   :  { %v7232_v32 = vadd.f32 %v7231_v1, %v7230_v30  ;;  %v7233_v33 = vpop.f32.mrb[46].mxu1 }
 0x3b6   :  { %v7234_v34 = vpop.f32.mrb[47].mxu1 }
 0x3b7   :  { %v6194_v35 = vadd.f32 %v7232_v32, %v6154_v47 }
 0x40e   :  { %v5329_v46 = vpop.f32.mrb[4].mxu0 }
 0x40f   :  { %v7301_v25 = vadd.f32 %v5329_v46, %v866_v41  ;;  %v5331_v48 = vpop.f32.mrb[5].mxu0 }
 0x410   :  { %v7303_v49 = vadd.f32 %v5331_v48, %v870_v45  ;;  %v5333_v17 = vpop.f32.mrb[6].mxu0 }
 0x411   :  { %v7302_v50 = vadd.f32 %v7301_v25, %v10622_v59  ;;  %v5334_v52 = vpop.f32.mrb[7].mxu0  ;;  %v8412_v59 = vld [vmem:[#allocation5 + $0x198] sm:$0xff]  }
 0x412   :  { %v7304_v53 = vadd.f32 %v7303_v49, %v10627_v62  ;;  %v8413_v62 = vld [vmem:[#allocation5 + $0x1a0] sm:$0xff]  }
 0x413   :  { %v5661_v57 = vpack.c.bf16 %v7302_v50, %v7302_v50 }
 0x414   :  { %v5662_v54 = vpack.c.bf16 %v7304_v53, %v7304_v53 }
 0x416   :  { %6231 = vmatprep.mubr.bf16.mxu1 %v5662_v54 }
 0x417   :  { %6232 = vmatmul.mubr.bf16.vlgmr.msra.gmra.mrb[48].mxu1 %v5661_v57 }
 0x418   :  { %7276 = vmatpush3.bf16.msra.mxu1 %v8409_v56  ;;  %7291 = vmatprep.mubr.msk.bf16.mxu1 %vm8525_vm1, %v8524_v10 }
 0x419   :  { %7277 = vmatprep.subr.bf16.mxu1 %v8524_v10 }
 0x41c   :  { %7278 = vmatpush3.bf16.msra.mxu1 %v8410_v9 }
 0x41d   :  { %7279 = vmatprep.subr.bf16.mxu1 %v8524_v10 }
 0x420   :  { %7280 = vmatpush3.bf16.msra.mxu1 %v8411_v44 }
 0x421   :  { %7281 = vmatprep.subr.bf16.mxu1 %v8524_v10 }
 0x424   :  { %7282 = vmatpush3.bf16.msra.mxu1 %v8412_v59 }
 0x425   :  { %7283 = vmatprep.subr.bf16.mxu1 %v8524_v10 }
 0x428   :  { %7284 = vmatpush3.bf16.msra.mxu1 %v8413_v62 }
 0x429   :  { %7285 = vmatprep.subr.bf16.mxu1 %v8524_v10 }
 0x42c   :  { %7286 = vmatpush3.bf16.msra.mxu1 %v8414_v60 }
 0x42d   :  { %7287 = vmatprep.subr.bf16.mxu1 %v8524_v10 }
 0x430   :  { %7288 = vmatpush3.bf16.msra.mxu1 %v8415_v61 }
 0x431   :  { %7289 = vmatprep.subr.bf16.mxu1 %v8524_v10 }
 0x434   :  { %7290 = vmatpush3.bf16.msra.mxu1 %v8416_v2 }
 0x437   :  { %7292 = vmatmul.mubr.bf16.vlgmr.msra.gmra.mrb[52].mxu1 %v5663_v4 }
 0x4ea   :  { %v7252_v58 = vpop.f32.mrb[48].mxu1 }
 0x4eb   :  { %v7253_v5 = vpop.f32.mrb[49].mxu1 }
 0x4ec   :  { %v7254_v18 = vadd.f32 %v7253_v5, %v7252_v58  ;;  %v7255_v6 = vpop.f32.mrb[50].mxu1 }
 0x4ed   :  { %v7256_v7 = vpop.f32.mrb[51].mxu1 }
 0x4ee   :  { %v6234_v37 = vadd.f32 %v7254_v18, %v6194_v35 }
 0x50a   :  { %v6273_v42 = vpop.f32.mrb[52].mxu1 }
 0x50b   :  { %v6274_v8 = vadd.f32 %v6273_v42, %v6234_v37  ;;  %v7293_v63 = vpop.f32.mrb[53].mxu1 }
 0x50c   :  { %v6276_v40 = vpop.f32.mrb[54].mxu1 }
 0x50d   :  { %v7294_v3 = vpop.f32.mrb[55].mxu1  ;;  %v6280_v23 = vsel %vm6279_vm2, %v6274_v8, -inf }
 0x50e   :  { %6281 = vmax.xlane.f32.xlu0 %v6280_v23 }
 0x59b   :  { %v6282_v10 = vpop.xlane.xlu0 %6281 }
 0x59c   :  { %v6283_v11 = vsub.f32 %v6274_v8, %v6282_v10 }
 0x59e   :  { %v6284_v12 = vmul.f32 1.442695, %v6283_v11 }
 0x5a0   :  { %8417 = vpow2.f32 %v6284_v12 }
 0x5aa   :  { %v8418_v13 = vpop.eup %8417 }
 0x5ab   :  { %v6286_v20 = vsel %vm6279_vm2, %v8418_v13, 0.0 }
 0x5ac   :  { %6287 = vadd.xlane.f32.xlu0 %v6286_v20 }
 0x639   :  { %v6288_v51 = vpop.xlane.xlu0 %6287 }
 0x63a   :  { %8419 = vlog2.f32 %v6288_v51 }
 0x644   :  { %v8420_v14 = vpop.eup %8419 }
 0x645   :  { %v6290_v15 = vmul.f32 0.6931472, %v8420_v14 }
 0x647   :  { %v6291_v16 = vadd.f32 %v6290_v15, %v6282_v10 }
 0x649   :  { %v6292_v31 = vsub.f32 %v6274_v8, %v6291_v16 }
 0x64b   :  { %6293 = vst [vmem:[#allocation8] sm:$0x3] %v6292_v31 }
 0x64c   :  { %8500 = shalt.err (!%p8497_p0)
}
 0x64d   :  { %s8501_s13 = scalar_lea.hbm %s10857_s5, 32 }
 0x64e   :  { %p8502_p1 = scmp.ne.s32.totalorder %s10857_s5, %s8501_s13  ;;  %p8505_p2 = scmp.lt.u32.totalorder %s8501_s13, %s10857_s5 }
 0x650   :  { %p8507_p3 = pnand %p8505_p2, %p8502_p1 }
 0x652   :  { %8510 = shalt.err (!%p8507_p3)
}
 0x653   :  { %6303 = dma.vmem_to_hbm [thread:$0]  %s6301_s4, 32, %s10857_s5, [#allocation4]  }
 0x654   :  { %8515 = dma.done.wait [#allocation4], 32  }
 0x655   :  { %8516 = vsyncadd [#allocation4], 4294967264 }
 0x656   :  { %6307 = vsyncpa [#allocation3], 1 }
 0x657   :  { %6308 = vsyncpa [#allocation6], 1 }
 0x658   :  { %6309 = vsyncpa [#allocation4], 1 }

</bundles_post_ra>
